<compile_context>
chip_gen: v7x
topology: tpu7x:2x2x1
jax: 0.10.0
libtpu: 0.0.40
codegen_flags: <defaults>
</compile_context>

<pallas_src>
import jax
import jax.numpy as jnp
from jax.experimental import pallas as pl
from jax.experimental.pallas import tpu as pltpu


def _full_spec(shape):
    nd = len(shape)
    return pl.BlockSpec(tuple(shape), lambda i, _nd=nd: (0,) * _nd)


def _layer_geometry(input_shape, conv_layers):
    """Static per-layer geometry: (cin, cout, k, hi, wi, ho, wo, po, qo)."""
    cin, hi, wi = input_shape
    cfg = []
    for cout, k in conv_layers:
        ho, wo = hi - k + 1, wi - k + 1          # Conv2d, stride 1, no padding
        po, qo = ho // k, wo // k                # MaxPool2d(k): stride k, floor
        cfg.append((cin, cout, k, hi, wi, ho, wo, po, qo))
        cin, hi, wi = cout, po, qo
    return tuple(cfg), (cin, hi, wi)


def make_cnn_forward(input_shape, conv_layers, eps=1e-5):
    cfg, (fc_c, fc_h, fc_w) = _layer_geometry(input_shape, conv_layers)
    nlayers = len(cfg)

    @jax.jit
    def forward(x_nchw, conv_params, fc_params):
        N = x_nchw.shape[0]
        x_nhwc = jnp.transpose(x_nchw, (0, 2, 3, 1)).astype(jnp.float32)

        # ---- parameter layout prep (static permutes, fused under jit) ----
        inputs = [x_nhwc]
        for (cin, cout, k, hi, wi, ho, wo, po, qo), p in zip(cfg, conv_params):
            # torch (Cout, Cin, KH, KW) -> (KH*KW, Cin, Cout), tap-major.
            wmat = jnp.transpose(p["W"], (2, 3, 1, 0)).reshape(k * k, cin, cout)
            # NOTE: conv bias p["b"] is intentionally NOT passed: training-mode
            # BatchNorm subtracts the per-channel batch mean, which cancels a
            # per-channel constant exactly, so dropping it is output-identical.
            inputs += [wmat.astype(jnp.float32),
                       p["gamma"].reshape(1, cout).astype(jnp.float32),
                       p["beta"].reshape(1, cout).astype(jnp.float32)]
        Wfc, bfc = fc_params
        out_dim = Wfc.shape[0]
        # torch Flatten on NCHW flattens in (c, h, w) order; the kernel flattens
        # its NHWC-resident activation in (h, w, c) order -> permute FC weight.
        Wp = Wfc.reshape(out_dim, fc_c, fc_h, fc_w)
        Wp = jnp.transpose(Wp, (0, 2, 3, 1)).reshape(out_dim, fc_h * fc_w * fc_c)
        inputs += [jnp.transpose(Wp).astype(jnp.float32),
                   bfc.reshape(1, out_dim).astype(jnp.float32)]

        def kernel(*refs):
            x_ref = refs[0]
            layer_refs = [refs[1 + 3 * i: 4 + 3 * i] for i in range(nlayers)]
            wfc_ref = refs[1 + 3 * nlayers]
            bfc_ref = refs[2 + 3 * nlayers]
            o_ref = refs[3 + 3 * nlayers]

            x = x_ref[...]                                   # (N, Hi, Wi, Cin)
            for li, (cin, cout, k, hi, wi, ho, wo, po, qo) in enumerate(cfg):
                w_ref, g_ref, be_ref = layer_refs[li]
                rows = N * ho * wo
                # ---- Conv2d: k*k shifted patches, one 2-D matmul per tap ----
                acc = None
                for di in range(k):
                    for dj in range(k):
                        patch = x[:, di:di + ho, dj:dj + wo, :]   # (N,ho,wo,cin)
                        patch2 = patch.reshape(rows, cin)
                        part = jnp.dot(patch2, w_ref[di * k + dj],
                                       preferred_element_type=jnp.float32)
                        acc = part if acc is None else acc + part  # (rows,cout)
                # ---- BatchNorm2d (batch stats, two-pass variance) ----
                cnt = float(rows)
                mean = jnp.sum(acc, axis=0, keepdims=True) / cnt   # (1, cout)
                d = acc - mean
                var = jnp.sum(d * d, axis=0, keepdims=True) / cnt
                scale = g_ref[...] * jax.lax.rsqrt(var + eps)      # (1, cout)
                # ---- fused normalize + affine + ReLU (still 2-D) ----
                y = jnp.maximum(d * scale + be_ref[...], 0.0)      # (rows, cout)
                # ---- MaxPool2d(k): fully in registers, no scratch stores ----
                y4 = y.reshape(N, ho, wo, cout)
                # pool H: split the (leading) H axis and max over the window
                yh_s = y4[:, :po * k, :, :].reshape(N, po, k, wo, cout)
                yh = yh_s[:, :, 0, :, :]
                for t in range(1, k):
                    yh = jnp.maximum(yh, yh_s[:, :, t, :, :])      # (N,po,wo,C)
                # pool W: split the sublane axis into (qo, k) and max over k
                yw_s = yh[:, :, :qo * k, :].reshape(N, po, qo, k, cout)
                yw = yw_s[:, :, :, 0, :]
                for t in range(1, k):
                    yw = jnp.maximum(yw, yw_s[:, :, :, t, :])      # (N,po,qo,C)
                x = yw
            # ---- Flatten + Linear: one batched matmul, one dense store ----
            flat = x.reshape(N, fc_h * fc_w * fc_c)
            o_ref[...] = (jnp.dot(flat, wfc_ref[...],
                                  preferred_element_type=jnp.float32)
                          + bfc_ref[...]).astype(o_ref.dtype)

        return pl.pallas_call(
            kernel,
            grid=(1,),
            in_specs=[_full_spec(a.shape) for a in inputs],
            out_specs=_full_spec((N, out_dim)),
            out_shape=jax.ShapeDtypeStruct((N, out_dim), jnp.float32),
            compiler_params=pltpu.CompilerParams(
                dimension_semantics=("arbitrary",)),
        )(*inputs)

    return forward


def init_params(key, input_shape, conv_layers, output_dim):
    """Deterministic parameter init mirroring the PyTorch layer shapes."""
    params = []
    c_in, h, w = input_shape
    for c_out, k in conv_layers:
        key, k1, k2 = jax.random.split(key, 3)
        fan_in = c_in * k * k
        bound = 1.0 / float(fan_in) ** 0.5
        params.append(dict(
            W=jax.random.uniform(k1, (c_out, c_in, k, k), jnp.float32,
                                 -bound, bound),
            b=jax.random.uniform(k2, (c_out,), jnp.float32, -bound, bound),
            gamma=jnp.ones((c_out,), jnp.float32),
            beta=jnp.zeros((c_out,), jnp.float32)))
        c_in = c_out
        h = (h - k + 1) // k
        w = (w - k + 1) // k
    fc_in = c_in * h * w
    key, k1, k2 = jax.random.split(key, 3)
    bound = 1.0 / float(fc_in) ** 0.5
    Wfc = jax.random.uniform(k1, (output_dim, fc_in), jnp.float32, -bound, bound)
    bfc = jax.random.uniform(k2, (output_dim,), jnp.float32, -bound, bound)
    return params, (Wfc, bfc)


def reference_forward(x_nchw, conv_params, fc_params, eps=1e-5):
    """Pure-JAX (XLA) reference mirroring the torch module's forward."""
    x = x_nchw.astype(jnp.float32)
    for p in conv_params:
        W, b = p["W"], p["b"]
        k = W.shape[-1]
        x = jax.lax.conv_general_dilated(
            x, W, window_strides=(1, 1), padding="VALID",
            dimension_numbers=("NCHW", "OIHW", "NCHW"))
        x = x + b[None, :, None, None]
        mean = jnp.mean(x, axis=(0, 2, 3), keepdims=True)
        var = jnp.mean((x - mean) ** 2, axis=(0, 2, 3), keepdims=True)
        x = (x - mean) * jax.lax.rsqrt(var + eps)
        x = x * p["gamma"][None, :, None, None] + p["beta"][None, :, None, None]
        x = jnp.maximum(x, 0.0)
        n_, c_, h_, w_ = x.shape
        ph, pw = h_ // k, w_ // k
        x = x[:, :, :ph * k, :pw * k].reshape(n_, c_, ph, k, pw, k)
        x = jnp.max(x, axis=(3, 5))
    Wfc, bfc = fc_params
    flat = x.reshape(x.shape[0], -1)
    return flat @ Wfc.T + bfc


if __name__ == "__main__":
    input_shape = (4, 16, 16)          # (C, H, W) as in the PyTorch module
    conv_layers = ((8, 3), (16, 2))
    output_dim = 10
    batch = 2

    key = jax.random.PRNGKey(0)
    kp, kx = jax.random.split(key)
    conv_params, fc_params = init_params(kp, input_shape, conv_layers, output_dim)
    x = jax.random.normal(kx, (batch, *input_shape), jnp.float32)   # NCHW input

    forward = make_cnn_forward(input_shape, conv_layers)
    out = jax.block_until_ready(forward(x, conv_params, fc_params))
    assert out.shape == (batch, output_dim), out.shape
    assert bool(jnp.all(jnp.isfinite(out)))

    ref = jax.block_until_ready(reference_forward(x, conv_params, fc_params))
    max_err = float(jnp.max(jnp.abs(out - ref)))
    assert max_err < 1e-3, f"mismatch vs reference: max_err={max_err}"
    print("KERNEL_OK")
</pallas_src>

<mosaic_0001>
module attributes {stable_mosaic.version = 11 : i64} {
  func.func @kernel(%arg0: i32, %arg1: memref<2x16x16x4xf32, #tpu.memory_space<vmem>>, %arg2: memref<9x4x8xf32, #tpu.memory_space<vmem>>, %arg3: memref<1x8xf32, #tpu.memory_space<vmem>>, %arg4: memref<1x8xf32, #tpu.memory_space<vmem>>, %arg5: memref<4x8x16xf32, #tpu.memory_space<vmem>>, %arg6: memref<1x16xf32, #tpu.memory_space<vmem>>, %arg7: memref<1x16xf32, #tpu.memory_space<vmem>>, %arg8: memref<16x10xf32, #tpu.memory_space<vmem>>, %arg9: memref<1x10xf32, #tpu.memory_space<vmem>>, %arg10: memref<2x10xf32, #tpu.memory_space<vmem>>) attributes {dimension_semantics = [#tpu.dimension_semantics<arbitrary>], iteration_bounds = array<i64: 1>, scalar_prefetch = 0 : i64, scratch_operands = 0 : i64, tpu.core_type = #tpu.core_type<tc>, window_params = [{pipeline_mode = #tpu.pipeline_mode<synchronous>, transform_indices = @transform_0, window_bounds = array<i64: 2, 16, 16, 4>}, {pipeline_mode = #tpu.pipeline_mode<synchronous>, transform_indices = @transform_1, window_bounds = array<i64: 9, 4, 8>}, {pipeline_mode = #tpu.pipeline_mode<synchronous>, transform_indices = @transform_2, window_bounds = array<i64: 1, 8>}, {pipeline_mode = #tpu.pipeline_mode<synchronous>, transform_indices = @transform_3, window_bounds = array<i64: 1, 8>}, {pipeline_mode = #tpu.pipeline_mode<synchronous>, transform_indices = @transform_4, window_bounds = array<i64: 4, 8, 16>}, {pipeline_mode = #tpu.pipeline_mode<synchronous>, transform_indices = @transform_5, window_bounds = array<i64: 1, 16>}, {pipeline_mode = #tpu.pipeline_mode<synchronous>, transform_indices = @transform_6, window_bounds = array<i64: 1, 16>}, {pipeline_mode = #tpu.pipeline_mode<synchronous>, transform_indices = @transform_7, window_bounds = array<i64: 16, 10>}, {pipeline_mode = #tpu.pipeline_mode<synchronous>, transform_indices = @transform_8, window_bounds = array<i64: 1, 10>}, {pipeline_mode = #tpu.pipeline_mode<synchronous>, transform_indices = @transform_9, window_bounds = array<i64: 2, 10>}]} {
    %c0 = arith.constant 0 : index
    %c0_0 = arith.constant 0 : index
    %c0_1 = arith.constant 0 : index
    %c0_2 = arith.constant 0 : index
    %0 = vector.load %arg1[%c0, %c0_0, %c0_1, %c0_2] : memref<2x16x16x4xf32, #tpu.memory_space<vmem>>, vector<2x16x16x4xf32>
    %1 = vector.extract_strided_slice %0 {offsets = [0, 0, 0, 0], sizes = [2, 14, 14, 4], strides = [1, 1, 1, 1]} : vector<2x16x16x4xf32> to vector<2x14x14x4xf32>
    %2 = vector.shape_cast %1 : vector<2x14x14x4xf32> to vector<392x4xf32>
    %c0_3 = arith.constant 0 : index
    %c0_4 = arith.constant 0 : index
    %c0_5 = arith.constant 0 : index
    %3 = vector.load %arg2[%c0_3, %c0_4, %c0_5] : memref<9x4x8xf32, #tpu.memory_space<vmem>>, vector<1x4x8xf32>
    %4 = vector.shape_cast %3 : vector<1x4x8xf32> to vector<4x8xf32>
    %cst = arith.constant dense<0.000000e+00> : vector<392x8xf32>
    %5 = tpu.matmul %2, %4, %cst {dimension_numbers = #tpu.dot_dimension_numbers<[1], [0], [0], [1], [0, 0, 1, 1], [], []>} : vector<392x4xf32>, vector<4x8xf32>, vector<392x8xf32> -> vector<392x8xf32>
    %6 = vector.extract_strided_slice %0 {offsets = [0, 0, 1, 0], sizes = [2, 14, 14, 4], strides = [1, 1, 1, 1]} : vector<2x16x16x4xf32> to vector<2x14x14x4xf32>
    %7 = vector.shape_cast %6 : vector<2x14x14x4xf32> to vector<392x4xf32>
    %c1 = arith.constant 1 : index
    %c0_6 = arith.constant 0 : index
    %c0_7 = arith.constant 0 : index
    %8 = vector.load %arg2[%c1, %c0_6, %c0_7] : memref<9x4x8xf32, #tpu.memory_space<vmem>>, vector<1x4x8xf32>
    %9 = vector.shape_cast %8 : vector<1x4x8xf32> to vector<4x8xf32>
    %cst_8 = arith.constant dense<0.000000e+00> : vector<392x8xf32>
    %10 = tpu.matmul %7, %9, %cst_8 {dimension_numbers = #tpu.dot_dimension_numbers<[1], [0], [0], [1], [0, 0, 1, 1], [], []>} : vector<392x4xf32>, vector<4x8xf32>, vector<392x8xf32> -> vector<392x8xf32>
    %11 = arith.addf %5, %10 : vector<392x8xf32>
    %12 = vector.extract_strided_slice %0 {offsets = [0, 0, 2, 0], sizes = [2, 14, 14, 4], strides = [1, 1, 1, 1]} : vector<2x16x16x4xf32> to vector<2x14x14x4xf32>
    %13 = vector.shape_cast %12 : vector<2x14x14x4xf32> to vector<392x4xf32>
    %c2 = arith.constant 2 : index
    %c0_9 = arith.constant 0 : index
    %c0_10 = arith.constant 0 : index
    %14 = vector.load %arg2[%c2, %c0_9, %c0_10] : memref<9x4x8xf32, #tpu.memory_space<vmem>>, vector<1x4x8xf32>
    %15 = vector.shape_cast %14 : vector<1x4x8xf32> to vector<4x8xf32>
    %cst_11 = arith.constant dense<0.000000e+00> : vector<392x8xf32>
    %16 = tpu.matmul %13, %15, %cst_11 {dimension_numbers = #tpu.dot_dimension_numbers<[1], [0], [0], [1], [0, 0, 1, 1], [], []>} : vector<392x4xf32>, vector<4x8xf32>, vector<392x8xf32> -> vector<392x8xf32>
    %17 = arith.addf %11, %16 : vector<392x8xf32>
    %18 = vector.extract_strided_slice %0 {offsets = [0, 1, 0, 0], sizes = [2, 14, 14, 4], strides = [1, 1, 1, 1]} : vector<2x16x16x4xf32> to vector<2x14x14x4xf32>
    %19 = vector.shape_cast %18 : vector<2x14x14x4xf32> to vector<392x4xf32>
    %c3 = arith.constant 3 : index
    %c0_12 = arith.constant 0 : index
    %c0_13 = arith.constant 0 : index
    %20 = vector.load %arg2[%c3, %c0_12, %c0_13] : memref<9x4x8xf32, #tpu.memory_space<vmem>>, vector<1x4x8xf32>
    %21 = vector.shape_cast %20 : vector<1x4x8xf32> to vector<4x8xf32>
    %cst_14 = arith.constant dense<0.000000e+00> : vector<392x8xf32>
    %22 = tpu.matmul %19, %21, %cst_14 {dimension_numbers = #tpu.dot_dimension_numbers<[1], [0], [0], [1], [0, 0, 1, 1], [], []>} : vector<392x4xf32>, vector<4x8xf32>, vector<392x8xf32> -> vector<392x8xf32>
    %23 = arith.addf %17, %22 : vector<392x8xf32>
    %24 = vector.extract_strided_slice %0 {offsets = [0, 1, 1, 0], sizes = [2, 14, 14, 4], strides = [1, 1, 1, 1]} : vector<2x16x16x4xf32> to vector<2x14x14x4xf32>
    %25 = vector.shape_cast %24 : vector<2x14x14x4xf32> to vector<392x4xf32>
    %c4 = arith.constant 4 : index
    %c0_15 = arith.constant 0 : index
    %c0_16 = arith.constant 0 : index
    %26 = vector.load %arg2[%c4, %c0_15, %c0_16] : memref<9x4x8xf32, #tpu.memory_space<vmem>>, vector<1x4x8xf32>
    %27 = vector.shape_cast %26 : vector<1x4x8xf32> to vector<4x8xf32>
    %cst_17 = arith.constant dense<0.000000e+00> : vector<392x8xf32>
    %28 = tpu.matmul %25, %27, %cst_17 {dimension_numbers = #tpu.dot_dimension_numbers<[1], [0], [0], [1], [0, 0, 1, 1], [], []>} : vector<392x4xf32>, vector<4x8xf32>, vector<392x8xf32> -> vector<392x8xf32>
    %29 = arith.addf %23, %28 : vector<392x8xf32>
    %30 = vector.extract_strided_slice %0 {offsets = [0, 1, 2, 0], sizes = [2, 14, 14, 4], strides = [1, 1, 1, 1]} : vector<2x16x16x4xf32> to vector<2x14x14x4xf32>
    %31 = vector.shape_cast %30 : vector<2x14x14x4xf32> to vector<392x4xf32>
    %c5 = arith.constant 5 : index
    %c0_18 = arith.constant 0 : index
    %c0_19 = arith.constant 0 : index
    %32 = vector.load %arg2[%c5, %c0_18, %c0_19] : memref<9x4x8xf32, #tpu.memory_space<vmem>>, vector<1x4x8xf32>
    %33 = vector.shape_cast %32 : vector<1x4x8xf32> to vector<4x8xf32>
    %cst_20 = arith.constant dense<0.000000e+00> : vector<392x8xf32>
    %34 = tpu.matmul %31, %33, %cst_20 {dimension_numbers = #tpu.dot_dimension_numbers<[1], [0], [0], [1], [0, 0, 1, 1], [], []>} : vector<392x4xf32>, vector<4x8xf32>, vector<392x8xf32> -> vector<392x8xf32>
    %35 = arith.addf %29, %34 : vector<392x8xf32>
    %36 = vector.extract_strided_slice %0 {offsets = [0, 2, 0, 0], sizes = [2, 14, 14, 4], strides = [1, 1, 1, 1]} : vector<2x16x16x4xf32> to vector<2x14x14x4xf32>
    %37 = vector.shape_cast %36 : vector<2x14x14x4xf32> to vector<392x4xf32>
    %c6 = arith.constant 6 : index
    %c0_21 = arith.constant 0 : index
    %c0_22 = arith.constant 0 : index
    %38 = vector.load %arg2[%c6, %c0_21, %c0_22] : memref<9x4x8xf32, #tpu.memory_space<vmem>>, vector<1x4x8xf32>
    %39 = vector.shape_cast %38 : vector<1x4x8xf32> to vector<4x8xf32>
    %cst_23 = arith.constant dense<0.000000e+00> : vector<392x8xf32>
    %40 = tpu.matmul %37, %39, %cst_23 {dimension_numbers = #tpu.dot_dimension_numbers<[1], [0], [0], [1], [0, 0, 1, 1], [], []>} : vector<392x4xf32>, vector<4x8xf32>, vector<392x8xf32> -> vector<392x8xf32>
    %41 = arith.addf %35, %40 : vector<392x8xf32>
    %42 = vector.extract_strided_slice %0 {offsets = [0, 2, 1, 0], sizes = [2, 14, 14, 4], strides = [1, 1, 1, 1]} : vector<2x16x16x4xf32> to vector<2x14x14x4xf32>
    %43 = vector.shape_cast %42 : vector<2x14x14x4xf32> to vector<392x4xf32>
    %c7 = arith.constant 7 : index
    %c0_24 = arith.constant 0 : index
    %c0_25 = arith.constant 0 : index
    %44 = vector.load %arg2[%c7, %c0_24, %c0_25] : memref<9x4x8xf32, #tpu.memory_space<vmem>>, vector<1x4x8xf32>
    %45 = vector.shape_cast %44 : vector<1x4x8xf32> to vector<4x8xf32>
    %cst_26 = arith.constant dense<0.000000e+00> : vector<392x8xf32>
    %46 = tpu.matmul %43, %45, %cst_26 {dimension_numbers = #tpu.dot_dimension_numbers<[1], [0], [0], [1], [0, 0, 1, 1], [], []>} : vector<392x4xf32>, vector<4x8xf32>, vector<392x8xf32> -> vector<392x8xf32>
    %47 = arith.addf %41, %46 : vector<392x8xf32>
    %48 = vector.extract_strided_slice %0 {offsets = [0, 2, 2, 0], sizes = [2, 14, 14, 4], strides = [1, 1, 1, 1]} : vector<2x16x16x4xf32> to vector<2x14x14x4xf32>
    %49 = vector.shape_cast %48 : vector<2x14x14x4xf32> to vector<392x4xf32>
    %c8 = arith.constant 8 : index
    %c0_27 = arith.constant 0 : index
    %c0_28 = arith.constant 0 : index
    %50 = vector.load %arg2[%c8, %c0_27, %c0_28] : memref<9x4x8xf32, #tpu.memory_space<vmem>>, vector<1x4x8xf32>
    %51 = vector.shape_cast %50 : vector<1x4x8xf32> to vector<4x8xf32>
    %cst_29 = arith.constant dense<0.000000e+00> : vector<392x8xf32>
    %52 = tpu.matmul %49, %51, %cst_29 {dimension_numbers = #tpu.dot_dimension_numbers<[1], [0], [0], [1], [0, 0, 1, 1], [], []>} : vector<392x4xf32>, vector<4x8xf32>, vector<392x8xf32> -> vector<392x8xf32>
    %53 = arith.addf %47, %52 : vector<392x8xf32>
    %cst_30 = arith.constant dense<0.000000e+00> : vector<8xf32>
    %54 = vector.multi_reduction <add>, %53, %cst_30 [0] : vector<392x8xf32> to vector<8xf32>
    %55 = vector.shape_cast %54 : vector<8xf32> to vector<1x8xf32>
    %cst_31 = arith.constant 3.920000e+02 : f32
    %56 = vector.broadcast %cst_31 : f32 to vector<1x8xf32>
    %57 = arith.divf %55, %56 : vector<1x8xf32>
    %58 = vector.broadcast %57 : vector<1x8xf32> to vector<392x8xf32>
    %59 = arith.subf %53, %58 : vector<392x8xf32>
    %60 = arith.mulf %59, %59 : vector<392x8xf32>
    %cst_32 = arith.constant dense<0.000000e+00> : vector<8xf32>
    %61 = vector.multi_reduction <add>, %60, %cst_32 [0] : vector<392x8xf32> to vector<8xf32>
    %62 = vector.shape_cast %61 : vector<8xf32> to vector<1x8xf32>
    %cst_33 = arith.constant 3.920000e+02 : f32
    %63 = vector.broadcast %cst_33 : f32 to vector<1x8xf32>
    %64 = arith.divf %62, %63 : vector<1x8xf32>
    %c0_34 = arith.constant 0 : index
    %c0_35 = arith.constant 0 : index
    %65 = vector.load %arg3[%c0_34, %c0_35] : memref<1x8xf32, #tpu.memory_space<vmem>>, vector<1x8xf32>
    %cst_36 = arith.constant 9.99999974E-6 : f32
    %66 = vector.broadcast %cst_36 : f32 to vector<1x8xf32>
    %67 = arith.addf %64, %66 : vector<1x8xf32>
    %68 = math.rsqrt %67 : vector<1x8xf32>
    %69 = arith.mulf %65, %68 : vector<1x8xf32>
    %70 = vector.broadcast %69 : vector<1x8xf32> to vector<392x8xf32>
    %71 = arith.mulf %59, %70 : vector<392x8xf32>
    %c0_37 = arith.constant 0 : index
    %c0_38 = arith.constant 0 : index
    %72 = vector.load %arg4[%c0_37, %c0_38] : memref<1x8xf32, #tpu.memory_space<vmem>>, vector<1x8xf32>
    %73 = vector.broadcast %72 : vector<1x8xf32> to vector<392x8xf32>
    %74 = arith.addf %71, %73 : vector<392x8xf32>
    %cst_39 = arith.constant 0.000000e+00 : f32
    %75 = vector.broadcast %cst_39 : f32 to vector<392x8xf32>
    %76 = arith.maximumf %74, %75 : vector<392x8xf32>
    %77 = vector.shape_cast %76 : vector<392x8xf32> to vector<2x14x14x8xf32>
    %78 = vector.extract_strided_slice %77 {offsets = [0, 0, 0, 0], sizes = [2, 12, 14, 8], strides = [1, 1, 1, 1]} : vector<2x14x14x8xf32> to vector<2x12x14x8xf32>
    %79 = vector.shape_cast %78 : vector<2x12x14x8xf32> to vector<2x4x3x14x8xf32>
    %80 = vector.extract_strided_slice %79 {offsets = [0, 0, 0, 0, 0], sizes = [2, 4, 1, 14, 8], strides = [1, 1, 1, 1, 1]} : vector<2x4x3x14x8xf32> to vector<2x4x1x14x8xf32>
    %81 = vector.shape_cast %80 : vector<2x4x1x14x8xf32> to vector<2x4x14x8xf32>
    %82 = vector.extract_strided_slice %79 {offsets = [0, 0, 1, 0, 0], sizes = [2, 4, 1, 14, 8], strides = [1, 1, 1, 1, 1]} : vector<2x4x3x14x8xf32> to vector<2x4x1x14x8xf32>
    %83 = vector.shape_cast %82 : vector<2x4x1x14x8xf32> to vector<2x4x14x8xf32>
    %84 = arith.maximumf %81, %83 : vector<2x4x14x8xf32>
    %85 = vector.extract_strided_slice %79 {offsets = [0, 0, 2, 0, 0], sizes = [2, 4, 1, 14, 8], strides = [1, 1, 1, 1, 1]} : vector<2x4x3x14x8xf32> to vector<2x4x1x14x8xf32>
    %86 = vector.shape_cast %85 : vector<2x4x1x14x8xf32> to vector<2x4x14x8xf32>
    %87 = arith.maximumf %84, %86 : vector<2x4x14x8xf32>
    %88 = vector.extract_strided_slice %87 {offsets = [0, 0, 0, 0], sizes = [2, 4, 12, 8], strides = [1, 1, 1, 1]} : vector<2x4x14x8xf32> to vector<2x4x12x8xf32>
    %89 = vector.shape_cast %88 : vector<2x4x12x8xf32> to vector<2x4x4x3x8xf32>
    %90 = vector.extract_strided_slice %89 {offsets = [0, 0, 0, 0, 0], sizes = [2, 4, 4, 1, 8], strides = [1, 1, 1, 1, 1]} : vector<2x4x4x3x8xf32> to vector<2x4x4x1x8xf32>
    %91 = vector.shape_cast %90 : vector<2x4x4x1x8xf32> to vector<2x4x4x8xf32>
    %92 = vector.extract_strided_slice %89 {offsets = [0, 0, 0, 1, 0], sizes = [2, 4, 4, 1, 8], strides = [1, 1, 1, 1, 1]} : vector<2x4x4x3x8xf32> to vector<2x4x4x1x8xf32>
    %93 = vector.shape_cast %92 : vector<2x4x4x1x8xf32> to vector<2x4x4x8xf32>
    %94 = arith.maximumf %91, %93 : vector<2x4x4x8xf32>
    %95 = vector.extract_strided_slice %89 {offsets = [0, 0, 0, 2, 0], sizes = [2, 4, 4, 1, 8], strides = [1, 1, 1, 1, 1]} : vector<2x4x4x3x8xf32> to vector<2x4x4x1x8xf32>
    %96 = vector.shape_cast %95 : vector<2x4x4x1x8xf32> to vector<2x4x4x8xf32>
    %97 = arith.maximumf %94, %96 : vector<2x4x4x8xf32>
    %98 = vector.extract_strided_slice %97 {offsets = [0, 0, 0, 0], sizes = [2, 3, 3, 8], strides = [1, 1, 1, 1]} : vector<2x4x4x8xf32> to vector<2x3x3x8xf32>
    %99 = vector.shape_cast %98 : vector<2x3x3x8xf32> to vector<18x8xf32>
    %c0_40 = arith.constant 0 : index
    %c0_41 = arith.constant 0 : index
    %c0_42 = arith.constant 0 : index
    %100 = vector.load %arg5[%c0_40, %c0_41, %c0_42] : memref<4x8x16xf32, #tpu.memory_space<vmem>>, vector<1x8x16xf32>
    %101 = vector.shape_cast %100 : vector<1x8x16xf32> to vector<8x16xf32>
    %cst_43 = arith.constant dense<0.000000e+00> : vector<18x16xf32>
    %102 = tpu.matmul %99, %101, %cst_43 {dimension_numbers = #tpu.dot_dimension_numbers<[1], [0], [0], [1], [0, 0, 1, 1], [], []>} : vector<18x8xf32>, vector<8x16xf32>, vector<18x16xf32> -> vector<18x16xf32>
    %103 = vector.extract_strided_slice %97 {offsets = [0, 0, 1, 0], sizes = [2, 3, 3, 8], strides = [1, 1, 1, 1]} : vector<2x4x4x8xf32> to vector<2x3x3x8xf32>
    %104 = vector.shape_cast %103 : vector<2x3x3x8xf32> to vector<18x8xf32>
    %c1_44 = arith.constant 1 : index
    %c0_45 = arith.constant 0 : index
    %c0_46 = arith.constant 0 : index
    %105 = vector.load %arg5[%c1_44, %c0_45, %c0_46] : memref<4x8x16xf32, #tpu.memory_space<vmem>>, vector<1x8x16xf32>
    %106 = vector.shape_cast %105 : vector<1x8x16xf32> to vector<8x16xf32>
    %cst_47 = arith.constant dense<0.000000e+00> : vector<18x16xf32>
    %107 = tpu.matmul %104, %106, %cst_47 {dimension_numbers = #tpu.dot_dimension_numbers<[1], [0], [0], [1], [0, 0, 1, 1], [], []>} : vector<18x8xf32>, vector<8x16xf32>, vector<18x16xf32> -> vector<18x16xf32>
    %108 = arith.addf %102, %107 : vector<18x16xf32>
    %109 = vector.extract_strided_slice %97 {offsets = [0, 1, 0, 0], sizes = [2, 3, 3, 8], strides = [1, 1, 1, 1]} : vector<2x4x4x8xf32> to vector<2x3x3x8xf32>
    %110 = vector.shape_cast %109 : vector<2x3x3x8xf32> to vector<18x8xf32>
    %c2_48 = arith.constant 2 : index
    %c0_49 = arith.constant 0 : index
    %c0_50 = arith.constant 0 : index
    %111 = vector.load %arg5[%c2_48, %c0_49, %c0_50] : memref<4x8x16xf32, #tpu.memory_space<vmem>>, vector<1x8x16xf32>
    %112 = vector.shape_cast %111 : vector<1x8x16xf32> to vector<8x16xf32>
    %cst_51 = arith.constant dense<0.000000e+00> : vector<18x16xf32>
    %113 = tpu.matmul %110, %112, %cst_51 {dimension_numbers = #tpu.dot_dimension_numbers<[1], [0], [0], [1], [0, 0, 1, 1], [], []>} : vector<18x8xf32>, vector<8x16xf32>, vector<18x16xf32> -> vector<18x16xf32>
    %114 = arith.addf %108, %113 : vector<18x16xf32>
    %115 = vector.extract_strided_slice %97 {offsets = [0, 1, 1, 0], sizes = [2, 3, 3, 8], strides = [1, 1, 1, 1]} : vector<2x4x4x8xf32> to vector<2x3x3x8xf32>
    %116 = vector.shape_cast %115 : vector<2x3x3x8xf32> to vector<18x8xf32>
    %c3_52 = arith.constant 3 : index
    %c0_53 = arith.constant 0 : index
    %c0_54 = arith.constant 0 : index
    %117 = vector.load %arg5[%c3_52, %c0_53, %c0_54] : memref<4x8x16xf32, #tpu.memory_space<vmem>>, vector<1x8x16xf32>
    %118 = vector.shape_cast %117 : vector<1x8x16xf32> to vector<8x16xf32>
    %cst_55 = arith.constant dense<0.000000e+00> : vector<18x16xf32>
    %119 = tpu.matmul %116, %118, %cst_55 {dimension_numbers = #tpu.dot_dimension_numbers<[1], [0], [0], [1], [0, 0, 1, 1], [], []>} : vector<18x8xf32>, vector<8x16xf32>, vector<18x16xf32> -> vector<18x16xf32>
    %120 = arith.addf %114, %119 : vector<18x16xf32>
    %cst_56 = arith.constant dense<0.000000e+00> : vector<16xf32>
    %121 = vector.multi_reduction <add>, %120, %cst_56 [0] : vector<18x16xf32> to vector<16xf32>
    %122 = vector.shape_cast %121 : vector<16xf32> to vector<1x16xf32>
    %cst_57 = arith.constant 1.800000e+01 : f32
    %123 = vector.broadcast %cst_57 : f32 to vector<1x16xf32>
    %124 = arith.divf %122, %123 : vector<1x16xf32>
    %125 = vector.broadcast %124 : vector<1x16xf32> to vector<18x16xf32>
    %126 = arith.subf %120, %125 : vector<18x16xf32>
    %127 = arith.mulf %126, %126 : vector<18x16xf32>
    %cst_58 = arith.constant dense<0.000000e+00> : vector<16xf32>
    %128 = vector.multi_reduction <add>, %127, %cst_58 [0] : vector<18x16xf32> to vector<16xf32>
    %129 = vector.shape_cast %128 : vector<16xf32> to vector<1x16xf32>
    %cst_59 = arith.constant 1.800000e+01 : f32
    %130 = vector.broadcast %cst_59 : f32 to vector<1x16xf32>
    %131 = arith.divf %129, %130 : vector<1x16xf32>
    %c0_60 = arith.constant 0 : index
    %c0_61 = arith.constant 0 : index
    %132 = vector.load %arg6[%c0_60, %c0_61] : memref<1x16xf32, #tpu.memory_space<vmem>>, vector<1x16xf32>
    %cst_62 = arith.constant 9.99999974E-6 : f32
    %133 = vector.broadcast %cst_62 : f32 to vector<1x16xf32>
    %134 = arith.addf %131, %133 : vector<1x16xf32>
    %135 = math.rsqrt %134 : vector<1x16xf32>
    %136 = arith.mulf %132, %135 : vector<1x16xf32>
    %137 = vector.broadcast %136 : vector<1x16xf32> to vector<18x16xf32>
    %138 = arith.mulf %126, %137 : vector<18x16xf32>
    %c0_63 = arith.constant 0 : index
    %c0_64 = arith.constant 0 : index
    %139 = vector.load %arg7[%c0_63, %c0_64] : memref<1x16xf32, #tpu.memory_space<vmem>>, vector<1x16xf32>
    %140 = vector.broadcast %139 : vector<1x16xf32> to vector<18x16xf32>
    %141 = arith.addf %138, %140 : vector<18x16xf32>
    %cst_65 = arith.constant 0.000000e+00 : f32
    %142 = vector.broadcast %cst_65 : f32 to vector<18x16xf32>
    %143 = arith.maximumf %141, %142 : vector<18x16xf32>
    %144 = vector.shape_cast %143 : vector<18x16xf32> to vector<2x3x3x16xf32>
    %145 = vector.extract_strided_slice %144 {offsets = [0, 0, 0, 0], sizes = [2, 2, 3, 16], strides = [1, 1, 1, 1]} : vector<2x3x3x16xf32> to vector<2x2x3x16xf32>
    %146 = vector.shape_cast %145 : vector<2x2x3x16xf32> to vector<2x1x2x3x16xf32>
    %147 = vector.extract_strided_slice %146 {offsets = [0, 0, 0, 0, 0], sizes = [2, 1, 1, 3, 16], strides = [1, 1, 1, 1, 1]} : vector<2x1x2x3x16xf32> to vector<2x1x1x3x16xf32>
    %148 = vector.shape_cast %147 : vector<2x1x1x3x16xf32> to vector<2x1x3x16xf32>
    %149 = vector.extract_strided_slice %146 {offsets = [0, 0, 1, 0, 0], sizes = [2, 1, 1, 3, 16], strides = [1, 1, 1, 1, 1]} : vector<2x1x2x3x16xf32> to vector<2x1x1x3x16xf32>
    %150 = vector.shape_cast %149 : vector<2x1x1x3x16xf32> to vector<2x1x3x16xf32>
    %151 = arith.maximumf %148, %150 : vector<2x1x3x16xf32>
    %152 = vector.extract_strided_slice %151 {offsets = [0, 0, 0, 0], sizes = [2, 1, 2, 16], strides = [1, 1, 1, 1]} : vector<2x1x3x16xf32> to vector<2x1x2x16xf32>
    %153 = vector.shape_cast %152 : vector<2x1x2x16xf32> to vector<2x1x1x2x16xf32>
    %154 = vector.extract_strided_slice %153 {offsets = [0, 0, 0, 0, 0], sizes = [2, 1, 1, 1, 16], strides = [1, 1, 1, 1, 1]} : vector<2x1x1x2x16xf32> to vector<2x1x1x1x16xf32>
    %155 = vector.shape_cast %154 : vector<2x1x1x1x16xf32> to vector<2x1x1x16xf32>
    %156 = vector.extract_strided_slice %153 {offsets = [0, 0, 0, 1, 0], sizes = [2, 1, 1, 1, 16], strides = [1, 1, 1, 1, 1]} : vector<2x1x1x2x16xf32> to vector<2x1x1x1x16xf32>
    %157 = vector.shape_cast %156 : vector<2x1x1x1x16xf32> to vector<2x1x1x16xf32>
    %158 = arith.maximumf %155, %157 : vector<2x1x1x16xf32>
    %159 = vector.shape_cast %158 : vector<2x1x1x16xf32> to vector<2x16xf32>
    %c0_66 = arith.constant 0 : index
    %c0_67 = arith.constant 0 : index
    %160 = vector.load %arg8[%c0_66, %c0_67] : memref<16x10xf32, #tpu.memory_space<vmem>>, vector<16x10xf32>
    %cst_68 = arith.constant dense<0.000000e+00> : vector<2x10xf32>
    %161 = tpu.matmul %159, %160, %cst_68 {dimension_numbers = #tpu.dot_dimension_numbers<[1], [0], [0], [1], [0, 0, 1, 1], [], []>} : vector<2x16xf32>, vector<16x10xf32>, vector<2x10xf32> -> vector<2x10xf32>
    %c0_69 = arith.constant 0 : index
    %c0_70 = arith.constant 0 : index
    %162 = vector.load %arg9[%c0_69, %c0_70] : memref<1x10xf32, #tpu.memory_space<vmem>>, vector<1x10xf32>
    %163 = vector.broadcast %162 : vector<1x10xf32> to vector<2x10xf32>
    %164 = arith.addf %161, %163 : vector<2x10xf32>
    %c0_71 = arith.constant 0 : index
    %c0_72 = arith.constant 0 : index
    %165 = vector.load %arg10[%c0_71, %c0_72] : memref<2x10xf32, #tpu.memory_space<vmem>>, vector<2x10xf32>
    tpu.vector_store %arg10[%c0_71, %c0_72], %164 {strides = array<i32>} : memref<2x10xf32, #tpu.memory_space<vmem>>, vector<2x10xf32>,
    return
  }
  func.func @transform_0(%arg0: i32) -> (i32, i32, i32, i32) {
    %c0_i32 = arith.constant 0 : i32
    %c0_i32_0 = arith.constant 0 : i32
    %c0_i32_1 = arith.constant 0 : i32
    %c0_i32_2 = arith.constant 0 : i32
    %c0_i32_3 = arith.constant 0 : i32
    return %c0_i32, %c0_i32_0, %c0_i32_1, %c0_i32_2 : i32, i32, i32, i32
  }
  func.func @transform_1(%arg0: i32) -> (i32, i32, i32) {
    %c0_i32 = arith.constant 0 : i32
    %c0_i32_0 = arith.constant 0 : i32
    %c0_i32_1 = arith.constant 0 : i32
    %c0_i32_2 = arith.constant 0 : i32
    return %c0_i32, %c0_i32_0, %c0_i32_1 : i32, i32, i32
  }
  func.func @transform_2(%arg0: i32) -> (i32, i32) {
    %c0_i32 = arith.constant 0 : i32
    %c0_i32_0 = arith.constant 0 : i32
    %c0_i32_1 = arith.constant 0 : i32
    return %c0_i32, %c0_i32_0 : i32, i32
  }
  func.func @transform_3(%arg0: i32) -> (i32, i32) {
    %c0_i32 = arith.constant 0 : i32
    %c0_i32_0 = arith.constant 0 : i32
    %c0_i32_1 = arith.constant 0 : i32
    return %c0_i32, %c0_i32_0 : i32, i32
  }
  func.func @transform_4(%arg0: i32) -> (i32, i32, i32) {
    %c0_i32 = arith.constant 0 : i32
    %c0_i32_0 = arith.constant 0 : i32
    %c0_i32_1 = arith.constant 0 : i32
    %c0_i32_2 = arith.constant 0 : i32
    return %c0_i32, %c0_i32_0, %c0_i32_1 : i32, i32, i32
  }
  func.func @transform_5(%arg0: i32) -> (i32, i32) {
    %c0_i32 = arith.constant 0 : i32
    %c0_i32_0 = arith.constant 0 : i32
    %c0_i32_1 = arith.constant 0 : i32
    return %c0_i32, %c0_i32_0 : i32, i32
  }
  func.func @transform_6(%arg0: i32) -> (i32, i32) {
    %c0_i32 = arith.constant 0 : i32
    %c0_i32_0 = arith.constant 0 : i32
    %c0_i32_1 = arith.constant 0 : i32
    return %c0_i32, %c0_i32_0 : i32, i32
  }
  func.func @transform_7(%arg0: i32) -> (i32, i32) {
    %c0_i32 = arith.constant 0 : i32
    %c0_i32_0 = arith.constant 0 : i32
    %c0_i32_1 = arith.constant 0 : i32
    return %c0_i32, %c0_i32_0 : i32, i32
  }
  func.func @transform_8(%arg0: i32) -> (i32, i32) {
    %c0_i32 = arith.constant 0 : i32
    %c0_i32_0 = arith.constant 0 : i32
    %c0_i32_1 = arith.constant 0 : i32
    return %c0_i32, %c0_i32_0 : i32, i32
  }
  func.func @transform_9(%arg0: i32) -> (i32, i32) {
    %c0_i32 = arith.constant 0 : i32
    %c0_i32_0 = arith.constant 0 : i32
    %c0_i32_1 = arith.constant 0 : i32
    return %c0_i32, %c0_i32_0 : i32, i32
  }
}

</mosaic_0001>

<bundles_post_ra>
// kernel: forward.1
= control target key start
LH: loop header
LB: loop body
LE: loop exit
PB: predicated region body
PF: predicated region fallthrough
CT: control target
= control target key end

     0   :  { %vm2663_vm0 = vcmask 1043456   ;;  %v157_v2 = vlaneseq  ;;  %v24832_v3 = vmov 0.0   ;;  %vm1106_vm1 = vcmask 1040384   ;;  %s24822_s0 = inlined_call_operand.vmem [shape: f32[2,16,16,4], index: 0, kind: input, shape index: {}]   ;;  %s24823_s1 = inlined_call_operand.vmem [shape: f32[9,4,8], index: 1, kind: input, shape index: {}]   ;;  %s24824_s2 = inlined_call_operand.vmem [shape: f32[1,8], index: 2, kind: input, shape index: {}]   ;;  %s24825_s3 = inlined_call_operand.vmem [shape: f32[1,8], index: 3, kind: input, shape index: {}]   ;;  %s24826_s4 = inlined_call_operand.vmem [shape: f32[4,8,16], index: 4, kind: input, shape index: {}]   ;;  %s24827_s5 = inlined_call_operand.vmem [shape: f32[1,16], index: 5, kind: input, shape index: {}]   ;;  %s24828_s6 = inlined_call_operand.vmem [shape: f32[1,16], index: 6, kind: input, shape index: {}]   ;;  %s24829_s7 = inlined_call_operand.vmem [shape: f32[16,10], index: 7, kind: input, shape index: {}]   ;;  %s24830_s8 = inlined_call_operand.vmem [shape: f32[1,10], index: 8, kind: input, shape index: {}]   ;;  %s24831_s9 = inlined_call_operand.hbm [shape: f32[2,10], index: 9, kind: output, shape index: {}]  }
   0x1   :  { %v13619_v0 = vld [vmem:[%s24823_s1 + $0x10] sm:$0xf]  ;;  %v13400_v1 = vld [vmem:[%s24823_s1 + $0x4] sm:$0xf]  ;;  %14976 = vmatprep.subr.mxu0 %v24832_v3  ;;  %14380 = vmatprep.subr.mxu1 %v24832_v3  ;;  %v34_v5 = vld [vmem:[%s24822_s0 + $0x8] sm:$0xff]  ;;  %vm16631_vm2 = vmmov 0  }
   0x2   :  { %v33_v4 = vld [vmem:[%s24822_s0] sm:$0xff]  ;;  %14977 = vmatpush3.msk.msra.mxu0 %vm2663_vm0, %v13619_v0  ;;  %14381 = vmatpush3.msk.msra.mxu1 %vm2663_vm0, %v13400_v1  ;;  %v16630_v6 = vmov 1983009808   ;;  %v16701_v8 = vshrl.u32 %v157_v2, 7  ;;  %v35_v9 = vld [vmem:[%s24822_s0 + $0x10] sm:$0xff]  ;;  %v36_v10 = vld [vmem:[%s24822_s0 + $0x18] sm:$0xff]  ;;  %v170_v14 = vcombine.high %v34_v5, %v34_v5 }
   0x3   :  { %v155_v7 = vunpack.c.l.s4 %v16630_v6  ;;  %14382 = vmatprep.mubr.msk.f32.mxu1 %vm16631_vm2, %v24832_v3  ;;  %14978 = vmatprep.mubr.msk.f32.mxu0 %vm16631_vm2, %v24832_v3  ;;  %vm1107_vm3 = vcmask 1042434   ;;  %v16716_v11 = vld [vmem:[%s24822_s0 + $0x20] sm:$0xff]  ;;  %v153_v12 = vcombine.high %v33_v4, %v33_v4  ;;  %vm1109_vm5 = vcmask 1044484   ;;  %v16727_v16 = vld [vmem:[%s24822_s0 + $0x28] sm:$0xff]  ;;  %v16732_v17 = vld [vmem:[%s24822_s0 + $0x30] sm:$0xff] }
   0x4   :  { %25684 = vst [vmem:[#allocation5_spill] sm:$0xff] %v16701_v8  ;;  %15125 = vmatprep.subr.mxu0 %v24832_v3  ;;  %vm16720_vm4 = vmor %vm1106_vm1, %vm1107_vm3  ;;  %14529 = vmatprep.subr.mxu1 %v24832_v3  ;;  %vm1111_vm6 = vcmask 1046534   ;;  %v186_v18 = vcombine.high %v35_v9, %v35_v9  ;;  %v203_v19 = vcombine.high %v36_v10, %v36_v10  ;;  %v16740_v21 = vld [vmem:[%s24822_s0 + $0x38] sm:$0xff]  ;;  %v16745_v22 = vld [vmem:[%s24822_s0 + $0x40] sm:$0xff]  ;;  %v25700_v45 = vmov 0 }
   0x5   :  { %v156_v13 = vunpack.c.0.s8 %v155_v7  ;;  %v219_v20 = vcombine.high %v16716_v11, %v16716_v11  ;;  %v16750_v23 = vld [vmem:[%s24822_s0 + $0x48] sm:$0xff]  ;;  %v236_v25 = vcombine.high %v16727_v16, %v16727_v16  ;;  %v252_v26 = vcombine.high %v16732_v17, %v16732_v17  ;;  %v16764_v28 = vld [vmem:[%s24822_s0 + $0x50] sm:$0xff]  ;;  %v16769_v29 = vld [vmem:[%s24822_s0 + $0x58] sm:$0xff] }
   0x6   :  { %v269_v27 = vcombine.high %v16740_v21, %v16740_v21  ;;  %vm16774_vm7 = vmor %vm16720_vm4, %vm1109_vm5  ;;  %v285_v31 = vcombine.high %v16745_v22, %v16745_v22 }
   0x7   :  { %v16753_v24 = vsub.s32 %v156_v13, %v16701_v8  ;;  %vm16821_vm8 = vmor %vm16774_vm7, %vm1111_vm6 }
   0x8   :  { %v25701_v45 = vsel %vm16821_vm8, 4294967295, %v25700_v45 }
   0x9   :  { %25687 = vst [vmem:[#allocation6_spill] sm:$0xff] %v16753_v24  ;;  %v16787_v35 = vrot.slane %v33_v4, %v16753_v24  ;;  %v16790_v36 = vrot.slane %v153_v12, %v16753_v24  ;;  %v16793_v37 = vrot.slane %v34_v5, %v16753_v24  ;;  %v16796_v38 = vrot.slane %v170_v14, %v16753_v24 }
   0xa   :  { %v16799_v39 = vrot.slane %v35_v9, %v16753_v24  ;;  %v16802_v40 = vrot.slane %v186_v18, %v16753_v24  ;;  %v16805_v41 = vrot.slane %v36_v10, %v16753_v24  ;;  %v16808_v42 = vrot.slane %v203_v19, %v16753_v24  ;;  %25702 = vst [vmem:[#allocation17_spill] sm:$0xff] %v25701_v45 }
   0xb   :  { %25690 = vst [vmem:[#allocation7_spill] sm:$0xff] %v16787_v35  ;;  %25691 = vst [vmem:[#allocation8_spill] sm:$0xff] %v16790_v36  ;;  %v16812_v43 = vcombine.high %v16787_v35, %v16787_v35  ;;  %v16816_v44 = vcombine.high %v16790_v36, %v16790_v36  ;;  %v13372_v46 = vrot.slane %v16787_v35, 9  ;;  %v1118_v47 = vrot.slane %v16790_v36, 7 }
   0xc   :  { %25692 = vst [vmem:[#allocation9_spill] sm:$0xff] %v16793_v37  ;;  %25693 = vst [vmem:[#allocation10_spill] sm:$0xff] %v16796_v38  ;;  %v1124_v48 = vrot.slane %v16793_v37, 7  ;;  %v16830_v49 = vcombine.high %v16799_v39, %v16799_v39  ;;  %v16834_v50 = vcombine.high %v16802_v40, %v16802_v40  ;;  %v13373_v51 = vrot.slane %v16799_v39, 9 }
   0xd   :  { %25694 = vst [vmem:[#allocation11_spill] sm:$0xff] %v16799_v39  ;;  %25695 = vst [vmem:[#allocation12_spill] sm:$0xff] %v16802_v40 }
   0xe   :  { %25696 = vst [vmem:[#allocation13_spill] sm:$0xff] %v16805_v41  ;;  %25697 = vst [vmem:[#allocation14_spill] sm:$0xff] %v16808_v42 }
   0xf   :  { %25698 = vst [vmem:[#allocation15_spill] sm:$0xff] %v16812_v43  ;;  %25699 = vst [vmem:[#allocation16_spill] sm:$0xff] %v16816_v44 }
  0x10   :  { %25703 = vst [vmem:[#allocation18_spill] sm:$0xff] %v16830_v49  ;;  %25704 = vst [vmem:[#allocation19_spill] sm:$0xff] %v16834_v50 }
  0x11   :  { %14 = vsyncpa [#allocation3], 0  ;;  %v1115_v52 = vrot.slane %v16812_v43, 7  ;;  %v1120_v53 = vrot.slane %v1118_v47, 2  ;;  %v1121_v54 = vrot.slane %v16816_v44, 7  ;;  %vm2564_vm9 = vcmask 31744  }
  0x12   :  { %v1140_v55 = vrot.slane %v16802_v40, 7  ;;  %v1137_v56 = vrot.slane %v16830_v49, 7  ;;  %v1143_v57 = vrot.slane %v16834_v50, 7  ;;  %v1146_v58 = vrot.slane %v16805_v41, 7  ;;  %s16634_s24 = smov [#allocation2]  }
  0x13   :  { %v16845_v59 = vcombine.high %v16793_v37, %v16793_v37  ;;  %v1116_v60 = vsel %vm16821_vm8, %v13372_v46, %v1115_v52  ;;  %v1117_v61 = vrot.slane %v1115_v52, 2  ;;  %v1122_v62 = vsel %vm16821_vm8, %v1120_v53, %v1121_v54  ;;  %s13364_s25 = sshll.u32 %s16634_s24, 4  ;;  %s13365_s25 = int_to_ptr.vmem [resolvable:$true] %s13364_s25 }
  0x14   :  { %v1123_v63 = vrot.slane %v1121_v54, 2  ;;  %v1138_v0 = vsel %vm16821_vm8, %v13373_v51, %v1137_v56  ;;  %v1139_v1 = vrot.slane %v1137_v56, 2  ;;  %v1142_v2 = vrot.slane %v1140_v55, 2  ;;  %s16605_s26 = scalar_lea.vmem %s13365_s25, 32  ;;  %p16610_p1 = scmp.lt.s32.totalorder %s13365_s25, %s13365_s25 }
  0x15   :  { %25705 = vst [vmem:[#allocation20_spill] sm:$0xff] %v16845_v59  ;;  %v1145_v4 = vrot.slane %v1143_v57, 2  ;;  %v1119_v5 = vsel %vm16821_vm8, %v1117_v61, %v1118_v47  ;;  %v1078_v7 = vcombine.high %v16796_v38, %v16796_v38  ;;  %v1126_v9 = vrot.slane %v1124_v48, 2  ;;  %p16606_p0 = scmp.ne.s32.totalorder %s13365_s25, %s16605_s26  ;;  %p16611_p2 = scmp.lt.s32.totalorder %s16605_s26, %s16605_s26 }
  0x16   :  { %v1125_v6 = vsel %vm16821_vm8, %v1123_v63, %v1124_v48  ;;  %v1731_v10 = vcombine.low %v1116_v60, %v1119_v5  ;;  %v1141_v13 = vsel %vm16821_vm8, %v1139_v1, %v1140_v55  ;;  %v1144_v14 = vsel %vm16821_vm8, %v1142_v2, %v1143_v57 }
  0x17   :  { %v1732_v12 = vcombine.low %v1122_v62, %v1125_v6  ;;  %v1147_v15 = vsel %vm16821_vm8, %v1145_v4, %v1146_v58  ;;  %v6417_v18 = vcombine.low %v1138_v0, %v1141_v13  ;;  %v1127_v19 = vrot.slane %v16845_v59, 7  ;;  %v1077_v62 = vld [vmem:[%s24823_s1] sm:$0xf]  ;;  %v13670_v6 = vld [vmem:[%s24823_s1 + $0x14] sm:$0xf]  ;;  %p16612_p3 = por %p16611_p2, %p16610_p1 }
  0x18   :  { %v1130_v30 = vrot.slane %v16796_v38, 7  ;;  %v1739_v46 = vrot.slane %v1731_v10, %v16753_v24  ;;  %v6418_v48 = vcombine.low %v1144_v14, %v1147_v15  ;;  %v1133_v51 = vrot.slane %v1078_v7, 7 }
  0x19   :  { %v1746_v47 = vrot.slane %v1732_v12, %v16753_v24  ;;  %v6425_v52 = vrot.slane %v6417_v18, %v16753_v24  ;;  %v1128_v53 = vsel %vm16821_vm8, %v1126_v9, %v1127_v19  ;;  %v1129_v54 = vrot.slane %v1127_v19, 2  ;;  %p16613_p4 = pnand %p16612_p3, %p16606_p0 }
  0x1a   :  { %v1132_v55 = vrot.slane %v1130_v30, 2  ;;  %v6432_v57 = vrot.slane %v6418_v48, %v16753_v24  ;;  %v16875_v60 = vcombine.high %v16805_v41, %v16805_v41  ;;  %v16879_v61 = vrot.slane %v16716_v11, %v16753_v24 }
  0x1b   :  { %v1747_v56 = vcombine.low %v1739_v46, %v1746_v47  ;;  %v1131_v63 = vsel %vm16821_vm8, %v1129_v54, %v1130_v30  ;;  %v16890_v2 = vcombine.high %v16808_v42, %v16808_v42  ;;  %v1148_v4 = vrot.slane %v1146_v58, 2 }
  0x1c   :  { %25706 = vst [vmem:[#allocation21_spill] sm:$0xff] %v16875_v60  ;;  %25707 = vst [vmem:[#allocation22_spill] sm:$0xff] %v16879_v61  ;;  %v1134_v1 = vsel %vm16821_vm8, %v1132_v55, %v1133_v51  ;;  %v6433_v5 = vcombine.low %v6425_v52, %v6432_v57  ;;  %v1748_v7 = vcombine.low %v1128_v53, %v1131_v63  ;;  %v1149_v12 = vrot.slane %v16875_v60, 7 }
  0x1d   :  { %25708 = vst [vmem:[#allocation23_spill] sm:$0xff] %v16890_v2  ;;  %14383 = vmatmul.mubr.msk.f32.vlgmr.msra.gmra.mrb[0].mxu1 %vm2564_vm9, %v1747_v56  ;;  %v1749_v9 = vcombine.low %v1134_v1, %v1138_v0  ;;  %v16898_v10 = vcombine.high %v16879_v61, %v16879_v61  ;;  %v1152_v58 = vrot.slane %v16808_v42, 7  ;;  %v1155_v18 = vrot.slane %v16890_v2, 7 }
  0x1e   :  { %14385 = vmatprep.mubr.msk.f32.mxu1 %vm16631_vm2, %v24832_v3  ;;  %v13374_v19 = vrot.slane %v16879_v61, 9  ;;  %14530 = vmatpush3.msk.msra.mxu1 %vm2663_vm0, %v1077_v62  ;;  %v1756_v0 = vrot.slane %v1748_v7, %v16753_v24  ;;  %v1765_v47 = vcombine.low %v1141_v13, %v1144_v14  ;;  %v1150_v48 = vsel %vm16821_vm8, %v1148_v4, %v1149_v12 }
  0x1f   :  { %25709 = vst [vmem:[#allocation24_spill] sm:$0xff] %v16898_v10  ;;  %14979 = vmatmul.mubr.msk.f32.vlgmr.msra.gmra.mrb[0].mxu0 %vm2564_vm9, %v6433_v5  ;;  %v1763_v30 = vrot.slane %v1749_v9, %v16753_v24  ;;  %v1159_v46 = vrot.slane %v16898_v10, 7  ;;  %14678 = vmatprep.subr.mxu1 %v24832_v3  ;;  %v1151_v51 = vrot.slane %v1149_v12, 2  ;;  %v1154_v52 = vrot.slane %v1152_v58, 2 }
  0x20   :  { %15126 = vmatpush3.msk.msra.mxu0 %vm2663_vm0, %v13670_v6  ;;  %14981 = vmatprep.mubr.msk.f32.mxu0 %vm16631_vm2, %v24832_v3  ;;  %v16921_v53 = vrot.slane %v219_v20, %v16753_v24  ;;  %v1766_v14 = vcombine.low %v1147_v15, %v1150_v48  ;;  %v1773_v55 = vrot.slane %v1765_v47, %v16753_v24  ;;  %vm10262_vm10 = vcmask 64512  }
  0x21   :  { %v1764_v54 = vcombine.low %v1756_v0, %v1763_v30  ;;  %v1160_v13 = vsel %vm16821_vm8, %v13374_v19, %v1159_v46  ;;  %15274 = vmatprep.subr.mxu0 %v24832_v3  ;;  %v1153_v56 = vsel %vm16821_vm8, %v1151_v51, %v1152_v58  ;;  %v1156_v57 = vsel %vm16821_vm8, %v1154_v52, %v1155_v18 }
  0x22   :  { %25710 = vst [vmem:[#allocation25_spill] sm:$0xff] %v16921_v53  ;;  %v16933_v11 = vcombine.high %v16921_v53, %v16921_v53  ;;  %v16937_v20 = vrot.slane %v16727_v16, %v16753_v24  ;;  %v6434_v15 = vcombine.low %v1150_v48, %v1153_v56  ;;  %v6435_v62 = vcombine.low %v1156_v57, %v1160_v13 }
  0x23   :  { %14386 = vmatmul.mubr.msk.f32.gmra.mrb[2].mxu1 %vm2564_vm9, %v1764_v54  ;;  %v1780_v63 = vrot.slane %v1766_v14, %v16753_v24  ;;  %v16945_v1 = vrot.slane %v236_v25, %v16753_v24  ;;  %v1161_v5 = vrot.slane %v1159_v46, 2  ;;  %v1162_v6 = vrot.slane %v16921_v53, 7 }
  0x24   :  { %25711 = vst [vmem:[#allocation26_spill] sm:$0xff] %v16933_v11  ;;  %25712 = vst [vmem:[#allocation27_spill] sm:$0xff] %v16937_v20  ;;  %14388 = vmatprep.mubr.msk.f32.mxu1 %vm16631_vm2, %v24832_v3  ;;  %v16951_v4 = vcombine.high %v16937_v20, %v16937_v20  ;;  %v1165_v7 = vrot.slane %v16933_v11, 7  ;;  %v6442_v9 = vrot.slane %v6434_v15, %v16753_v24  ;;  %v1168_v16 = vrot.slane %v16937_v20, 7 }
  0x25   :  { %25713 = vst [vmem:[#allocation28_spill] sm:$0xff] %v16945_v1  ;;  %v6449_v12 = vrot.slane %v6435_v62, %v16753_v24  ;;  %v1781_v58 = vcombine.low %v1773_v55, %v1780_v63  ;;  %v1163_v25 = vsel %vm16821_vm8, %v1161_v5, %v1162_v6  ;;  %v1164_v18 = vrot.slane %v1162_v6, 2 }
  0x26   :  { %25714 = vst [vmem:[#allocation29_spill] sm:$0xff] %v16951_v4  ;;  %v1167_v19 = vrot.slane %v1165_v7, 2  ;;  %v1171_v0 = vrot.slane %v16951_v4, 7  ;;  %v1170_v46 = vrot.slane %v1168_v16, 2  ;;  %v1782_v47 = vcombine.low %v1153_v56, %v1156_v57 }
  0x27   :  { %v6450_v30 = vcombine.low %v6442_v9, %v6449_v12  ;;  %14389 = vmatmul.mubr.msk.f32.gmra.mrb[4].mxu1 %vm2564_vm9, %v1781_v58  ;;  %v1783_v48 = vcombine.low %v1160_v13, %v1163_v25  ;;  %v1166_v51 = vsel %vm16821_vm8, %v1164_v18, %v1165_v7  ;;  %v16970_v54 = vrot.slane %v16732_v17, %v16753_v24 }
  0x28   :  { %v1169_v52 = vsel %vm16821_vm8, %v1167_v19, %v1168_v16  ;;  %14391 = vmatprep.mubr.msk.f32.mxu1 %vm16631_vm2, %v24832_v3  ;;  %v16976_v14 = vrot.slane %v252_v26, %v16753_v24  ;;  %v1172_v13 = vsel %vm16821_vm8, %v1170_v46, %v1171_v0  ;;  %v6451_v55 = vcombine.low %v1163_v25, %v1166_v51 }
  0x29   :  { %25715 = vst [vmem:[#allocation30_spill] sm:$0xff] %v16970_v54  ;;  %14982 = vmatmul.mubr.msk.f32.gmra.mrb[2].mxu0 %vm2564_vm9, %v6450_v30  ;;  %v1790_v56 = vrot.slane %v1782_v47, %v16753_v24  ;;  %v16983_v57 = vrot.slane %v1783_v48, %v16753_v24  ;;  %v6452_v15 = vcombine.low %v1169_v52, %v1172_v13  ;;  %v1173_v62 = vrot.slane %v1171_v0, 2 }
  0x2a   :  { %25716 = vst [vmem:[#allocation31_spill] sm:$0xff] %v16976_v14  ;;  %14984 = vmatprep.mubr.msk.f32.mxu0 %vm16631_vm2, %v24832_v3  ;;  %v16989_v17 = vcombine.high %v16970_v54, %v16970_v54  ;;  %v16993_v26 = vcombine.high %v16945_v1, %v16945_v1  ;;  %v6459_v63 = vrot.slane %v6451_v55, %v16753_v24  ;;  %v1174_v6 = vrot.slane %v16945_v1, 7 }
  0x2b   :  { %25717 = vst [vmem:[#allocation32_spill] sm:$0xff] %v16983_v57  ;;  %v1798_v5 = vcombine.low %v1790_v56, %v16983_v57  ;;  %v13375_v7 = vrot.slane %v16970_v54, 9  ;;  %v6466_v9 = vrot.slane %v6452_v15, %v16753_v24  ;;  %v1184_v16 = vrot.slane %v16976_v14, 7 }
  0x2c   :  { %25718 = vst [vmem:[#allocation33_spill] sm:$0xff] %v16989_v17  ;;  %v1177_v12 = vrot.slane %v16993_v26, 7  ;;  %v1181_v58 = vrot.slane %v16989_v17, 7  ;;  %v1175_v25 = vsel %vm16821_vm8, %v1173_v62, %v1174_v6  ;;  %v1176_v18 = vrot.slane %v1174_v6, 2 }
  0x2d   :  { %14392 = vmatmul.mubr.msk.f32.gmra.mrb[6].mxu1 %vm2564_vm9, %v1798_v5  ;;  %v1799_v19 = vcombine.low %v1166_v51, %v1169_v52  ;;  %v17008_v0 = vcombine.high %v16976_v14, %v16976_v14  ;;  %v6467_v30 = vcombine.low %v6459_v63, %v6466_v9  ;;  %v1800_v48 = vcombine.low %v1172_v13, %v1175_v25 }
  0x2e   :  { %v1182_v46 = vsel %vm16821_vm8, %v13375_v7, %v1181_v58  ;;  %v1183_v47 = vrot.slane %v1181_v58, 2  ;;  %14394 = vmatprep.mubr.msk.f32.mxu1 %vm16631_vm2, %v24832_v3  ;;  %v1178_v55 = vsel %vm16821_vm8, %v1176_v18, %v1177_v12  ;;  %v17021_v51 = vrot.slane %v16740_v21, %v16753_v24 }
  0x2f   :  { %25719 = vst [vmem:[#allocation34_spill] sm:$0xff] %v17008_v0  ;;  %v17017_v56 = vrot.slane %v1799_v19, %v16753_v24  ;;  %v17027_v52 = vrot.slane %v269_v27, %v16753_v24  ;;  %14985 = vmatmul.mubr.msk.f32.gmra.mrb[4].mxu0 %vm2564_vm9, %v6467_v30  ;;  %v6468_v15 = vcombine.low %v1175_v25, %v1178_v55  ;;  %v1186_v63 = vrot.slane %v1184_v16, 2 }
  0x30   :  { %25721 = vst [vmem:[#allocation36_spill] sm:$0xff] %v17021_v51  ;;  %v1185_v13 = vsel %vm16821_vm8, %v1183_v47, %v1184_v16  ;;  %v17033_v62 = vrot.slane %v1800_v48, %v16753_v24  ;;  %14987 = vmatprep.mubr.msk.f32.mxu0 %vm16631_vm2, %v24832_v3  ;;  %v17041_v21 = vcombine.high %v17021_v51, %v17021_v51  ;;  %v1187_v27 = vrot.slane %v17008_v0, 7 }
  0x31   :  { %25720 = vst [vmem:[#allocation35_spill] sm:$0xff] %v17017_v56  ;;  %25722 = vst [vmem:[#allocation37_spill] sm:$0xff] %v17027_v52  ;;  %v6469_v5 = vcombine.low %v1182_v46, %v1185_v13  ;;  %v6476_v7 = vrot.slane %v6468_v15, %v16753_v24  ;;  %v1190_v12 = vrot.slane %v17021_v51, 7  ;;  %v1196_v58 = vrot.slane %v17027_v52, 7 }
  0x32   :  { %25723 = vst [vmem:[#allocation38_spill] sm:$0xff] %v17033_v62  ;;  %25724 = vst [vmem:[#allocation39_spill] sm:$0xff] %v17041_v21  ;;  %v1815_v9 = vcombine.low %v17017_v56, %v17033_v62  ;;  %v1188_v25 = vsel %vm16821_vm8, %v1186_v63, %v1187_v27  ;;  %v1189_v18 = vrot.slane %v1187_v27, 2  ;;  %v1193_v19 = vrot.slane %v17041_v21, 7 }
  0x33   :  { %v6483_v16 = vrot.slane %v6469_v5, %v16753_v24  ;;  %v1192_v30 = vrot.slane %v1190_v12, 2  ;;  %v1816_v47 = vcombine.low %v1178_v55, %v1182_v46  ;;  %v1817_v48 = vcombine.low %v1185_v13, %v1188_v25 }
  0x34   :  { %14395 = vmatmul.mubr.msk.f32.gmra.mrb[8].mxu1 %vm2564_vm9, %v1815_v9  ;;  %v17056_v15 = vrot.slane %v16745_v22, %v16753_v24  ;;  %v1191_v34 = vsel %vm16821_vm8, %v1189_v18, %v1190_v12  ;;  %v1195_v5 = vrot.slane %v1193_v19, 2  ;;  %v17066_v63 = vrot.slane %v285_v31, %v16753_v24 }
  0x35   :  { %v6484_v6 = vcombine.low %v6476_v7, %v6483_v16  ;;  %14397 = vmatprep.mubr.msk.f32.mxu1 %vm16631_vm2, %v24832_v3  ;;  %v1194_v46 = vsel %vm16821_vm8, %v1192_v30, %v1193_v19  ;;  %v6485_v55 = vcombine.low %v1188_v25, %v1191_v34  ;;  %v17071_v13 = vrot.slane %v1816_v47, %v16753_v24 }
  0x36   :  { %25725 = vst [vmem:[#allocation40_spill] sm:$0xff] %v17056_v15  ;;  %25726 = vst [vmem:[#allocation41_spill] sm:$0xff] %v17066_v63  ;;  %v17074_v27 = vrot.slane %v1817_v48, %v16753_v24  ;;  %v1197_v7 = vsel %vm16821_vm8, %v1195_v5, %v1196_v58  ;;  %v17081_v22 = vcombine.high %v17056_v15, %v17056_v15  ;;  %v1198_v25 = vrot.slane %v1196_v58, 2 }
  0x37   :  { %25727 = vst [vmem:[#allocation42_spill] sm:$0xff] %v17071_v13  ;;  %14988 = vmatmul.mubr.msk.f32.gmra.mrb[6].mxu0 %vm2564_vm9, %v6484_v6  ;;  %v17085_v31 = vcombine.high %v17066_v63, %v17066_v63  ;;  %v17089_v9 = vcombine.high %v17027_v52, %v17027_v52  ;;  %v6486_v12 = vcombine.low %v1194_v46, %v1197_v7  ;;  %v13376_v19 = vrot.slane %v17056_v15, 9 }
  0x38   :  { %25728 = vst [vmem:[#allocation43_spill] sm:$0xff] %v17074_v27  ;;  %25729 = vst [vmem:[#allocation44_spill] sm:$0xff] %v17081_v22  ;;  %14990 = vmatprep.mubr.msk.f32.mxu0 %vm16631_vm2, %v24832_v3  ;;  %v6493_v6 = vrot.slane %v6485_v55, %v16753_v24  ;;  %v1832_v16 = vcombine.low %v17071_v13, %v17074_v27  ;;  %v1203_v30 = vrot.slane %v17081_v22, 7  ;;  %v1206_v47 = vrot.slane %v17066_v63, 7 }
  0x39   :  { %25730 = vst [vmem:[#allocation45_spill] sm:$0xff] %v17085_v31  ;;  %25731 = vst [vmem:[#allocation46_spill] sm:$0xff] %v17089_v9  ;;  %v1199_v18 = vrot.slane %v17089_v9, 7  ;;  %v6500_v48 = vrot.slane %v6486_v12, %v16753_v24  ;;  %v1209_v5 = vrot.slane %v17085_v31, 7  ;;  %v1833_v33 = vcombine.low %v1191_v34, %v1194_v46 }
  0x3a   :  { %14398 = vmatmul.mubr.msk.f32.gmra.mrb[10].mxu1 %vm2564_vm9, %v1832_v16  ;;  %v17105_v55 = vrot.slane %v16750_v23, %v16753_v24  ;;  %v1204_v32 = vsel %vm16821_vm8, %v13376_v19, %v1203_v30  ;;  %v1205_v3 = vrot.slane %v1203_v30, 2  ;;  %v1208_v8 = vrot.slane %v1206_v47, 2 }
  0x3b   :  { %v1200_v58 = vsel %vm16821_vm8, %v1198_v25, %v1199_v18  ;;  %v25733_v27 = vmov 0.0   ;;  %v6501_v12 = vcombine.low %v6493_v6, %v6500_v48  ;;  %v17114_v34 = vrot.slane %v1833_v33, %v16753_v24 }
  0x3c   :  { %25732 = vst [vmem:[#allocation47_spill] sm:$0xff] %v17105_v55  ;;  %14400 = vmatprep.mubr.msk.f32.mxu1 %vm16631_vm2, %v25733_v27  ;;  %v6502_v16 = vcombine.low %v1200_v58, %v1204_v32  ;;  %v1834_v62 = vcombine.low %v1197_v7, %v1200_v58  ;;  %v1207_v46 = vsel %vm16821_vm8, %v1205_v3, %v1206_v47  ;;  %v1211_v30 = vrot.slane %v1209_v5, 2 }
  0x3d   :  { %25734 = vst [vmem:[#allocation48_spill] sm:$0xff] %v17114_v34  ;;  %v1210_v25 = vsel %vm16821_vm8, %v1208_v8, %v1209_v5  ;;  %v25735_v18 = vcombine.high %v16750_v23, %v16750_v23  ;;  %v17128_v6 = vcombine.high %v17105_v55, %v17105_v55  ;;  %14991 = vmatmul.mubr.msk.f32.gmra.mrb[8].mxu0 %vm2564_vm9, %v6501_v12  ;;  %v1212_v23 = vrot.slane %v17105_v55, 7 }
  0x3e   :  { %v6503_v33 = vcombine.low %v1207_v46, %v1210_v25  ;;  %v6510_v7 = vrot.slane %v6502_v16, %v16753_v24  ;;  %v17133_v3 = vrot.slane %v1834_v62, %v16753_v24  ;;  %14993 = vmatprep.mubr.msk.f32.mxu0 %vm16631_vm2, %v25733_v27  ;;  %v1850_v12 = vcombine.low %v1204_v32, %v1207_v46 }
  0x3f   :  { %v17124_v19 = vrot.slane %v25735_v18, %v16753_v24  ;;  %25737 = vst [vmem:[#allocation50_spill] sm:$0xff] %v17128_v6  ;;  %v1215_v47 = vrot.slane %v17128_v6, 7  ;;  %v17149_v5 = vrot.slane %v16764_v28, %v16753_v24  ;;  %v1213_v16 = vsel %vm16821_vm8, %v1211_v30, %v1212_v23 }
  0x40   :  { %25738 = vst [vmem:[#allocation51_spill] sm:$0xff] %v17133_v3  ;;  %v6517_v58 = vrot.slane %v6503_v33, %v16753_v24  ;;  %v1849_v62 = vcombine.low %v17114_v34, %v17133_v3  ;;  %v1214_v18 = vrot.slane %v1212_v23, 2  ;;  %v1851_v33 = vcombine.low %v1210_v25, %v1213_v16 }
  0x41   :  { %25736 = vst [vmem:[#allocation49_spill] sm:$0xff] %v17124_v19  ;;  %v17139_v8 = vcombine.high %v17124_v19, %v17124_v19  ;;  %v1218_v48 = vrot.slane %v17124_v19, 7  ;;  %25739 = vst [vmem:[#allocation52_spill] sm:$0xff] %v17149_v5  ;;  %v1217_v13 = vrot.slane %v1215_v47, 2  ;;  %v17156_v2 = vrot.slane %v1850_v12, %v16753_v24 }
  0x42   :  { %v6518_v57 = vcombine.low %v6510_v7, %v6517_v58  ;;  %14401 = vmatmul.mubr.msk.f32.gmra.mrb[12].mxu1 %vm2564_vm9, %v1849_v62  ;;  %v1216_v32 = vsel %vm16821_vm8, %v1214_v18, %v1215_v47  ;;  %v25741_v7 = vcombine.high %v16764_v28, %v16764_v28  ;;  %v17172_v25 = vcombine.high %v17149_v5, %v17149_v5 }
  0x43   :  { %v1220_v56 = vrot.slane %v1218_v48, 2  ;;  %v1221_v9 = vrot.slane %v17139_v8, 7  ;;  %25740 = vst [vmem:[#allocation53_spill] sm:$0xff] %v17156_v2  ;;  %v1219_v46 = vsel %vm16821_vm8, %v1217_v13, %v1218_v48  ;;  %14403 = vmatprep.mubr.msk.f32.mxu1 %vm16631_vm2, %v25733_v27  ;;  %v6519_v47 = vcombine.low %v1213_v16, %v1216_v32 }
  0x44   :  { %v17168_v30 = vrot.slane %v25741_v7, %v16753_v24  ;;  %25743 = vst [vmem:[#allocation55_spill] sm:$0xff] %v17172_v25  ;;  %14994 = vmatmul.mubr.msk.f32.gmra.mrb[10].mxu0 %vm2564_vm9, %v6518_v57  ;;  %v17178_v13 = vrot.slane %v1851_v33, %v16753_v24  ;;  %v17182_v48 = vrot.slane %v16769_v29, %v16753_v24  ;;  %v1225_v16 = vrot.slane %v17172_v25, 7 }
  0x45   :  { %v1222_v23 = vsel %vm16821_vm8, %v1220_v56, %v1221_v9  ;;  %14996 = vmatprep.mubr.msk.f32.mxu0 %vm16631_vm2, %v25733_v27  ;;  %v25747_v57 = vcombine.high %v16769_v29, %v16769_v29  ;;  %v13377_v9 = vrot.slane %v17149_v5, 9  ;;  %v6527_v62 = vrot.slane %v6519_v47, %v16753_v24 }
  0x46   :  { %25742 = vst [vmem:[#allocation54_spill] sm:$0xff] %v17168_v30  ;;  %25744 = vst [vmem:[#allocation56_spill] sm:$0xff] %v17178_v13  ;;  %v6520_v28 = vcombine.low %v1219_v46, %v1222_v23  ;;  %v17188_v58 = vcombine.high %v17168_v30, %v17168_v30  ;;  %v1866_v12 = vcombine.low %v17156_v2, %v17178_v13  ;;  %v1228_v18 = vrot.slane %v17168_v30, 7 }
  0x47   :  { %25745 = vst [vmem:[#allocation57_spill] sm:$0xff] %v17182_v48  ;;  %v17194_v56 = vrot.slane %v25747_v57, %v16753_v24  ;;  %v1234_v3 = vrot.slane %v17182_v48, 7  ;;  %v1867_v29 = vcombine.low %v1216_v32, %v1219_v46  ;;  %v45_v57 = vld [vmem:[%s24822_s0 + $0x60] sm:$0xff]  ;;  %v1226_v47 = vsel %vm16821_vm8, %v13377_v9, %v1225_v16 }
  0x48   :  { %25746 = vst [vmem:[#allocation58_spill] sm:$0xff] %v17188_v58  ;;  %v6534_v33 = vrot.slane %v6520_v28, %v16753_v24  ;;  %v1231_v7 = vrot.slane %v17188_v58, 7  ;;  %14404 = vmatmul.mubr.msk.f32.gmra.mrb[14].mxu1 %vm2564_vm9, %v1866_v12  ;;  %v1227_v13 = vrot.slane %v1225_v16, 2  ;;  %v1230_v2 = vrot.slane %v1228_v18, 2 }
  0x49   :  { %25748 = vst [vmem:[#allocation59_spill] sm:$0xff] %v17194_v56  ;;  %v17213_v34 = vcombine.high %v17182_v48, %v17182_v48  ;;  %14406 = vmatprep.mubr.msk.f32.mxu1 %vm16631_vm2, %v25733_v27  ;;  %v1868_v32 = vcombine.low %v1222_v23, %v1226_v47  ;;  %v17218_v46 = vrot.slane %v1867_v29, %v16753_v24  ;;  %vm13102_vm11 = vcmask 130048  }
  0x4a   :  { %v6535_v28 = vcombine.low %v6527_v62, %v6534_v33  ;;  %v1233_v5 = vrot.slane %v1231_v7, 2  ;;  %v1229_v12 = vsel %vm16821_vm8, %v1227_v13, %v1228_v18  ;;  %v1232_v9 = vsel %vm16821_vm8, %v1230_v2, %v1231_v7 }
  0x4b   :  { %25749 = vst [vmem:[#allocation60_spill] sm:$0xff] %v17213_v34  ;;  %25750 = vst [vmem:[#allocation61_spill] sm:$0xff] %v17218_v46  ;;  %v17225_v16 = vrot.slane %v45_v57, %v16753_v24  ;;  %v17229_v62 = vcombine.high %v17194_v56, %v17194_v56  ;;  %v6536_v33 = vcombine.low %v1226_v47, %v1229_v12  ;;  %v1236_v13 = vrot.slane %v1234_v3, 2 }
  0x4c   :  { %14997 = vmatmul.mubr.msk.f32.gmra.mrb[12].mxu0 %vm2564_vm9, %v6535_v28  ;;  %v1235_v23 = vsel %vm16821_vm8, %v1233_v5, %v1234_v3  ;;  %v17235_v29 = vrot.slane %v1868_v32, %v16753_v24  ;;  %v1237_v7 = vrot.slane %v17213_v34, 7  ;;  %v1240_v28 = vrot.slane %v17194_v56, 7 }
  0x4d   :  { %25751 = vst [vmem:[#allocation62_spill] sm:$0xff] %v17225_v16  ;;  %25752 = vst [vmem:[#allocation63_spill] sm:$0xff] %v17229_v62  ;;  %14999 = vmatprep.mubr.msk.f32.mxu0 %vm16631_vm2, %v25733_v27  ;;  %v6537_v2 = vcombine.low %v1232_v9, %v1235_v23  ;;  %v17241_v18 = vcombine.high %v17225_v16, %v17225_v16  ;;  %v6544_v22 = vrot.slane %v6536_v33, %v16753_v24  ;;  %vm13106_vm12 = vcmask 123904  }
  0x4e   :  { %25753 = vst [vmem:[#allocation64_spill] sm:$0xff] %v17235_v29  ;;  %v1883_v5 = vcombine.low %v17218_v46, %v17235_v29  ;;  %v1243_v47 = vrot.slane %v17229_v62, 7  ;;  %v13378_v3 = vrot.slane %v17225_v16, 9  ;;  %v1238_v54 = vsel %vm16821_vm8, %v1236_v13, %v1237_v7  ;;  %v46_v29 = vld [vmem:[%s24822_s0 + $0x68] sm:$0xff] }
  0x4f   :  { %25754 = vst [vmem:[#allocation65_spill] sm:$0xff] %v17241_v18  ;;  %v6551_v32 = vrot.slane %v6537_v2, %v16753_v24  ;;  %v1239_v10 = vrot.slane %v1237_v7, 2  ;;  %v1242_v38 = vrot.slane %v1240_v28, 2  ;;  %v1247_v39 = vrot.slane %v17241_v18, 7 }
  0x50   :  { %14407 = vmatmul.mubr.msk.f32.gmra.mrb[16].mxu1 %vm2564_vm9, %v1883_v5  ;;  %v1884_v37 = vcombine.low %v1229_v12, %v1232_v9  ;;  %v1885_v33 = vcombine.low %v1235_v23, %v1238_v54  ;;  %v351_v46 = vcombine.high %v45_v57, %v45_v57  ;;  %v368_v7 = vcombine.high %v46_v29, %v46_v29 }
  0x51   :  { %v6552_v62 = vcombine.low %v6544_v22, %v6551_v32  ;;  %v1241_v2 = vsel %vm16821_vm8, %v1239_v10, %v1240_v28  ;;  %v1244_v13 = vsel %vm16821_vm8, %v1242_v38, %v1243_v47  ;;  %14409 = vmatprep.mubr.msk.f32.mxu1 %vm16631_vm2, %v25733_v27  ;;  %v1248_v12 = vsel %vm16821_vm8, %v13378_v3, %v1247_v39 }
  0x52   :  { %v6553_v9 = vcombine.low %v1238_v54, %v1241_v2  ;;  %v17267_v23 = vrot.slane %v1884_v37, %v16753_v24  ;;  %v17270_v57 = vrot.slane %v1885_v33, %v16753_v24  ;;  %v6554_v10 = vcombine.low %v1244_v13, %v1248_v12  ;;  %v47_v37 = vld [vmem:[%s24822_s0 + $0x70] sm:$0xff] }
  0x53   :  { %15000 = vmatmul.mubr.msk.f32.gmra.mrb[14].mxu0 %vm2564_vm9, %v6552_v62  ;;  %v17274_v22 = vrot.slane %v351_v46, %v16753_v24  ;;  %v17277_v38 = vrot.slane %v46_v29, %v16753_v24  ;;  %v17280_v28 = vrot.slane %v368_v7, %v16753_v24  ;;  %v1249_v46 = vrot.slane %v1247_v39, 2 }
  0x54   :  { %25755 = vst [vmem:[#allocation66_spill] sm:$0xff] %v17267_v23  ;;  %25756 = vst [vmem:[#allocation67_spill] sm:$0xff] %v17270_v57  ;;  %15002 = vmatprep.mubr.msk.f32.mxu0 %vm16631_vm2, %v25733_v27  ;;  %v6561_v54 = vrot.slane %v6553_v9, %v16753_v24  ;;  %v1900_v62 = vcombine.low %v17267_v23, %v17270_v57  ;;  %v1901_v5 = vcombine.low %v1241_v2, %v1244_v13  ;;  %vm13356_vm13 = vcmask 74752  }
  0x55   :  { %25757 = vst [vmem:[#allocation68_spill] sm:$0xff] %v17274_v22  ;;  %25758 = vst [vmem:[#allocation69_spill] sm:$0xff] %v17277_v38  ;;  %v6568_v29 = vrot.slane %v6554_v10, %v16753_v24  ;;  %v17293_v47 = vcombine.high %v17274_v22, %v17274_v22  ;;  %v17297_v3 = vcombine.high %v17277_v38, %v17277_v38  ;;  %v1250_v32 = vrot.slane %v17274_v22, 7 }
  0x56   :  { %25759 = vst [vmem:[#allocation70_spill] sm:$0xff] %v17280_v28  ;;  %14410 = vmatmul.mubr.msk.f32.gmra.mrb[18].mxu1 %vm2564_vm9, %v1900_v62  ;;  %v1256_v33 = vrot.slane %v17277_v38, 7  ;;  %v17303_v7 = vrot.slane %v1901_v5, %v16753_v24  ;;  %v384_v39 = vcombine.high %v47_v37, %v47_v37  ;;  %v17306_v2 = vrot.slane %v47_v37, %v16753_v24 }
  0x57   :  { %25760 = vst [vmem:[#allocation71_spill] sm:$0xff] %v17293_v47  ;;  %25761 = vst [vmem:[#allocation72_spill] sm:$0xff] %v17297_v3  ;;  %v6569_v13 = vcombine.low %v6561_v54, %v6568_v29  ;;  %v1251_v9 = vsel %vm16821_vm8, %v1249_v46, %v1250_v32  ;;  %v1252_v10 = vrot.slane %v1250_v32, 2  ;;  %v1253_v57 = vrot.slane %v17293_v47, 7  ;;  %14412 = vmatprep.mubr.msk.f32.mxu1 %vm16631_vm2, %v25733_v27 }
  0x58   :  { %25762 = vst [vmem:[#allocation73_spill] sm:$0xff] %v17303_v7  ;;  %25763 = vst [vmem:[#allocation74_spill] sm:$0xff] %v17306_v2  ;;  %v1258_v62 = vrot.slane %v1256_v33, 2  ;;  %v1259_v23 = vrot.slane %v17297_v3, 7  ;;  %v1902_v18 = vcombine.low %v1248_v12, %v1251_v9  ;;  %v17315_v5 = vrot.slane %v384_v39, %v16753_v24 }
  0x59   :  { %15003 = vmatmul.mubr.msk.f32.gmra.mrb[16].mxu0 %vm2564_vm9, %v6569_v13  ;;  %v1254_v37 = vsel %vm16821_vm8, %v1252_v10, %v1253_v57  ;;  %v1255_v54 = vrot.slane %v1253_v57, 2  ;;  %v17322_v46 = vcombine.high %v17306_v2, %v17306_v2  ;;  %v17326_v29 = vcombine.high %v17280_v28, %v17280_v28 }
  0x5a   :  { %25764 = vst [vmem:[#allocation75_spill] sm:$0xff] %v17315_v5  ;;  %15005 = vmatprep.mubr.msk.f32.mxu0 %vm16631_vm2, %v25733_v27  ;;  %v1260_v12 = vsel %vm16821_vm8, %v1258_v62, %v1259_v23  ;;  %v6570_v32 = vcombine.low %v1251_v9, %v1254_v37  ;;  %v17333_v39 = vrot.slane %v1902_v18, %v16753_v24  ;;  %v1261_v13 = vrot.slane %v1259_v23, 2 }
  0x5b   :  { %25765 = vst [vmem:[#allocation76_spill] sm:$0xff] %v17322_v46  ;;  %25766 = vst [vmem:[#allocation77_spill] sm:$0xff] %v17326_v29  ;;  %v1257_v57 = vsel %vm16821_vm8, %v1255_v54, %v1256_v33  ;;  %v1262_v10 = vrot.slane %v17280_v28, 7  ;;  %v1265_v59 = vrot.slane %v17326_v29, 7  ;;  %v13379_v36 = vrot.slane %v17306_v2, 9 }
  0x5c   :  { %25767 = vst [vmem:[#allocation78_spill] sm:$0xff] %v17333_v39  ;;  %v6571_v44 = vcombine.low %v1257_v57, %v1260_v12  ;;  %v6578_v35 = vrot.slane %v6570_v32, %v16753_v24  ;;  %v1917_v62 = vcombine.low %v17303_v7, %v17333_v39  ;;  %v1269_v9 = vrot.slane %v17322_v46, 7  ;;  %v48_v39 = vld [vmem:[%s24822_s0 + $0x78] sm:$0xff]  ;;  %v49_v7 = vld [vmem:[%s24822_s0 + $0x80] sm:$0xff] }
  0x5d   :  { %v1263_v18 = vsel %vm16821_vm8, %v1261_v13, %v1262_v10  ;;  %v1264_v23 = vrot.slane %v1262_v10, 2  ;;  %v1272_v33 = vrot.slane %v17315_v5, 7  ;;  %v1918_v54 = vcombine.low %v1254_v37, %v1257_v57 }
  0x5e   :  { %v6585_v43 = vrot.slane %v6571_v44, %v16753_v24  ;;  %14413 = vmatmul.mubr.msk.f32.gmra.mrb[20].mxu1 %vm2564_vm9, %v1917_v62  ;;  %v1270_v2 = vsel %vm16821_vm8, %v13379_v36, %v1269_v9  ;;  %v1271_v32 = vrot.slane %v1269_v9, 2  ;;  %v1919_v28 = vcombine.low %v1260_v12, %v1263_v18 }
  0x5f   :  { %v1266_v13 = vsel %vm16821_vm8, %v1264_v23, %v1265_v59  ;;  %14415 = vmatprep.mubr.msk.f32.mxu1 %vm16631_vm2, %v25733_v27  ;;  %v17359_v37 = vrot.slane %v1918_v54, %v16753_v24  ;;  %v17363_v44 = vcombine.high %v17315_v5, %v17315_v5  ;;  %v401_v36 = vcombine.high %v48_v39, %v48_v39 }
  0x60   :  { %v6586_v57 = vcombine.low %v6578_v35, %v6585_v43  ;;  %v1273_v12 = vsel %vm16821_vm8, %v1271_v32, %v1272_v33  ;;  %v6587_v10 = vcombine.low %v1263_v18, %v1266_v13  ;;  %v17368_v62 = vrot.slane %v1919_v28, %v16753_v24 }
  0x61   :  { %25768 = vst [vmem:[#allocation79_spill] sm:$0xff] %v17359_v37  ;;  %25769 = vst [vmem:[#allocation80_spill] sm:$0xff] %v17363_v44  ;;  %v6588_v59 = vcombine.low %v1270_v2, %v1273_v12  ;;  %v17371_v9 = vrot.slane %v48_v39, %v16753_v24  ;;  %v17374_v23 = vrot.slane %v401_v36, %v16753_v24  ;;  %v1274_v54 = vrot.slane %v1272_v33, 2 }
  0x62   :  { %25770 = vst [vmem:[#allocation81_spill] sm:$0xff] %v17368_v62  ;;  %15006 = vmatmul.mubr.msk.f32.gmra.mrb[18].mxu0 %vm2564_vm9, %v6586_v57  ;;  %v6595_v35 = vrot.slane %v6587_v10, %v16753_v24  ;;  %v1934_v43 = vcombine.low %v17359_v37, %v17368_v62  ;;  %v1275_v28 = vrot.slane %v17363_v44, 7  ;;  %v1935_v18 = vcombine.low %v1266_v13, %v1270_v2 }
  0x63   :  { %25771 = vst [vmem:[#allocation82_spill] sm:$0xff] %v17371_v9  ;;  %25772 = vst [vmem:[#allocation83_spill] sm:$0xff] %v17374_v23  ;;  %15008 = vmatprep.mubr.msk.f32.mxu0 %vm16631_vm2, %v25733_v27  ;;  %v6602_v39 = vrot.slane %v6588_v59, %v16753_v24  ;;  %v17389_v33 = vcombine.high %v17371_v9, %v17371_v9  ;;  %v1278_v32 = vrot.slane %v17371_v9, 7  ;;  %v1284_v36 = vrot.slane %v17374_v23, 7 }
  0x64   :  { %14416 = vmatmul.mubr.msk.f32.gmra.mrb[22].mxu1 %vm2564_vm9, %v1934_v43  ;;  %v1276_v57 = vsel %vm16821_vm8, %v1274_v54, %v1275_v28  ;;  %v1277_v10 = vrot.slane %v1275_v28, 2  ;;  %v17397_v2 = vrot.slane %v1935_v18, %v16753_v24  ;;  %v417_v13 = vcombine.high %v49_v7, %v49_v7 }
  0x65   :  { %25773 = vst [vmem:[#allocation84_spill] sm:$0xff] %v17389_v33  ;;  %v6603_v62 = vcombine.low %v6595_v35, %v6602_v39  ;;  %v1280_v59 = vrot.slane %v1278_v32, 2  ;;  %v1281_v37 = vrot.slane %v17389_v33, 7  ;;  %14418 = vmatprep.mubr.msk.f32.mxu1 %vm16631_vm2, %v25733_v27  ;;  %v1936_v44 = vcombine.low %v1273_v12, %v1276_v57 }
  0x66   :  { %25774 = vst [vmem:[#allocation85_spill] sm:$0xff] %v17397_v2  ;;  %v1279_v9 = vsel %vm16821_vm8, %v1277_v10, %v1278_v32  ;;  %v17405_v43 = vrot.slane %v49_v7, %v16753_v24  ;;  %v17408_v54 = vrot.slane %v417_v13, %v16753_v24  ;;  %v17412_v28 = vcombine.high %v17374_v23, %v17374_v23 }
  0x67   :  { %15009 = vmatmul.mubr.msk.f32.gmra.mrb[20].mxu0 %vm2564_vm9, %v6603_v62  ;;  %v1282_v35 = vsel %vm16821_vm8, %v1280_v59, %v1281_v37  ;;  %v1283_v18 = vrot.slane %v1281_v37, 2  ;;  %v6604_v12 = vcombine.low %v1276_v57, %v1279_v9  ;;  %v17418_v39 = vrot.slane %v1936_v44, %v16753_v24  ;;  %v50_v37 = vld [vmem:[%s24822_s0 + $0x88] sm:$0xff] }
  0x68   :  { %25775 = vst [vmem:[#allocation86_spill] sm:$0xff] %v17405_v43  ;;  %25776 = vst [vmem:[#allocation87_spill] sm:$0xff] %v17408_v54  ;;  %15011 = vmatprep.mubr.msk.f32.mxu0 %vm16631_vm2, %v25733_v27  ;;  %v17424_v7 = vcombine.high %v17405_v43, %v17405_v43  ;;  %v17428_v32 = vcombine.high %v17408_v54, %v17408_v54  ;;  %v1286_v62 = vrot.slane %v1284_v36, 2  ;;  %v1287_v10 = vrot.slane %v17412_v28, 7 }
  0x69   :  { %25777 = vst [vmem:[#allocation88_spill] sm:$0xff] %v17412_v28  ;;  %25778 = vst [vmem:[#allocation89_spill] sm:$0xff] %v17418_v39  ;;  %v1285_v44 = vsel %vm16821_vm8, %v1283_v18, %v1284_v36  ;;  %v6612_v57 = vrot.slane %v6604_v12, %v16753_v24  ;;  %v1951_v13 = vcombine.low %v17397_v2, %v17418_v39  ;;  %v13380_v59 = vrot.slane %v17405_v43, 9 }
  0x6a   :  { %25779 = vst [vmem:[#allocation90_spill] sm:$0xff] %v17424_v7  ;;  %25780 = vst [vmem:[#allocation91_spill] sm:$0xff] %v17428_v32  ;;  %v6605_v33 = vcombine.low %v1282_v35, %v1285_v44  ;;  %v1288_v23 = vsel %vm16821_vm8, %v1286_v62, %v1287_v10  ;;  %v1291_v28 = vrot.slane %v17424_v7, 7  ;;  %v1294_v29 = vrot.slane %v17408_v54, 7 }
  0x6b   :  { %14419 = vmatmul.mubr.msk.f32.gmra.mrb[24].mxu1 %vm2564_vm9, %v1951_v13  ;;  %v1297_v46 = vrot.slane %v17428_v32, 7  ;;  %v1952_v36 = vcombine.low %v1279_v9, %v1282_v35  ;;  %v1953_v18 = vcombine.low %v1285_v44, %v1288_v23  ;;  %v434_v12 = vcombine.high %v50_v37, %v50_v37 }
  0x6c   :  { %v6619_v5 = vrot.slane %v6605_v33, %v16753_v24  ;;  %v1292_v39 = vsel %vm16821_vm8, %v13380_v59, %v1291_v28  ;;  %v1293_v2 = vrot.slane %v1291_v28, 2  ;;  %v1296_v43 = vrot.slane %v1294_v29, 2  ;;  %14421 = vmatprep.mubr.msk.f32.mxu1 %vm16631_vm2, %v25733_v27 }
  0x6d   :  { %v6621_v62 = vcombine.low %v1288_v23, %v1292_v39  ;;  %v17452_v10 = vrot.slane %v1952_v36, %v16753_v24  ;;  %v17455_v13 = vrot.slane %v1953_v18, %v16753_v24  ;;  %v17458_v9 = vrot.slane %v50_v37, %v16753_v24  ;;  %v51_v23 = vld [vmem:[%s24822_s0 + $0x90] sm:$0xff] }
  0x6e   :  { %v6620_v35 = vcombine.low %v6612_v57, %v6619_v5  ;;  %v1295_v33 = vsel %vm16821_vm8, %v1293_v2, %v1294_v29  ;;  %v1298_v28 = vsel %vm16821_vm8, %v1296_v43, %v1297_v46  ;;  %v17465_v44 = vrot.slane %v434_v12, %v16753_v24 }
  0x6f   :  { %25781 = vst [vmem:[#allocation92_spill] sm:$0xff] %v17452_v10  ;;  %25782 = vst [vmem:[#allocation93_spill] sm:$0xff] %v17455_v13  ;;  %v6622_v59 = vcombine.low %v1295_v33, %v1298_v28  ;;  %v6629_v36 = vrot.slane %v6621_v62, %v16753_v24  ;;  %v1968_v37 = vcombine.low %v17452_v10, %v17455_v13  ;;  %v1299_v2 = vrot.slane %v1297_v46, 2 }
  0x70   :  { %25783 = vst [vmem:[#allocation94_spill] sm:$0xff] %v17458_v9  ;;  %25784 = vst [vmem:[#allocation95_spill] sm:$0xff] %v17465_v44  ;;  %v17475_v5 = vcombine.high %v17458_v9, %v17458_v9  ;;  %15012 = vmatmul.mubr.msk.f32.gmra.mrb[22].mxu0 %vm2564_vm9, %v6620_v35  ;;  %v17480_v29 = vcombine.high %v17465_v44, %v17465_v44  ;;  %v1300_v43 = vrot.slane %v17458_v9, 7  ;;  %v1306_v57 = vrot.slane %v17465_v44, 7 }
  0x71   :  { %15014 = vmatprep.mubr.msk.f32.mxu0 %vm16631_vm2, %v25733_v27  ;;  %v6636_v18 = vrot.slane %v6622_v59, %v16753_v24  ;;  %14422 = vmatmul.mubr.msk.f32.gmra.mrb[26].mxu1 %vm2564_vm9, %v1968_v37  ;;  %v1969_v62 = vcombine.low %v1292_v39, %v1295_v33  ;;  %v450_v35 = vcombine.high %v51_v23, %v51_v23  ;;  %v52_v59 = vld [vmem:[%s24822_s0 + $0x98] sm:$0xff] }
  0x72   :  { %25785 = vst [vmem:[#allocation96_spill] sm:$0xff] %v17475_v5  ;;  %25786 = vst [vmem:[#allocation97_spill] sm:$0xff] %v17480_v29  ;;  %v1303_v12 = vrot.slane %v17475_v5, 7  ;;  %v1301_v13 = vsel %vm16821_vm8, %v1299_v2, %v1300_v43  ;;  %v1302_v10 = vrot.slane %v1300_v43, 2  ;;  %v1308_v46 = vrot.slane %v1306_v57, 2  ;;  %14424 = vmatprep.mubr.msk.f32.mxu1 %vm16631_vm2, %v25733_v27 }
  0x73   :  { %v1309_v7 = vrot.slane %v17480_v29, 7  ;;  %v6637_v44 = vcombine.low %v6629_v36, %v6636_v18  ;;  %v1970_v9 = vcombine.low %v1298_v28, %v1301_v13  ;;  %v17498_v39 = vrot.slane %v1969_v62, %v16753_v24 }
  0x74   :  { %v1305_v37 = vrot.slane %v1303_v12, 2  ;;  %v1304_v33 = vsel %vm16821_vm8, %v1302_v10, %v1303_v12  ;;  %v17505_v43 = vrot.slane %v51_v23, %v16753_v24  ;;  %v17508_v29 = vrot.slane %v450_v35, %v16753_v24 }
  0x75   :  { %25787 = vst [vmem:[#allocation98_spill] sm:$0xff] %v17498_v39  ;;  %v1310_v2 = vsel %vm16821_vm8, %v1308_v46, %v1309_v7  ;;  %15015 = vmatmul.mubr.msk.f32.gmra.mrb[24].mxu0 %vm2564_vm9, %v6637_v44  ;;  %v6638_v36 = vcombine.low %v1301_v13, %v1304_v33  ;;  %v17514_v18 = vrot.slane %v1970_v9, %v16753_v24  ;;  %v53_v13 = vld [vmem:[%s24822_s0 + $0xa0] sm:$0xff] }
  0x76   :  { %25788 = vst [vmem:[#allocation99_spill] sm:$0xff] %v17505_v43  ;;  %25789 = vst [vmem:[#allocation100_spill] sm:$0xff] %v17508_v29  ;;  %v1307_v28 = vsel %vm16821_vm8, %v1305_v37, %v1306_v57  ;;  %v467_v62 = vcombine.high %v52_v59, %v52_v59  ;;  %15017 = vmatprep.mubr.msk.f32.mxu0 %vm16631_vm2, %v25733_v27  ;;  %v17520_v10 = vcombine.high %v17505_v43, %v17505_v43 }
  0x77   :  { %25790 = vst [vmem:[#allocation101_spill] sm:$0xff] %v17514_v18  ;;  %v6639_v7 = vcombine.low %v1307_v28, %v1310_v2  ;;  %v17524_v23 = vcombine.high %v17508_v29, %v17508_v29  ;;  %v17527_v44 = vrot.slane %v52_v59, %v16753_v24  ;;  %v6646_v9 = vrot.slane %v6638_v36, %v16753_v24 }
  0x78   :  { %25791 = vst [vmem:[#allocation102_spill] sm:$0xff] %v17520_v10  ;;  %v1985_v57 = vcombine.low %v17498_v39, %v17514_v18  ;;  %v17536_v12 = vrot.slane %v467_v62, %v16753_v24  ;;  %v13381_v35 = vrot.slane %v17505_v43, 9  ;;  %v1313_v37 = vrot.slane %v17520_v10, 7 }
  0x79   :  { %25792 = vst [vmem:[#allocation103_spill] sm:$0xff] %v17524_v23  ;;  %25793 = vst [vmem:[#allocation104_spill] sm:$0xff] %v17527_v44  ;;  %v6653_v46 = vrot.slane %v6639_v7, %v16753_v24  ;;  %v1316_v59 = vrot.slane %v17508_v29, 7  ;;  %v1319_v5 = vrot.slane %v17524_v23, 7  ;;  %v1322_v36 = vrot.slane %v17527_v44, 7 }
  0x7a   :  { %25794 = vst [vmem:[#allocation105_spill] sm:$0xff] %v17536_v12  ;;  %14425 = vmatmul.mubr.msk.f32.gmra.mrb[28].mxu1 %vm2564_vm9, %v1985_v57  ;;  %v1986_v54 = vcombine.low %v1304_v33, %v1307_v28  ;;  %v17547_v18 = vcombine.high %v17527_v44, %v17527_v44  ;;  %v17550_v62 = vrot.slane %v53_v13, %v16753_v24  ;;  %v1315_v43 = vrot.slane %v1313_v37, 2 }
  0x7b   :  { %v6654_v39 = vcombine.low %v6646_v9, %v6653_v46  ;;  %v1314_v7 = vsel %vm16821_vm8, %v13381_v35, %v1313_v37  ;;  %v1318_v10 = vrot.slane %v1316_v59, 2  ;;  %14427 = vmatprep.mubr.msk.f32.mxu1 %vm16631_vm2, %v25733_v27  ;;  %v1321_v57 = vrot.slane %v1319_v5, 2 }
  0x7c   :  { %25795 = vst [vmem:[#allocation106_spill] sm:$0xff] %v17547_v18  ;;  %25796 = vst [vmem:[#allocation107_spill] sm:$0xff] %v17550_v62  ;;  %v1987_v23 = vcombine.low %v1310_v2, %v1314_v7  ;;  %v17557_v33 = vrot.slane %v1986_v54, %v16753_v24  ;;  %v17561_v28 = vcombine.high %v17550_v62, %v17550_v62  ;;  %v1324_v2 = vrot.slane %v1322_v36, 2 }
  0x7d   :  { %15018 = vmatmul.mubr.msk.f32.gmra.mrb[26].mxu0 %vm2564_vm9, %v6654_v39  ;;  %v1317_v9 = vsel %vm16821_vm8, %v1315_v43, %v1316_v59  ;;  %v1320_v35 = vsel %vm16821_vm8, %v1318_v10, %v1319_v5  ;;  %v17570_v46 = vcombine.high %v17536_v12, %v17536_v12  ;;  %v1323_v54 = vsel %vm16821_vm8, %v1321_v57, %v1322_v36 }
  0x7e   :  { %25797 = vst [vmem:[#allocation108_spill] sm:$0xff] %v17557_v33  ;;  %25798 = vst [vmem:[#allocation109_spill] sm:$0xff] %v17561_v28  ;;  %15020 = vmatprep.mubr.msk.f32.mxu0 %vm16631_vm2, %v25733_v27  ;;  %v6655_v37 = vcombine.low %v1314_v7, %v1317_v9  ;;  %v17577_v39 = vrot.slane %v1987_v23, %v16753_v24  ;;  %v1325_v43 = vrot.slane %v17547_v18, 7  ;;  %v1328_v5 = vrot.slane %v17536_v12, 7 }
  0x7f   :  { %25799 = vst [vmem:[#allocation110_spill] sm:$0xff] %v17570_v46  ;;  %v6656_v59 = vcombine.low %v1320_v35, %v1323_v54  ;;  %v1331_v10 = vrot.slane %v17570_v46, 7  ;;  %v13382_v44 = vrot.slane %v17550_v62, 9  ;;  %v1335_v18 = vrot.slane %v17561_v28, 7  ;;  %v54_v46 = vld [vmem:[%s24822_s0 + $0xa8] sm:$0xff] }
  0x80   :  { %25800 = vst [vmem:[#allocation111_spill] sm:$0xff] %v17577_v39  ;;  %v6663_v29 = vrot.slane %v6655_v37, %v16753_v24  ;;  %v2002_v32 = vcombine.low %v17557_v33, %v17577_v39  ;;  %v1326_v36 = vsel %vm16821_vm8, %v1324_v2, %v1325_v43  ;;  %v1327_v7 = vrot.slane %v1325_v43, 2 }
  0x81   :  { %v6670_v23 = vrot.slane %v6656_v59, %v16753_v24  ;;  %v1330_v57 = vrot.slane %v1328_v5, 2  ;;  %v2003_v38 = vcombine.low %v1317_v9, %v1320_v35  ;;  %v2004_v39 = vcombine.low %v1323_v54, %v1326_v36 }
  0x82   :  { %14428 = vmatmul.mubr.msk.f32.gmra.mrb[30].mxu1 %vm2564_vm9, %v2002_v32  ;;  %v1329_v37 = vsel %vm16821_vm8, %v1327_v7, %v1328_v5  ;;  %v483_v33 = vcombine.high %v53_v13, %v53_v13  ;;  %v500_v62 = vcombine.high %v54_v46, %v54_v46  ;;  %v1336_v59 = vsel %vm16821_vm8, %v13382_v44, %v1335_v18 }
  0x83   :  { %v6671_v2 = vcombine.low %v6663_v29, %v6670_v23  ;;  %v1332_v43 = vsel %vm16821_vm8, %v1330_v57, %v1331_v10  ;;  %v6672_v9 = vcombine.low %v1326_v36, %v1329_v37  ;;  %14430 = vmatprep.mubr.msk.f32.mxu1 %vm16631_vm2, %v25733_v27  ;;  %v17603_v32 = vrot.slane %v2003_v38, %v16753_v24 }
  0x84   :  { %v6673_v35 = vcombine.low %v1332_v43, %v1336_v59  ;;  %v17606_v5 = vrot.slane %v2004_v39, %v16753_v24  ;;  %v17609_v13 = vrot.slane %v483_v33, %v16753_v24  ;;  %v17614_v44 = vrot.slane %v54_v46, %v16753_v24 }
  0x85   :  { %25801 = vst [vmem:[#allocation112_spill] sm:$0xff] %v17603_v32  ;;  %15021 = vmatmul.mubr.msk.f32.gmra.mrb[28].mxu0 %vm2564_vm9, %v6671_v2  ;;  %v6680_v29 = vrot.slane %v6672_v9, %v16753_v24  ;;  %v17617_v54 = vrot.slane %v500_v62, %v16753_v24  ;;  %v1337_v10 = vrot.slane %v1335_v18, 2  ;;  %v55_v62 = vld [vmem:[%s24822_s0 + $0xb0] sm:$0xff]  ;;  %v2020_v7 = vcombine.low %v1329_v37, %v1332_v43 }
  0x86   :  { %25802 = vst [vmem:[#allocation113_spill] sm:$0xff] %v17606_v5  ;;  %25803 = vst [vmem:[#allocation114_spill] sm:$0xff] %v17609_v13  ;;  %15023 = vmatprep.mubr.msk.f32.mxu0 %vm16631_vm2, %v25733_v27  ;;  %v6687_v38 = vrot.slane %v6673_v35, %v16753_v24  ;;  %v2019_v33 = vcombine.low %v17603_v32, %v17606_v5  ;;  %v17626_v39 = vcombine.high %v17609_v13, %v17609_v13 }
  0x87   :  { %25804 = vst [vmem:[#allocation115_spill] sm:$0xff] %v17614_v44  ;;  %25805 = vst [vmem:[#allocation116_spill] sm:$0xff] %v17617_v54  ;;  %v1338_v36 = vrot.slane %v17609_v13, 7  ;;  %v17634_v18 = vcombine.high %v17614_v44, %v17614_v44  ;;  %v1344_v46 = vrot.slane %v17614_v44, 7  ;;  %v516_v23 = vcombine.high %v55_v62, %v55_v62 }
  0x88   :  { %25806 = vst [vmem:[#allocation117_spill] sm:$0xff] %v17626_v39  ;;  %v6688_v57 = vcombine.low %v6680_v29, %v6687_v38  ;;  %14431 = vmatmul.mubr.msk.f32.gmra.mrb[32].mxu1 %vm2564_vm9, %v2019_v33  ;;  %v1341_v35 = vrot.slane %v17626_v39, 7  ;;  %v17645_v44 = vrot.slane %v2020_v7, %v16753_v24  ;;  %v17651_v29 = vrot.slane %v55_v62, %v16753_v24 }
  0x89   :  { %25807 = vst [vmem:[#allocation118_spill] sm:$0xff] %v17634_v18  ;;  %v1339_v2 = vsel %vm16821_vm8, %v1337_v10, %v1338_v36  ;;  %v1340_v9 = vrot.slane %v1338_v36, 2  ;;  %v1346_v5 = vrot.slane %v1344_v46, 2  ;;  %v1347_v32 = vrot.slane %v17634_v18, 7  ;;  %14433 = vmatprep.mubr.msk.f32.mxu1 %vm16631_vm2, %v25733_v27 }
  0x8a   :  { %v2021_v28 = vcombine.low %v1336_v59, %v1339_v2  ;;  %25808 = vst [vmem:[#allocation119_spill] sm:$0xff] %v17645_v44  ;;  %15024 = vmatmul.mubr.msk.f32.gmra.mrb[30].mxu0 %vm2564_vm9, %v6688_v57  ;;  %v1343_v43 = vrot.slane %v1341_v35, 2  ;;  %25809 = vst [vmem:[#allocation120_spill] sm:$0xff] %v17651_v29  ;;  %v17654_v10 = vrot.slane %v516_v23, %v16753_v24  ;;  %v1350_v57 = vrot.slane %v17617_v54, 7 }
  0x8b   :  { %v1342_v37 = vsel %vm16821_vm8, %v1340_v9, %v1341_v35  ;;  %15026 = vmatprep.mubr.msk.f32.mxu0 %vm16631_vm2, %v25733_v27  ;;  %v1348_v59 = vsel %vm16821_vm8, %v1346_v5, %v1347_v32  ;;  %v17665_v36 = vcombine.high %v17617_v54, %v17617_v54  ;;  %v17671_v7 = vcombine.high %v17651_v29, %v17651_v29 }
  0x8c   :  { %25810 = vst [vmem:[#allocation121_spill] sm:$0xff] %v17654_v10  ;;  %v6689_v38 = vcombine.low %v1339_v2, %v1342_v37  ;;  %v17661_v33 = vrot.slane %v2021_v28, %v16753_v24  ;;  %v1345_v62 = vsel %vm16821_vm8, %v1343_v43, %v1344_v46  ;;  %v1349_v23 = vrot.slane %v1347_v32, 2 }
  0x8d   :  { %25812 = vst [vmem:[#allocation123_spill] sm:$0xff] %v17665_v36  ;;  %25813 = vst [vmem:[#allocation124_spill] sm:$0xff] %v17671_v7  ;;  %v6690_v9 = vcombine.low %v1345_v62, %v1348_v59  ;;  %v1353_v2 = vrot.slane %v17665_v36, 7  ;;  %v1352_v18 = vrot.slane %v1350_v57, 2  ;;  %v13383_v46 = vrot.slane %v17651_v29, 9  ;;  %v57_v29 = vld [vmem:[%s24822_s0 + $0xc0] sm:$0xff] }
  0x8e   :  { %25811 = vst [vmem:[#allocation122_spill] sm:$0xff] %v17661_v33  ;;  %v6697_v5 = vrot.slane %v6689_v38, %v16753_v24  ;;  %v2036_v28 = vcombine.low %v17645_v44, %v17661_v33  ;;  %v1351_v35 = vsel %vm16821_vm8, %v1349_v23, %v1350_v57  ;;  %v1357_v43 = vrot.slane %v17671_v7, 7  ;;  %v56_v33 = vld [vmem:[%s24822_s0 + $0xb8] sm:$0xff] }
  0x8f   :  { %v6704_v32 = vrot.slane %v6690_v9, %v16753_v24  ;;  %v1360_v54 = vrot.slane %v17654_v10, 7  ;;  %v2037_v38 = vcombine.low %v1342_v37, %v1345_v62  ;;  %v2038_v13 = vcombine.low %v1348_v59, %v1351_v35 }
  0x90   :  { %14434 = vmatmul.mubr.msk.f32.gmra.mrb[34].mxu1 %vm2564_vm9, %v2036_v28  ;;  %v1354_v23 = vsel %vm16821_vm8, %v1352_v18, %v1353_v2  ;;  %v1358_v57 = vsel %vm16821_vm8, %v13383_v46, %v1357_v43  ;;  %v1359_v44 = vrot.slane %v1357_v43, 2  ;;  %v17696_v9 = vcombine.high %v17654_v10, %v17654_v10 }
  0x91   :  { %14436 = vmatprep.mubr.msk.f32.mxu1 %vm16631_vm2, %v25733_v27  ;;  %v6705_v37 = vcombine.low %v6697_v5, %v6704_v32  ;;  %v6706_v59 = vcombine.low %v1351_v35, %v1354_v23  ;;  %v17699_v62 = vrot.slane %v2037_v38, %v16753_v24  ;;  %v17702_v28 = vrot.slane %v2038_v13, %v16753_v24 }
  0x92   :  { %25814 = vst [vmem:[#allocation125_spill] sm:$0xff] %v17696_v9  ;;  %v1361_v18 = vsel %vm16821_vm8, %v1359_v44, %v1360_v54  ;;  %v533_v2 = vcombine.high %v56_v33, %v56_v33  ;;  %v17707_v46 = vrot.slane %v56_v33, %v16753_v24  ;;  %v1362_v43 = vrot.slane %v1360_v54, 2 }
  0x93   :  { %25815 = vst [vmem:[#allocation126_spill] sm:$0xff] %v17699_v62  ;;  %25816 = vst [vmem:[#allocation127_spill] sm:$0xff] %v17702_v28  ;;  %15027 = vmatmul.mubr.msk.f32.gmra.mrb[32].mxu0 %vm2564_vm9, %v6705_v37  ;;  %v6707_v5 = vcombine.low %v1358_v57, %v1361_v18  ;;  %v6714_v35 = vrot.slane %v6706_v59, %v16753_v24  ;;  %v2053_v13 = vcombine.low %v17699_v62, %v17702_v28 }
  0x94   :  { %25817 = vst [vmem:[#allocation128_spill] sm:$0xff] %v17707_v46  ;;  %v1363_v32 = vrot.slane %v17696_v9, 7  ;;  %15029 = vmatprep.mubr.msk.f32.mxu0 %vm16631_vm2, %v25733_v27  ;;  %v17720_v44 = vrot.slane %v533_v2, %v16753_v24  ;;  %v17724_v54 = vcombine.high %v17707_v46, %v17707_v46  ;;  %v1366_v33 = vrot.slane %v17707_v46, 7 }
  0x95   :  { %v2054_v38 = vcombine.low %v1354_v23, %v1358_v57  ;;  %v6721_v37 = vrot.slane %v6707_v5, %v16753_v24  ;;  %14437 = vmatmul.mubr.msk.f32.gmra.mrb[36].mxu1 %vm2564_vm9, %v2053_v13  ;;  %v549_v62 = vcombine.high %v57_v29, %v57_v29 }
  0x96   :  { %25818 = vst [vmem:[#allocation129_spill] sm:$0xff] %v17720_v44  ;;  %25819 = vst [vmem:[#allocation130_spill] sm:$0xff] %v17724_v54  ;;  %v1364_v59 = vsel %vm16821_vm8, %v1362_v43, %v1363_v32  ;;  %v1365_v28 = vrot.slane %v1363_v32, 2  ;;  %v1368_v9 = vrot.slane %v1366_v33, 2  ;;  %v1369_v2 = vrot.slane %v17724_v54, 7  ;;  %14439 = vmatprep.mubr.msk.f32.mxu1 %vm16631_vm2, %v25733_v27 }
  0x97   :  { %v1372_v36 = vrot.slane %v17720_v44, 7  ;;  %v2055_v7 = vcombine.low %v1361_v18, %v1364_v59  ;;  %v6722_v46 = vcombine.low %v6714_v35, %v6721_v37  ;;  %v17738_v57 = vrot.slane %v2054_v38, %v16753_v24 }
  0x98   :  { %v1367_v23 = vsel %vm16821_vm8, %v1365_v28, %v1366_v33  ;;  %v17741_v43 = vrot.slane %v57_v29, %v16753_v24  ;;  %v1370_v5 = vsel %vm16821_vm8, %v1368_v9, %v1369_v2  ;;  %v1371_v13 = vrot.slane %v1369_v2, 2  ;;  %v58_v9 = vld [vmem:[%s24822_s0 + $0xc8] sm:$0xff] }
  0x99   :  { %25820 = vst [vmem:[#allocation131_spill] sm:$0xff] %v17738_v57  ;;  %v6723_v32 = vcombine.low %v1364_v59, %v1367_v23  ;;  %v17746_v54 = vrot.slane %v2055_v7, %v16753_v24  ;;  %15030 = vmatmul.mubr.msk.f32.gmra.mrb[34].mxu0 %vm2564_vm9, %v6722_v46  ;;  %v17750_v18 = vrot.slane %v549_v62, %v16753_v24  ;;  %v1374_v35 = vrot.slane %v1372_v36, 2 }
  0x9a   :  { %25821 = vst [vmem:[#allocation132_spill] sm:$0xff] %v17741_v43  ;;  %v17754_v28 = vcombine.high %v17741_v43, %v17741_v43  ;;  %v17758_v29 = vcombine.high %v17720_v44, %v17720_v44  ;;  %15032 = vmatprep.mubr.msk.f32.mxu0 %vm16631_vm2, %v25733_v27  ;;  %v1373_v7 = vsel %vm16821_vm8, %v1371_v13, %v1372_v36  ;;  %v13384_v33 = vrot.slane %v17741_v43, 9 }
  0x9b   :  { %25822 = vst [vmem:[#allocation133_spill] sm:$0xff] %v17746_v54  ;;  %25823 = vst [vmem:[#allocation134_spill] sm:$0xff] %v17750_v18  ;;  %v6731_v62 = vrot.slane %v6723_v32, %v16753_v24  ;;  %v2070_v46 = vcombine.low %v17738_v57, %v17746_v54  ;;  %v6724_v38 = vcombine.low %v1370_v5, %v1373_v7  ;;  %v1382_v36 = vrot.slane %v17750_v18, 7 }
  0x9c   :  { %25824 = vst [vmem:[#allocation135_spill] sm:$0xff] %v17754_v28  ;;  %25825 = vst [vmem:[#allocation136_spill] sm:$0xff] %v17758_v29  ;;  %v17773_v37 = vcombine.high %v17750_v18, %v17750_v18  ;;  %v1375_v59 = vrot.slane %v17758_v29, 7  ;;  %v1379_v2 = vrot.slane %v17754_v28, 7  ;;  %v2071_v13 = vcombine.low %v1367_v23, %v1370_v5 }
  0x9d   :  { %14440 = vmatmul.mubr.msk.f32.gmra.mrb[38].mxu1 %vm2564_vm9, %v2070_v46  ;;  %v566_v32 = vcombine.high %v58_v9, %v58_v9  ;;  %v17780_v44 = vrot.slane %v58_v9, %v16753_v24  ;;  %v6738_v54 = vrot.slane %v6724_v38, %v16753_v24  ;;  %v1384_v46 = vrot.slane %v1382_v36, 2 }
  0x9e   :  { %25826 = vst [vmem:[#allocation137_spill] sm:$0xff] %v17773_v37  ;;  %v1376_v57 = vsel %vm16821_vm8, %v1374_v35, %v1375_v59  ;;  %v1380_v43 = vsel %vm16821_vm8, %v13384_v33, %v1379_v2  ;;  %v1381_v29 = vrot.slane %v1379_v2, 2  ;;  %14442 = vmatprep.mubr.msk.f32.mxu1 %vm16631_vm2, %v25733_v27  ;;  %v1385_v28 = vrot.slane %v17773_v37, 7 }
  0x9f   :  { %25827 = vst [vmem:[#allocation138_spill] sm:$0xff] %v17780_v44  ;;  %v6740_v23 = vcombine.low %v1376_v57, %v1380_v43  ;;  %v2072_v5 = vcombine.low %v1373_v7, %v1376_v57  ;;  %v6739_v18 = vcombine.low %v6731_v62, %v6738_v54  ;;  %v17793_v38 = vrot.slane %v2071_v13, %v16753_v24 }
  0xa0   :  { %v1383_v9 = vsel %vm16821_vm8, %v1381_v29, %v1382_v36  ;;  %v17796_v35 = vrot.slane %v566_v32, %v16753_v24  ;;  %v1386_v33 = vsel %vm16821_vm8, %v1384_v46, %v1385_v28  ;;  %v17806_v54 = vcombine.high %v17780_v44, %v17780_v44 }
  0xa1   :  { %25828 = vst [vmem:[#allocation139_spill] sm:$0xff] %v17793_v38  ;;  %v6748_v59 = vrot.slane %v6740_v23, %v16753_v24  ;;  %v17802_v2 = vrot.slane %v2072_v5, %v16753_v24  ;;  %15033 = vmatmul.mubr.msk.f32.gmra.mrb[36].mxu0 %vm2564_vm9, %v6739_v18  ;;  %v6741_v57 = vcombine.low %v1383_v9, %v1386_v33  ;;  %v1387_v7 = vrot.slane %v1385_v28, 2  ;;  %v59_v18 = vld [vmem:[%s24822_s0 + $0xd0] sm:$0xff] }
  0xa2   :  { %25829 = vst [vmem:[#allocation140_spill] sm:$0xff] %v17796_v35  ;;  %25831 = vst [vmem:[#allocation142_spill] sm:$0xff] %v17806_v54  ;;  %v17811_v29 = vcombine.high %v17796_v35, %v17796_v35  ;;  %v1388_v62 = vrot.slane %v17780_v44, 7  ;;  %15035 = vmatprep.mubr.msk.f32.mxu0 %vm16631_vm2, %v25733_v27  ;;  %v1391_v13 = vrot.slane %v17806_v54, 7  ;;  %v1394_v32 = vrot.slane %v17796_v35, 7 }
  0xa3   :  { %25830 = vst [vmem:[#allocation141_spill] sm:$0xff] %v17802_v2  ;;  %v2087_v36 = vcombine.low %v17793_v38, %v17802_v2  ;;  %v2088_v46 = vcombine.low %v1380_v43, %v1383_v9  ;;  %v6755_v23 = vrot.slane %v6741_v57, %v16753_v24  ;;  %v60_v43 = vld [vmem:[%s24822_s0 + $0xd8] sm:$0xff] }
  0xa4   :  { %25832 = vst [vmem:[#allocation143_spill] sm:$0xff] %v17811_v29  ;;  %v1389_v28 = vsel %vm16821_vm8, %v1387_v7, %v1388_v62  ;;  %v1390_v5 = vrot.slane %v1388_v62, 2  ;;  %v1397_v44 = vrot.slane %v17811_v29, 7  ;;  %v1393_v2 = vrot.slane %v1391_v13, 2 }
  0xa5   :  { %14443 = vmatmul.mubr.msk.f32.gmra.mrb[40].mxu1 %vm2564_vm9, %v2087_v36  ;;  %v1396_v38 = vrot.slane %v1394_v32, 2  ;;  %v2089_v54 = vcombine.low %v1386_v33, %v1389_v28  ;;  %v17829_v35 = vrot.slane %v2088_v46, %v16753_v24  ;;  %v6756_v9 = vcombine.low %v6748_v59, %v6755_v23  ;;  %v26148_v45 = vld [vmem:[#allocation137_spill] sm:$0xff] }
  0xa6   :  { %v1392_v57 = vsel %vm16821_vm8, %v1390_v5, %v1391_v13  ;;  %14445 = vmatprep.mubr.msk.f32.mxu1 %vm16631_vm2, %v25733_v27  ;;  %v582_v7 = vcombine.high %v59_v18, %v59_v18  ;;  %v17839_v62 = vrot.slane %v59_v18, %v16753_v24  ;;  %v1395_v33 = vsel %vm16821_vm8, %v1393_v2, %v1394_v32 }
  0xa7   :  { %25833 = vst [vmem:[#allocation144_spill] sm:$0xff] %v17829_v35  ;;  %v1398_v36 = vsel %vm16821_vm8, %v1396_v38, %v1397_v44  ;;  %v6757_v46 = vcombine.low %v1389_v28, %v1392_v57  ;;  %v17846_v29 = vrot.slane %v2089_v54, %v16753_v24  ;;  %15036 = vmatmul.mubr.msk.f32.gmra.mrb[38].mxu0 %vm2564_vm9, %v6756_v9 }
  0xa8   :  { %25834 = vst [vmem:[#allocation145_spill] sm:$0xff] %v17839_v62  ;;  %v6758_v59 = vcombine.low %v1395_v33, %v1398_v36  ;;  %v17850_v13 = vrot.slane %v582_v7, %v16753_v24  ;;  %v17854_v18 = vcombine.high %v17839_v62, %v17839_v62  ;;  %v599_v23 = vcombine.high %v60_v43, %v60_v43 }
  0xa9   :  { %25835 = vst [vmem:[#allocation146_spill] sm:$0xff] %v17846_v29  ;;  %15038 = vmatprep.mubr.msk.f32.mxu0 %vm16631_vm2, %v25733_v27  ;;  %v6765_v44 = vrot.slane %v6757_v46, %v16753_v24  ;;  %v2104_v38 = vcombine.low %v17829_v35, %v17846_v29  ;;  %v17862_v2 = vrot.slane %v60_v43, %v16753_v24  ;;  %v13385_v54 = vrot.slane %v17839_v62, 9 }
  0xaa   :  { %25836 = vst [vmem:[#allocation147_spill] sm:$0xff] %v17850_v13  ;;  %25837 = vst [vmem:[#allocation148_spill] sm:$0xff] %v17854_v18  ;;  %v6772_v32 = vrot.slane %v6758_v59, %v16753_v24  ;;  %v17868_v28 = vcombine.high %v17850_v13, %v17850_v13  ;;  %v17871_v5 = vrot.slane %v599_v23, %v16753_v24  ;;  %v1401_v9 = vrot.slane %v17854_v18, 7 }
  0xab   :  { %25838 = vst [vmem:[#allocation149_spill] sm:$0xff] %v17862_v2  ;;  %14446 = vmatmul.mubr.msk.f32.gmra.mrb[42].mxu1 %vm2564_vm9, %v2104_v38  ;;  %v1404_v7 = vrot.slane %v17850_v13, 7  ;;  %v1410_v43 = vrot.slane %v17862_v2, 7  ;;  %v2105_v46 = vcombine.low %v1392_v57, %v1395_v33  ;;  %v17879_v29 = vcombine.high %v17862_v2, %v17862_v2 }
  0xac   :  { %25839 = vst [vmem:[#allocation150_spill] sm:$0xff] %v17868_v28  ;;  %25840 = vst [vmem:[#allocation151_spill] sm:$0xff] %v17871_v5  ;;  %v6773_v59 = vcombine.low %v6765_v44, %v6772_v32  ;;  %v1402_v35 = vsel %vm16821_vm8, %v13385_v54, %v1401_v9  ;;  %v1403_v62 = vrot.slane %v1401_v9, 2  ;;  %v1407_v23 = vrot.slane %v17868_v28, 7  ;;  %14448 = vmatprep.mubr.msk.f32.mxu1 %vm16631_vm2, %v25733_v27 }
  0xad   :  { %25841 = vst [vmem:[#allocation152_spill] sm:$0xff] %v17879_v29  ;;  %v1406_v38 = vrot.slane %v1404_v7, 2  ;;  %v2106_v18 = vcombine.low %v1398_v36, %v1402_v35  ;;  %v17887_v13 = vrot.slane %v2105_v46, %v16753_v24  ;;  %v17891_v57 = vcombine.high %v17871_v5, %v17871_v5 }
  0xae   :  { %15039 = vmatmul.mubr.msk.f32.gmra.mrb[40].mxu0 %vm2564_vm9, %v6773_v59  ;;  %v1405_v33 = vsel %vm16821_vm8, %v1403_v62, %v1404_v7  ;;  %v1409_v44 = vrot.slane %v1407_v23, 2  ;;  %v1412_v54 = vrot.slane %v1410_v43, 2  ;;  %v1413_v32 = vrot.slane %v17879_v29, 7  ;;  %v61_v59 = vld [vmem:[%s24822_s0 + $0xe0] sm:$0xff] }
  0xaf   :  { %25842 = vst [vmem:[#allocation153_spill] sm:$0xff] %v17887_v13  ;;  %25843 = vst [vmem:[#allocation154_spill] sm:$0xff] %v17891_v57  ;;  %15041 = vmatprep.mubr.msk.f32.mxu0 %vm16631_vm2, %v25733_v27  ;;  %v1408_v36 = vsel %vm16821_vm8, %v1406_v38, %v1407_v23  ;;  %v6774_v9 = vcombine.low %v1402_v35, %v1405_v33  ;;  %v17902_v46 = vrot.slane %v2106_v18, %v16753_v24 }
  0xb0   :  { %v1416_v62 = vrot.slane %v17871_v5, 7  ;;  %v1411_v7 = vsel %vm16821_vm8, %v1409_v44, %v1410_v43  ;;  %v1414_v29 = vsel %vm16821_vm8, %v1412_v54, %v1413_v32  ;;  %v1415_v28 = vrot.slane %v1413_v32, 2 }
  0xb1   :  { %25844 = vst [vmem:[#allocation155_spill] sm:$0xff] %v17902_v46  ;;  %v1419_v2 = vrot.slane %v17891_v57, 7  ;;  %v6775_v23 = vcombine.low %v1408_v36, %v1411_v7  ;;  %v6782_v35 = vrot.slane %v6774_v9, %v16753_v24  ;;  %v2121_v18 = vcombine.low %v17887_v13, %v17902_v46  ;;  %v62_v46 = vld [vmem:[%s24822_s0 + $0xe8] sm:$0xff] }
  0xb2   :  { %v1418_v38 = vrot.slane %v1416_v62, 2  ;;  %v17918_v37 = vsel %vm16821_vm8, %v1415_v28, %v1416_v62  ;;  %v17921_v5 = vrot.slane %v61_v59, %v16753_v24  ;;  %v2122_v43 = vcombine.low %v1405_v33, %v1408_v36 }
  0xb3   :  { %v2123_v44 = vcombine.low %v1411_v7, %v1414_v29  ;;  %v6789_v54 = vrot.slane %v6775_v23, %v16753_v24  ;;  %14449 = vmatmul.mubr.msk.f32.gmra.mrb[44].mxu1 %vm2564_vm9, %v2121_v18  ;;  %v6791_v9 = vcombine.low %v1414_v29, %v17918_v37  ;;  %v5520_v28 = vcombine.high %v61_v59, %v61_v59  ;;  %v65_v29 = vld [vmem:[%s24822_s0 + $0x100] sm:$0xff] }
  0xb4   :  { %25845 = vst [vmem:[#allocation156_spill] sm:$0xff] %v17921_v5  ;;  %v1420_v32 = vsel %vm16821_vm8, %v1418_v38, %v1419_v2  ;;  %v17933_v62 = vcombine.high %v17921_v5, %v17921_v5  ;;  %v13617_v33 = vrot.slane %v17921_v5, 9  ;;  %14451 = vmatprep.mubr.msk.f32.mxu1 %vm16631_vm2, %v25733_v27  ;;  %v17939_v36 = vrot.slane %v2122_v43, %v16753_v24 }
  0xb5   :  { %v17942_v2 = vrot.slane %v2123_v44, %v16753_v24  ;;  %v6790_v59 = vcombine.low %v6782_v35, %v6789_v54  ;;  %v6799_v7 = vrot.slane %v6791_v9, %v16753_v24  ;;  %v17949_v23 = vrot.slane %v5520_v28, %v16753_v24 }
  0xb6   :  { %25846 = vst [vmem:[#allocation157_spill] sm:$0xff] %v17933_v62  ;;  %25847 = vst [vmem:[#allocation158_spill] sm:$0xff] %v17939_v36  ;;  %v5537_v18 = vcombine.high %v62_v46, %v62_v46  ;;  %v6373_v38 = vrot.slane %v17933_v62, 7  ;;  %v17955_v13 = vrot.slane %v62_v46, %v16753_v24  ;;  %v615_v44 = vcombine.high %v65_v29, %v65_v29 }
  0xb7   :  { %25848 = vst [vmem:[#allocation159_spill] sm:$0xff] %v17942_v2  ;;  %25849 = vst [vmem:[#allocation160_spill] sm:$0xff] %v17949_v23  ;;  %v2138_v43 = vcombine.low %v17939_v36, %v17942_v2  ;;  %15042 = vmatmul.mubr.msk.f32.gmra.mrb[42].mxu0 %vm2564_vm9, %v6790_v59  ;;  %v17960_v35 = vcombine.high %v17949_v23, %v17949_v23  ;;  %v6376_v9 = vrot.slane %v17949_v23, 7 }
  0xb8   :  { %25850 = vst [vmem:[#allocation161_spill] sm:$0xff] %v17955_v13  ;;  %v17963_v54 = vrot.slane %v5537_v18, %v16753_v24  ;;  %v17967_v28 = vrot.slane %v65_v29, %v16753_v24  ;;  %15044 = vmatprep.mubr.msk.f32.mxu0 %vm16631_vm2, %v25733_v27  ;;  %v17973_v46 = vsel %vm16821_vm8, %v13617_v33, %v6373_v38  ;;  %v6375_v18 = vrot.slane %v6373_v38, 2 }
  0xb9   :  { %25851 = vst [vmem:[#allocation162_spill] sm:$0xff] %v17960_v35  ;;  %25854 = vst [vmem:[#allocation165_spill] sm:$0xff] %v17973_v46  ;;  %14452 = vmatmul.mubr.msk.f32.gmra.mrb[46].mxu1 %vm2564_vm9, %v2138_v43  ;;  %v17978_v59 = vcombine.high %v17955_v13, %v17955_v13  ;;  %v6382_v2 = vrot.slane %v17955_v13, 7  ;;  %v6792_v36 = vcombine.low %v1420_v32, %v17973_v46  ;;  %v6378_v29 = vrot.slane %v6376_v9, 2 }
  0xba   :  { %25852 = vst [vmem:[#allocation163_spill] sm:$0xff] %v17963_v54  ;;  %25853 = vst [vmem:[#allocation164_spill] sm:$0xff] %v17967_v28  ;;  %v6379_v57 = vrot.slane %v17960_v35, 7  ;;  %14454 = vmatprep.mubr.msk.f32.mxu1 %vm16631_vm2, %v25733_v27  ;;  %v17986_v33 = vrot.slane %v615_v44, %v16753_v24  ;;  %v17990_v43 = vsel %vm16821_vm8, %v6375_v18, %v6376_v9  ;;  %v13386_v44 = vrot.slane %v17967_v28, 9 }
  0xbb   :  { %25855 = vst [vmem:[#allocation166_spill] sm:$0xff] %v17978_v59  ;;  %25857 = vst [vmem:[#allocation168_spill] sm:$0xff] %v17990_v43  ;;  %v6384_v62 = vrot.slane %v6382_v2, 2  ;;  %v6385_v38 = vrot.slane %v17978_v59, 7  ;;  %v17995_v13 = vcombine.high %v17967_v28, %v17967_v28  ;;  %v6806_v46 = vrot.slane %v6792_v36, %v16753_v24  ;;  %v67_v36 = vld [vmem:[%s24822_s0 + $0x110] sm:$0xff] }
  0xbc   :  { %25856 = vst [vmem:[#allocation167_spill] sm:$0xff] %v17986_v33  ;;  %v18000_v23 = vsel %vm16821_vm8, %v6378_v29, %v6379_v57  ;;  %v6381_v35 = vrot.slane %v6379_v57, 2  ;;  %v1426_v5 = vrot.slane %v17986_v33, 7  ;;  %v2139_v28 = vcombine.low %v17918_v37, %v1420_v32 }
  0xbd   :  { %25858 = vst [vmem:[#allocation169_spill] sm:$0xff] %v17995_v13  ;;  %25859 = vst [vmem:[#allocation170_spill] sm:$0xff] %v18000_v23  ;;  %v18005_v9 = vsel %vm16821_vm8, %v6384_v62, %v6385_v38  ;;  %v6808_v18 = vcombine.low %v17990_v43, %v18000_v23  ;;  %v1423_v59 = vrot.slane %v17995_v13, 7  ;;  %v6807_v29 = vcombine.low %v6799_v7, %v6806_v46 }
  0xbe   :  { %25860 = vst [vmem:[#allocation171_spill] sm:$0xff] %v18005_v9  ;;  %v18016_v57 = vsel %vm16821_vm8, %v6381_v35, %v6382_v2  ;;  %v648_v62 = vcombine.high %v67_v36, %v67_v36  ;;  %v18026_v7 = vrot.slane %v2139_v28, %v16753_v24  ;;  %v18029_v2 = vrot.slane %v67_v36, %v16753_v24 }
  0xbf   :  { %25861 = vst [vmem:[#allocation172_spill] sm:$0xff] %v18016_v57  ;;  %v6809_v10 = vcombine.low %v18016_v57, %v18005_v9  ;;  %v6816_v23 = vrot.slane %v6808_v18, %v16753_v24  ;;  %v1424_v43 = vsel %vm16821_vm8, %v13386_v44, %v1423_v59  ;;  %v1425_v13 = vrot.slane %v1423_v59, 2  ;;  %15045 = vmatmul.mubr.msk.f32.gmra.mrb[44].mxu0 %vm2564_vm9, %v6807_v29 }
  0xc0   :  { %25862 = vst [vmem:[#allocation173_spill] sm:$0xff] %v18026_v7  ;;  %25863 = vst [vmem:[#allocation174_spill] sm:$0xff] %v18029_v2  ;;  %v18032_v37 = vrot.slane %v648_v62, %v16753_v24  ;;  %v18036_v32 = vcombine.high %v17963_v54, %v17963_v54  ;;  %15047 = vmatprep.mubr.msk.f32.mxu0 %vm16631_vm2, %v25733_v27  ;;  %v6387_v28 = vrot.slane %v6385_v38, 2  ;;  %v6388_v59 = vrot.slane %v17963_v54, 7  ;;  %v66_v62 = vld [vmem:[%s24822_s0 + $0x108] sm:$0xff] }
  0xc1   :  { %v6823_v35 = vrot.slane %v6809_v10, %v16753_v24  ;;  %v1427_v46 = vsel %vm16821_vm8, %v1425_v13, %v1426_v5  ;;  %v18046_v18 = vcombine.high %v18029_v2, %v18029_v2  ;;  %v13387_v36 = vrot.slane %v18029_v2, 9 }
  0xc2   :  { %25864 = vst [vmem:[#allocation175_spill] sm:$0xff] %v18032_v37  ;;  %25865 = vst [vmem:[#allocation176_spill] sm:$0xff] %v18036_v32  ;;  %v2140_v44 = vcombine.low %v1424_v43, %v1427_v46  ;;  %v1448_v29 = vrot.slane %v18032_v37, 7  ;;  %v18055_v13 = vsel %vm16821_vm8, %v6387_v28, %v6388_v59  ;;  %v6390_v38 = vrot.slane %v6388_v59, 2  ;;  %v68_v59 = vld [vmem:[%s24822_s0 + $0x118] sm:$0xff] }
  0xc3   :  { %25866 = vst [vmem:[#allocation177_spill] sm:$0xff] %v18046_v18  ;;  %v6824_v10 = vcombine.low %v6816_v23, %v6823_v35  ;;  %25867 = vst [vmem:[#allocation178_spill] sm:$0xff] %v18055_v13  ;;  %v6391_v43 = vrot.slane %v18036_v32, 7  ;;  %v1445_v9 = vrot.slane %v18046_v18, 7  ;;  %v18062_v57 = vcombine.high %v17986_v33, %v17986_v33 }
  0xc4   :  { %v2154_v46 = vrot.slane %v2140_v44, %v16753_v24  ;;  %v632_v2 = vcombine.high %v66_v62, %v66_v62  ;;  %v18070_v35 = vrot.slane %v66_v62, %v16753_v24  ;;  %v1428_v28 = vrot.slane %v1426_v5, 2 }
  0xc5   :  { %25868 = vst [vmem:[#allocation179_spill] sm:$0xff] %v18062_v57  ;;  %15048 = vmatmul.mubr.msk.f32.gmra.mrb[46].mxu0 %vm2564_vm9, %v6824_v10  ;;  %v18067_v23 = vsel %vm16821_vm8, %v6390_v38, %v6391_v43  ;;  %v18077_v44 = vcombine.high %v18032_v37, %v18032_v37  ;;  %v1446_v38 = vsel %vm16821_vm8, %v13387_v36, %v1445_v9  ;;  %v1447_v43 = vrot.slane %v1445_v9, 2 }
  0xc6   :  { %25869 = vst [vmem:[#allocation180_spill] sm:$0xff] %v18067_v23  ;;  %25870 = vst [vmem:[#allocation181_spill] sm:$0xff] %v18070_v35  ;;  %15050 = vmatprep.mubr.msk.f32.mxu0 %vm16631_vm2, %v25733_v27  ;;  %v2155_v10 = vcombine.low %v18026_v7, %v2154_v46  ;;  %v6825_v5 = vcombine.low %v18055_v13, %v18067_v23  ;;  %v18087_v62 = vrot.slane %v632_v2, %v16753_v24 }
  0xc7   :  { %25871 = vst [vmem:[#allocation182_spill] sm:$0xff] %v18077_v44  ;;  %v18091_v33 = vcombine.high %v18070_v35, %v18070_v35  ;;  %v1429_v54 = vrot.slane %v18062_v57, 7  ;;  %v1432_v32 = vrot.slane %v18070_v35, 7  ;;  %v1449_v36 = vsel %vm16821_vm8, %v1447_v43, %v1448_v29 }
  0xc8   :  { %25872 = vst [vmem:[#allocation183_spill] sm:$0xff] %v18087_v62  ;;  %14455 = vmatmul.mubr.msk.f32.gmra.mrb[48].mxu1 %vm2564_vm9, %v2155_v10  ;;  %v6833_v9 = vrot.slane %v6825_v5, %v16753_v24  ;;  %v665_v46 = vcombine.high %v68_v59, %v68_v59  ;;  %v18100_v23 = vrot.slane %v68_v59, %v16753_v24  ;;  %v1438_v57 = vrot.slane %v18087_v62, 7 }
  0xc9   :  { %25873 = vst [vmem:[#allocation184_spill] sm:$0xff] %v18091_v33  ;;  %v6826_v2 = vcombine.low %v1446_v38, %v1449_v36  ;;  %14457 = vmatprep.mubr.msk.f32.mxu1 %vm16631_vm2, %v25733_v27  ;;  %v1430_v13 = vsel %vm16821_vm8, %v1428_v28, %v1429_v54  ;;  %v1431_v7 = vrot.slane %v1429_v54, 2  ;;  %v1434_v35 = vrot.slane %v1432_v32, 2 }
  0xca   :  { %25874 = vst [vmem:[#allocation185_spill] sm:$0xff] %v18100_v23  ;;  %v1435_v10 = vrot.slane %v18091_v33, 7  ;;  %v18109_v43 = vrot.slane %v665_v46, %v16753_v24  ;;  %v18113_v59 = vcombine.high %v18100_v23, %v18100_v23  ;;  %v1450_v37 = vrot.slane %v1448_v29, 2 }
  0xcb   :  { %v6840_v5 = vrot.slane %v6826_v2, %v16753_v24  ;;  %v1433_v18 = vsel %vm16821_vm8, %v1431_v7, %v1432_v32  ;;  %v1451_v54 = vrot.slane %v18077_v44, 7  ;;  %v1454_v46 = vrot.slane %v18100_v23, 7 }
  0xcc   :  { %25875 = vst [vmem:[#allocation186_spill] sm:$0xff] %v18109_v43  ;;  %25876 = vst [vmem:[#allocation187_spill] sm:$0xff] %v18113_v59  ;;  %v1436_v28 = vsel %vm16821_vm8, %v1434_v35, %v1435_v10  ;;  %v1437_v33 = vrot.slane %v1435_v10, 2  ;;  %v2156_v39 = vcombine.low %v1430_v13, %v1433_v18  ;;  %v1457_v2 = vrot.slane %v18113_v59, 7  ;;  %v69_v18 = vld [vmem:[%s24822_s0 + $0x120] sm:$0xff] }
  0xcd   :  { %v6841_v12 = vcombine.low %v6833_v9, %v6840_v5  ;;  %v1452_v3 = vsel %vm16821_vm8, %v1450_v37, %v1451_v54  ;;  %v1453_v22 = vrot.slane %v1451_v54, 2  ;;  %v1456_v29 = vrot.slane %v1454_v46, 2 }
  0xce   :  { %v1439_v7 = vsel %vm16821_vm8, %v1437_v33, %v1438_v57  ;;  %v2164_v32 = vrot.slane %v2156_v39, %v16753_v24  ;;  %v1460_v44 = vrot.slane %v18109_v43, 7  ;;  %v1459_v35 = vrot.slane %v1457_v2, 2 }
  0xcf   :  { %15051 = vmatmul.mubr.msk.f32.gmra.mrb[48].mxu0 %vm2564_vm9, %v6841_v12  ;;  %v2157_v13 = vcombine.low %v1436_v28, %v1439_v7  ;;  %v1455_v37 = vsel %vm16821_vm8, %v1453_v22, %v1454_v46  ;;  %v1092_v9 = vcombine.high %v18087_v62, %v18087_v62  ;;  %v1458_v39 = vsel %vm16821_vm8, %v1456_v29, %v1457_v2 }
  0xd0   :  { %15053 = vmatprep.mubr.msk.f32.mxu0 %vm16631_vm2, %v25733_v27  ;;  %v6842_v33 = vcombine.low %v1452_v3, %v1455_v37  ;;  %v1440_v10 = vrot.slane %v1438_v57, 2  ;;  %v2174_v5 = vcombine.low %v1449_v36, %v1452_v3  ;;  %v1461_v12 = vsel %vm16821_vm8, %v1459_v35, %v1460_v44 }
  0xd1   :  { %v2171_v54 = vrot.slane %v2157_v13, %v16753_v24  ;;  %v1441_v28 = vrot.slane %v1092_v9, 7  ;;  %v681_v22 = vcombine.high %v69_v18, %v69_v18  ;;  %v6843_v46 = vcombine.low %v1458_v39, %v1461_v12 }
  0xd2   :  { %v6850_v7 = vrot.slane %v6842_v33, %v16753_v24  ;;  %v2188_v62 = vrot.slane %v2174_v5, %v16753_v24  ;;  %v18147_v59 = vrot.slane %v69_v18, %v16753_v24  ;;  %v18156_v36 = vcombine.high %v18109_v43, %v18109_v43 }
  0xd3   :  { %v2172_v23 = vcombine.low %v2164_v32, %v2171_v54  ;;  %v1442_v57 = vsel %vm16821_vm8, %v1440_v10, %v1441_v28  ;;  %v18152_v3 = vrot.slane %v681_v22, %v16753_v24  ;;  %v6857_v2 = vrot.slane %v6843_v46, %v16753_v24  ;;  %v70_v32 = vld [vmem:[%s24822_s0 + $0x128] sm:$0xff] }
  0xd4   :  { %25877 = vst [vmem:[#allocation188_spill] sm:$0xff] %v18147_v59  ;;  %25879 = vst [vmem:[#allocation190_spill] sm:$0xff] %v18156_v36  ;;  %v2173_v29 = vcombine.low %v1442_v57, %v1446_v38  ;;  %v18161_v13 = vcombine.high %v18147_v59, %v18147_v59  ;;  %v1462_v18 = vrot.slane %v1460_v44, 2  ;;  %v1463_v9 = vrot.slane %v18156_v36, 7 }
  0xd5   :  { %25878 = vst [vmem:[#allocation189_spill] sm:$0xff] %v18152_v3  ;;  %14458 = vmatmul.mubr.msk.f32.gmra.mrb[50].mxu1 %vm2564_vm9, %v2172_v23  ;;  %v18169_v35 = vcombine.high %v18152_v3, %v18152_v3  ;;  %v13388_v33 = vrot.slane %v18147_v59, 9  ;;  %v1470_v38 = vrot.slane %v18152_v3, 7  ;;  %v6858_v10 = vcombine.low %v6850_v7, %v6857_v2 }
  0xd6   :  { %25880 = vst [vmem:[#allocation191_spill] sm:$0xff] %v18161_v13  ;;  %14460 = vmatprep.mubr.msk.f32.mxu1 %vm16631_vm2, %v25733_v27  ;;  %v2181_v44 = vrot.slane %v2173_v29, %v16753_v24  ;;  %v1467_v5 = vrot.slane %v18161_v13, 7  ;;  %v2190_v54 = vcombine.low %v1455_v37, %v1458_v39  ;;  %v1464_v23 = vsel %vm16821_vm8, %v1462_v18, %v1463_v9 }
  0xd7   :  { %25881 = vst [vmem:[#allocation192_spill] sm:$0xff] %v18169_v35  ;;  %v1472_v28 = vrot.slane %v1470_v38, 2  ;;  %v1473_v22 = vrot.slane %v18169_v35, 7  ;;  %v698_v46 = vcombine.high %v70_v32, %v70_v32  ;;  %15054 = vmatmul.mubr.msk.f32.gmra.mrb[50].mxu0 %vm2564_vm9, %v6858_v10  ;;  %v2191_v36 = vcombine.low %v1461_v12, %v1464_v23 }
  0xd8   :  { %v2189_v57 = vcombine.low %v2181_v44, %v2188_v62  ;;  %v1468_v7 = vsel %vm16821_vm8, %v13388_v33, %v1467_v5  ;;  %v1469_v2 = vrot.slane %v1467_v5, 2  ;;  %15056 = vmatprep.mubr.msk.f32.mxu0 %vm16631_vm2, %v25733_v27  ;;  %v2198_v29 = vrot.slane %v2190_v54, %v16753_v24 }
  0xd9   :  { %v1474_v37 = vsel %vm16821_vm8, %v1472_v28, %v1473_v22  ;;  %v6859_v39 = vcombine.low %v1464_v23, %v1468_v7  ;;  %v18190_v18 = vrot.slane %v70_v32, %v16753_v24  ;;  %v2205_v9 = vrot.slane %v2191_v36, %v16753_v24  ;;  %v71_v28 = vld [vmem:[%s24822_s0 + $0x130] sm:$0xff] }
  0xda   :  { %14461 = vmatmul.mubr.msk.f32.gmra.mrb[52].mxu1 %vm2564_vm9, %v2189_v57  ;;  %v1471_v62 = vsel %vm16821_vm8, %v1469_v2, %v1470_v38  ;;  %v18197_v12 = vrot.slane %v698_v46, %v16753_v24  ;;  %v1475_v33 = vrot.slane %v1473_v22, 2 }
  0xdb   :  { %25882 = vst [vmem:[#allocation193_spill] sm:$0xff] %v18190_v18  ;;  %v6860_v10 = vcombine.low %v1471_v62, %v1474_v37  ;;  %v6867_v44 = vrot.slane %v6859_v39, %v16753_v24  ;;  %14463 = vmatprep.mubr.msk.f32.mxu1 %vm16631_vm2, %v25733_v27  ;;  %v18204_v32 = vcombine.high %v18190_v18, %v18190_v18  ;;  %v1476_v5 = vrot.slane %v18190_v18, 7 }
  0xdc   :  { %25883 = vst [vmem:[#allocation194_spill] sm:$0xff] %v18197_v12  ;;  %v2206_v54 = vcombine.low %v2198_v29, %v2205_v9  ;;  %v18209_v36 = vcombine.high %v18197_v12, %v18197_v12  ;;  %v1482_v38 = vrot.slane %v18197_v12, 7  ;;  %v2207_v23 = vcombine.low %v1468_v7, %v1471_v62  ;;  %v72_v62 = vld [vmem:[%s24822_s0 + $0x138] sm:$0xff] }
  0xdd   :  { %25884 = vst [vmem:[#allocation195_spill] sm:$0xff] %v18204_v32  ;;  %v6874_v22 = vrot.slane %v6860_v10, %v16753_v24  ;;  %v1477_v46 = vsel %vm16821_vm8, %v1475_v33, %v1476_v5  ;;  %v1478_v57 = vrot.slane %v1476_v5, 2  ;;  %v1479_v2 = vrot.slane %v18204_v32, 7 }
  0xde   :  { %25885 = vst [vmem:[#allocation196_spill] sm:$0xff] %v18209_v36  ;;  %14464 = vmatmul.mubr.msk.f32.gmra.mrb[54].mxu1 %vm2564_vm9, %v2206_v54  ;;  %v1484_v39 = vrot.slane %v1482_v38, 2  ;;  %v1485_v29 = vrot.slane %v18209_v36, 7  ;;  %v2208_v9 = vcombine.low %v1474_v37, %v1477_v46  ;;  %v18222_v7 = vrot.slane %v2207_v23, %v16753_v24 }
  0xdf   :  { %v6875_v10 = vcombine.low %v6867_v44, %v6874_v22  ;;  %v1480_v33 = vsel %vm16821_vm8, %v1478_v57, %v1479_v2  ;;  %v1481_v5 = vrot.slane %v1479_v2, 2  ;;  %14466 = vmatprep.mubr.msk.f32.mxu1 %vm16631_vm2, %v25733_v27  ;;  %v714_v54 = vcombine.high %v71_v28, %v71_v28 }
  0xe0   :  { %25886 = vst [vmem:[#allocation197_spill] sm:$0xff] %v18222_v7  ;;  %v1486_v13 = vsel %vm16821_vm8, %v1484_v39, %v1485_v29  ;;  %v6876_v37 = vcombine.low %v1477_v46, %v1480_v33  ;;  %v18234_v23 = vrot.slane %v2208_v9, %v16753_v24  ;;  %v18237_v12 = vrot.slane %v71_v28, %v16753_v24 }
  0xe1   :  { %15057 = vmatmul.mubr.msk.f32.gmra.mrb[52].mxu0 %vm2564_vm9, %v6875_v10  ;;  %v1483_v44 = vsel %vm16821_vm8, %v1481_v5, %v1482_v38  ;;  %v18243_v22 = vrot.slane %v714_v54, %v16753_v24  ;;  %v731_v57 = vcombine.high %v72_v62, %v72_v62  ;;  %v18246_v2 = vrot.slane %v72_v62, %v16753_v24  ;;  %v73_v38 = vld [vmem:[%s24822_s0 + $0x140] sm:$0xff] }
  0xe2   :  { %25887 = vst [vmem:[#allocation198_spill] sm:$0xff] %v18234_v23  ;;  %25888 = vst [vmem:[#allocation199_spill] sm:$0xff] %v18237_v12  ;;  %15059 = vmatprep.mubr.msk.f32.mxu0 %vm16631_vm2, %v25733_v27  ;;  %v6877_v46 = vcombine.low %v1483_v44, %v1486_v13  ;;  %v6884_v39 = vrot.slane %v6876_v37, %v16753_v24  ;;  %v2223_v28 = vcombine.low %v18222_v7, %v18234_v23 }
  0xe3   :  { %25889 = vst [vmem:[#allocation200_spill] sm:$0xff] %v18243_v22  ;;  %25890 = vst [vmem:[#allocation201_spill] sm:$0xff] %v18246_v2  ;;  %v18255_v29 = vcombine.high %v18237_v12, %v18237_v12  ;;  %v18262_v9 = vcombine.high %v18243_v22, %v18243_v22  ;;  %v18265_v62 = vrot.slane %v731_v57, %v16753_v24  ;;  %v13389_v10 = vrot.slane %v18237_v12, 9 }
  0xe4   :  { %v1492_v5 = vrot.slane %v18243_v22, 7  ;;  %v6891_v54 = vrot.slane %v6877_v46, %v16753_v24  ;;  %14467 = vmatmul.mubr.msk.f32.gmra.mrb[56].mxu1 %vm2564_vm9, %v2223_v28  ;;  %v1498_v23 = vrot.slane %v18246_v2, 7  ;;  %v2224_v7 = vcombine.low %v1480_v33, %v1483_v44 }
  0xe5   :  { %25891 = vst [vmem:[#allocation202_spill] sm:$0xff] %v18255_v29  ;;  %25892 = vst [vmem:[#allocation203_spill] sm:$0xff] %v18262_v9  ;;  %v1489_v37 = vrot.slane %v18255_v29, 7  ;;  %v1495_v18 = vrot.slane %v18262_v9, 7  ;;  %14469 = vmatprep.mubr.msk.f32.mxu1 %vm16631_vm2, %v25733_v27  ;;  %v18278_v57 = vcombine.high %v18246_v2, %v18246_v2  ;;  %v18281_v12 = vrot.slane %v73_v38, %v16753_v24 }
  0xe6   :  { %25893 = vst [vmem:[#allocation204_spill] sm:$0xff] %v18265_v62  ;;  %v1494_v36 = vrot.slane %v1492_v5, 2  ;;  %v6892_v46 = vcombine.low %v6884_v39, %v6891_v54  ;;  %v18286_v33 = vrot.slane %v2224_v7, %v16753_v24  ;;  %v1500_v7 = vrot.slane %v1498_v23, 2 }
  0xe7   :  { %25894 = vst [vmem:[#allocation205_spill] sm:$0xff] %v18278_v57  ;;  %25895 = vst [vmem:[#allocation206_spill] sm:$0xff] %v18281_v12  ;;  %v1490_v28 = vsel %vm16821_vm8, %v13389_v10, %v1489_v37  ;;  %v1491_v29 = vrot.slane %v1489_v37, 2  ;;  %v1497_v9 = vrot.slane %v1495_v18, 2  ;;  %v18292_v2 = vcombine.high %v18281_v12, %v18281_v12 }
  0xe8   :  { %25896 = vst [vmem:[#allocation207_spill] sm:$0xff] %v18286_v33  ;;  %v1496_v44 = vsel %vm16821_vm8, %v1494_v36, %v1495_v18  ;;  %v2225_v22 = vcombine.low %v1486_v13, %v1490_v28  ;;  %15060 = vmatmul.mubr.msk.f32.gmra.mrb[54].mxu0 %vm2564_vm9, %v6892_v46  ;;  %v18299_v10 = vcombine.high %v18265_v62, %v18265_v62  ;;  %v1501_v54 = vrot.slane %v18278_v57, 7 }
  0xe9   :  { %25897 = vst [vmem:[#allocation208_spill] sm:$0xff] %v18292_v2  ;;  %v1493_v39 = vsel %vm16821_vm8, %v1491_v29, %v1492_v5  ;;  %15062 = vmatprep.mubr.msk.f32.mxu0 %vm16631_vm2, %v25733_v27  ;;  %v1499_v13 = vsel %vm16821_vm8, %v1497_v9, %v1498_v23  ;;  %v1504_v37 = vrot.slane %v18265_v62, 7  ;;  %v13390_v23 = vrot.slane %v18281_v12, 9 }
  0xea   :  { %25898 = vst [vmem:[#allocation209_spill] sm:$0xff] %v18299_v10  ;;  %v6893_v18 = vcombine.low %v1490_v28, %v1493_v39  ;;  %v18307_v36 = vrot.slane %v2225_v22, %v16753_v24  ;;  %v6894_v29 = vcombine.low %v1496_v44, %v1499_v13  ;;  %v1502_v5 = vsel %vm16821_vm8, %v1500_v7, %v1501_v54 }
  0xeb   :  { %v1503_v46 = vrot.slane %v1501_v54, 2  ;;  %v1507_v32 = vrot.slane %v18299_v10, 7  ;;  %v1506_v3 = vrot.slane %v1504_v37, 2  ;;  %v1511_v28 = vrot.slane %v18292_v2, 7 }
  0xec   :  { %25899 = vst [vmem:[#allocation210_spill] sm:$0xff] %v18307_v36  ;;  %v6901_v57 = vrot.slane %v6893_v18, %v16753_v24  ;;  %v2240_v59 = vcombine.low %v18286_v33, %v18307_v36  ;;  %v6908_v22 = vrot.slane %v6894_v29, %v16753_v24  ;;  %v2241_v62 = vcombine.low %v1493_v39, %v1496_v44  ;;  %v74_v36 = vld [vmem:[%s24822_s0 + $0x148] sm:$0xff] }
  0xed   :  { %v1505_v9 = vsel %vm16821_vm8, %v1503_v46, %v1504_v37  ;;  %v1508_v7 = vsel %vm16821_vm8, %v1506_v3, %v1507_v32  ;;  %v2242_v18 = vcombine.low %v1499_v13, %v1502_v5  ;;  %v747_v33 = vcombine.high %v73_v38, %v73_v38 }
  0xee   :  { %14470 = vmatmul.mubr.msk.f32.gmra.mrb[58].mxu1 %vm2564_vm9, %v2240_v59  ;;  %v6910_v54 = vcombine.low %v1502_v5, %v1505_v9  ;;  %v6909_v10 = vcombine.low %v6901_v57, %v6908_v22  ;;  %v1512_v29 = vsel %vm16821_vm8, %v13390_v23, %v1511_v28  ;;  %v18332_v44 = vrot.slane %v2241_v62, %v16753_v24 }
  0xef   :  { %14472 = vmatprep.mubr.msk.f32.mxu1 %vm16631_vm2, %v25733_v27  ;;  %v764_v59 = vcombine.high %v74_v36, %v74_v36  ;;  %v6911_v39 = vcombine.low %v1508_v7, %v1512_v29  ;;  %v18336_v32 = vrot.slane %v2242_v18, %v16753_v24  ;;  %v18339_v13 = vrot.slane %v747_v33, %v16753_v24 }
  0xf0   :  { %25900 = vst [vmem:[#allocation211_spill] sm:$0xff] %v18332_v44  ;;  %v6918_v3 = vrot.slane %v6910_v54, %v16753_v24  ;;  %15063 = vmatmul.mubr.msk.f32.gmra.mrb[56].mxu0 %vm2564_vm9, %v6909_v10  ;;  %v18343_v38 = vrot.slane %v74_v36, %v16753_v24  ;;  %v1513_v62 = vrot.slane %v1511_v28, 2  ;;  %v2258_v37 = vcombine.low %v1505_v9, %v1508_v7 }
  0xf1   :  { %25901 = vst [vmem:[#allocation212_spill] sm:$0xff] %v18336_v32  ;;  %25902 = vst [vmem:[#allocation213_spill] sm:$0xff] %v18339_v13  ;;  %v18346_v57 = vrot.slane %v764_v59, %v16753_v24  ;;  %15065 = vmatprep.mubr.msk.f32.mxu0 %vm16631_vm2, %v25733_v27  ;;  %v6925_v5 = vrot.slane %v6911_v39, %v16753_v24  ;;  %v2257_v46 = vcombine.low %v18332_v44, %v18336_v32 }
  0xf2   :  { %25903 = vst [vmem:[#allocation214_spill] sm:$0xff] %v18343_v38  ;;  %v18355_v33 = vcombine.high %v18339_v13, %v18339_v13  ;;  %v1514_v10 = vrot.slane %v18339_v13, 7  ;;  %v18360_v36 = vcombine.high %v18343_v38, %v18343_v38  ;;  %v1520_v23 = vrot.slane %v18343_v38, 7 }
  0xf3   :  { %25904 = vst [vmem:[#allocation215_spill] sm:$0xff] %v18346_v57  ;;  %v18364_v22 = vrot.slane %v2258_v37, %v16753_v24  ;;  %v3011_v9 = vcombine.low %v16830_v49, %v16802_v40  ;;  %v6926_v28 = vcombine.low %v6918_v3, %v6925_v5  ;;  %14473 = vmatmul.mubr.msk.f32.gmra.mrb[60].mxu1 %vm2564_vm9, %v2257_v46  ;;  %v1526_v46 = vrot.slane %v18346_v57, 7 }
  0xf4   :  { %25905 = vst [vmem:[#allocation216_spill] sm:$0xff] %v18355_v33  ;;  %25906 = vst [vmem:[#allocation217_spill] sm:$0xff] %v18360_v36  ;;  %v1515_v7 = vsel %vm16821_vm8, %v1513_v62, %v1514_v10  ;;  %v1516_v54 = vrot.slane %v1514_v10, 2  ;;  %v1517_v18 = vrot.slane %v18355_v33, 7  ;;  %v1522_v59 = vrot.slane %v1520_v23, 2  ;;  %14475 = vmatprep.mubr.msk.f32.mxu1 %vm16631_vm2, %v25733_v27 }
  0xf5   :  { %25907 = vst [vmem:[#allocation218_spill] sm:$0xff] %v18364_v22  ;;  %v1523_v39 = vrot.slane %v18360_v36, 7  ;;  %v2259_v37 = vcombine.low %v1512_v29, %v1515_v7  ;;  %v3012_v32 = vcombine.low %v16834_v50, %v16805_v41  ;;  %15066 = vmatmul.mubr.msk.f32.gmra.mrb[58].mxu0 %vm2564_vm9, %v6926_v28  ;;  %v3019_v62 = vrot.slane %v3011_v9, %v16753_v24 }
  0xf6   :  { %v1518_v3 = vsel %vm16821_vm8, %v1516_v54, %v1517_v18  ;;  %v1519_v5 = vrot.slane %v1517_v18, 2  ;;  %15068 = vmatprep.mubr.msk.f32.mxu0 %vm16631_vm2, %v25733_v27  ;;  %v3028_v9 = vcombine.low %v16875_v60, %v16808_v42  ;;  %v13671_v49 = vcombine.high %v16808_v42, %v16879_v61 }
  0xf7   :  { %v1524_v10 = vsel %vm16821_vm8, %v1522_v59, %v1523_v39  ;;  %v6927_v29 = vcombine.low %v1515_v7, %v1518_v3  ;;  %v18387_v44 = vrot.slane %v2259_v37, %v16753_v24  ;;  %v3026_v28 = vrot.slane %v3012_v32, %v16753_v24  ;;  %v75_v59 = vld [vmem:[%s24822_s0 + $0x150] sm:$0xff] }
  0xf8   :  { %v1521_v54 = vsel %vm16821_vm8, %v1519_v5, %v1520_v23  ;;  %v1525_v18 = vrot.slane %v1523_v39, 2  ;;  %v18409_v5 = vrot.slane %v3028_v9, %v16753_v24  ;;  %v18415_v40 = vrot.slane %v75_v59, %v16753_v24 }
  0xf9   :  { %25908 = vst [vmem:[#allocation219_spill] sm:$0xff] %v18387_v44  ;;  %v6928_v7 = vcombine.low %v1521_v54, %v1524_v10  ;;  %v6935_v37 = vrot.slane %v6927_v29, %v16753_v24  ;;  %v2274_v32 = vcombine.low %v18364_v22, %v18387_v44  ;;  %v18402_v41 = vcombine.low %v3019_v62, %v3026_v28 }
  0xfa   :  { %v18406_v23 = vsel %vm16821_vm8, %v1525_v18, %v1526_v46  ;;  %v2275_v39 = vcombine.low %v1518_v3, %v1521_v54  ;;  %v780_v29 = vcombine.high %v75_v59, %v75_v59  ;;  %25910 = vst [vmem:[#allocation221_spill] sm:$0xff] %v18415_v40  ;;  %v7719_v3 = vrot.slane %v13671_v49, %v16753_v24  ;;  %v76_v49 = vld [vmem:[%s24822_s0 + $0x158] sm:$0xff] }
  0xfb   :  { %25909 = vst [vmem:[#allocation220_spill] sm:$0xff] %v18406_v23  ;;  %v6942_v42 = vrot.slane %v6928_v7, %v16753_v24  ;;  %14476 = vmatmul.mubr.msk.f32.gmra.mrb[62].mxu1 %vm2564_vm9, %v2274_v32  ;;  %v2276_v60 = vcombine.low %v1524_v10, %v18406_v23  ;;  %v18425_v28 = vcombine.high %v18346_v57, %v18346_v57  ;;  %v1528_v54 = vrot.slane %v1526_v46, 2 }
  0xfc   :  { %14478 = vmatprep.mubr.msk.f32.mxu1 %vm16631_vm2, %v25733_v27  ;;  %v18420_v62 = vrot.slane %v2275_v39, %v16753_v24  ;;  %v18431_v9 = vrot.slane %v780_v29, %v16753_v24  ;;  %v18435_v59 = vcombine.high %v18415_v40, %v18415_v40  ;;  %v13391_v32 = vrot.slane %v18415_v40, 9 }
  0xfd   :  { %v6943_v18 = vcombine.low %v6935_v37, %v6942_v42  ;;  %v18428_v10 = vrot.slane %v2276_v60, %v16753_v24  ;;  %v1529_v7 = vrot.slane %v18425_v28, 7  ;;  %v3045_v42 = vcombine.low %v16921_v53, %v16933_v11 }
  0xfe   :  { %25911 = vst [vmem:[#allocation222_spill] sm:$0xff] %v18420_v62  ;;  %25913 = vst [vmem:[#allocation224_spill] sm:$0xff] %v18431_v9  ;;  %v3046_v60 = vcombine.low %v16937_v20, %v16951_v4  ;;  %v18451_v37 = vcombine.high %v18431_v9, %v18431_v9  ;;  %v1533_v39 = vrot.slane %v18435_v59, 7  ;;  %v1536_v29 = vrot.slane %v18431_v9, 7 }
  0xff   :  { %25912 = vst [vmem:[#allocation223_spill] sm:$0xff] %v18428_v10  ;;  %25914 = vst [vmem:[#allocation225_spill] sm:$0xff] %v18435_v59  ;;  %15069 = vmatmul.mubr.msk.f32.gmra.mrb[60].mxu0 %vm2564_vm9, %v6943_v18  ;;  %v2291_v46 = vcombine.low %v18420_v62, %v18428_v10  ;;  %v7720_v44 = vcombine.low %v18409_v5, %v7719_v3  ;;  %v18460_v22 = vsel %vm16821_vm8, %v1528_v54, %v1529_v7  ;;  %v13735_v62 = vld [vmem:[%s24823_s1 + $0x18] sm:$0xf] }
 0x100   :  { %25915 = vst [vmem:[#allocation226_spill] sm:$0xff] %v18451_v37  ;;  %15127 = vmatprep.mubr.msk.f32.mxu0 %vm16631_vm2, %v25733_v27  ;;  %25916 = vst [vmem:[#allocation227_spill] sm:$0xff] %v18460_v22  ;;  %v18463_v18 = vrot.slane %v3045_v42, %v16753_v24  ;;  %v797_v10 = vcombine.high %v76_v49, %v76_v49  ;;  %v18471_v4 = vsel %vm16821_vm8, %v13391_v32, %v1533_v39 }
 0x101   :  { %14479 = vmatmul.mubr.msk.f32.gmra.mrb[64].mxu1 %vm2564_vm9, %v2291_v46  ;;  %25918 = vst [vmem:[#allocation229_spill] sm:$0xff] %v18471_v4  ;;  %v1535_v11 = vrot.slane %v1533_v39, 2  ;;  %v1538_v3 = vrot.slane %v1536_v29, 2  ;;  %v1539_v20 = vrot.slane %v18451_v37, 7  ;;  %v2292_v54 = vcombine.low %v18460_v22, %v18471_v4 }
 0x102   :  { %25917 = vst [vmem:[#allocation228_spill] sm:$0xff] %v18463_v18  ;;  %14481 = vmatprep.mubr.msk.f32.mxu1 %vm16631_vm2, %v25733_v27  ;;  %v18481_v42 = vrot.slane %v3046_v60, %v16753_v24  ;;  %v18484_v46 = vrot.slane %v76_v49, %v16753_v24  ;;  %v18497_v53 = vrot.slane %v797_v10, %v16753_v24 }
 0x103   :  { %15128 = vmatmul.mubr.msk.f32.vlgmr.msra.gmra.mrb[0].mxu0 %vm2564_vm9, %v18402_v41  ;;  %v18490_v32 = vsel %vm16821_vm8, %v1535_v11, %v1536_v29  ;;  %v18494_v39 = vsel %vm16821_vm8, %v1538_v3, %v1539_v20  ;;  %v1541_v7 = vrot.slane %v1539_v20, 2  ;;  %v18505_v60 = vrot.slane %v2292_v54, %v16753_v24  ;;  %v77_v3 = vld [vmem:[%s24822_s0 + $0x160] sm:$0xff] }
 0x104   :  { %25919 = vst [vmem:[#allocation230_spill] sm:$0xff] %v18481_v42  ;;  %25920 = vst [vmem:[#allocation231_spill] sm:$0xff] %v18484_v46  ;;  %15275 = vmatpush3.msk.msra.mxu0 %vm2663_vm0, %v13735_v62  ;;  %15130 = vmatprep.mubr.msk.f32.mxu0 %vm16631_vm2, %v25733_v27  ;;  %v2293_v49 = vcombine.low %v18490_v32, %v18494_v39  ;;  %v1542_v29 = vrot.slane %v18484_v46, 7  ;;  %v18512_v10 = vcombine.high %v18484_v46, %v18484_v46 }
 0x105   :  { %25921 = vst [vmem:[#allocation232_spill] sm:$0xff] %v18490_v32  ;;  %25922 = vst [vmem:[#allocation233_spill] sm:$0xff] %v18494_v39  ;;  %v18516_v20 = vcombine.high %v18497_v53, %v18497_v53  ;;  %v1548_v62 = vrot.slane %v18497_v53, 7  ;;  %15423 = vmatprep.subr.mxu0 %v25733_v27  ;;  %v18528_v11 = vcombine.low %v18463_v18, %v18481_v42 }
 0x106   :  { %25923 = vst [vmem:[#allocation234_spill] sm:$0xff] %v18497_v53  ;;  %25924 = vst [vmem:[#allocation235_spill] sm:$0xff] %v18505_v60  ;;  %v18524_v54 = vrot.slane %v2293_v49, %v16753_v24  ;;  %v18532_v39 = vsel %vm16821_vm8, %v1541_v7, %v1542_v29  ;;  %v1544_v32 = vrot.slane %v1542_v29, 2  ;;  %v1545_v4 = vrot.slane %v18512_v10, 7 }
 0x107   :  { %25925 = vst [vmem:[#allocation236_spill] sm:$0xff] %v18512_v10  ;;  %25926 = vst [vmem:[#allocation237_spill] sm:$0xff] %v18516_v20  ;;  %15131 = vmatmul.mubr.msk.f32.gmra.mrb[2].mxu0 %vm2564_vm9, %v7720_v44  ;;  %v1550_v22 = vrot.slane %v1548_v62, 2  ;;  %v1551_v23 = vrot.slane %v18516_v20, 7  ;;  %v3063_v49 = vcombine.low %v16989_v17, %v16976_v14  ;;  %v7721_v7 = vcombine.low %v16945_v1, %v16993_v26  ;;  %v78_v44 = vld [vmem:[%s24822_s0 + $0x168] sm:$0xff] }
 0x108   :  { %25927 = vst [vmem:[#allocation238_spill] sm:$0xff] %v18524_v54  ;;  %25928 = vst [vmem:[#allocation239_spill] sm:$0xff] %v18532_v39  ;;  %15133 = vmatprep.mubr.msk.f32.mxu0 %vm16631_vm2, %v25733_v27  ;;  %v2308_v50 = vcombine.low %v18505_v60, %v18524_v54  ;;  %v813_v29 = vcombine.high %v77_v3, %v77_v3  ;;  %v18549_v40 = vrot.slane %v77_v3, %v16753_v24 }
 0x109   :  { %v18553_v17 = vsel %vm16821_vm8, %v1544_v32, %v1545_v4  ;;  %v1547_v20 = vrot.slane %v1545_v4, 2  ;;  %v18557_v14 = vsel %vm16821_vm8, %v1550_v22, %v1551_v23  ;;  %v18560_v54 = vrot.slane %v3063_v49, %v16753_v24 }
 0x10a   :  { %25929 = vst [vmem:[#allocation240_spill] sm:$0xff] %v18549_v40  ;;  %25930 = vst [vmem:[#allocation241_spill] sm:$0xff] %v18553_v17  ;;  %14482 = vmatmul.mubr.msk.f32.gmra.mrb[66].mxu1 %vm2564_vm9, %v2308_v50  ;;  %v2309_v26 = vcombine.low %v18532_v39, %v18553_v17  ;;  %v7728_v3 = vrot.slane %v7721_v7, %v16753_v24  ;;  %v18567_v60 = vrot.slane %v813_v29, %v16753_v24 }
 0x10b   :  { %25931 = vst [vmem:[#allocation242_spill] sm:$0xff] %v18557_v14  ;;  %v18571_v4 = vcombine.high %v18549_v40, %v18549_v40  ;;  %15134 = vmatmul.mubr.msk.f32.gmra.mrb[4].mxu0 %vm2564_vm9, %v18528_v11  ;;  %14484 = vmatprep.mubr.msk.f32.mxu1 %vm16631_vm2, %v25733_v27  ;;  %v18579_v50 = vsel %vm16821_vm8, %v1547_v20, %v1548_v62  ;;  %v13392_v32 = vrot.slane %v18549_v40, 9 }
 0x10c   :  { %25932 = vst [vmem:[#allocation243_spill] sm:$0xff] %v18567_v60  ;;  %25934 = vst [vmem:[#allocation245_spill] sm:$0xff] %v18579_v50  ;;  %v830_v22 = vcombine.high %v78_v44, %v78_v44  ;;  %v18582_v23 = vrot.slane %v78_v44, %v16753_v24  ;;  %15136 = vmatprep.mubr.msk.f32.mxu0 %vm16631_vm2, %v25733_v27  ;;  %v2310_v49 = vcombine.low %v18579_v50, %v18557_v14 }
 0x10d   :  { %25933 = vst [vmem:[#allocation244_spill] sm:$0xff] %v18571_v4  ;;  %v18590_v7 = vrot.slane %v2309_v26, %v16753_v24  ;;  %v7729_v29 = vcombine.low %v7728_v3, %v18560_v54  ;;  %v18595_v20 = vcombine.high %v18567_v60, %v18567_v60  ;;  %v1555_v44 = vrot.slane %v18571_v4, 7 }
 0x10e   :  { %25935 = vst [vmem:[#allocation246_spill] sm:$0xff] %v18582_v23  ;;  %v18598_v62 = vrot.slane %v830_v22, %v16753_v24  ;;  %v1558_v17 = vrot.slane %v18567_v60, 7  ;;  %v1564_v39 = vrot.slane %v18582_v23, 7  ;;  %v18604_v14 = vrot.slane %v2310_v49, %v16753_v24  ;;  %v79_v22 = vld [vmem:[%s24822_s0 + $0x170] sm:$0xff] }
 0x10f   :  { %25936 = vst [vmem:[#allocation247_spill] sm:$0xff] %v18590_v7  ;;  %25937 = vst [vmem:[#allocation248_spill] sm:$0xff] %v18595_v20  ;;  %v1561_v26 = vrot.slane %v18595_v20, 7  ;;  %v3079_v3 = vcombine.low %v17008_v0, %v17021_v51  ;;  %v3080_v50 = vcombine.low %v17041_v21, %v17027_v52  ;;  %15137 = vmatmul.mubr.msk.f32.gmra.mrb[6].mxu0 %vm2564_vm9, %v7729_v29  ;;  %v1557_v49 = vrot.slane %v1555_v44, 2 }
 0x110   :  { %25938 = vst [vmem:[#allocation249_spill] sm:$0xff] %v18598_v62  ;;  %25939 = vst [vmem:[#allocation250_spill] sm:$0xff] %v18604_v14  ;;  %v18617_v4 = vsel %vm16821_vm8, %v13392_v32, %v1555_v44  ;;  %v1560_v42 = vrot.slane %v1558_v17, 2  ;;  %v18621_v18 = vcombine.high %v18582_v23, %v18582_v23  ;;  %v2325_v51 = vcombine.low %v18590_v7, %v18604_v14 }
 0x111   :  { %25940 = vst [vmem:[#allocation251_spill] sm:$0xff] %v18617_v4  ;;  %15139 = vmatprep.mubr.msk.f32.mxu0 %vm16631_vm2, %v25733_v27  ;;  %v1563_v21 = vrot.slane %v1561_v26, 2  ;;  %v18628_v0 = vrot.slane %v3079_v3, %v16753_v24  ;;  %v18631_v29 = vrot.slane %v3080_v50, %v16753_v24  ;;  %v18635_v32 = vsel %vm16821_vm8, %v1557_v49, %v1558_v17 }
 0x112   :  { %25941 = vst [vmem:[#allocation252_spill] sm:$0xff] %v18621_v18  ;;  %25944 = vst [vmem:[#allocation255_spill] sm:$0xff] %v18635_v32  ;;  %v18639_v44 = vsel %vm16821_vm8, %v1560_v42, %v1561_v26  ;;  %v18642_v14 = vrot.slane %v79_v22, %v16753_v24  ;;  %v18646_v7 = vcombine.high %v18598_v62, %v18598_v62  ;;  %14485 = vmatmul.mubr.msk.f32.gmra.mrb[68].mxu1 %vm2564_vm9, %v2325_v51 }
 0x113   :  { %25942 = vst [vmem:[#allocation253_spill] sm:$0xff] %v18628_v0  ;;  %25943 = vst [vmem:[#allocation254_spill] sm:$0xff] %v18631_v29  ;;  %v18651_v50 = vsel %vm16821_vm8, %v1563_v21, %v1564_v39  ;;  %v2326_v17 = vcombine.low %v18617_v4, %v18635_v32  ;;  %v18657_v42 = vcombine.low %v18628_v0, %v18631_v29  ;;  %v1566_v26 = vrot.slane %v1564_v39, 2 }
 0x114   :  { %25945 = vst [vmem:[#allocation256_spill] sm:$0xff] %v18639_v44  ;;  %25946 = vst [vmem:[#allocation257_spill] sm:$0xff] %v18642_v14  ;;  %14487 = vmatprep.mubr.msk.f32.mxu1 %vm16631_vm2, %v25733_v27  ;;  %v2327_v3 = vcombine.low %v18639_v44, %v18651_v50  ;;  %v18665_v51 = vcombine.high %v18642_v14, %v18642_v14  ;;  %v1567_v21 = vrot.slane %v18621_v18, 7  ;;  %v1570_v49 = vrot.slane %v18598_v62, 7 }
 0x115   :  { %25947 = vst [vmem:[#allocation258_spill] sm:$0xff] %v18646_v7  ;;  %25948 = vst [vmem:[#allocation259_spill] sm:$0xff] %v18651_v50  ;;  %v18670_v32 = vrot.slane %v2326_v17, %v16753_v24  ;;  %15140 = vmatmul.mubr.msk.f32.gmra.mrb[8].mxu0 %vm2564_vm9, %v18657_v42  ;;  %v1573_v39 = vrot.slane %v18646_v7, 7  ;;  %v13393_v4 = vrot.slane %v18642_v14, 9  ;;  %v3097_v50 = vcombine.low %v17066_v63, %v17085_v31 }
 0x116   :  { %25949 = vst [vmem:[#allocation260_spill] sm:$0xff] %v18665_v51  ;;  %v18679_v44 = vrot.slane %v2327_v3, %v16753_v24  ;;  %15142 = vmatprep.mubr.msk.f32.mxu0 %vm16631_vm2, %v25733_v27  ;;  %v18685_v17 = vsel %vm16821_vm8, %v1566_v26, %v1567_v21  ;;  %v1569_v29 = vrot.slane %v1567_v21, 2  ;;  %v1572_v0 = vrot.slane %v1570_v49, 2  ;;  %v80_v3 = vld [vmem:[%s24822_s0 + $0x178] sm:$0xff] }
 0x117   :  { %25950 = vst [vmem:[#allocation261_spill] sm:$0xff] %v18670_v32  ;;  %25952 = vst [vmem:[#allocation263_spill] sm:$0xff] %v18685_v17  ;;  %v1577_v2 = vrot.slane %v18665_v51, 7  ;;  %v18689_v62 = vrot.slane %v3097_v50, %v16753_v24  ;;  %v13672_v31 = vcombine.high %v17027_v52, %v17056_v15  ;;  %v846_v63 = vcombine.high %v79_v22, %v79_v22 }
 0x118   :  { %25951 = vst [vmem:[#allocation262_spill] sm:$0xff] %v18679_v44  ;;  %v2342_v14 = vcombine.low %v18670_v32, %v18679_v44  ;;  %v18700_v26 = vsel %vm16821_vm8, %v1569_v29, %v1570_v49  ;;  %v18704_v21 = vsel %vm16821_vm8, %v1572_v0, %v1573_v39  ;;  %v863_v50 = vcombine.high %v80_v3, %v80_v3 }
 0x119   :  { %25953 = vst [vmem:[#allocation264_spill] sm:$0xff] %v18700_v26  ;;  %25954 = vst [vmem:[#allocation265_spill] sm:$0xff] %v18704_v21  ;;  %v18708_v52 = vsel %vm16821_vm8, %v13393_v4, %v1577_v2  ;;  %v2343_v51 = vcombine.low %v18685_v17, %v18700_v26  ;;  %v7737_v22 = vrot.slane %v13672_v31, %v16753_v24  ;;  %v1579_v4 = vrot.slane %v1577_v2, 2 }
 0x11a   :  { %25955 = vst [vmem:[#allocation266_spill] sm:$0xff] %v18708_v52  ;;  %v18714_v44 = vrot.slane %v846_v63, %v16753_v24  ;;  %14488 = vmatmul.mubr.msk.f32.gmra.mrb[70].mxu1 %vm2564_vm9, %v2342_v14  ;;  %v2344_v29 = vcombine.low %v18704_v21, %v18708_v52  ;;  %v18720_v0 = vrot.slane %v80_v3, %v16753_v24  ;;  %v81_v21 = vld [vmem:[%s24822_s0 + $0x180] sm:$0xff] }
 0x11b   :  { %v18723_v49 = vrot.slane %v863_v50, %v16753_v24  ;;  %14490 = vmatprep.mubr.msk.f32.mxu1 %vm16631_vm2, %v25733_v27  ;;  %v18728_v31 = vrot.slane %v2343_v51, %v16753_v24  ;;  %v7738_v63 = vcombine.low %v7737_v22, %v18689_v62  ;;  %v3113_v51 = vcombine.low %v17105_v55, %v17128_v6 }
 0x11c   :  { %25956 = vst [vmem:[#allocation267_spill] sm:$0xff] %v18714_v44  ;;  %25957 = vst [vmem:[#allocation268_spill] sm:$0xff] %v18720_v0  ;;  %v18733_v14 = vcombine.high %v18714_v44, %v18714_v44  ;;  %v1580_v39 = vrot.slane %v18714_v44, 7  ;;  %v18737_v3 = vrot.slane %v2344_v29, %v16753_v24  ;;  %v18741_v2 = vcombine.high %v18720_v0, %v18720_v0 }
 0x11d   :  { %25958 = vst [vmem:[#allocation269_spill] sm:$0xff] %v18723_v49  ;;  %25959 = vst [vmem:[#allocation270_spill] sm:$0xff] %v18728_v31  ;;  %v1586_v50 = vrot.slane %v18720_v0, 7  ;;  %15143 = vmatmul.mubr.msk.f32.gmra.mrb[10].mxu0 %vm2564_vm9, %v7738_v63  ;;  %v7739_v29 = vcombine.low %v17124_v19, %v17139_v8  ;;  %v879_v55 = vcombine.high %v81_v21, %v81_v21 }
 0x11e   :  { %25960 = vst [vmem:[#allocation271_spill] sm:$0xff] %v18733_v14  ;;  %25961 = vst [vmem:[#allocation272_spill] sm:$0xff] %v18737_v3  ;;  %v18749_v22 = vsel %vm16821_vm8, %v1579_v4, %v1580_v39  ;;  %v1582_v52 = vrot.slane %v1580_v39, 2  ;;  %v1583_v26 = vrot.slane %v18733_v14, 7  ;;  %v2359_v17 = vcombine.low %v18728_v31, %v18737_v3  ;;  %15145 = vmatprep.mubr.msk.f32.mxu0 %vm16631_vm2, %v25733_v27 }
 0x11f   :  { %25962 = vst [vmem:[#allocation273_spill] sm:$0xff] %v18741_v2  ;;  %25963 = vst [vmem:[#allocation274_spill] sm:$0xff] %v18749_v22  ;;  %v1588_v63 = vrot.slane %v1586_v50, 2  ;;  %v1589_v4 = vrot.slane %v18741_v2, 7  ;;  %v18763_v39 = vrot.slane %v3113_v51, %v16753_v24  ;;  %v7746_v6 = vrot.slane %v7739_v29, %v16753_v24 }
 0x120   :  { %v18767_v32 = vsel %vm16821_vm8, %v1582_v52, %v1583_v26  ;;  %v1585_v8 = vrot.slane %v1583_v26, 2  ;;  %14491 = vmatmul.mubr.msk.f32.gmra.mrb[72].mxu1 %vm2564_vm9, %v2359_v17  ;;  %v18778_v51 = vrot.slane %v81_v21, %v16753_v24  ;;  %v18782_v52 = vcombine.high %v18723_v49, %v18723_v49 }
 0x121   :  { %25964 = vst [vmem:[#allocation275_spill] sm:$0xff] %v18767_v32  ;;  %v18773_v3 = vsel %vm16821_vm8, %v1588_v63, %v1589_v4  ;;  %v2360_v31 = vcombine.low %v18749_v22, %v18767_v32  ;;  %14493 = vmatprep.mubr.msk.f32.mxu1 %vm16631_vm2, %v25733_v27  ;;  %v7747_v26 = vcombine.low %v18763_v39, %v7746_v6  ;;  %v1591_v63 = vrot.slane %v1589_v4, 2 }
 0x122   :  { %25965 = vst [vmem:[#allocation276_spill] sm:$0xff] %v18773_v3  ;;  %25966 = vst [vmem:[#allocation277_spill] sm:$0xff] %v18778_v51  ;;  %v18788_v17 = vsel %vm16821_vm8, %v1585_v8, %v1586_v50  ;;  %v18792_v29 = vrot.slane %v879_v55, %v16753_v24  ;;  %v18801_v22 = vcombine.high %v18778_v51, %v18778_v51  ;;  %v1592_v2 = vrot.slane %v18723_v49, 7 }
 0x123   :  { %25967 = vst [vmem:[#allocation278_spill] sm:$0xff] %v18782_v52  ;;  %25968 = vst [vmem:[#allocation279_spill] sm:$0xff] %v18788_v17  ;;  %v2361_v21 = vcombine.low %v18788_v17, %v18773_v3  ;;  %v18797_v32 = vrot.slane %v2360_v31, %v16753_v24  ;;  %15146 = vmatmul.mubr.msk.f32.gmra.mrb[12].mxu0 %vm2564_vm9, %v7747_v26  ;;  %v1595_v6 = vrot.slane %v18782_v52, 7  ;;  %v13394_v55 = vrot.slane %v18778_v51, 9  ;;  %v82_v17 = vld [vmem:[%s24822_s0 + $0x188] sm:$0xff] }
 0x124   :  { %25969 = vst [vmem:[#allocation280_spill] sm:$0xff] %v18792_v29  ;;  %25971 = vst [vmem:[#allocation282_spill] sm:$0xff] %v18801_v22  ;;  %v1602_v50 = vrot.slane %v18792_v29, 7  ;;  %v3130_v4 = vcombine.low %v17172_v25, %v17168_v30  ;;  %15148 = vmatprep.mubr.msk.f32.mxu0 %vm16631_vm2, %v25733_v27  ;;  %v18817_v8 = vsel %vm16821_vm8, %v1591_v63, %v1592_v2  ;;  %v1594_v26 = vrot.slane %v1592_v2, 2 }
 0x125   :  { %25970 = vst [vmem:[#allocation281_spill] sm:$0xff] %v18797_v32  ;;  %v18811_v31 = vrot.slane %v2361_v21, %v16753_v24  ;;  %25973 = vst [vmem:[#allocation284_spill] sm:$0xff] %v18817_v8  ;;  %v1599_v3 = vrot.slane %v18801_v22, 7  ;;  %v3131_v25 = vcombine.low %v17188_v58, %v17182_v48  ;;  %v18830_v52 = vcombine.high %v18792_v29, %v18792_v29 }
 0x126   :  { %v18826_v21 = vrot.slane %v3130_v4, %v16753_v24  ;;  %v896_v30 = vcombine.high %v82_v17, %v82_v17  ;;  %v18836_v63 = vsel %vm16821_vm8, %v1594_v26, %v1595_v6  ;;  %v18848_v29 = vrot.slane %v82_v17, %v16753_v24 }
 0x127   :  { %25972 = vst [vmem:[#allocation283_spill] sm:$0xff] %v18811_v31  ;;  %25975 = vst [vmem:[#allocation286_spill] sm:$0xff] %v18830_v52  ;;  %v2376_v2 = vcombine.low %v18797_v32, %v18811_v31  ;;  %v18840_v22 = vsel %vm16821_vm8, %v13394_v55, %v1599_v3  ;;  %v1601_v48 = vrot.slane %v1599_v3, 2  ;;  %v2377_v4 = vcombine.low %v18817_v8, %v18836_v63 }
 0x128   :  { %25974 = vst [vmem:[#allocation285_spill] sm:$0xff] %v18826_v21  ;;  %25976 = vst [vmem:[#allocation287_spill] sm:$0xff] %v18836_v63  ;;  %v18845_v58 = vrot.slane %v3131_v25, %v16753_v24  ;;  %v18851_v31 = vrot.slane %v896_v30, %v16753_v24  ;;  %v1604_v55 = vrot.slane %v1602_v50, 2  ;;  %v1605_v3 = vrot.slane %v18830_v52, 7  ;;  %v25997_v52 = vld [vmem:[#allocation69_spill] sm:$0xff] }
 0x129   :  { %25977 = vst [vmem:[#allocation288_spill] sm:$0xff] %v18840_v22  ;;  %25979 = vst [vmem:[#allocation290_spill] sm:$0xff] %v18848_v29  ;;  %14494 = vmatmul.mubr.msk.f32.gmra.mrb[74].mxu1 %vm2564_vm9, %v2376_v2  ;;  %v18856_v6 = vsel %vm16821_vm8, %v1601_v48, %v1602_v50  ;;  %v3147_v26 = vcombine.low %v17213_v34, %v17194_v56  ;;  %v18866_v30 = vrot.slane %v2377_v4, %v16753_v24  ;;  %v83_v50 = vld [vmem:[%s24822_s0 + $0x190] sm:$0xff] }
 0x12a   :  { %25978 = vst [vmem:[#allocation289_spill] sm:$0xff] %v18845_v58  ;;  %25980 = vst [vmem:[#allocation291_spill] sm:$0xff] %v18851_v31  ;;  %14496 = vmatprep.mubr.msk.f32.mxu1 %vm16631_vm2, %v25733_v27  ;;  %v2378_v25 = vcombine.low %v18840_v22, %v18856_v6  ;;  %v18870_v17 = vcombine.low %v18826_v21, %v18845_v58  ;;  %v18874_v48 = vcombine.high %v18848_v29, %v18848_v29 }
 0x12b   :  { %25981 = vst [vmem:[#allocation292_spill] sm:$0xff] %v18856_v6  ;;  %25982 = vst [vmem:[#allocation293_spill] sm:$0xff] %v18866_v30  ;;  %v18881_v2 = vsel %vm16821_vm8, %v1604_v55, %v1605_v3  ;;  %v1607_v6 = vrot.slane %v1605_v3, 2  ;;  %v1608_v4 = vrot.slane %v18848_v29, 7  ;;  %v1614_v63 = vrot.slane %v18851_v31, 7 }
 0x12c   :  { %25983 = vst [vmem:[#allocation294_spill] sm:$0xff] %v18874_v48  ;;  %25984 = vst [vmem:[#allocation295_spill] sm:$0xff] %v18881_v2  ;;  %v18886_v22 = vrot.slane %v2378_v25, %v16753_v24  ;;  %15149 = vmatmul.mubr.msk.f32.gmra.mrb[14].mxu0 %vm2564_vm9, %v18870_v17  ;;  %v1611_v8 = vrot.slane %v18874_v48, 7  ;;  %v18892_v32 = vrot.slane %v3147_v26, %v16753_v24 }
 0x12d   :  { %v13673_v55 = vcombine.high %v17194_v56, %v17225_v16  ;;  %15151 = vmatprep.mubr.msk.f32.mxu0 %vm16631_vm2, %v25733_v27  ;;  %v18900_v3 = vsel %vm16821_vm8, %v1607_v6, %v1608_v4  ;;  %v1610_v25 = vrot.slane %v1608_v4, 2  ;;  %v912_v34 = vcombine.high %v83_v50, %v83_v50 }
 0x12e   :  { %25985 = vst [vmem:[#allocation296_spill] sm:$0xff] %v18886_v22  ;;  %25986 = vst [vmem:[#allocation297_spill] sm:$0xff] %v18900_v3  ;;  %v18903_v58 = vrot.slane %v83_v50, %v16753_v24  ;;  %v2393_v21 = vcombine.low %v18866_v30, %v18886_v22  ;;  %v1613_v26 = vrot.slane %v1611_v8, 2  ;;  %v2394_v29 = vcombine.low %v18881_v2, %v18900_v3  ;;  %v84_v3 = vld [vmem:[%s24822_s0 + $0x198] sm:$0xff] }
 0x12f   :  { %v7755_v56 = vrot.slane %v13673_v55, %v16753_v24  ;;  %v18912_v48 = vsel %vm16821_vm8, %v1610_v25, %v1611_v8  ;;  %v18915_v6 = vrot.slane %v912_v34, %v16753_v24  ;;  %v18923_v4 = vcombine.high %v18851_v31, %v18851_v31  ;;  %v25995_v22 = vld [vmem:[#allocation68_spill] sm:$0xff] }
 0x130   :  { %25987 = vst [vmem:[#allocation298_spill] sm:$0xff] %v18903_v58  ;;  %25988 = vst [vmem:[#allocation299_spill] sm:$0xff] %v18912_v48  ;;  %v18919_v50 = vcombine.high %v18903_v58, %v18903_v58  ;;  %14497 = vmatmul.mubr.msk.f32.gmra.mrb[76].mxu1 %vm2564_vm9, %v2393_v21  ;;  %v18928_v55 = vsel %vm16821_vm8, %v1613_v26, %v1614_v63  ;;  %v18931_v8 = vrot.slane %v2394_v29, %v16753_v24  ;;  %v25996_v31 = vld [vmem:[#allocation72_spill] sm:$0xff] }
 0x131   :  { %25989 = vst [vmem:[#allocation300_spill] sm:$0xff] %v18915_v6  ;;  %25991 = vst [vmem:[#allocation302_spill] sm:$0xff] %v18923_v4  ;;  %v7756_v34 = vcombine.low %v18892_v32, %v7755_v56  ;;  %v1616_v25 = vrot.slane %v1614_v63, 2  ;;  %14499 = vmatprep.mubr.msk.f32.mxu1 %vm16631_vm2, %v25733_v27  ;;  %v2395_v21 = vcombine.low %v18912_v48, %v18928_v55  ;;  %v1617_v29 = vrot.slane %v18923_v4, 7 }
 0x132   :  { %25990 = vst [vmem:[#allocation301_spill] sm:$0xff] %v18919_v50  ;;  %25992 = vst [vmem:[#allocation303_spill] sm:$0xff] %v18928_v55  ;;  %v18943_v26 = vcombine.high %v18915_v6, %v18915_v6  ;;  %v13395_v2 = vrot.slane %v18903_v58, 9  ;;  %v1621_v56 = vrot.slane %v18919_v50, 7  ;;  %v1624_v63 = vrot.slane %v18915_v6, 7 }
 0x133   :  { %25993 = vst [vmem:[#allocation304_spill] sm:$0xff] %v18931_v8  ;;  %15152 = vmatmul.mubr.msk.f32.gmra.mrb[16].mxu0 %vm2564_vm9, %v7756_v34  ;;  %v3164_v30 = vcombine.low %v25995_v22, %v17293_v47  ;;  %v3165_v55 = vcombine.low %v25997_v52, %v25996_v31  ;;  %v18955_v48 = vrot.slane %v2395_v21, %v16753_v24 }
 0x134   :  { %25994 = vst [vmem:[#allocation305_spill] sm:$0xff] %v18943_v26  ;;  %15154 = vmatprep.mubr.msk.f32.mxu0 %vm16631_vm2, %v25733_v27  ;;  %v18961_v58 = vsel %vm16821_vm8, %v1616_v25, %v1617_v29  ;;  %v1627_v34 = vrot.slane %v18943_v26, 7  ;;  %v929_v4 = vcombine.high %v84_v3, %v84_v3  ;;  %v18966_v50 = vsel %vm16821_vm8, %v13395_v2, %v1621_v56 }
 0x135   :  { %25998 = vst [vmem:[#allocation306_spill] sm:$0xff] %v18955_v48  ;;  %25999 = vst [vmem:[#allocation307_spill] sm:$0xff] %v18961_v58  ;;  %v1623_v47 = vrot.slane %v1621_v56, 2  ;;  %v1626_v22 = vrot.slane %v1624_v63, 2  ;;  %v18969_v31 = vrot.slane %v3164_v30, %v16753_v24  ;;  %v2410_v21 = vcombine.low %v18931_v8, %v18955_v48  ;;  %v26013_v8 = vld [vmem:[#allocation77_spill] sm:$0xff] }
 0x136   :  { %26000 = vst [vmem:[#allocation308_spill] sm:$0xff] %v18966_v50  ;;  %v2411_v52 = vcombine.low %v18961_v58, %v18966_v50  ;;  %v18976_v25 = vrot.slane %v3165_v55, %v16753_v24  ;;  %v18979_v29 = vrot.slane %v84_v3, %v16753_v24  ;;  %v18990_v56 = vrot.slane %v929_v4, %v16753_v24  ;;  %v85_v55 = vld [vmem:[%s24822_s0 + $0x1a0] sm:$0xff] }
 0x137   :  { %26001 = vst [vmem:[#allocation309_spill] sm:$0xff] %v18969_v31  ;;  %v18983_v2 = vsel %vm16821_vm8, %v1623_v47, %v1624_v63  ;;  %v18987_v30 = vsel %vm16821_vm8, %v1626_v22, %v1627_v34  ;;  %v1629_v48 = vrot.slane %v1627_v34, 2  ;;  %14500 = vmatmul.mubr.msk.f32.gmra.mrb[78].mxu1 %vm2564_vm9, %v2410_v21  ;;  %v26010_v21 = vld [vmem:[#allocation75_spill] sm:$0xff]  ;;  %v945_v26 = vcombine.high %v85_v55, %v85_v55 }
 0x138   :  { %26002 = vst [vmem:[#allocation310_spill] sm:$0xff] %v18976_v25  ;;  %26003 = vst [vmem:[#allocation311_spill] sm:$0xff] %v18979_v29  ;;  %v2412_v3 = vcombine.low %v18983_v2, %v18987_v30  ;;  %v18999_v47 = vrot.slane %v2411_v52, %v16753_v24  ;;  %v19003_v22 = vcombine.low %v18969_v31, %v18976_v25  ;;  %14502 = vmatprep.mubr.msk.f32.mxu1 %vm16631_vm2, %v25733_v27  ;;  %v26014_v25 = vld [vmem:[#allocation70_spill] sm:$0xff] }
 0x139   :  { %26004 = vst [vmem:[#allocation312_spill] sm:$0xff] %v18983_v2  ;;  %26005 = vst [vmem:[#allocation313_spill] sm:$0xff] %v18987_v30  ;;  %v19007_v4 = vcombine.high %v18979_v29, %v18979_v29  ;;  %v19013_v63 = vcombine.high %v18990_v56, %v18990_v56  ;;  %v1630_v34 = vrot.slane %v18979_v29, 7  ;;  %v1636_v52 = vrot.slane %v18990_v56, 7  ;;  %v26011_v30 = vld [vmem:[#allocation76_spill] sm:$0xff]  ;;  %v86_v29 = vld [vmem:[%s24822_s0 + $0x1a8] sm:$0xff] }
 0x13a   :  { %26006 = vst [vmem:[#allocation314_spill] sm:$0xff] %v18990_v56  ;;  %26007 = vst [vmem:[#allocation315_spill] sm:$0xff] %v18999_v47  ;;  %v3182_v50 = vcombine.low %v26011_v30, %v26010_v21  ;;  %v19020_v2 = vrot.slane %v2412_v3, %v16753_v24  ;;  %15155 = vmatmul.mubr.msk.f32.gmra.mrb[18].mxu0 %vm2564_vm9, %v19003_v22  ;;  %v7757_v31 = vcombine.low %v26014_v25, %v26013_v8 }
 0x13b   :  { %26008 = vst [vmem:[#allocation316_spill] sm:$0xff] %v19007_v4  ;;  %26009 = vst [vmem:[#allocation317_spill] sm:$0xff] %v19013_v63  ;;  %v1633_v58 = vrot.slane %v19007_v4, 7  ;;  %15157 = vmatprep.mubr.msk.f32.mxu0 %vm16631_vm2, %v25733_v27  ;;  %v19031_v56 = vsel %vm16821_vm8, %v1629_v48, %v1630_v34  ;;  %v1632_v30 = vrot.slane %v1630_v34, 2  ;;  %v1638_v21 = vrot.slane %v1636_v52, 2 }
 0x13c   :  { %26012 = vst [vmem:[#allocation318_spill] sm:$0xff] %v19020_v2  ;;  %26015 = vst [vmem:[#allocation77_spill] sm:$0xff] %v19031_v56  ;;  %v1639_v3 = vrot.slane %v19013_v63, 7  ;;  %v2427_v4 = vcombine.low %v18999_v47, %v19020_v2  ;;  %v19040_v6 = vrot.slane %v3182_v50, %v16753_v24  ;;  %v7764_v51 = vrot.slane %v7757_v31, %v16753_v24  ;;  %v26029_v47 = vld [vmem:[#allocation83_spill] sm:$0xff] }
 0x13d   :  { %v1635_v8 = vrot.slane %v1633_v58, 2  ;;  %v19045_v48 = vsel %vm16821_vm8, %v1632_v30, %v1633_v58  ;;  %v19052_v63 = vrot.slane %v85_v55, %v16753_v24  ;;  %v19055_v49 = vrot.slane %v945_v26, %v16753_v24 }
 0x13e   :  { %26016 = vst [vmem:[#allocation319_spill] sm:$0xff] %v19045_v48  ;;  %v19049_v34 = vsel %vm16821_vm8, %v1638_v21, %v1639_v3  ;;  %14503 = vmatmul.mubr.msk.f32.gmra.mrb[80].mxu1 %vm2564_vm9, %v2427_v4  ;;  %v2428_v58 = vcombine.low %v19031_v56, %v19045_v48  ;;  %v7765_v31 = vcombine.low %v7764_v51, %v19040_v6  ;;  %v26028_v56 = vld [vmem:[#allocation80_spill] sm:$0xff] }
 0x13f   :  { %26017 = vst [vmem:[#allocation320_spill] sm:$0xff] %v19049_v34  ;;  %26018 = vst [vmem:[#allocation321_spill] sm:$0xff] %v19052_v63  ;;  %v19060_v50 = vsel %vm16821_vm8, %v1635_v8, %v1636_v52  ;;  %v962_v30 = vcombine.high %v86_v29, %v86_v29  ;;  %14505 = vmatprep.mubr.msk.f32.mxu1 %vm16631_vm2, %v25733_v27  ;;  %v19071_v26 = vcombine.high %v19052_v63, %v19052_v63 }
 0x140   :  { %26019 = vst [vmem:[#allocation322_spill] sm:$0xff] %v19055_v49  ;;  %26020 = vst [vmem:[#allocation323_spill] sm:$0xff] %v19060_v50  ;;  %v2429_v55 = vcombine.low %v19060_v50, %v19049_v34  ;;  %v19075_v4 = vcombine.high %v19055_v49, %v19055_v49  ;;  %v19078_v52 = vrot.slane %v86_v29, %v16753_v24  ;;  %15158 = vmatmul.mubr.msk.f32.gmra.mrb[20].mxu0 %vm2564_vm9, %v7765_v31  ;;  %v87_v31 = vld [vmem:[%s24822_s0 + $0x1b0] sm:$0xff] }
 0x141   :  { %26021 = vst [vmem:[#allocation324_spill] sm:$0xff] %v19071_v26  ;;  %v19081_v51 = vrot.slane %v2428_v58, %v16753_v24  ;;  %v19085_v21 = vrot.slane %v962_v30, %v16753_v24  ;;  %v13396_v3 = vrot.slane %v19052_v63, 9  ;;  %v1646_v8 = vrot.slane %v19055_v49, 7  ;;  %15160 = vmatprep.mubr.msk.f32.mxu0 %vm16631_vm2, %v25733_v27  ;;  %v26027_v50 = vld [vmem:[#allocation82_spill] sm:$0xff] }
 0x142   :  { %26022 = vst [vmem:[#allocation325_spill] sm:$0xff] %v19075_v4  ;;  %26023 = vst [vmem:[#allocation326_spill] sm:$0xff] %v19078_v52  ;;  %v19090_v34 = vrot.slane %v2429_v55, %v16753_v24  ;;  %v1643_v29 = vrot.slane %v19071_v26, 7  ;;  %v1649_v58 = vrot.slane %v19075_v4, 7  ;;  %v1652_v48 = vrot.slane %v19078_v52, 7  ;;  %v26030_v55 = vld [vmem:[#allocation84_spill] sm:$0xff] }
 0x143   :  { %26024 = vst [vmem:[#allocation327_spill] sm:$0xff] %v19081_v51  ;;  %26025 = vst [vmem:[#allocation328_spill] sm:$0xff] %v19085_v21  ;;  %v1648_v30 = vrot.slane %v1646_v8, 2  ;;  %v3198_v2 = vcombine.low %v26028_v56, %v26027_v50  ;;  %v3199_v63 = vcombine.low %v26030_v55, %v26029_v47  ;;  %v19106_v49 = vcombine.high %v19078_v52, %v19078_v52 }
 0x144   :  { %26026 = vst [vmem:[#allocation329_spill] sm:$0xff] %v19090_v34  ;;  %v2444_v26 = vcombine.low %v19081_v51, %v19090_v34  ;;  %v19112_v4 = vsel %vm16821_vm8, %v13396_v3, %v1643_v29  ;;  %v1645_v14 = vrot.slane %v1643_v29, 2  ;;  %v1651_v0 = vrot.slane %v1649_v58, 2  ;;  %v26045_v51 = vld [vmem:[#allocation87_spill] sm:$0xff] }
 0x145   :  { %26031 = vst [vmem:[#allocation330_spill] sm:$0xff] %v19106_v49  ;;  %26032 = vst [vmem:[#allocation331_spill] sm:$0xff] %v19112_v4  ;;  %v19116_v44 = vsel %vm16821_vm8, %v1648_v30, %v1649_v58  ;;  %v19119_v50 = vrot.slane %v3198_v2, %v16753_v24  ;;  %v19122_v55 = vrot.slane %v3199_v63, %v16753_v24  ;;  %v1654_v58 = vrot.slane %v1652_v48, 2 }
 0x146   :  { %26033 = vst [vmem:[#allocation332_spill] sm:$0xff] %v19116_v44  ;;  %v19125_v56 = vrot.slane %v87_v31, %v16753_v24  ;;  %14506 = vmatmul.mubr.msk.f32.gmra.mrb[82].mxu1 %vm2564_vm9, %v2444_v26  ;;  %v19130_v3 = vsel %vm16821_vm8, %v1645_v14, %v1646_v8  ;;  %v19134_v29 = vsel %vm16821_vm8, %v1651_v0, %v1652_v48  ;;  %v1655_v8 = vrot.slane %v19106_v49, 7 }
 0x147   :  { %26034 = vst [vmem:[#allocation333_spill] sm:$0xff] %v19119_v50  ;;  %26035 = vst [vmem:[#allocation334_spill] sm:$0xff] %v19122_v55  ;;  %v19138_v2 = vcombine.high %v19085_v21, %v19085_v21  ;;  %14508 = vmatprep.mubr.msk.f32.mxu1 %vm16631_vm2, %v25733_v27  ;;  %v2445_v63 = vcombine.low %v19112_v4, %v19130_v3  ;;  %v2446_v26 = vcombine.low %v19116_v44, %v19134_v29  ;;  %v26044_v4 = vld [vmem:[#allocation91_spill] sm:$0xff] }
 0x148   :  { %26036 = vst [vmem:[#allocation335_spill] sm:$0xff] %v19125_v56  ;;  %26037 = vst [vmem:[#allocation336_spill] sm:$0xff] %v19130_v3  ;;  %v19148_v14 = vcombine.low %v19119_v50, %v19122_v55  ;;  %v19152_v0 = vcombine.high %v19125_v56, %v19125_v56  ;;  %v1658_v48 = vrot.slane %v19085_v21, 7  ;;  %v13397_v34 = vrot.slane %v19125_v56, 9  ;;  %v26047_v21 = vld [vmem:[#allocation86_spill] sm:$0xff] }
 0x149   :  { %26038 = vst [vmem:[#allocation337_spill] sm:$0xff] %v19134_v29  ;;  %26039 = vst [vmem:[#allocation338_spill] sm:$0xff] %v19138_v2  ;;  %v1661_v30 = vrot.slane %v19138_v2, 7  ;;  %v19159_v3 = vrot.slane %v2445_v63, %v16753_v24  ;;  %v19162_v29 = vrot.slane %v2446_v26, %v16753_v24  ;;  %v3216_v55 = vcombine.low %v26045_v51, %v26044_v4  ;;  %v88_v2 = vld [vmem:[%s24822_s0 + $0x1b8] sm:$0xff] }
 0x14a   :  { %26040 = vst [vmem:[#allocation339_spill] sm:$0xff] %v19148_v14  ;;  %26041 = vst [vmem:[#allocation340_spill] sm:$0xff] %v19152_v0  ;;  %15161 = vmatmul.mubr.msk.f32.gmra.mrb[22].mxu0 %vm2564_vm9, %v19148_v14  ;;  %v1665_v44 = vrot.slane %v19152_v0, 7  ;;  %v19173_v56 = vsel %vm16821_vm8, %v1654_v58, %v1655_v8  ;;  %v1657_v63 = vrot.slane %v1655_v8, 2  ;;  %v1660_v50 = vrot.slane %v1658_v48, 2 }
 0x14b   :  { %26042 = vst [vmem:[#allocation341_spill] sm:$0xff] %v19159_v3  ;;  %26043 = vst [vmem:[#allocation342_spill] sm:$0xff] %v19162_v29  ;;  %15163 = vmatprep.mubr.msk.f32.mxu0 %vm16631_vm2, %v25733_v27  ;;  %v13674_v26 = vcombine.high %v26029_v47, %v26047_v21  ;;  %v2461_v0 = vcombine.low %v19159_v3, %v19162_v29  ;;  %v19187_v51 = vrot.slane %v3216_v55, %v16753_v24  ;;  %v89_v29 = vld [vmem:[%s24822_s0 + $0x1c0] sm:$0xff] }
 0x14c   :  { %26046 = vst [vmem:[#allocation343_spill] sm:$0xff] %v19173_v56  ;;  %v19184_v4 = vsel %vm16821_vm8, %v13397_v34, %v1665_v44  ;;  %v978_v58 = vcombine.high %v87_v31, %v87_v31  ;;  %v19191_v8 = vsel %vm16821_vm8, %v1657_v63, %v1658_v48  ;;  %v19195_v47 = vsel %vm16821_vm8, %v1660_v50, %v1661_v30  ;;  %v26055_v63 = vld [vmem:[#allocation96_spill] sm:$0xff] }
 0x14d   :  { %26048 = vst [vmem:[#allocation344_spill] sm:$0xff] %v19184_v4  ;;  %26049 = vst [vmem:[#allocation345_spill] sm:$0xff] %v19187_v51  ;;  %v7773_v52 = vrot.slane %v13674_v26, %v16753_v24  ;;  %v995_v49 = vcombine.high %v88_v2, %v88_v2  ;;  %14509 = vmatmul.mubr.msk.f32.gmra.mrb[84].mxu1 %vm2564_vm9, %v2461_v0  ;;  %v2462_v34 = vcombine.low %v19173_v56, %v19191_v8  ;;  %v26056_v26 = vld [vmem:[#allocation94_spill] sm:$0xff] }
 0x14e   :  { %26050 = vst [vmem:[#allocation346_spill] sm:$0xff] %v19191_v8  ;;  %26051 = vst [vmem:[#allocation347_spill] sm:$0xff] %v19195_v47  ;;  %v2463_v55 = vcombine.low %v19195_v47, %v19184_v4  ;;  %v19204_v31 = vrot.slane %v978_v58, %v16753_v24  ;;  %v19207_v48 = vrot.slane %v88_v2, %v16753_v24  ;;  %14511 = vmatprep.mubr.msk.f32.mxu1 %vm16631_vm2, %v25733_v27  ;;  %v26062_v47 = vld [vmem:[#allocation97_spill] sm:$0xff] }
 0x14f   :  { %v7774_v50 = vcombine.low %v7773_v52, %v19187_v51  ;;  %v19213_v30 = vrot.slane %v995_v49, %v16753_v24  ;;  %v1667_v0 = vrot.slane %v1665_v44, 2  ;;  %v3232_v8 = vcombine.low %v26056_v26, %v26055_v63 }
 0x150   :  { %26052 = vst [vmem:[#allocation348_spill] sm:$0xff] %v19204_v31  ;;  %26053 = vst [vmem:[#allocation349_spill] sm:$0xff] %v19207_v48  ;;  %v19218_v4 = vrot.slane %v2462_v34, %v16753_v24  ;;  %v19221_v58 = vrot.slane %v2463_v55, %v16753_v24  ;;  %v19225_v2 = vcombine.high %v19204_v31, %v19204_v31  ;;  %v1668_v44 = vrot.slane %v19204_v31, 7  ;;  %v26063_v55 = vld [vmem:[#allocation95_spill] sm:$0xff] }
 0x151   :  { %26054 = vst [vmem:[#allocation350_spill] sm:$0xff] %v19213_v30  ;;  %v19229_v52 = vcombine.high %v19207_v48, %v19207_v48  ;;  %15164 = vmatmul.mubr.msk.f32.gmra.mrb[24].mxu0 %vm2564_vm9, %v7774_v50  ;;  %v1674_v49 = vrot.slane %v19207_v48, 7  ;;  %v19235_v34 = vrot.slane %v3232_v8, %v16753_v24  ;;  %v7775_v56 = vcombine.low %v26063_v55, %v26062_v47 }
 0x152   :  { %26057 = vst [vmem:[#allocation351_spill] sm:$0xff] %v19218_v4  ;;  %26058 = vst [vmem:[#allocation352_spill] sm:$0xff] %v19221_v58  ;;  %v2478_v3 = vcombine.low %v19218_v4, %v19221_v58  ;;  %15166 = vmatprep.mubr.msk.f32.mxu0 %vm16631_vm2, %v25733_v27  ;;  %v1671_v50 = vrot.slane %v19225_v2, 7  ;;  %v1011_v26 = vcombine.high %v89_v29, %v89_v29  ;;  %v1670_v47 = vrot.slane %v1668_v44, 2 }
 0x153   :  { %26059 = vst [vmem:[#allocation353_spill] sm:$0xff] %v19225_v2  ;;  %26060 = vst [vmem:[#allocation354_spill] sm:$0xff] %v19229_v52  ;;  %v1677_v63 = vrot.slane %v19229_v52, 7  ;;  %v19250_v8 = vsel %vm16821_vm8, %v1667_v0, %v1668_v44  ;;  %v1676_v48 = vrot.slane %v1674_v49, 2  ;;  %v7782_v31 = vrot.slane %v7775_v56, %v16753_v24 }
 0x154   :  { %26061 = vst [vmem:[#allocation355_spill] sm:$0xff] %v19235_v34  ;;  %26064 = vst [vmem:[#allocation97_spill] sm:$0xff] %v19250_v8  ;;  %14512 = vmatmul.mubr.msk.f32.gmra.mrb[86].mxu1 %vm2564_vm9, %v2478_v3  ;;  %v1673_v51 = vrot.slane %v1671_v50, 2  ;;  %v19255_v58 = vrot.slane %v89_v29, %v16753_v24  ;;  %v19258_v4 = vrot.slane %v1011_v26, %v16753_v24 }
 0x155   :  { %v19262_v52 = vcombine.high %v19213_v30, %v19213_v30  ;;  %14514 = vmatprep.mubr.msk.f32.mxu1 %vm16631_vm2, %v25733_v27  ;;  %v19268_v0 = vsel %vm16821_vm8, %v1670_v47, %v1671_v50  ;;  %v19272_v56 = vsel %vm16821_vm8, %v1676_v48, %v1677_v63  ;;  %v7783_v3 = vcombine.low %v19235_v34, %v7782_v31  ;;  %v90_v34 = vld [vmem:[%s24822_s0 + $0x1c8] sm:$0xff] }
 0x156   :  { %26065 = vst [vmem:[#allocation356_spill] sm:$0xff] %v19255_v58  ;;  %26066 = vst [vmem:[#allocation357_spill] sm:$0xff] %v19258_v4  ;;  %v1679_v29 = vrot.slane %v1677_v63, 2  ;;  %v19277_v26 = vsel %vm16821_vm8, %v1673_v51, %v1674_v49  ;;  %v2479_v44 = vcombine.low %v19250_v8, %v19268_v0  ;;  %v19283_v2 = vcombine.high %v19255_v58, %v19255_v58  ;;  %v26076_v8 = vld [vmem:[#allocation102_spill] sm:$0xff] }
 0x157   :  { %26067 = vst [vmem:[#allocation358_spill] sm:$0xff] %v19262_v52  ;;  %26068 = vst [vmem:[#allocation359_spill] sm:$0xff] %v19268_v0  ;;  %v1680_v50 = vrot.slane %v19213_v30, 7  ;;  %v2480_v48 = vcombine.low %v19277_v26, %v19272_v56  ;;  %15167 = vmatmul.mubr.msk.f32.gmra.mrb[26].mxu0 %vm2564_vm9, %v7783_v3  ;;  %v1683_v31 = vrot.slane %v19262_v52, 7  ;;  %v13398_v63 = vrot.slane %v19255_v58, 9  ;;  %v26077_v58 = vld [vmem:[#allocation104_spill] sm:$0xff] }
 0x158   :  { %26069 = vst [vmem:[#allocation360_spill] sm:$0xff] %v19272_v56  ;;  %26070 = vst [vmem:[#allocation361_spill] sm:$0xff] %v19277_v26  ;;  %v1690_v51 = vrot.slane %v19258_v4, 7  ;;  %v19293_v49 = vrot.slane %v2479_v44, %v16753_v24  ;;  %15169 = vmatprep.mubr.msk.f32.mxu0 %vm16631_vm2, %v25733_v27  ;;  %v1687_v56 = vrot.slane %v19283_v2, 7  ;;  %v26075_v26 = vld [vmem:[#allocation100_spill] sm:$0xff]  ;;  %v26078_v30 = vld [vmem:[#allocation103_spill] sm:$0xff] }
 0x159   :  { %26071 = vst [vmem:[#allocation362_spill] sm:$0xff] %v19283_v2  ;;  %v19299_v47 = vsel %vm16821_vm8, %v1679_v29, %v1680_v50  ;;  %v1682_v0 = vrot.slane %v1680_v50, 2  ;;  %v19303_v3 = vrot.slane %v2480_v48, %v16753_v24  ;;  %v3249_v52 = vcombine.low %v26076_v8, %v26075_v26 }
 0x15a   :  { %26072 = vst [vmem:[#allocation363_spill] sm:$0xff] %v19293_v49  ;;  %26073 = vst [vmem:[#allocation364_spill] sm:$0xff] %v19299_v47  ;;  %v3250_v44 = vcombine.low %v26078_v30, %v26077_v58  ;;  %v19314_v29 = vcombine.high %v19258_v4, %v19258_v4  ;;  %v19322_v48 = vsel %vm16821_vm8, %v13398_v63, %v1687_v56  ;;  %v1689_v8 = vrot.slane %v1687_v56, 2 }
 0x15b   :  { %26074 = vst [vmem:[#allocation365_spill] sm:$0xff] %v19303_v3  ;;  %v19318_v50 = vsel %vm16821_vm8, %v1682_v0, %v1683_v31  ;;  %26081 = vst [vmem:[#allocation368_spill] sm:$0xff] %v19322_v48  ;;  %v1028_v26 = vcombine.high %v90_v34, %v90_v34  ;;  %v2495_v58 = vcombine.low %v19293_v49, %v19303_v3  ;;  %v1692_v63 = vrot.slane %v1690_v51, 2 }
 0x15c   :  { %26079 = vst [vmem:[#allocation366_spill] sm:$0xff] %v19314_v29  ;;  %26080 = vst [vmem:[#allocation367_spill] sm:$0xff] %v19318_v50  ;;  %v2496_v30 = vcombine.low %v19299_v47, %v19318_v50  ;;  %v19329_v2 = vrot.slane %v3249_v52, %v16753_v24  ;;  %v19332_v4 = vrot.slane %v3250_v44, %v16753_v24 }
 0x15d   :  { %v19336_v0 = vsel %vm16821_vm8, %v1689_v8, %v1690_v51  ;;  %v19339_v31 = vrot.slane %v90_v34, %v16753_v24  ;;  %v19342_v56 = vrot.slane %v1028_v26, %v16753_v24  ;;  %14515 = vmatmul.mubr.msk.f32.gmra.mrb[88].mxu1 %vm2564_vm9, %v2495_v58  ;;  %v1693_v8 = vrot.slane %v19314_v29, 7  ;;  %v91_v34 = vld [vmem:[%s24822_s0 + $0x1d0] sm:$0xff]  ;;  %v26090_v51 = vld [vmem:[#allocation105_spill] sm:$0xff] }
 0x15e   :  { %26082 = vst [vmem:[#allocation369_spill] sm:$0xff] %v19329_v2  ;;  %26083 = vst [vmem:[#allocation370_spill] sm:$0xff] %v19332_v4  ;;  %v2497_v52 = vcombine.low %v19322_v48, %v19336_v0  ;;  %v19348_v50 = vrot.slane %v2496_v30, %v16753_v24  ;;  %v19352_v44 = vcombine.low %v19329_v2, %v19332_v4  ;;  %14517 = vmatprep.mubr.msk.f32.mxu1 %vm16631_vm2, %v25733_v27  ;;  %v26094_v4 = vld [vmem:[#allocation107_spill] sm:$0xff] }
 0x15f   :  { %26084 = vst [vmem:[#allocation371_spill] sm:$0xff] %v19336_v0  ;;  %26085 = vst [vmem:[#allocation372_spill] sm:$0xff] %v19339_v31  ;;  %v19362_v58 = vcombine.high %v19339_v31, %v19339_v31  ;;  %v1696_v30 = vrot.slane %v19339_v31, 7  ;;  %v1702_v26 = vrot.slane %v19342_v56, 7  ;;  %v26091_v0 = vld [vmem:[#allocation106_spill] sm:$0xff]  ;;  %v19375_v3 = vsel %vm16821_vm8, %v1692_v63, %v1693_v8 }
 0x160   :  { %26086 = vst [vmem:[#allocation373_spill] sm:$0xff] %v19342_v56  ;;  %26087 = vst [vmem:[#allocation374_spill] sm:$0xff] %v19348_v50  ;;  %v3266_v48 = vcombine.low %v26091_v0, %v26090_v51  ;;  %v19369_v47 = vrot.slane %v2497_v52, %v16753_v24  ;;  %15170 = vmatmul.mubr.msk.f32.gmra.mrb[28].mxu0 %vm2564_vm9, %v19352_v44  ;;  %v1695_v49 = vrot.slane %v1693_v8, 2 }
 0x161   :  { %26088 = vst [vmem:[#allocation375_spill] sm:$0xff] %v19352_v44  ;;  %26089 = vst [vmem:[#allocation376_spill] sm:$0xff] %v19362_v58  ;;  %v13675_v2 = vcombine.high %v26090_v51, %v26094_v4  ;;  %15172 = vmatprep.mubr.msk.f32.mxu0 %vm16631_vm2, %v25733_v27  ;;  %v1698_v31 = vrot.slane %v1696_v30, 2  ;;  %v1699_v0 = vrot.slane %v19362_v58, 7  ;;  %v1044_v29 = vcombine.high %v91_v34, %v91_v34 }
 0x162   :  { %26092 = vst [vmem:[#allocation377_spill] sm:$0xff] %v19369_v47  ;;  %26093 = vst [vmem:[#allocation378_spill] sm:$0xff] %v19375_v3  ;;  %v19383_v52 = vrot.slane %v3266_v48, %v16753_v24  ;;  %v2512_v44 = vcombine.low %v19348_v50, %v19369_v47  ;;  %v19389_v63 = vsel %vm16821_vm8, %v1695_v49, %v1696_v30  ;;  %v26106_v50 = vld [vmem:[#allocation114_spill] sm:$0xff] }
 0x163   :  { %26096 = vst [vmem:[#allocation380_spill] sm:$0xff] %v19389_v63  ;;  %v7791_v8 = vrot.slane %v13675_v2, %v16753_v24  ;;  %v19393_v51 = vrot.slane %v91_v34, %v16753_v24  ;;  %v19397_v4 = vsel %vm16821_vm8, %v1698_v31, %v1699_v0  ;;  %v1701_v58 = vrot.slane %v1699_v0, 2  ;;  %v92_v0 = vld [vmem:[%s24822_s0 + $0x1d8] sm:$0xff] }
 0x164   :  { %26095 = vst [vmem:[#allocation379_spill] sm:$0xff] %v19383_v52  ;;  %26098 = vst [vmem:[#allocation382_spill] sm:$0xff] %v19397_v4  ;;  %v2513_v48 = vcombine.low %v19375_v3, %v19389_v63  ;;  %v19402_v14 = vrot.slane %v1044_v29, %v16753_v24  ;;  %14518 = vmatmul.mubr.msk.f32.gmra.mrb[90].mxu1 %vm2564_vm9, %v2512_v44  ;;  %v19412_v34 = vcombine.high %v19342_v56, %v19342_v56 }
 0x165   :  { %26097 = vst [vmem:[#allocation381_spill] sm:$0xff] %v19393_v51  ;;  %v7792_v49 = vcombine.low %v19383_v52, %v7791_v8  ;;  %v19408_v2 = vcombine.high %v19393_v51, %v19393_v51  ;;  %v1704_v31 = vrot.slane %v1702_v26, 2  ;;  %14520 = vmatprep.mubr.msk.f32.mxu1 %vm16631_vm2, %v25733_v27  ;;  %v19421_v29 = vsel %vm16821_vm8, %v1701_v58, %v1702_v26  ;;  %v26108_v52 = vld [vmem:[#allocation115_spill] sm:$0xff] }
 0x166   :  { %26099 = vst [vmem:[#allocation383_spill] sm:$0xff] %v19402_v14  ;;  %26101 = vst [vmem:[#allocation385_spill] sm:$0xff] %v19412_v34  ;;  %v19424_v44 = vrot.slane %v2513_v48, %v16753_v24  ;;  %v19428_v30 = vcombine.high %v19402_v14, %v19402_v14  ;;  %v13399_v8 = vrot.slane %v19393_v51, 9  ;;  %v2514_v63 = vcombine.low %v19397_v4, %v19421_v29  ;;  %v26105_v48 = vld [vmem:[#allocation117_spill] sm:$0xff]  ;;  %v26107_v51 = vld [vmem:[#allocation118_spill] sm:$0xff] }
 0x167   :  { %26100 = vst [vmem:[#allocation384_spill] sm:$0xff] %v19408_v2  ;;  %26102 = vst [vmem:[#allocation386_spill] sm:$0xff] %v19421_v29  ;;  %15173 = vmatmul.mubr.msk.f32.gmra.mrb[30].mxu0 %vm2564_vm9, %v7792_v49  ;;  %v1705_v3 = vrot.slane %v19412_v34, 7  ;;  %v1709_v47 = vrot.slane %v19408_v2, 7  ;;  %v1712_v58 = vrot.slane %v19402_v14, 7  ;;  %v3283_v56 = vcombine.low %v26106_v50, %v26105_v48  ;;  %v26132_v14 = vld [vmem:[#allocation16_spill] sm:$0xff] }
 0x168   :  { %26103 = vst [vmem:[#allocation387_spill] sm:$0xff] %v19424_v44  ;;  %26104 = vst [vmem:[#allocation388_spill] sm:$0xff] %v19428_v30  ;;  %15175 = vmatprep.mubr.msk.f32.mxu0 %vm16631_vm2, %v25733_v27  ;;  %v1715_v26 = vrot.slane %v19428_v30, 7  ;;  %v3284_v55 = vcombine.low %v26108_v52, %v26107_v51  ;;  %v1061_v29 = vcombine.high %v92_v0, %v92_v0 }
 0x169   :  { %v19445_v49 = vrot.slane %v2514_v63, %v16753_v24  ;;  %v19449_v4 = vsel %vm16821_vm8, %v1704_v31, %v1705_v3  ;;  %v19453_v34 = vsel %vm16821_vm8, %v13399_v8, %v1709_v47  ;;  %v1711_v2 = vrot.slane %v1709_v47, 2 }
 0x16a   :  { %26110 = vst [vmem:[#allocation390_spill] sm:$0xff] %v19449_v4  ;;  %26111 = vst [vmem:[#allocation391_spill] sm:$0xff] %v19453_v34  ;;  %v1714_v30 = vrot.slane %v1712_v58, 2  ;;  %v2530_v48 = vcombine.low %v19449_v4, %v19453_v34  ;;  %v19458_v50 = vrot.slane %v3283_v56, %v16753_v24  ;;  %v19461_v51 = vrot.slane %v3284_v55, %v16753_v24 }
 0x16b   :  { %26109 = vst [vmem:[#allocation389_spill] sm:$0xff] %v19445_v49  ;;  %v2529_v63 = vcombine.low %v19424_v44, %v19445_v49  ;;  %v19467_v3 = vsel %vm16821_vm8, %v1711_v2, %v1712_v58  ;;  %v19470_v31 = vrot.slane %v92_v0, %v16753_v24  ;;  %v19473_v47 = vrot.slane %v1061_v29, %v16753_v24  ;;  %v26126_v49 = vld [vmem:[#allocation15_spill] sm:$0xff] }
 0x16c   :  { %26112 = vst [vmem:[#allocation392_spill] sm:$0xff] %v19458_v50  ;;  %26113 = vst [vmem:[#allocation393_spill] sm:$0xff] %v19461_v51  ;;  %v19477_v56 = vsel %vm16821_vm8, %v1714_v30, %v1715_v26  ;;  %v19480_v55 = vrot.slane %v2530_v48, %v16753_v24  ;;  %v19484_v8 = vcombine.low %v19458_v50, %v19461_v51  ;;  %v1717_v34 = vrot.slane %v1715_v26, 2  ;;  %v26122_v26 = vld [vmem:[#allocation121_spill] sm:$0xff]  ;;  %v26123_v48 = vld [vmem:[#allocation124_spill] sm:$0xff] }
 0x16d   :  { %26114 = vst [vmem:[#allocation394_spill] sm:$0xff] %v19467_v3  ;;  %26115 = vst [vmem:[#allocation395_spill] sm:$0xff] %v19470_v31  ;;  %14521 = vmatmul.mubr.msk.f32.gmra.mrb[92].mxu1 %vm2564_vm9, %v2529_v63  ;;  %v2531_v2 = vcombine.low %v19467_v3, %v19477_v56  ;;  %v19491_v0 = vcombine.high %v19470_v31, %v19470_v31  ;;  %v19495_v29 = vcombine.high %v19473_v47, %v19473_v47  ;;  %v26125_v3 = vld [vmem:[#allocation116_spill] sm:$0xff]  ;;  %v26127_v44 = vld [vmem:[#allocation7_spill] sm:$0xff] }
 0x16e   :  { %26116 = vst [vmem:[#allocation396_spill] sm:$0xff] %v19473_v47  ;;  %26117 = vst [vmem:[#allocation397_spill] sm:$0xff] %v19477_v56  ;;  %v1718_v30 = vrot.slane %v19470_v31, 7  ;;  %14523 = vmatprep.mubr.msk.f32.mxu1 %vm16631_vm2, %v25733_v27  ;;  %15176 = vmatmul.mubr.msk.f32.gmra.mrb[32].mxu0 %vm2564_vm9, %v19484_v8  ;;  %v1724_v58 = vrot.slane %v19473_v47, 7  ;;  %v3301_v63 = vcombine.low %v26123_v48, %v26122_v26  ;;  %v26124_v56 = vld [vmem:[#allocation123_spill] sm:$0xff] }
 0x16f   :  { %26118 = vst [vmem:[#allocation398_spill] sm:$0xff] %v19480_v55  ;;  %26119 = vst [vmem:[#allocation399_spill] sm:$0xff] %v19484_v8  ;;  %v7793_v4 = vcombine.low %v26125_v3, %v26124_v56  ;;  %v2977_v52 = vcombine.low %v26127_v44, %v26126_v49  ;;  %v19510_v51 = vrot.slane %v2531_v2, %v16753_v24  ;;  %15178 = vmatprep.mubr.msk.f32.mxu0 %vm16631_vm2, %v25733_v27 }
 0x170   :  { %26120 = vst [vmem:[#allocation400_spill] sm:$0xff] %v19491_v0  ;;  %26121 = vst [vmem:[#allocation401_spill] sm:$0xff] %v19495_v29  ;;  %v19516_v50 = vsel %vm16821_vm8, %v1717_v34, %v1718_v30  ;;  %v1720_v47 = vrot.slane %v1718_v30, 2  ;;  %v1721_v31 = vrot.slane %v19491_v0, 7  ;;  %v1726_v48 = vrot.slane %v1724_v58, 2  ;;  %v26133_v30 = vld [vmem:[#allocation8_spill] sm:$0xff] }
 0x171   :  { %26128 = vst [vmem:[#allocation123_spill] sm:$0xff] %v19510_v51  ;;  %26129 = vst [vmem:[#allocation7_spill] sm:$0xff] %v19516_v50  ;;  %v1727_v26 = vrot.slane %v19495_v29, 7  ;;  %v19521_v56 = vrot.slane %v3301_v63, %v16753_v24  ;;  %v7800_v44 = vrot.slane %v7793_v4, %v16753_v24  ;;  %v2546_v2 = vcombine.low %v19480_v55, %v19510_v51  ;;  %v26137_v55 = vld [vmem:[#allocation125_spill] sm:$0xff] }
 0x172   :  { %v19528_v49 = vsel %vm16821_vm8, %v1720_v47, %v1721_v31  ;;  %v1723_v34 = vrot.slane %v1721_v31, 2  ;;  %v2978_v8 = vcombine.low %v26133_v30, %v26132_v14  ;;  %v2985_v31 = vrot.slane %v2977_v52, %v16753_v24  ;;  %v26136_v47 = vld [vmem:[#allocation128_spill] sm:$0xff]  ;;  %v26138_v14 = vld [vmem:[#allocation129_spill] sm:$0xff]  ;;  %v26139_v30 = vld [vmem:[#allocation130_spill] sm:$0xff] }
 0x173   :  { %26130 = vst [vmem:[#allocation402_spill] sm:$0xff] %v19521_v56  ;;  %26131 = vst [vmem:[#allocation403_spill] sm:$0xff] %v19528_v49  ;;  %v19534_v0 = vsel %vm16821_vm8, %v1726_v48, %v1727_v26  ;;  %v2547_v63 = vcombine.low %v19516_v50, %v19528_v49  ;;  %v7801_v4 = vcombine.low %v7800_v44, %v19521_v56  ;;  %14524 = vmatmul.mubr.msk.f32.gmra.mrb[94].mxu1 %vm2564_vm9, %v2546_v2  ;;  %v26144_v49 = vld [vmem:[#allocation9_spill] sm:$0xff]  ;;  %v26152_v56 = vld [vmem:[#allocation138_spill] sm:$0xff] }
 0x174   :  { %26134 = vst [vmem:[#allocation404_spill] sm:$0xff] %v19534_v0  ;;  %v19542_v51 = vsel %vm16821_vm8, %v1723_v34, %v1724_v58  ;;  %v3317_v29 = vcombine.low %v26137_v55, %v26136_v47  ;;  %v3318_v26 = vcombine.low %v26139_v30, %v26138_v14  ;;  %14526 = vmatprep.mubr.msk.f32.mxu1 %vm16631_vm2, %v25733_v27  ;;  %v26143_v34 = vld [vmem:[#allocation20_spill] sm:$0xff] }
 0x175   :  { %26135 = vst [vmem:[#allocation405_spill] sm:$0xff] %v19542_v51  ;;  %v2548_v48 = vcombine.low %v19542_v51, %v19534_v0  ;;  %v19554_v44 = vrot.slane %v2547_v63, %v16753_v24  ;;  %15179 = vmatmul.mubr.msk.f32.gmra.mrb[34].mxu0 %vm2564_vm9, %v7801_v4  ;;  %v2992_v58 = vrot.slane %v2978_v8, %v16753_v24  ;;  %v26146_v63 = vld [vmem:[#allocation11_spill] sm:$0xff]  ;;  %v26147_v51 = vld [vmem:[#allocation10_spill] sm:$0xff]  ;;  %v26150_v30 = vld [vmem:[#allocation132_spill] sm:$0xff] }
 0x176   :  { %15181 = vmatprep.mubr.msk.f32.mxu0 %vm16631_vm2, %v25733_v27  ;;  %v19561_v52 = vrot.slane %v3317_v29, %v16753_v24  ;;  %v19564_v2 = vrot.slane %v3318_v26, %v16753_v24  ;;  %v2994_v50 = vcombine.low %v26144_v49, %v26143_v34  ;;  %v2995_v4 = vcombine.low %v26147_v51, %v26146_v63  ;;  %v26149_v8 = vld [vmem:[#allocation134_spill] sm:$0xff]  ;;  %v26153_v34 = vld [vmem:[#allocation143_spill] sm:$0xff]  ;;  %v26154_v49 = vld [vmem:[#allocation140_spill] sm:$0xff] }
 0x177   :  { %26140 = vst [vmem:[#allocation406_spill] sm:$0xff] %v19554_v44  ;;  %v19569_v0 = vrot.slane %v2548_v48, %v16753_v24  ;;  %v3335_v47 = vcombine.low %v26149_v8, %v26148_v45  ;;  %v13676_v55 = vcombine.high %v26138_v14, %v26150_v30  ;;  %v26151_v26 = vld [vmem:[#allocation142_spill] sm:$0xff]  ;;  %v7811_v48 = vcombine.low %v26154_v49, %v26153_v34  ;;  %v26157_v34 = vld [vmem:[#allocation147_spill] sm:$0xff] }
 0x178   :  { %26141 = vst [vmem:[#allocation407_spill] sm:$0xff] %v19561_v52  ;;  %26142 = vst [vmem:[#allocation408_spill] sm:$0xff] %v19564_v2  ;;  %v19579_v29 = vcombine.low %v19561_v52, %v19564_v2  ;;  %v3351_v3 = vcombine.low %v26152_v56, %v26151_v26  ;;  %v2993_v63 = vcombine.low %v2985_v31, %v2992_v58  ;;  %v26158_v56 = vld [vmem:[#allocation148_spill] sm:$0xff]  ;;  %v26160_v58 = vld [vmem:[#allocation150_spill] sm:$0xff] }
 0x179   :  { %26145 = vst [vmem:[#allocation409_spill] sm:$0xff] %v19569_v0  ;;  %v2563_v7 = vcombine.low %v19554_v44, %v19569_v0  ;;  %v19588_v51 = vrot.slane %v3335_v47, %v16753_v24  ;;  %v7809_v45 = vrot.slane %v13676_v55, %v16753_v24  ;;  %v3002_v8 = vrot.slane %v2994_v50, %v16753_v24  ;;  %v26159_v47 = vld [vmem:[#allocation149_spill] sm:$0xff]  ;;  %v26242_v52 = vld [vmem:[#allocation316_spill] sm:$0xff] }
 0x17a   :  { %15182 = vmatmul.mubr.msk.f32.gmra.mrb[36].mxu0 %vm2564_vm9, %v19579_v29  ;;  %v19595_v14 = vrot.slane %v3351_v3, %v16753_v24  ;;  %v7818_v26 = vrot.slane %v7811_v48, %v16753_v24  ;;  %v3368_v2 = vcombine.low %v26158_v56, %v26157_v34  ;;  %v3009_v55 = vrot.slane %v2995_v4, %v16753_v24  ;;  %v26161_v3 = vld [vmem:[#allocation151_spill] sm:$0xff]  ;;  %v26162_v48 = vld [vmem:[#allocation152_spill] sm:$0xff]  ;;  %v26171_v34 = vld [vmem:[#allocation161_spill] sm:$0xff] }
 0x17b   :  { %26155 = vst [vmem:[#allocation143_spill] sm:$0xff] %v19588_v51  ;;  %14527 = vmatmul.mubr.msk.f32.gmra.mrb[96].mxu1 %vm2564_vm9, %v2563_v7  ;;  %15184 = vmatprep.mubr.msk.f32.mxu0 %vm16631_vm2, %v25733_v27  ;;  %v7810_v31 = vcombine.low %v7809_v45, %v19588_v51  ;;  %v3369_v50 = vcombine.low %v26160_v58, %v26159_v47  ;;  %v26165_v45 = vld [vmem:[#allocation156_spill] sm:$0xff]  ;;  %v13501_v47 = vld [vmem:[%s24823_s1 + $0x8] sm:$0xf] }
 0x17c   :  { %26156 = vst [vmem:[#allocation410_spill] sm:$0xff] %v19595_v14  ;;  %14531 = vmatprep.mubr.msk.f32.mxu1 %vm16631_vm2, %v25733_v27  ;;  %v3385_v0 = vcombine.low %v26162_v48, %v26161_v3  ;;  %v7819_v7 = vcombine.low %v19595_v14, %v7818_v26  ;;  %v19614_v44 = vrot.slane %v3368_v2, %v16753_v24  ;;  %v26166_v26 = vld [vmem:[#allocation24_spill] sm:$0xff] }
 0x17d   :  { %v19617_v4 = vrot.slane %v3369_v50, %v16753_v24  ;;  %v13677_v56 = vcombine.high %v26161_v3, %v26165_v45  ;;  %v3010_v48 = vcombine.low %v3002_v8, %v3009_v55  ;;  %v3029_v2 = vcombine.low %v16879_v61, %v26166_v26  ;;  %v26168_v55 = vld [vmem:[#allocation162_spill] sm:$0xff]  ;;  %v26169_v50 = vld [vmem:[#allocation160_spill] sm:$0xff] }
 0x17e   :  { %15185 = vmatmul.mubr.msk.f32.gmra.mrb[38].mxu0 %vm2564_vm9, %v7810_v31  ;;  %26163 = vst [vmem:[#allocation411_spill] sm:$0xff] %v19614_v44  ;;  %v19632_v31 = vrot.slane %v3385_v0, %v16753_v24  ;;  %v7829_v3 = vcombine.low %v26169_v50, %v26168_v55  ;;  %v26170_v61 = vld [vmem:[#allocation166_spill] sm:$0xff] }
 0x17f   :  { %26164 = vst [vmem:[#allocation412_spill] sm:$0xff] %v19617_v4  ;;  %14532 = vmatmul.mubr.msk.f32.vlgmr.msra.gmra.mrb[0].mxu1 %vm2564_vm9, %v2993_v63  ;;  %15187 = vmatprep.mubr.msk.f32.mxu0 %vm16631_vm2, %v25733_v27  ;;  %v19638_v63 = vcombine.low %v19614_v44, %v19617_v4  ;;  %v7827_v8 = vrot.slane %v13677_v56, %v16753_v24  ;;  %v26241_v45 = vld [vmem:[#allocation314_spill] sm:$0xff] }
 0x180   :  { %14534 = vmatprep.mubr.msk.f32.mxu1 %vm16631_vm2, %v25733_v27  ;;  %26167 = vst [vmem:[#allocation413_spill] sm:$0xff] %v19632_v31  ;;  %14679 = vmatpush3.msk.msra.mxu1 %vm2663_vm0, %v13501_v47  ;;  %v7830_v58 = vcombine.low %v26171_v34, %v26170_v61  ;;  %v19649_v0 = vrot.slane %v3029_v2, %v16753_v24  ;;  %v26172_v47 = vld [vmem:[#allocation175_spill] sm:$0xff]  ;;  %v26176_v2 = vld [vmem:[#allocation176_spill] sm:$0xff] }
 0x181   :  { %14827 = vmatprep.subr.mxu1 %v25733_v27  ;;  %v7828_v61 = vcombine.low %v19632_v31, %v7827_v8  ;;  %v26177_v34 = vld [vmem:[#allocation163_spill] sm:$0xff] }
 0x182   :  { %15188 = vmatmul.mubr.msk.f32.gmra.mrb[40].mxu0 %vm2564_vm9, %v7819_v7  ;;  %v26173_v7 = vld [vmem:[#allocation177_spill] sm:$0xff]  ;;  %v19663_v55 = vrot.slane %v7830_v58, %v16753_v24  ;;  %v7846_v50 = vcombine.low %v26177_v34, %v26176_v2  ;;  %v26181_v34 = vld [vmem:[#allocation187_spill] sm:$0xff] }
 0x183   :  { %14535 = vmatmul.mubr.msk.f32.gmra.mrb[2].mxu1 %vm2564_vm9, %v3010_v48  ;;  %15190 = vmatprep.mubr.msk.f32.mxu0 %vm16631_vm2, %v25733_v27  ;;  %v3420_v56 = vcombine.low %v26173_v7, %v26172_v47  ;;  %v19660_v48 = vrot.slane %v7829_v3, %v16753_v24  ;;  %v3044_v7 = vcombine.low %v18409_v5, %v19649_v0  ;;  %v26178_v47 = vld [vmem:[#allocation30_spill] sm:$0xff]  ;;  %v26179_v58 = vld [vmem:[#allocation185_spill] sm:$0xff] }
 0x184   :  { %14537 = vmatprep.mubr.msk.f32.mxu1 %vm16631_vm2, %v25733_v27  ;;  %26175 = vst [vmem:[#allocation415_spill] sm:$0xff] %v19663_v55  ;;  %v3062_v8 = vcombine.low %v16945_v1, %v26178_v47  ;;  %v26180_v3 = vld [vmem:[#allocation182_spill] sm:$0xff]  ;;  %v7853_v5 = vrot.slane %v7846_v50, %v16753_v24  ;;  %v3437_v4 = vcombine.low %v26181_v34, %v18109_v43  ;;  %v26182_v34 = vld [vmem:[#allocation189_spill] sm:$0xff]  ;;  %v26187_v47 = vld [vmem:[#allocation196_spill] sm:$0xff] }
 0x185   :  { %26174 = vst [vmem:[#allocation414_spill] sm:$0xff] %v19660_v48  ;;  %v3436_v26 = vcombine.low %v26180_v3, %v26179_v58  ;;  %v19683_v2 = vrot.slane %v3420_v56, %v16753_v24  ;;  %v26183_v3 = vld [vmem:[#allocation188_spill] sm:$0xff]  ;;  %v26188_v1 = vld [vmem:[#allocation194_spill] sm:$0xff] }
 0x186   :  { %15191 = vmatmul.mubr.msk.f32.gmra.mrb[42].mxu0 %vm2564_vm9, %v19638_v63  ;;  %v19692_v58 = vrot.slane %v3062_v8, %v16753_v24  ;;  %v3451_v56 = vrot.slane %v3437_v4, %v16753_v24  ;;  %v26185_v4 = vld [vmem:[#allocation195_spill] sm:$0xff] }
 0x187   :  { %14538 = vmatmul.mubr.msk.f32.gmra.mrb[4].mxu1 %vm2564_vm9, %v18402_v41  ;;  %15193 = vmatprep.mubr.msk.f32.mxu0 %vm16631_vm2, %v25733_v27  ;;  %v7845_v41 = vcombine.low %v19660_v48, %v19663_v55  ;;  %v7854_v50 = vcombine.low %v7853_v5, %v19683_v2  ;;  %v13678_v55 = vcombine.high %v18109_v43, %v26183_v3  ;;  %v26186_v5 = vld [vmem:[#allocation193_spill] sm:$0xff] }
 0x188   :  { %14540 = vmatprep.mubr.msk.f32.mxu1 %vm16631_vm2, %v25733_v27  ;;  %v3078_v8 = vcombine.low %v19692_v58, %v18560_v54  ;;  %v7864_v48 = vcombine.low %v26188_v1, %v26187_v47 }
 0x189   :  { %v7862_v43 = vrot.slane %v13678_v55, %v16753_v24 }
 0x18a   :  { %15194 = vmatmul.mubr.msk.f32.gmra.mrb[44].mxu0 %vm2564_vm9, %v7828_v61  ;;  %v3444_v61 = vrot.slane %v3436_v26, %v16753_v24  ;;  %v26184_v26 = vld [vmem:[#allocation44_spill] sm:$0xff]  ;;  %v7871_v47 = vrot.slane %v7864_v48, %v16753_v24  ;;  %v26195_v48 = vld [vmem:[#allocation205_spill] sm:$0xff] }
 0x18b   :  { %14541 = vmatmul.mubr.msk.f32.gmra.mrb[6].mxu1 %vm2564_vm9, %v3044_v7  ;;  %15196 = vmatprep.mubr.msk.f32.mxu0 %vm16631_vm2, %v25733_v27  ;;  %v3454_v7 = vcombine.low %v26182_v34, %v18169_v35  ;;  %v3470_v35 = vcombine.low %v26186_v5, %v26185_v4  ;;  %v26189_v4 = vld [vmem:[#allocation52_spill] sm:$0xff]  ;;  %v26193_v5 = vld [vmem:[#allocation203_spill] sm:$0xff] }
 0x18c   :  { %14543 = vmatprep.mubr.msk.f32.mxu1 %vm16631_vm2, %v25733_v27  ;;  %v19717_v34 = vcombine.low %v3444_v61, %v3451_v56  ;;  %v3114_v61 = vcombine.low %v17124_v19, %v26189_v4  ;;  %v26190_v56 = vld [vmem:[#allocation200_spill] sm:$0xff] }
 0x18e   :  { %15197 = vmatmul.mubr.msk.f32.gmra.mrb[46].mxu0 %vm2564_vm9, %v7845_v41  ;;  %v3096_v41 = vcombine.low %v17056_v15, %v26184_v26  ;;  %v19753_v4 = vrot.slane %v3114_v61, %v16753_v24 }
 0x18f   :  { %14544 = vmatmul.mubr.msk.f32.gmra.mrb[8].mxu1 %vm2564_vm9, %v18528_v11  ;;  %15199 = vmatprep.mubr.msk.f32.mxu0 %vm16631_vm2, %v25733_v27  ;;  %v19720_v11 = vrot.slane %v3454_v7, %v16753_v24  ;;  %v26191_v7 = vld [vmem:[#allocation202_spill] sm:$0xff] }
 0x190   :  { %14546 = vmatprep.mubr.msk.f32.mxu1 %vm16631_vm2, %v25733_v27  ;;  %v19729_v15 = vrot.slane %v3096_v41, %v16753_v24  ;;  %v26192_v41 = vld [vmem:[#allocation201_spill] sm:$0xff] }
 0x191   :  { %v7863_v55 = vcombine.low %v7862_v43, %v19720_v11  ;;  %v3488_v26 = vcombine.low %v26193_v5, %v26192_v41  ;;  %v26194_v43 = vld [vmem:[#allocation204_spill] sm:$0xff]  ;;  %v3129_v5 = vcombine.low %v18763_v39, %v19753_v4 }
 0x192   :  { %15200 = vmatmul.mubr.msk.f32.gmra.mrb[48].mxu0 %vm2564_vm9, %v7854_v50  ;;  %v19736_v50 = vrot.slane %v3470_v35, %v16753_v24  ;;  %v3112_v35 = vcombine.low %v19729_v15, %v18689_v62  ;;  %v13679_v61 = vcombine.high %v26194_v43, %v18281_v12 }
 0x193   :  { %14547 = vmatmul.mubr.msk.f32.gmra.mrb[10].mxu1 %vm2564_vm9, %v3078_v8  ;;  %15202 = vmatprep.mubr.msk.f32.mxu0 %vm16631_vm2, %v25733_v27  ;;  %v3487_v8 = vcombine.low %v26191_v7, %v26190_v56  ;;  %v3504_v7 = vcombine.low %v26195_v48, %v26194_v43  ;;  %v19765_v56 = vrot.slane %v3488_v26, %v16753_v24  ;;  %v26211_v48 = vld [vmem:[#allocation268_spill] sm:$0xff] }
 0x194   :  { %14549 = vmatprep.mubr.msk.f32.mxu1 %vm16631_vm2, %v25733_v27  ;;  %v7872_v41 = vcombine.low %v19736_v50, %v7871_v47  ;;  %v3521_v43 = vcombine.low %v18339_v13, %v18355_v33  ;;  %v3556_v33 = vcombine.low %v18512_v10, %v18497_v53  ;;  %v26210_v13 = vld [vmem:[#allocation260_spill] sm:$0xff] }
 0x195   :  { %26197 = vst [vmem:[#allocation196_spill] sm:$0xff] %v19765_v56  ;;  %v19779_v26 = vrot.slane %v3504_v7, %v16753_v24 }
 0x196   :  { %15203 = vmatmul.mubr.msk.f32.gmra.mrb[50].mxu0 %vm2564_vm9, %v19717_v34 }
 0x197   :  { %14550 = vmatmul.mubr.msk.f32.gmra.mrb[12].mxu1 %vm2564_vm9, %v18657_v42  ;;  %15205 = vmatprep.mubr.msk.f32.mxu0 %vm16631_vm2, %v25733_v27  ;;  %v19762_v42 = vrot.slane %v3487_v8, %v16753_v24 }
 0x198   :  { %14552 = vmatprep.mubr.msk.f32.mxu1 %vm16631_vm2, %v25733_v27 }
 0x199   :  { %26196 = vst [vmem:[#allocation176_spill] sm:$0xff] %v19762_v42  ;;  %v19784_v8 = vcombine.low %v19762_v42, %v19765_v56  ;;  %v26227_v56 = vld [vmem:[#allocation290_spill] sm:$0xff] }
 0x19a   :  { %15206 = vmatmul.mubr.msk.f32.gmra.mrb[52].mxu0 %vm2564_vm9, %v7863_v55  ;;  %v26198_v55 = vld [vmem:[#allocation65_spill] sm:$0xff] }
 0x19b   :  { %14553 = vmatmul.mubr.msk.f32.gmra.mrb[14].mxu1 %vm2564_vm9, %v3112_v35  ;;  %15208 = vmatprep.mubr.msk.f32.mxu0 %vm16631_vm2, %v25733_v27  ;;  %v3148_v47 = vcombine.low %v17225_v16, %v26198_v55  ;;  %v7880_v35 = vrot.slane %v13679_v61, %v16753_v24  ;;  %v3522_v16 = vcombine.low %v18343_v38, %v18360_v36  ;;  %v26226_v55 = vld [vmem:[#allocation294_spill] sm:$0xff] }
 0x19c   :  { %14555 = vmatprep.mubr.msk.f32.mxu1 %vm16631_vm2, %v25733_v27  ;;  %v7882_v61 = vcombine.low %v18346_v57, %v18425_v28  ;;  %v19807_v36 = vrot.slane %v3521_v43, %v16753_v24  ;;  %v26201_v28 = vld [vmem:[#allocation74_spill] sm:$0xff] }
 0x19d   :  { %v19795_v7 = vrot.slane %v3148_v47, %v16753_v24  ;;  %v19810_v47 = vrot.slane %v3522_v16, %v16753_v24 }
 0x19e   :  { %15209 = vmatmul.mubr.msk.f32.gmra.mrb[54].mxu0 %vm2564_vm9, %v7872_v41  ;;  %v3539_v41 = vcombine.low %v18435_v59, %v18431_v9  ;;  %26199 = vst [vmem:[#allocation194_spill] sm:$0xff] %v19807_v36  ;;  %v3181_v9 = vcombine.low %v26014_v25, %v26201_v28  ;;  %v7889_v16 = vrot.slane %v7882_v61, %v16753_v24  ;;  %v26221_v28 = vld [vmem:[#allocation355_spill] sm:$0xff]  ;;  %v26225_v25 = vld [vmem:[#allocation280_spill] sm:$0xff] }
 0x19f   :  { %14556 = vmatmul.mubr.msk.f32.gmra.mrb[16].mxu1 %vm2564_vm9, %v3129_v5  ;;  %15211 = vmatprep.mubr.msk.f32.mxu0 %vm16631_vm2, %v25733_v27  ;;  %v7881_v5 = vcombine.low %v19779_v26, %v7880_v35  ;;  %26200 = vst [vmem:[#allocation416_spill] sm:$0xff] %v19810_v47  ;;  %v3163_v59 = vcombine.low %v18892_v32, %v19795_v7 }
 0x1a0   :  { %14558 = vmatprep.mubr.msk.f32.mxu1 %vm16631_vm2, %v25733_v27  ;;  %v19823_v43 = vrot.slane %v3539_v41, %v16753_v24  ;;  %v3555_v35 = vcombine.low %v18451_v37, %v18484_v46  ;;  %v19839_v41 = vrot.slane %v3181_v9, %v16753_v24  ;;  %v19850_v46 = vrot.slane %v3556_v33, %v16753_v24  ;;  %v26206_v37 = vld [vmem:[#allocation249_spill] sm:$0xff] }
 0x1a1   :  { %v13680_v9 = vcombine.high %v18497_v53, %v18549_v40  ;;  %v3589_v33 = vcombine.low %v18582_v23, %v18621_v18  ;;  %v26205_v53 = vld [vmem:[#allocation258_spill] sm:$0xff]  ;;  %v26208_v23 = vld [vmem:[#allocation95_spill] sm:$0xff] }
 0x1a2   :  { %15212 = vmatmul.mubr.msk.f32.gmra.mrb[56].mxu0 %vm2564_vm9, %v19784_v8  ;;  %v7890_v61 = vcombine.low %v7889_v16, %v19823_v43  ;;  %26203 = vst [vmem:[#allocation418_spill] sm:$0xff] %v19850_v46  ;;  %v3197_v16 = vcombine.low %v19839_v41, %v19040_v6 }
 0x1a3   :  { %14559 = vmatmul.mubr.msk.f32.gmra.mrb[18].mxu1 %vm2564_vm9, %v18870_v17  ;;  %15214 = vmatprep.mubr.msk.f32.mxu0 %vm16631_vm2, %v25733_v27  ;;  %v19829_v17 = vcombine.low %v19807_v36, %v19810_v47 }
 0x1a4   :  { %14561 = vmatprep.mubr.msk.f32.mxu1 %vm16631_vm2, %v25733_v27 }
 0x1a6   :  { %15215 = vmatmul.mubr.msk.f32.gmra.mrb[58].mxu0 %vm2564_vm9, %v7881_v5  ;;  %v19847_v5 = vrot.slane %v3555_v35, %v16753_v24  ;;  %v26204_v35 = vld [vmem:[#allocation90_spill] sm:$0xff] }
 0x1a7   :  { %14562 = vmatmul.mubr.msk.f32.gmra.mrb[20].mxu1 %vm2564_vm9, %v3163_v59  ;;  %15217 = vmatprep.mubr.msk.f32.mxu0 %vm16631_vm2, %v25733_v27  ;;  %v3573_v59 = vcombine.low %v18567_v60, %v18595_v20  ;;  %v3215_v10 = vcombine.low %v26047_v21, %v26204_v35  ;;  %v7898_v60 = vrot.slane %v13680_v9, %v16753_v24  ;;  %v26212_v35 = vld [vmem:[#allocation271_spill] sm:$0xff] }
 0x1a8   :  { %14564 = vmatprep.mubr.msk.f32.mxu1 %vm16631_vm2, %v25733_v27  ;;  %26202 = vst [vmem:[#allocation417_spill] sm:$0xff] %v19847_v5  ;;  %v7900_v21 = vcombine.low %v26206_v37, %v26205_v53 }
 0x1a9   :  { %v19874_v20 = vrot.slane %v3573_v59, %v16753_v24  ;;  %v19883_v18 = vrot.slane %v3215_v10, %v16753_v24  ;;  %v19890_v59 = vrot.slane %v3589_v33, %v16753_v24 }
 0x1aa   :  { %15218 = vmatmul.mubr.msk.f32.gmra.mrb[60].mxu0 %vm2564_vm9, %v19829_v17  ;;  %v7907_v9 = vrot.slane %v7900_v21, %v16753_v24  ;;  %v26217_v21 = vld [vmem:[#allocation273_spill] sm:$0xff] }
 0x1ab   :  { %14565 = vmatmul.mubr.msk.f32.gmra.mrb[22].mxu1 %vm2564_vm9, %v19003_v22  ;;  %15220 = vmatprep.mubr.msk.f32.mxu0 %vm16631_vm2, %v25733_v27  ;;  %v19871_v22 = vcombine.low %v19847_v5, %v19850_v46  ;;  %v7899_v53 = vcombine.low %v7898_v60, %v19874_v20  ;;  %v3607_v46 = vcombine.low %v26212_v35, %v26211_v48  ;;  %v26216_v60 = vld [vmem:[#allocation269_spill] sm:$0xff] }
 0x1ac   :  { %14567 = vmatprep.mubr.msk.f32.mxu1 %vm16631_vm2, %v25733_v27  ;;  %v7908_v48 = vcombine.low %v19890_v59, %v7907_v9  ;;  %v26220_v35 = vld [vmem:[#allocation277_spill] sm:$0xff] }
 0x1ae   :  { %15221 = vmatmul.mubr.msk.f32.gmra.mrb[62].mxu0 %vm2564_vm9, %v7890_v61  ;;  %v26207_v61 = vld [vmem:[#allocation99_spill] sm:$0xff] }
 0x1af   :  { %14568 = vmatmul.mubr.msk.f32.gmra.mrb[24].mxu1 %vm2564_vm9, %v3197_v16  ;;  %15223 = vmatprep.mubr.msk.f32.mxu0 %vm16631_vm2, %v25733_v27  ;;  %v3233_v38 = vcombine.low %v26208_v23, %v26207_v61  ;;  %v26209_v16 = vld [vmem:[#allocation267_spill] sm:$0xff]  ;;  %v26214_v23 = vld [vmem:[#allocation345_spill] sm:$0xff] }
 0x1b0   :  { %14570 = vmatprep.mubr.msk.f32.mxu1 %vm16631_vm2, %v25733_v27  ;;  %v3606_v10 = vcombine.low %v26210_v13, %v26209_v16  ;;  %v26213_v61 = vld [vmem:[#allocation339_spill] sm:$0xff]  ;;  %v3231_v33 = vcombine.low %v19883_v18, %v26214_v23  ;;  %v3623_v13 = vcombine.low %v26217_v21, %v26216_v60  ;;  %v19919_v16 = vrot.slane %v3607_v46, %v16753_v24 }
 0x1b1   :  { %v19907_v5 = vrot.slane %v3233_v38, %v16753_v24  ;;  %v13681_v38 = vcombine.high %v26216_v60, %v26220_v35  ;;  %v26223_v21 = vld [vmem:[#allocation107_spill] sm:$0xff]  ;;  %v26224_v60 = vld [vmem:[#allocation286_spill] sm:$0xff] }
 0x1b2   :  { %15224 = vmatmul.mubr.msk.f32.gmra.mrb[64].mxu0 %vm2564_vm9, %v19871_v22  ;;  %26219 = vst [vmem:[#allocation345_spill] sm:$0xff] %v19919_v16  ;;  %v19933_v46 = vrot.slane %v3623_v13, %v16753_v24  ;;  %v3640_v36 = vcombine.low %v26225_v25, %v26224_v60 }
 0x1b3   :  { %14571 = vmatmul.mubr.msk.f32.gmra.mrb[26].mxu1 %vm2564_vm9, %v26213_v61  ;;  %15226 = vmatprep.mubr.msk.f32.mxu0 %vm16631_vm2, %v25733_v27  ;;  %26215 = vst [vmem:[#allocation258_spill] sm:$0xff] %v19907_v5  ;;  %v19916_v61 = vrot.slane %v3606_v10, %v16753_v24  ;;  %v3248_v47 = vcombine.low %v26221_v28, %v19907_v5 }
 0x1b4   :  { %14573 = vmatprep.mubr.msk.f32.mxu1 %vm16631_vm2, %v25733_v27 }
 0x1b5   :  { %26218 = vst [vmem:[#allocation339_spill] sm:$0xff] %v19916_v61  ;;  %v19938_v10 = vcombine.low %v19916_v61, %v19919_v16  ;;  %v26235_v16 = vld [vmem:[#allocation375_spill] sm:$0xff] }
 0x1b6   :  { %15227 = vmatmul.mubr.msk.f32.gmra.mrb[66].mxu0 %vm2564_vm9, %v7899_v53  ;;  %v26222_v53 = vld [vmem:[#allocation109_spill] sm:$0xff]  ;;  %v26236_v61 = vld [vmem:[#allocation379_spill] sm:$0xff] }
 0x1b7   :  { %14574 = vmatmul.mubr.msk.f32.gmra.mrb[28].mxu1 %vm2564_vm9, %v3231_v33  ;;  %15229 = vmatprep.mubr.msk.f32.mxu0 %vm16631_vm2, %v25733_v27  ;;  %v3267_v9 = vcombine.low %v26223_v21, %v26222_v53  ;;  %v7916_v33 = vrot.slane %v13681_v38, %v16753_v24  ;;  %v3641_v21 = vcombine.low %v26227_v56, %v26226_v55  ;;  %v26230_v53 = vld [vmem:[#allocation301_spill] sm:$0xff]  ;;  %v26233_v56 = vld [vmem:[#allocation302_spill] sm:$0xff] }
 0x1b8   :  { %14576 = vmatprep.mubr.msk.f32.mxu1 %vm16631_vm2, %v25733_v27  ;;  %v19959_v55 = vrot.slane %v3640_v36, %v16753_v24  ;;  %v26239_v36 = vld [vmem:[#allocation311_spill] sm:$0xff] }
 0x1b9   :  { %v19949_v13 = vrot.slane %v3267_v9, %v16753_v24  ;;  %v7917_v60 = vcombine.low %v19933_v46, %v7916_v33  ;;  %v26234_v9 = vld [vmem:[#allocation291_spill] sm:$0xff]  ;;  %v26238_v33 = vld [vmem:[#allocation116_spill] sm:$0xff] }
 0x1ba   :  { %15230 = vmatmul.mubr.msk.f32.gmra.mrb[68].mxu0 %vm2564_vm9, %v7908_v48  ;;  %v26229_v48 = vld [vmem:[#allocation300_spill] sm:$0xff]  ;;  %26231 = vst [vmem:[#allocation419_spill] sm:$0xff] %v19959_v55  ;;  %v7918_v25 = vcombine.low %v26234_v9, %v26233_v56 }
 0x1bb   :  { %14577 = vmatmul.mubr.msk.f32.gmra.mrb[30].mxu1 %vm2564_vm9, %v3248_v47  ;;  %15232 = vmatprep.mubr.msk.f32.mxu0 %vm16631_vm2, %v25733_v27  ;;  %26228 = vst [vmem:[#allocation355_spill] sm:$0xff] %v19949_v13  ;;  %v3658_v38 = vcombine.low %v26230_v53, %v26229_v48  ;;  %v19962_v47 = vrot.slane %v3641_v21, %v16753_v24  ;;  %v26237_v48 = vld [vmem:[#allocation120_spill] sm:$0xff]  ;;  %v26240_v21 = vld [vmem:[#allocation305_spill] sm:$0xff] }
 0x1bc   :  { %14579 = vmatprep.mubr.msk.f32.mxu1 %vm16631_vm2, %v25733_v27  ;;  %v3282_v53 = vcombine.low %v26236_v61, %v19949_v13  ;;  %v3300_v42 = vcombine.low %v26238_v33, %v26237_v48  ;;  %v3674_v19 = vcombine.low %v26240_v21, %v26239_v36  ;;  %v7925_v44 = vrot.slane %v7918_v25, %v16753_v24  ;;  %v26249_v33 = vld [vmem:[#allocation399_spill] sm:$0xff]  ;;  %v26254_v61 = vld [vmem:[#allocation338_spill] sm:$0xff] }
 0x1bd   :  { %26232 = vst [vmem:[#allocation420_spill] sm:$0xff] %v19962_v47  ;;  %v19981_v56 = vcombine.low %v19959_v55, %v19962_v47  ;;  %v3675_v48 = vcombine.low %v26242_v52, %v26241_v45  ;;  %v26247_v52 = vld [vmem:[#allocation322_spill] sm:$0xff]  ;;  %v26248_v47 = vld [vmem:[#allocation321_spill] sm:$0xff]  ;;  %v26251_v13 = vld [vmem:[#allocation135_spill] sm:$0xff] }
 0x1be   :  { %15233 = vmatmul.mubr.msk.f32.gmra.mrb[70].mxu0 %vm2564_vm9, %v19938_v10  ;;  %v19993_v36 = vrot.slane %v3300_v42, %v16753_v24  ;;  %v13682_v42 = vcombine.high %v26241_v45, %v26248_v47  ;;  %v26250_v55 = vld [vmem:[#allocation402_spill] sm:$0xff]  ;;  %v26255_v45 = vld [vmem:[#allocation328_spill] sm:$0xff] }
 0x1bf   :  { %14580 = vmatmul.mubr.msk.f32.gmra.mrb[32].mxu1 %vm2564_vm9, %v26235_v16  ;;  %15235 = vmatprep.mubr.msk.f32.mxu0 %vm16631_vm2, %v25733_v27  ;;  %v19984_v16 = vrot.slane %v3658_v38, %v16753_v24  ;;  %v20004_v38 = vrot.slane %v3675_v48, %v16753_v24  ;;  %v26252_v48 = vld [vmem:[#allocation330_spill] sm:$0xff]  ;;  %v7936_v5 = vcombine.low %v26255_v45, %v26254_v61  ;;  %v26259_v61 = vld [vmem:[#allocation145_spill] sm:$0xff] }
 0x1c0   :  { %14582 = vmatprep.mubr.msk.f32.mxu1 %vm16631_vm2, %v25733_v27  ;;  %26243 = vst [vmem:[#allocation302_spill] sm:$0xff] %v19993_v36 }
 0x1c1   :  { %v7926_v25 = vcombine.low %v7925_v44, %v19984_v16  ;;  %26245 = vst [vmem:[#allocation421_spill] sm:$0xff] %v20004_v38  ;;  %v3334_v44 = vcombine.low %v26150_v30, %v26251_v13  ;;  %v7934_v30 = vrot.slane %v13682_v42, %v16753_v24  ;;  %v26262_v13 = vld [vmem:[#allocation340_spill] sm:$0xff] }
 0x1c2   :  { %15236 = vmatmul.mubr.msk.f32.gmra.mrb[72].mxu0 %vm2564_vm9, %v7917_v60  ;;  %v19998_v60 = vrot.slane %v3674_v19, %v16753_v24  ;;  %v3316_v19 = vcombine.low %v19993_v36, %v26250_v55 }
 0x1c3   :  { %14583 = vmatmul.mubr.msk.f32.gmra.mrb[34].mxu1 %vm2564_vm9, %v3282_v53  ;;  %15238 = vmatprep.mubr.msk.f32.mxu0 %vm16631_vm2, %v25733_v27  ;;  %v26246_v53 = vld [vmem:[#allocation325_spill] sm:$0xff] }
 0x1c4   :  { %14585 = vmatprep.mubr.msk.f32.mxu1 %vm16631_vm2, %v25733_v27  ;;  %26244 = vst [vmem:[#allocation375_spill] sm:$0xff] %v19998_v60  ;;  %v3692_v21 = vcombine.low %v26247_v52, %v26246_v53  ;;  %v26253_v53 = vld [vmem:[#allocation326_spill] sm:$0xff] }
 0x1c5   :  { %v3708_v52 = vcombine.low %v26253_v53, %v26252_v48  ;;  %v20037_v48 = vrot.slane %v3334_v44, %v16753_v24 }
 0x1c6   :  { %15239 = vmatmul.mubr.msk.f32.gmra.mrb[74].mxu0 %vm2564_vm9, %v19981_v56  ;;  %v20030_v55 = vrot.slane %v3692_v21, %v16753_v24  ;;  %v7943_v21 = vrot.slane %v7936_v5, %v16753_v24 }
 0x1c7   :  { %14586 = vmatmul.mubr.msk.f32.gmra.mrb[36].mxu1 %vm2564_vm9, %v26249_v33  ;;  %15241 = vmatprep.mubr.msk.f32.mxu0 %vm16631_vm2, %v25733_v27  ;;  %v20027_v33 = vcombine.low %v19998_v60, %v20004_v38  ;;  %26258 = vst [vmem:[#allocation422_spill] sm:$0xff] %v20037_v48  ;;  %v20044_v53 = vrot.slane %v3708_v52, %v16753_v24  ;;  %v26263_v38 = vld [vmem:[#allocation349_spill] sm:$0xff] }
 0x1c8   :  { %14588 = vmatprep.mubr.msk.f32.mxu1 %vm16631_vm2, %v25733_v27  ;;  %26257 = vst [vmem:[#allocation338_spill] sm:$0xff] %v20030_v55  ;;  %v7935_v42 = vcombine.low %v7934_v30, %v20030_v55  ;;  %v26264_v60 = vld [vmem:[#allocation353_spill] sm:$0xff]  ;;  %v3350_v52 = vcombine.low %v20037_v48, %v19588_v51  ;;  %v26272_v51 = vld [vmem:[#allocation356_spill] sm:$0xff] }
 0x1c9   :  { %26256 = vst [vmem:[#allocation399_spill] sm:$0xff] %v20027_v33  ;;  %26260 = vst [vmem:[#allocation423_spill] sm:$0xff] %v20044_v53  ;;  %v3726_v36 = vcombine.low %v26264_v60, %v26263_v38  ;;  %v7944_v30 = vcombine.low %v20044_v53, %v7943_v21 }
 0x1ca   :  { %15242 = vmatmul.mubr.msk.f32.gmra.mrb[76].mxu0 %vm2564_vm9, %v7926_v25  ;;  %v3352_v25 = vcombine.low %v26154_v49, %v26259_v61  ;;  %v26270_v61 = vld [vmem:[#allocation350_spill] sm:$0xff] }
 0x1cb   :  { %14589 = vmatmul.mubr.msk.f32.gmra.mrb[38].mxu1 %vm2564_vm9, %v3316_v19  ;;  %15244 = vmatprep.mubr.msk.f32.mxu0 %vm16631_vm2, %v25733_v27  ;;  %v26261_v19 = vld [vmem:[#allocation348_spill] sm:$0xff]  ;;  %v20073_v60 = vrot.slane %v3726_v36, %v16753_v24  ;;  %v26271_v49 = vld [vmem:[#allocation354_spill] sm:$0xff]  ;;  %v13683_v48 = vcombine.high %v26270_v61, %v26272_v51 }
 0x1cc   :  { %14591 = vmatprep.mubr.msk.f32.mxu1 %vm16631_vm2, %v25733_v27  ;;  %v3725_v44 = vcombine.low %v26262_v13, %v26261_v19  ;;  %v20061_v5 = vrot.slane %v3352_v25, %v16753_v24  ;;  %v26266_v13 = vld [vmem:[#allocation169_spill] sm:$0xff]  ;;  %v26267_v19 = vld [vmem:[#allocation164_spill] sm:$0xff]  ;;  %v3742_v25 = vcombine.low %v26271_v49, %v26270_v61 }
 0x1cd   :  { %v3386_v38 = vcombine.low %v26267_v19, %v26266_v13  ;;  %26269 = vst [vmem:[#allocation425_spill] sm:$0xff] %v20073_v60  ;;  %v26273_v19 = vld [vmem:[#allocation366_spill] sm:$0xff]  ;;  %v26275_v49 = vld [vmem:[#allocation376_spill] sm:$0xff]  ;;  %v7952_v51 = vrot.slane %v13683_v48, %v16753_v24  ;;  %v26283_v48 = vld [vmem:[#allocation383_spill] sm:$0xff] }
 0x1ce   :  { %15245 = vmatmul.mubr.msk.f32.gmra.mrb[78].mxu0 %vm2564_vm9, %v20027_v33  ;;  %26265 = vst [vmem:[#allocation424_spill] sm:$0xff] %v20061_v5  ;;  %v3367_v21 = vcombine.low %v19595_v14, %v20061_v5  ;;  %v20100_v14 = vrot.slane %v3742_v25, %v16753_v24  ;;  %v26284_v25 = vld [vmem:[#allocation384_spill] sm:$0xff] }
 0x1cf   :  { %14592 = vmatmul.mubr.msk.f32.gmra.mrb[40].mxu1 %vm2564_vm9, %v19579_v29  ;;  %15247 = vmatprep.mubr.msk.f32.mxu0 %vm16631_vm2, %v25733_v27  ;;  %v20070_v29 = vrot.slane %v3725_v44, %v16753_v24  ;;  %v3400_v36 = vrot.slane %v3386_v38, %v16753_v24  ;;  %v26274_v44 = vld [vmem:[#allocation357_spill] sm:$0xff]  ;;  %v26279_v38 = vld [vmem:[#allocation179_spill] sm:$0xff] }
 0x1d0   :  { %14594 = vmatprep.mubr.msk.f32.mxu1 %vm16631_vm2, %v25733_v27  ;;  %v3759_v61 = vcombine.low %v26274_v44, %v26273_v19  ;;  %26278 = vst [vmem:[#allocation427_spill] sm:$0xff] %v20100_v14  ;;  %v26280_v19 = vld [vmem:[#allocation167_spill] sm:$0xff] }
 0x1d1   :  { %26268 = vst [vmem:[#allocation164_spill] sm:$0xff] %v20070_v29  ;;  %v20097_v5 = vcombine.low %v20070_v29, %v20073_v60  ;;  %v94_v60 = vld [vmem:[%s24822_s0 + $0x1e8] sm:$0xff]  ;;  %v3777_v29 = vcombine.low %v26284_v25, %v26283_v48 }
 0x1d2   :  { %15248 = vmatmul.mubr.msk.f32.gmra.mrb[80].mxu0 %vm2564_vm9, %v7935_v42  ;;  %v93_v42 = vld [vmem:[%s24822_s0 + $0x1e0] sm:$0xff]  ;;  %v5570_v25 = vcombine.high %v94_v60, %v94_v60 }
 0x1d3   :  { %14595 = vmatmul.mubr.msk.f32.gmra.mrb[42].mxu1 %vm2564_vm9, %v3350_v52  ;;  %15250 = vmatprep.mubr.msk.f32.mxu0 %vm16631_vm2, %v25733_v27  ;;  %v26276_v52 = vld [vmem:[#allocation372_spill] sm:$0xff]  ;;  %26277 = vst [vmem:[#allocation426_spill] sm:$0xff] %v20097_v5  ;;  %v5553_v53 = vcombine.high %v93_v42, %v93_v42 }
 0x1d4   :  { %14597 = vmatprep.mubr.msk.f32.mxu1 %vm16631_vm2, %v25733_v27  ;;  %v3760_v13 = vcombine.low %v26276_v52, %v26275_v49  ;;  %v3402_v49 = vcombine.low %v26280_v19, %v26279_v38  ;;  %v26281_v52 = vld [vmem:[#allocation184_spill] sm:$0xff]  ;;  %v26286_v38 = vld [vmem:[#allocation385_spill] sm:$0xff] }
 0x1d5   :  { %v26287_v19 = vld [vmem:[#allocation373_spill] sm:$0xff]  ;;  %v20130_v45 = vrot.slane %v5553_v53, %v16753_v24 }
 0x1d6   :  { %15251 = vmatmul.mubr.msk.f32.gmra.mrb[82].mxu0 %vm2564_vm9, %v7944_v30  ;;  %v26282_v30 = vld [vmem:[#allocation181_spill] sm:$0xff]  ;;  %v20121_v55 = vrot.slane %v3760_v13, %v16753_v24  ;;  %v7954_v33 = vcombine.low %v26287_v19, %v26286_v38  ;;  %v3410_v13 = vrot.slane %v3402_v49, %v16753_v24  ;;  %v26290_v38 = vld [vmem:[#allocation183_spill] sm:$0xff]  ;;  %v26292_v19 = vld [vmem:[#allocation388_spill] sm:$0xff] }
 0x1d7   :  { %14598 = vmatmul.mubr.msk.f32.gmra.mrb[44].mxu1 %vm2564_vm9, %v3367_v21  ;;  %15253 = vmatprep.mubr.msk.f32.mxu0 %vm16631_vm2, %v25733_v27  ;;  %v3403_v44 = vcombine.low %v26282_v30, %v26281_v52  ;;  %v20118_v21 = vrot.slane %v3759_v61, %v16753_v24  ;;  %v3401_v52 = vcombine.low %v19632_v31, %v3400_v36  ;;  %v26289_v36 = vld [vmem:[#allocation174_spill] sm:$0xff]  ;;  %v26291_v31 = vld [vmem:[#allocation395_spill] sm:$0xff] }
 0x1d8   :  { %14600 = vmatprep.mubr.msk.f32.mxu1 %vm16631_vm2, %v25733_v27  ;;  %26285 = vst [vmem:[#allocation428_spill] sm:$0xff] %v20121_v55  ;;  %v7953_v30 = vcombine.low %v20100_v14, %v7952_v51  ;;  %26288 = vst [vmem:[#allocation385_spill] sm:$0xff] %v20130_v45  ;;  %v3419_v48 = vcombine.low %v26290_v38, %v26289_v36  ;;  %v20143_v51 = vrot.slane %v3777_v29, %v16753_v24  ;;  %v26293_v14 = vld [vmem:[#allocation396_spill] sm:$0xff] }
 0x1d9   :  { %v3417_v61 = vrot.slane %v3403_v44, %v16753_v24  ;;  %v20147_v53 = vcombine.low %v20118_v21, %v20121_v55  ;;  %v3793_v49 = vcombine.low %v26292_v19, %v26291_v31  ;;  %v26294_v44 = vld [vmem:[#allocation400_spill] sm:$0xff]  ;;  %v20156_v36 = vrot.slane %v93_v42, %v16753_v24 }
 0x1da   :  { %15254 = vmatmul.mubr.msk.f32.gmra.mrb[84].mxu0 %vm2564_vm9, %v20097_v5  ;;  %v3794_v5 = vcombine.low %v26294_v44, %v26293_v14  ;;  %v20160_v29 = vcombine.high %v20130_v45, %v20130_v45  ;;  %v20163_v55 = vrot.slane %v94_v60, %v16753_v24  ;;  %v26345_v19 = vld [vmem:[#allocation16_spill] sm:$0xff] }
 0x1db   :  { %14601 = vmatmul.mubr.msk.f32.gmra.mrb[46].mxu1 %vm2564_vm9, %v19638_v63  ;;  %15256 = vmatprep.mubr.msk.f32.mxu0 %vm16631_vm2, %v25733_v27  ;;  %v7961_v63 = vrot.slane %v7954_v33, %v16753_v24  ;;  %26295 = vst [vmem:[#allocation183_spill] sm:$0xff] %v20156_v36  ;;  %v20166_v33 = vrot.slane %v5570_v25, %v16753_v24 }
 0x1dc   :  { %14603 = vmatprep.mubr.msk.f32.mxu1 %vm16631_vm2, %v25733_v27  ;;  %26296 = vst [vmem:[#allocation429_spill] sm:$0xff] %v20160_v29  ;;  %26297 = vst [vmem:[#allocation430_spill] sm:$0xff] %v20163_v55  ;;  %v3418_v31 = vcombine.low %v3410_v13, %v3417_v61  ;;  %v20176_v44 = vrot.slane %v3793_v49, %v16753_v24  ;;  %v20179_v60 = vrot.slane %v3794_v5, %v16753_v24  ;;  %v26300_v61 = vld [vmem:[#allocation191_spill] sm:$0xff] }
 0x1dd   :  { %v7962_v42 = vcombine.low %v7961_v63, %v20143_v51  ;;  %v20189_v25 = vcombine.high %v20163_v55, %v20163_v55  ;;  %v20193_v13 = vcombine.high %v20166_v33, %v20166_v33  ;;  %v3453_v63 = vcombine.low %v26183_v3, %v26300_v61 }
 0x1de   :  { %15257 = vmatmul.mubr.msk.f32.gmra.mrb[86].mxu0 %vm2564_vm9, %v7953_v30  ;;  %v3427_v30 = vrot.slane %v3419_v48, %v16753_v24  ;;  %v7964_v48 = vcombine.low %v20130_v45, %v20160_v29  ;;  %v20205_v49 = vcombine.low %v20176_v44, %v20179_v60  ;;  %v26341_v45 = vld [vmem:[#allocation408_spill] sm:$0xff] }
 0x1df   :  { %14604 = vmatmul.mubr.msk.f32.gmra.mrb[48].mxu1 %vm2564_vm9, %v3401_v52  ;;  %15259 = vmatprep.mubr.msk.f32.mxu0 %vm16631_vm2, %v25733_v27  ;;  %v13684_v52 = vcombine.high %v26293_v14, %v20156_v36  ;;  %26298 = vst [vmem:[#allocation431_spill] sm:$0xff] %v20189_v25  ;;  %26299 = vst [vmem:[#allocation432_spill] sm:$0xff] %v20193_v13  ;;  %v20220_v3 = vrot.slane %v3453_v63, %v16753_v24 }
 0x1e0   :  { %14606 = vmatprep.mubr.msk.f32.mxu1 %vm16631_vm2, %v25733_v27  ;;  %v3435_v5 = vcombine.low %v3427_v30, %v19683_v2  ;;  %v7980_v2 = vcombine.low %v20163_v55, %v20189_v25  ;;  %v7981_v30 = vcombine.low %v20166_v33, %v20193_v13 }
 0x1e1   :  { %v7971_v29 = vrot.slane %v13684_v52, %v16753_v24  ;;  %v3469_v63 = vcombine.low %v20220_v3, %v19720_v11 }
 0x1e2   :  { %15260 = vmatmul.mubr.msk.f32.gmra.mrb[88].mxu0 %vm2564_vm9, %v20147_v53  ;;  %v20230_v13 = vrot.slane %v7980_v2, %v16753_v24  ;;  %v26302_v2 = vld [vmem:[#allocation208_spill] sm:$0xff] }
 0x1e3   :  { %14607 = vmatmul.mubr.msk.f32.gmra.mrb[50].mxu1 %vm2564_vm9, %v3418_v31  ;;  %15262 = vmatprep.mubr.msk.f32.mxu0 %vm16631_vm2, %v25733_v27  ;;  %v20210_v31 = vrot.slane %v7964_v48, %v16753_v24 }
 0x1e4   :  { %14609 = vmatprep.mubr.msk.f32.mxu1 %vm16631_vm2, %v25733_v27 }
 0x1e5   :  { %v7979_v48 = vcombine.low %v7971_v29, %v20210_v31 }
 0x1e6   :  { %15263 = vmatmul.mubr.msk.f32.gmra.mrb[90].mxu0 %vm2564_vm9, %v7962_v42  ;;  %v26301_v42 = vld [vmem:[#allocation199_spill] sm:$0xff] }
 0x1e7   :  { %14610 = vmatmul.mubr.msk.f32.gmra.mrb[52].mxu1 %vm2564_vm9, %v3435_v5  ;;  %15265 = vmatprep.mubr.msk.f32.mxu0 %vm16631_vm2, %v25733_v27  ;;  %v3471_v52 = vcombine.low %v26188_v1, %v26301_v42  ;;  %v7995_v5 = vrot.slane %v7981_v30, %v16753_v24  ;;  %v3505_v30 = vcombine.low %v18281_v12, %v26302_v2  ;;  %v26339_v12 = vld [vmem:[#allocation402_spill] sm:$0xff] }
 0x1e8   :  { %14612 = vmatprep.mubr.msk.f32.mxu1 %vm16631_vm2, %v25733_v27 }
 0x1e9   :  { %v20240_v25 = vrot.slane %v3471_v52, %v16753_v24  ;;  %v7996_v29 = vcombine.low %v20230_v13, %v7995_v5  ;;  %v26303_v52 = vld [vmem:[#allocation228_spill] sm:$0xff] }
 0x1ea   :  { %15266 = vmatmul.mubr.msk.f32.gmra.mrb[92].mxu0 %vm2564_vm9, %v20205_v49  ;;  %v8489_v55 = vcombine.low %v19649_v0, %v26303_v52  ;;  %v13788_v5 = vld [vmem:[%s24823_s1 + $0x1c] sm:$0xf]  ;;  %v26304_v0 = vld [vmem:[#allocation230_spill] sm:$0xff] }
 0x1eb   :  { %14613 = vmatmul.mubr.msk.f32.gmra.mrb[54].mxu1 %vm2564_vm9, %v19717_v34  ;;  %15268 = vmatprep.mubr.msk.f32.mxu0 %vm16631_vm2, %v25733_v27  ;;  %v3486_v34 = vcombine.low %v19736_v50, %v20240_v25  ;;  %v26307_v52 = vld [vmem:[#allocation254_spill] sm:$0xff] }
 0x1ec   :  { %14615 = vmatprep.mubr.msk.f32.mxu1 %vm16631_vm2, %v25733_v27 }
 0x1ee   :  { %15269 = vmatmul.mubr.msk.f32.gmra.mrb[94].mxu0 %vm2564_vm9, %v7979_v48  ;;  %v20262_v48 = vrot.slane %v3505_v30, %v16753_v24 }
 0x1ef   :  { %14616 = vmatmul.mubr.msk.f32.gmra.mrb[56].mxu1 %vm2564_vm9, %v3469_v63  ;;  %15271 = vmatprep.mubr.msk.f32.mxu0 %vm16631_vm2, %v25733_v27  ;;  %v8490_v63 = vcombine.low %v26304_v0, %v19692_v58  ;;  %v26306_v58 = vld [vmem:[#allocation253_spill] sm:$0xff]  ;;  %v26308_v0 = vld [vmem:[#allocation244_spill] sm:$0xff] }
 0x1f0   :  { %14618 = vmatprep.mubr.msk.f32.mxu1 %vm16631_vm2, %v25733_v27 }
 0x1f2   :  { %15272 = vmatmul.mubr.msk.f32.gmra.mrb[96].mxu0 %vm2564_vm9, %v7996_v29  ;;  %v3520_v29 = vcombine.low %v19779_v26, %v20262_v48 }
 0x1f3   :  { %14619 = vmatmul.mubr.msk.f32.gmra.mrb[58].mxu1 %vm2564_vm9, %v3486_v34  ;;  %15276 = vmatprep.mubr.msk.f32.mxu0 %vm16631_vm2, %v25733_v27  ;;  %v26305_v34 = vld [vmem:[#allocation221_spill] sm:$0xff] }
 0x1f4   :  { %14621 = vmatprep.mubr.msk.f32.mxu1 %vm16631_vm2, %v25733_v27  ;;  %v3538_v30 = vcombine.low %v18346_v57, %v26305_v34  ;;  %v26374_v34 = vld [vmem:[#allocation28_spill] sm:$0xff]  ;;  %v26375_v57 = vld [vmem:[#allocation29_spill] sm:$0xff] }
 0x1f6   :  { %15277 = vmatmul.mubr.msk.f32.vlgmr.msra.gmra.mrb[0].mxu0 %vm2564_vm9, %v8489_v55  ;;  %v8491_v55 = vcombine.low %v18560_v54, %v26306_v58  ;;  %v26310_v58 = vld [vmem:[#allocation285_spill] sm:$0xff] }
 0x1f7   :  { %14622 = vmatmul.mubr.msk.f32.gmra.mrb[60].mxu1 %vm2564_vm9, %v19784_v8  ;;  %15424 = vmatpush3.msk.msra.mxu0 %vm2663_vm0, %v13788_v5  ;;  %v20291_v8 = vrot.slane %v3538_v30, %v16753_v24  ;;  %v8492_v5 = vcombine.low %v26307_v52, %v19729_v15  ;;  %v8493_v15 = vcombine.low %v18689_v62, %v18763_v39  ;;  %v26311_v52 = vld [vmem:[#allocation289_spill] sm:$0xff] }
 0x1f8   :  { %14624 = vmatprep.mubr.msk.f32.mxu1 %vm16631_vm2, %v25733_v27  ;;  %15279 = vmatprep.mubr.msk.f32.mxu0 %vm16631_vm2, %v25733_v27 }
 0x1f9   :  { %15572 = vmatprep.subr.mxu0 %v25733_v27  ;;  %v3554_v54 = vcombine.low %v20291_v8, %v19823_v43 }
 0x1fa   :  { %15280 = vmatmul.mubr.msk.f32.gmra.mrb[2].mxu0 %vm2564_vm9, %v8490_v63  ;;  %v3572_v63 = vcombine.low %v18549_v40, %v26308_v0 }
 0x1fb   :  { %14625 = vmatmul.mubr.msk.f32.gmra.mrb[62].mxu1 %vm2564_vm9, %v3520_v29  ;;  %15282 = vmatprep.mubr.msk.f32.mxu0 %vm16631_vm2, %v25733_v27  ;;  %v26309_v29 = vld [vmem:[#allocation257_spill] sm:$0xff] }
 0x1fc   :  { %14627 = vmatprep.mubr.msk.f32.mxu1 %vm16631_vm2, %v25733_v27  ;;  %v3590_v30 = vcombine.low %v26206_v37, %v26309_v29  ;;  %v26373_v37 = vld [vmem:[#allocation26_spill] sm:$0xff] }
 0x1fe   :  { %15283 = vmatmul.mubr.msk.f32.gmra.mrb[4].mxu0 %vm2564_vm9, %v8491_v55  ;;  %v8494_v55 = vcombine.low %v19753_v4, %v26310_v58  ;;  %v20331_v39 = vrot.slane %v3590_v30, %v16753_v24  ;;  %v8495_v4 = vcombine.low %v26311_v52, %v18892_v32  ;;  %v26314_v30 = vld [vmem:[#allocation310_spill] sm:$0xff]  ;;  %v26316_v52 = vld [vmem:[#allocation333_spill] sm:$0xff] }
 0x1ff   :  { %14628 = vmatmul.mubr.msk.f32.gmra.mrb[64].mxu1 %vm2564_vm9, %v19829_v17  ;;  %15285 = vmatprep.mubr.msk.f32.mxu0 %vm16631_vm2, %v25733_v27  ;;  %v20315_v17 = vrot.slane %v3572_v63, %v16753_v24  ;;  %v26313_v63 = vld [vmem:[#allocation309_spill] sm:$0xff]  ;;  %v8497_v58 = vcombine.low %v26314_v30, %v19839_v41  ;;  %v8498_v41 = vcombine.low %v19040_v6, %v26316_v52  ;;  %v26320_v30 = vld [vmem:[#allocation328_spill] sm:$0xff] }
 0x200   :  { %14630 = vmatprep.mubr.msk.f32.mxu1 %vm16631_vm2, %v25733_v27 }
 0x201   :  { %v3588_v62 = vcombine.low %v20315_v17, %v19874_v20 }
 0x202   :  { %15286 = vmatmul.mubr.msk.f32.gmra.mrb[6].mxu0 %vm2564_vm9, %v8492_v5  ;;  %v26312_v5 = vld [vmem:[#allocation282_spill] sm:$0xff] }
 0x203   :  { %14631 = vmatmul.mubr.msk.f32.gmra.mrb[66].mxu1 %vm2564_vm9, %v3554_v54  ;;  %15288 = vmatprep.mubr.msk.f32.mxu0 %vm16631_vm2, %v25733_v27  ;;  %v3624_v54 = vcombine.low %v26220_v35, %v26312_v5 }
 0x204   :  { %14633 = vmatprep.mubr.msk.f32.mxu1 %vm16631_vm2, %v25733_v27 }
 0x205   :  { %v20354_v32 = vrot.slane %v3624_v54, %v16753_v24  ;;  %v26318_v54 = vld [vmem:[#allocation324_spill] sm:$0xff] }
 0x206   :  { %15289 = vmatmul.mubr.msk.f32.gmra.mrb[8].mxu0 %vm2564_vm9, %v8493_v15  ;;  %v8496_v15 = vcombine.low %v19795_v7, %v26313_v63  ;;  %v3691_v63 = vcombine.low %v26248_v47, %v26318_v54  ;;  %v26331_v47 = vld [vmem:[#allocation355_spill] sm:$0xff]  ;;  %v26354_v54 = vld [vmem:[#allocation156_spill] sm:$0xff] }
 0x207   :  { %14634 = vmatmul.mubr.msk.f32.gmra.mrb[68].mxu1 %vm2564_vm9, %v19871_v22  ;;  %15291 = vmatprep.mubr.msk.f32.mxu0 %vm16631_vm2, %v25733_v27  ;;  %v3605_v22 = vcombine.low %v19890_v59, %v20331_v39  ;;  %v3639_v7 = vcombine.low %v19933_v46, %v20354_v32 }
 0x208   :  { %14636 = vmatprep.mubr.msk.f32.mxu1 %vm16631_vm2, %v25733_v27 }
 0x20a   :  { %15292 = vmatmul.mubr.msk.f32.gmra.mrb[10].mxu0 %vm2564_vm9, %v8494_v55  ;;  %v26315_v55 = vld [vmem:[#allocation298_spill] sm:$0xff] }
 0x20b   :  { %14637 = vmatmul.mubr.msk.f32.gmra.mrb[70].mxu1 %vm2564_vm9, %v3588_v62  ;;  %15294 = vmatprep.mubr.msk.f32.mxu0 %vm16631_vm2, %v25733_v27  ;;  %v3657_v62 = vcombine.low %v26234_v9, %v26315_v55 }
 0x20c   :  { %14639 = vmatprep.mubr.msk.f32.mxu1 %vm16631_vm2, %v25733_v27 }
 0x20e   :  { %15295 = vmatmul.mubr.msk.f32.gmra.mrb[12].mxu0 %vm2564_vm9, %v8495_v4  ;;  %v26317_v4 = vld [vmem:[#allocation334_spill] sm:$0xff] }
 0x20f   :  { %14640 = vmatmul.mubr.msk.f32.gmra.mrb[72].mxu1 %vm2564_vm9, %v3605_v22  ;;  %15297 = vmatprep.mubr.msk.f32.mxu0 %vm16631_vm2, %v25733_v27  ;;  %v8499_v22 = vcombine.low %v26317_v4, %v19883_v18  ;;  %v8500_v18 = vcombine.low %v26214_v23, %v26221_v28  ;;  %v26323_v23 = vld [vmem:[#allocation399_spill] sm:$0xff]  ;;  %v26324_v28 = vld [vmem:[#allocation338_spill] sm:$0xff] }
 0x210   :  { %14642 = vmatprep.mubr.msk.f32.mxu1 %vm16631_vm2, %v25733_v27 }
 0x212   :  { %15298 = vmatmul.mubr.msk.f32.gmra.mrb[14].mxu0 %vm2564_vm9, %v8496_v15  ;;  %v26319_v15 = vld [vmem:[#allocation335_spill] sm:$0xff] }
 0x213   :  { %14643 = vmatmul.mubr.msk.f32.gmra.mrb[74].mxu1 %vm2564_vm9, %v19938_v10  ;;  %15300 = vmatprep.mubr.msk.f32.mxu0 %vm16631_vm2, %v25733_v27  ;;  %v20378_v10 = vrot.slane %v3657_v62, %v16753_v24  ;;  %v26322_v62 = vld [vmem:[#allocation258_spill] sm:$0xff] }
 0x214   :  { %14645 = vmatprep.mubr.msk.f32.mxu1 %vm16631_vm2, %v25733_v27 }
 0x215   :  { %v3673_v6 = vcombine.low %v20378_v10, %v19984_v16 }
 0x216   :  { %15301 = vmatmul.mubr.msk.f32.gmra.mrb[16].mxu0 %vm2564_vm9, %v8497_v58  ;;  %v3709_v58 = vcombine.low %v26320_v30, %v26319_v15  ;;  %v26349_v15 = vld [vmem:[#allocation410_spill] sm:$0xff] }
 0x217   :  { %14646 = vmatmul.mubr.msk.f32.gmra.mrb[76].mxu1 %vm2564_vm9, %v3639_v7  ;;  %15303 = vmatprep.mubr.msk.f32.mxu0 %vm16631_vm2, %v25733_v27  ;;  %v26321_v7 = vld [vmem:[#allocation369_spill] sm:$0xff] }
 0x218   :  { %14648 = vmatprep.mubr.msk.f32.mxu1 %vm16631_vm2, %v25733_v27  ;;  %v8501_v52 = vcombine.low %v26322_v62, %v26321_v7  ;;  %v20418_v4 = vrot.slane %v3709_v58, %v16753_v24  ;;  %v26328_v62 = vld [vmem:[#allocation362_spill] sm:$0xff] }
 0x21a   :  { %15304 = vmatmul.mubr.msk.f32.gmra.mrb[18].mxu0 %vm2564_vm9, %v8498_v41 }
 0x21b   :  { %14649 = vmatmul.mubr.msk.f32.gmra.mrb[78].mxu1 %vm2564_vm9, %v19981_v56  ;;  %15306 = vmatprep.mubr.msk.f32.mxu0 %vm16631_vm2, %v25733_v27  ;;  %v20402_v56 = vrot.slane %v3691_v63, %v16753_v24 }
 0x21c   :  { %14651 = vmatprep.mubr.msk.f32.mxu1 %vm16631_vm2, %v25733_v27 }
 0x21d   :  { %v3707_v41 = vcombine.low %v20402_v56, %v26324_v28 }
 0x21e   :  { %15307 = vmatmul.mubr.msk.f32.gmra.mrb[20].mxu0 %vm2564_vm9, %v8499_v22  ;;  %v26325_v22 = vld [vmem:[#allocation379_spill] sm:$0xff] }
 0x21f   :  { %14652 = vmatmul.mubr.msk.f32.gmra.mrb[80].mxu1 %vm2564_vm9, %v3673_v6  ;;  %15309 = vmatprep.mubr.msk.f32.mxu0 %vm16631_vm2, %v25733_v27  ;;  %v26326_v6 = vld [vmem:[#allocation370_spill] sm:$0xff] }
 0x220   :  { %14654 = vmatprep.mubr.msk.f32.mxu1 %vm16631_vm2, %v25733_v27  ;;  %v8502_v63 = vcombine.low %v26326_v6, %v26325_v22  ;;  %v26332_v22 = vld [vmem:[#allocation302_spill] sm:$0xff]  ;;  %v26333_v6 = vld [vmem:[#allocation393_spill] sm:$0xff] }
 0x222   :  { %15310 = vmatmul.mubr.msk.f32.gmra.mrb[22].mxu0 %vm2564_vm9, %v8500_v18  ;;  %v26327_v18 = vld [vmem:[#allocation423_spill] sm:$0xff] }
 0x223   :  { %14655 = vmatmul.mubr.msk.f32.gmra.mrb[82].mxu1 %vm2564_vm9, %v26323_v23  ;;  %15312 = vmatprep.mubr.msk.f32.mxu0 %vm16631_vm2, %v25733_v27  ;;  %v3724_v7 = vcombine.low %v26327_v18, %v20418_v4  ;;  %v26329_v23 = vld [vmem:[#allocation356_spill] sm:$0xff] }
 0x224   :  { %14657 = vmatprep.mubr.msk.f32.mxu1 %vm16631_vm2, %v25733_v27  ;;  %v3743_v58 = vcombine.low %v26329_v23, %v26328_v62  ;;  %v8504_v23 = vcombine.low %v26333_v6, %v26332_v22 }
 0x226   :  { %15313 = vmatmul.mubr.msk.f32.gmra.mrb[24].mxu0 %vm2564_vm9, %v8501_v52  ;;  %v26330_v52 = vld [vmem:[#allocation392_spill] sm:$0xff] }
 0x227   :  { %14658 = vmatmul.mubr.msk.f32.gmra.mrb[84].mxu1 %vm2564_vm9, %v3707_v41  ;;  %15315 = vmatprep.mubr.msk.f32.mxu0 %vm16631_vm2, %v25733_v27  ;;  %v8503_v35 = vcombine.low %v26331_v47, %v26330_v52  ;;  %v20441_v41 = vrot.slane %v3743_v58, %v16753_v24  ;;  %v26335_v47 = vld [vmem:[#allocation427_spill] sm:$0xff]  ;;  %v26336_v52 = vld [vmem:[#allocation381_spill] sm:$0xff] }
 0x228   :  { %14660 = vmatprep.mubr.msk.f32.mxu1 %vm16631_vm2, %v25733_v27  ;;  %v26337_v58 = vld [vmem:[#allocation373_spill] sm:$0xff] }
 0x229   :  { %v3776_v40 = vcombine.low %v26337_v58, %v26336_v52  ;;  %v26348_v58 = vld [vmem:[#allocation11_spill] sm:$0xff] }
 0x22a   :  { %15316 = vmatmul.mubr.msk.f32.gmra.mrb[26].mxu0 %vm2564_vm9, %v8502_v63  ;;  %v26334_v63 = vld [vmem:[#allocation426_spill] sm:$0xff] }
 0x22b   :  { %14661 = vmatmul.mubr.msk.f32.gmra.mrb[86].mxu1 %vm2564_vm9, %v3724_v7  ;;  %15318 = vmatprep.mubr.msk.f32.mxu0 %vm16631_vm2, %v25733_v27  ;;  %v3758_v7 = vcombine.low %v26335_v47, %v20441_v41  ;;  %v20465_v6 = vrot.slane %v3776_v40, %v16753_v24  ;;  %v26343_v40 = vld [vmem:[#allocation15_spill] sm:$0xff] }
 0x22c   :  { %14663 = vmatprep.mubr.msk.f32.mxu1 %vm16631_vm2, %v25733_v27 }
 0x22e   :  { %15319 = vmatmul.mubr.msk.f32.gmra.mrb[28].mxu0 %vm2564_vm9, %v8503_v35  ;;  %v26338_v35 = vld [vmem:[#allocation407_spill] sm:$0xff] }
 0x22f   :  { %14664 = vmatmul.mubr.msk.f32.gmra.mrb[88].mxu1 %vm2564_vm9, %v26334_v63  ;;  %15321 = vmatprep.mubr.msk.f32.mxu0 %vm16631_vm2, %v25733_v27  ;;  %v8505_v22 = vcombine.low %v26339_v12, %v26338_v35  ;;  %v26340_v63 = vld [vmem:[#allocation422_spill] sm:$0xff]  ;;  %v3792_v12 = vcombine.low %v20465_v6, %v20143_v51  ;;  %v26344_v35 = vld [vmem:[#allocation9_spill] sm:$0xff] }
 0x230   :  { %14666 = vmatprep.mubr.msk.f32.mxu1 %vm16631_vm2, %v25733_v27  ;;  %v8506_v14 = vcombine.low %v26341_v45, %v26340_v63  ;;  %v4224_v52 = vcombine.low %v26345_v19, %v26344_v35  ;;  %v26346_v45 = vld [vmem:[#allocation10_spill] sm:$0xff] }
 0x231   :  { %v13502_v62 = vcombine.high %v26346_v45, %v26348_v58  ;;  %v26352_v58 = vld [vmem:[#allocation12_spill] sm:$0xff] }
 0x232   :  { %15322 = vmatmul.mubr.msk.f32.gmra.mrb[30].mxu0 %vm2564_vm9, %v8504_v23  ;;  %v26342_v23 = vld [vmem:[#allocation8_spill] sm:$0xff]  ;;  %v4238_v35 = vrot.slane %v4224_v52, %v16753_v24 }
 0x233   :  { %14667 = vmatmul.mubr.msk.f32.gmra.mrb[90].mxu1 %vm2564_vm9, %v3758_v7  ;;  %15324 = vmatprep.mubr.msk.f32.mxu0 %vm16631_vm2, %v25733_v27  ;;  %v4223_v7 = vcombine.low %v26343_v40, %v26342_v23  ;;  %v26350_v23 = vld [vmem:[#allocation143_spill] sm:$0xff]  ;;  %v26357_v52 = vld [vmem:[#allocation424_spill] sm:$0xff] }
 0x234   :  { %14669 = vmatprep.mubr.msk.f32.mxu1 %vm16631_vm2, %v25733_v27  ;;  %v8507_v40 = vcombine.low %v26350_v23, %v26349_v15  ;;  %v26353_v23 = vld [vmem:[#allocation157_spill] sm:$0xff] }
 0x235   :  { %v4231_v19 = vrot.slane %v4223_v7, %v16753_v24  ;;  %v26356_v7 = vld [vmem:[#allocation411_spill] sm:$0xff] }
 0x236   :  { %15325 = vmatmul.mubr.msk.f32.gmra.mrb[32].mxu0 %vm2564_vm9, %v8505_v22  ;;  %v63_v22 = vld [vmem:[%s24822_s0 + $0xf0] sm:$0xff]  ;;  %v8508_v9 = vcombine.low %v26357_v52, %v26356_v7  ;;  %v26361_v7 = vld [vmem:[#allocation413_spill] sm:$0xff] }
 0x237   :  { %14670 = vmatmul.mubr.msk.f32.gmra.mrb[92].mxu1 %vm2564_vm9, %v20147_v53  ;;  %15327 = vmatprep.mubr.msk.f32.mxu0 %vm16631_vm2, %v25733_v27  ;;  %v26347_v53 = vld [vmem:[#allocation20_spill] sm:$0xff]  ;;  %v8421_v30 = vcombine.high %v63_v22, %v63_v22  ;;  %v20508_v55 = vrot.slane %v63_v22, %v16753_v24  ;;  %v26363_v52 = vld [vmem:[#allocation163_spill] sm:$0xff] }
 0x238   :  { %14672 = vmatprep.mubr.msk.f32.mxu1 %vm16631_vm2, %v25733_v27  ;;  %v4240_v63 = vcombine.low %v26347_v53, %v26346_v45  ;;  %v26351_v53 = vld [vmem:[#allocation19_spill] sm:$0xff] }
 0x239   :  { %v4257_v15 = vcombine.low %v26352_v58, %v26351_v53  ;;  %26355 = vst [vmem:[#allocation191_spill] sm:$0xff] %v20508_v55  ;;  %v20514_v5 = vrot.slane %v8421_v30, %v16753_v24  ;;  %v26359_v58 = vld [vmem:[#allocation21_spill] sm:$0xff]  ;;  %v64_v22 = vld [vmem:[%s24822_s0 + $0xf8] sm:$0xff] }
 0x23a   :  { %15328 = vmatmul.mubr.msk.f32.gmra.mrb[34].mxu0 %vm2564_vm9, %v8506_v14  ;;  %v4248_v45 = vrot.slane %v4240_v63, %v16753_v24  ;;  %v4255_v14 = vrot.slane %v13502_v62, %v16753_v24  ;;  %v4239_v62 = vcombine.low %v4231_v19, %v4238_v35  ;;  %v26360_v63 = vld [vmem:[#allocation13_spill] sm:$0xff] }
 0x23b   :  { %14673 = vmatmul.mubr.msk.f32.gmra.mrb[94].mxu1 %vm2564_vm9, %v3792_v12  ;;  %15330 = vmatprep.mubr.msk.f32.mxu0 %vm16631_vm2, %v25733_v27  ;;  %v8510_v12 = vcombine.low %v26354_v54, %v26353_v23  ;;  %26358 = vst [vmem:[#allocation228_spill] sm:$0xff] %v20514_v5  ;;  %v4258_v53 = vcombine.low %v26360_v63, %v26359_v58  ;;  %v13566_v58 = vld [vmem:[%s24823_s1 + $0xc] sm:$0xf]  ;;  %v26370_v54 = vld [vmem:[#allocation24_spill] sm:$0xff] }
 0x23c   :  { %14675 = vmatprep.mubr.msk.f32.mxu1 %vm16631_vm2, %v25733_v27  ;;  %v20528_v30 = vrot.slane %v4257_v15, %v16753_v24  ;;  %v8519_v23 = vcombine.low %v26363_v52, %v20508_v55  ;;  %v20548_v15 = vrot.slane %v64_v22, %v16753_v24  ;;  %v26369_v52 = vld [vmem:[#allocation25_spill] sm:$0xff] }
 0x23d   :  { %v8517_v35 = vrot.slane %v8510_v12, %v16753_v24  ;;  %v8438_v12 = vcombine.high %v64_v22, %v64_v22  ;;  %v20554_v63 = vrot.slane %v4258_v53, %v16753_v24  ;;  %v26371_v22 = vld [vmem:[#allocation414_spill] sm:$0xff]  ;;  %v4292_v53 = vcombine.low %v26375_v57, %v26374_v34 }
 0x23e   :  { %15331 = vmatmul.mubr.msk.f32.gmra.mrb[36].mxu0 %vm2564_vm9, %v8507_v40  ;;  %v4256_v40 = vcombine.low %v4248_v45, %v4255_v14  ;;  %v20541_v45 = vcombine.high %v20508_v55, %v20508_v55  ;;  %v20545_v14 = vcombine.high %v20514_v5, %v20514_v5  ;;  %26365 = vst [vmem:[#allocation253_spill] sm:$0xff] %v20548_v15 }
 0x23f   :  { %14676 = vmatmul.mubr.msk.f32.gmra.mrb[96].mxu1 %vm2564_vm9, %v20205_v49  ;;  %15333 = vmatprep.mubr.msk.f32.mxu0 %vm16631_vm2, %v25733_v27  ;;  %v26362_v49 = vld [vmem:[#allocation412_spill] sm:$0xff]  ;;  %26366 = vst [vmem:[#allocation254_spill] sm:$0xff] %v20554_v63  ;;  %v4275_v55 = vcombine.low %v26370_v54, %v26369_v52  ;;  %v8518_v29 = vcombine.low %v8517_v35, %v26371_v22  ;;  %v26381_v22 = vld [vmem:[#allocation415_spill] sm:$0xff] }
 0x240   :  { %14680 = vmatprep.mubr.msk.f32.mxu1 %vm16631_vm2, %v25733_v27  ;;  %v8509_v19 = vcombine.low %v26362_v49, %v26361_v7  ;;  %26364 = vst [vmem:[#allocation230_spill] sm:$0xff] %v20545_v14  ;;  %v26368_v7 = vld [vmem:[#allocation14_spill] sm:$0xff]  ;;  %v8526_v2 = vrot.slane %v8519_v23, %v16753_v24  ;;  %v8528_v54 = vcombine.low %v20541_v45, %v20514_v5 }
 0x241   :  { %v8529_v52 = vcombine.low %v20545_v14, %v20548_v15  ;;  %v20576_v35 = vrot.slane %v8438_v12, %v16753_v24  ;;  %v4273_v57 = vcombine.low %v20528_v30, %v20554_v63  ;;  %v20597_v12 = vrot.slane %v4292_v53, %v16753_v24  ;;  %v26382_v53 = vld [vmem:[#allocation34_spill] sm:$0xff] }
 0x242   :  { %15334 = vmatmul.mubr.msk.f32.gmra.mrb[38].mxu0 %vm2564_vm9, %v8508_v9  ;;  %v26367_v9 = vld [vmem:[#allocation23_spill] sm:$0xff] }
 0x243   :  { %14681 = vmatmul.mubr.msk.f32.vlgmr.msra.gmra.mrb[0].mxu1 %vm2564_vm9, %v4239_v62  ;;  %15336 = vmatprep.mubr.msk.f32.mxu0 %vm16631_vm2, %v25733_v27  ;;  %v4274_v49 = vcombine.low %v26368_v7, %v26367_v9  ;;  %v26372_v62 = vld [vmem:[#allocation27_spill] sm:$0xff]  ;;  %26376 = vst [vmem:[#allocation285_spill] sm:$0xff] %v20576_v35  ;;  %26379 = vst [vmem:[#allocation310_spill] sm:$0xff] %v20597_v12 }
 0x244   :  { %14683 = vmatprep.mubr.msk.f32.mxu1 %vm16631_vm2, %v25733_v27  ;;  %14828 = vmatpush3.msk.msra.mxu1 %vm2663_vm0, %v13566_v58  ;;  %v4291_v0 = vcombine.low %v26373_v37, %v26372_v62  ;;  %v20580_v37 = vcombine.high %v20548_v15, %v20548_v15  ;;  %v8527_v62 = vcombine.low %v26381_v22, %v8526_v2  ;;  %v26386_v22 = vld [vmem:[#allocation36_spill] sm:$0xff] }
 0x245   :  { %15775 = vmatprep.subr.mxu1 %v25733_v27  ;;  %v4282_v23 = vrot.slane %v4274_v49, %v16753_v24  ;;  %v8536_v49 = vrot.slane %v8528_v54, %v16753_v24 }
 0x246   :  { %15337 = vmatmul.mubr.msk.f32.gmra.mrb[40].mxu0 %vm2564_vm9, %v8509_v19  ;;  %26377 = vst [vmem:[#allocation289_spill] sm:$0xff] %v20580_v37  ;;  %v20589_v19 = vrot.slane %v4275_v55, %v16753_v24  ;;  %v20594_v58 = vrot.slane %v4291_v0, %v16753_v24  ;;  %v8543_v55 = vrot.slane %v8529_v52, %v16753_v24 }
 0x247   :  { %14684 = vmatmul.mubr.msk.f32.gmra.mrb[2].mxu1 %vm2564_vm9, %v4256_v40  ;;  %15339 = vmatprep.mubr.msk.f32.mxu0 %vm16631_vm2, %v25733_v27  ;;  %v26380_v40 = vld [vmem:[#allocation30_spill] sm:$0xff]  ;;  %v8545_v63 = vcombine.low %v20580_v37, %v20576_v35 }
 0x248   :  { %26378 = vst [vmem:[#allocation309_spill] sm:$0xff] %v20589_v19  ;;  %14686 = vmatprep.mubr.msk.f32.mxu1 %vm16631_vm2, %v25733_v27  ;;  %v13503_v9 = vcombine.high %v26374_v34, %v26380_v40  ;;  %v4290_v0 = vcombine.low %v4282_v23, %v20589_v19  ;;  %v26383_v34 = vld [vmem:[#allocation31_spill] sm:$0xff]  ;;  %v4307_v2 = vcombine.low %v20594_v58, %v20597_v12  ;;  %v26388_v12 = vld [vmem:[#allocation37_spill] sm:$0xff] }
 0x249   :  { %v4309_v40 = vcombine.low %v26383_v34, %v26382_v53  ;;  %v8544_v54 = vcombine.low %v8536_v49, %v8543_v55  ;;  %v8552_v52 = vrot.slane %v8545_v63, %v16753_v24  ;;  %v26385_v23 = vld [vmem:[#allocation39_spill] sm:$0xff]  ;;  %v26387_v34 = vld [vmem:[#allocation46_spill] sm:$0xff]  ;;  %v26390_v49 = vld [vmem:[#allocation44_spill] sm:$0xff] }
 0x24a   :  { %15340 = vmatmul.mubr.msk.f32.gmra.mrb[42].mxu0 %vm2564_vm9, %v8518_v29  ;;  %v20619_v29 = vrot.slane %v13503_v9, %v16753_v24  ;;  %v4325_v53 = vcombine.low %v26386_v22, %v26385_v23  ;;  %v26389_v9 = vld [vmem:[#allocation41_spill] sm:$0xff] }
 0x24b   :  { %14687 = vmatmul.mubr.msk.f32.gmra.mrb[4].mxu1 %vm2564_vm9, %v4273_v57  ;;  %15342 = vmatprep.mubr.msk.f32.mxu0 %vm16631_vm2, %v25733_v27  ;;  %v20626_v57 = vrot.slane %v4309_v40, %v16753_v24  ;;  %v8553_v63 = vcombine.low %v8552_v52, %v20220_v3  ;;  %v4342_v55 = vcombine.low %v26390_v49, %v26389_v9  ;;  %v26392_v19 = vld [vmem:[#allocation45_spill] sm:$0xff]  ;;  %v26398_v49 = vld [vmem:[#allocation176_spill] sm:$0xff] }
 0x24c   :  { %14689 = vmatprep.mubr.msk.f32.mxu1 %vm16631_vm2, %v25733_v27  ;;  %26384 = vst [vmem:[#allocation333_spill] sm:$0xff] %v20619_v29  ;;  %v20646_v22 = vrot.slane %v4325_v53, %v16753_v24  ;;  %v26395_v52 = vld [vmem:[#allocation49_spill] sm:$0xff]  ;;  %v26396_v53 = vld [vmem:[#allocation50_spill] sm:$0xff] }
 0x24d   :  { %v4324_v23 = vcombine.low %v20619_v29, %v20626_v57  ;;  %v20655_v3 = vrot.slane %v4342_v55, %v16753_v24  ;;  %v8555_v55 = vcombine.low %v20240_v25, %v26398_v49  ;;  %v26404_v25 = vld [vmem:[#allocation196_spill] sm:$0xff]  ;;  %v26406_v49 = vld [vmem:[#allocation59_spill] sm:$0xff] }
 0x24e   :  { %15343 = vmatmul.mubr.msk.f32.gmra.mrb[44].mxu0 %vm2564_vm9, %v8527_v62  ;;  %v4326_v62 = vcombine.low %v26388_v12, %v26387_v34  ;;  %v4359_v34 = vcombine.low %v26396_v53, %v26395_v52  ;;  %v26402_v53 = vld [vmem:[#allocation60_spill] sm:$0xff] }
 0x24f   :  { %14690 = vmatmul.mubr.msk.f32.gmra.mrb[6].mxu1 %vm2564_vm9, %v4290_v0  ;;  %15345 = vmatprep.mubr.msk.f32.mxu0 %vm16631_vm2, %v25733_v27  ;;  %v26391_v0 = vld [vmem:[#allocation47_spill] sm:$0xff] }
 0x250   :  { %14692 = vmatprep.mubr.msk.f32.mxu1 %vm16631_vm2, %v25733_v27  ;;  %v4343_v40 = vcombine.low %v26392_v19, %v26391_v0 }
 0x252   :  { %15346 = vmatmul.mubr.msk.f32.gmra.mrb[46].mxu0 %vm2564_vm9, %v8544_v54  ;;  %v20649_v54 = vrot.slane %v4326_v62, %v16753_v24  ;;  %v20658_v19 = vrot.slane %v4343_v40, %v16753_v24  ;;  %v26400_v40 = vld [vmem:[#allocation58_spill] sm:$0xff] }
 0x253   :  { %14693 = vmatmul.mubr.msk.f32.gmra.mrb[8].mxu1 %vm2564_vm9, %v4307_v2  ;;  %15348 = vmatprep.mubr.msk.f32.mxu0 %vm16631_vm2, %v25733_v27  ;;  %v8554_v2 = vcombine.low %v19720_v11, %v19736_v50  ;;  %v20677_v50 = vrot.slane %v4359_v34, %v16753_v24  ;;  %v8556_v34 = vcombine.low %v26404_v25, %v19779_v26 }
 0x254   :  { %26393 = vst [vmem:[#allocation334_spill] sm:$0xff] %v20649_v54  ;;  %14695 = vmatprep.mubr.msk.f32.mxu1 %vm16631_vm2, %v25733_v27  ;;  %26394 = vst [vmem:[#allocation369_spill] sm:$0xff] %v20658_v19  ;;  %v4341_v62 = vcombine.low %v20646_v22, %v20649_v54  ;;  %v4358_v11 = vcombine.low %v20655_v3, %v20658_v19  ;;  %v26403_v54 = vld [vmem:[#allocation57_spill] sm:$0xff]  ;;  %v26407_v19 = vld [vmem:[#allocation68_spill] sm:$0xff] }
 0x256   :  { %15349 = vmatmul.mubr.msk.f32.gmra.mrb[48].mxu0 %vm2564_vm9, %v8553_v63  ;;  %v26397_v63 = vld [vmem:[#allocation52_spill] sm:$0xff] }
 0x257   :  { %14696 = vmatmul.mubr.msk.f32.gmra.mrb[10].mxu1 %vm2564_vm9, %v4324_v23  ;;  %15351 = vmatprep.mubr.msk.f32.mxu0 %vm16631_vm2, %v25733_v27  ;;  %v13504_v9 = vcombine.high %v26395_v52, %v26397_v63  ;;  %v26401_v23 = vld [vmem:[#allocation54_spill] sm:$0xff] }
 0x258   :  { %14698 = vmatprep.mubr.msk.f32.mxu1 %vm16631_vm2, %v25733_v27  ;;  %v4376_v52 = vcombine.low %v26401_v23, %v26400_v40 }
 0x259   :  { %v20685_v0 = vrot.slane %v13504_v9, %v16753_v24  ;;  %v26408_v9 = vld [vmem:[#allocation65_spill] sm:$0xff] }
 0x25a   :  { %15352 = vmatmul.mubr.msk.f32.gmra.mrb[50].mxu0 %vm2564_vm9, %v8554_v2  ;;  %v4377_v2 = vcombine.low %v26403_v54, %v26402_v53  ;;  %v4394_v63 = vcombine.low %v26408_v9, %v26407_v19  ;;  %v20706_v54 = vrot.slane %v4376_v52, %v16753_v24  ;;  %v26413_v53 = vld [vmem:[#allocation69_spill] sm:$0xff]  ;;  %v26414_v52 = vld [vmem:[#allocation71_spill] sm:$0xff]  ;;  %v26417_v9 = vld [vmem:[#allocation416_spill] sm:$0xff] }
 0x25b   :  { %14699 = vmatmul.mubr.msk.f32.gmra.mrb[12].mxu1 %vm2564_vm9, %v4341_v62  ;;  %15354 = vmatprep.mubr.msk.f32.mxu0 %vm16631_vm2, %v25733_v27  ;;  %26399 = vst [vmem:[#allocation258_spill] sm:$0xff] %v20685_v0  ;;  %v26405_v62 = vld [vmem:[#allocation63_spill] sm:$0xff]  ;;  %v4375_v40 = vcombine.low %v20677_v50, %v20685_v0  ;;  %v4410_v25 = vcombine.low %v26414_v52, %v26413_v53  ;;  %v26418_v53 = vld [vmem:[#allocation74_spill] sm:$0xff] }
 0x25c   :  { %14701 = vmatprep.mubr.msk.f32.mxu1 %vm16631_vm2, %v25733_v27  ;;  %v4393_v29 = vcombine.low %v26406_v49, %v26405_v62  ;;  %v20718_v19 = vrot.slane %v4394_v63, %v16753_v24 }
 0x25d   :  { %v20737_v63 = vrot.slane %v4410_v25, %v16753_v24 }
 0x25e   :  { %15355 = vmatmul.mubr.msk.f32.gmra.mrb[52].mxu0 %vm2564_vm9, %v8555_v55  ;;  %v20709_v55 = vrot.slane %v4377_v2, %v16753_v24  ;;  %v20715_v26 = vrot.slane %v4393_v29, %v16753_v24  ;;  %26411 = vst [vmem:[#allocation379_spill] sm:$0xff] %v20718_v19  ;;  %v26416_v29 = vld [vmem:[#allocation72_spill] sm:$0xff] }
 0x25f   :  { %14702 = vmatmul.mubr.msk.f32.gmra.mrb[14].mxu1 %vm2564_vm9, %v4358_v11  ;;  %15357 = vmatprep.mubr.msk.f32.mxu0 %vm16631_vm2, %v25733_v27  ;;  %v26412_v11 = vld [vmem:[#allocation194_spill] sm:$0xff] }
 0x260   :  { %26409 = vst [vmem:[#allocation399_spill] sm:$0xff] %v20709_v55  ;;  %14704 = vmatprep.mubr.msk.f32.mxu1 %vm16631_vm2, %v25733_v27  ;;  %26410 = vst [vmem:[#allocation338_spill] sm:$0xff] %v20715_v26  ;;  %v8557_v23 = vcombine.low %v20262_v48, %v26412_v11  ;;  %v4392_v2 = vcombine.low %v20706_v54, %v20709_v55  ;;  %v4409_v48 = vcombine.low %v20715_v26, %v20718_v19  ;;  %v26420_v26 = vld [vmem:[#allocation75_spill] sm:$0xff]  ;;  %v26424_v19 = vld [vmem:[#allocation88_spill] sm:$0xff] }
 0x262   :  { %15358 = vmatmul.mubr.msk.f32.gmra.mrb[54].mxu0 %vm2564_vm9, %v8556_v34  ;;  %v26415_v34 = vld [vmem:[#allocation70_spill] sm:$0xff] }
 0x263   :  { %14705 = vmatmul.mubr.msk.f32.gmra.mrb[16].mxu1 %vm2564_vm9, %v4375_v40  ;;  %15360 = vmatprep.mubr.msk.f32.mxu0 %vm16631_vm2, %v25733_v27  ;;  %v4411_v62 = vcombine.low %v26416_v29, %v26415_v34  ;;  %v8558_v40 = vcombine.low %v26417_v9, %v20291_v8  ;;  %v13505_v52 = vcombine.high %v26415_v34, %v26418_v53  ;;  %v26419_v29 = vld [vmem:[#allocation80_spill] sm:$0xff]  ;;  %v26421_v8 = vld [vmem:[#allocation417_spill] sm:$0xff]  ;;  %v26423_v9 = vld [vmem:[#allocation82_spill] sm:$0xff] }
 0x264   :  { %14707 = vmatprep.mubr.msk.f32.mxu1 %vm16631_vm2, %v25733_v27  ;;  %v8559_v25 = vcombine.low %v19823_v43, %v26421_v8  ;;  %v26430_v8 = vld [vmem:[#allocation87_spill] sm:$0xff] }
 0x265   :  { %v20745_v11 = vrot.slane %v4411_v62, %v16753_v24  ;;  %v26425_v62 = vld [vmem:[#allocation83_spill] sm:$0xff] }
 0x266   :  { %15361 = vmatmul.mubr.msk.f32.gmra.mrb[56].mxu0 %vm2564_vm9, %v8557_v23  ;;  %v4428_v23 = vcombine.low %v26420_v26, %v26419_v29  ;;  %v4445_v55 = vcombine.low %v26425_v62, %v26424_v19  ;;  %v20766_v26 = vrot.slane %v13505_v52, %v16753_v24  ;;  %v26431_v52 = vld [vmem:[#allocation90_spill] sm:$0xff] }
 0x267   :  { %14708 = vmatmul.mubr.msk.f32.gmra.mrb[18].mxu1 %vm2564_vm9, %v4392_v2  ;;  %15363 = vmatprep.mubr.msk.f32.mxu0 %vm16631_vm2, %v25733_v27  ;;  %v26422_v2 = vld [vmem:[#allocation84_spill] sm:$0xff]  ;;  %v4426_v34 = vcombine.low %v20737_v63, %v20745_v11 }
 0x268   :  { %14710 = vmatprep.mubr.msk.f32.mxu1 %vm16631_vm2, %v25733_v27  ;;  %v4444_v0 = vcombine.low %v26423_v9, %v26422_v2  ;;  %26426 = vst [vmem:[#allocation370_spill] sm:$0xff] %v20766_v26  ;;  %v20778_v19 = vrot.slane %v4445_v55, %v16753_v24  ;;  %v4461_v2 = vcombine.low %v26431_v52, %v26430_v8  ;;  %v26435_v8 = vld [vmem:[#allocation95_spill] sm:$0xff]  ;;  %v26436_v52 = vld [vmem:[#allocation96_spill] sm:$0xff] }
 0x26a   :  { %15364 = vmatmul.mubr.msk.f32.gmra.mrb[58].mxu0 %vm2564_vm9, %v8558_v40  ;;  %v20769_v40 = vrot.slane %v4428_v23, %v16753_v24  ;;  %v20775_v43 = vrot.slane %v4444_v0, %v16753_v24  ;;  %26428 = vst [vmem:[#allocation392_spill] sm:$0xff] %v20778_v19  ;;  %v26433_v0 = vld [vmem:[#allocation91_spill] sm:$0xff]  ;;  %v20797_v55 = vrot.slane %v4461_v2, %v16753_v24 }
 0x26b   :  { %14711 = vmatmul.mubr.msk.f32.gmra.mrb[20].mxu1 %vm2564_vm9, %v4409_v48  ;;  %15366 = vmatprep.mubr.msk.f32.mxu0 %vm16631_vm2, %v25733_v27  ;;  %v26429_v48 = vld [vmem:[#allocation418_spill] sm:$0xff]  ;;  %v26439_v2 = vld [vmem:[#allocation103_spill] sm:$0xff] }
 0x26c   :  { %26427 = vst [vmem:[#allocation423_spill] sm:$0xff] %v20769_v40  ;;  %14713 = vmatprep.mubr.msk.f32.mxu1 %vm16631_vm2, %v25733_v27  ;;  %v8560_v29 = vcombine.low %v26429_v48, %v20315_v17  ;;  %v4443_v23 = vcombine.low %v20766_v26, %v20769_v40  ;;  %v4460_v17 = vcombine.low %v20775_v43, %v20778_v19  ;;  %v26441_v26 = vld [vmem:[#allocation106_spill] sm:$0xff] }
 0x26e   :  { %15367 = vmatmul.mubr.msk.f32.gmra.mrb[60].mxu0 %vm2564_vm9, %v8559_v25  ;;  %v26432_v25 = vld [vmem:[#allocation94_spill] sm:$0xff] }
 0x26f   :  { %14714 = vmatmul.mubr.msk.f32.gmra.mrb[22].mxu1 %vm2564_vm9, %v4426_v34  ;;  %15369 = vmatprep.mubr.msk.f32.mxu0 %vm16631_vm2, %v25733_v27  ;;  %v4462_v9 = vcombine.low %v26433_v0, %v26432_v25  ;;  %v8561_v34 = vcombine.low %v19874_v20, %v19890_v59  ;;  %v4478_v25 = vcombine.low %v26436_v52, %v26435_v8  ;;  %v26437_v0 = vld [vmem:[#allocation99_spill] sm:$0xff] }
 0x270   :  { %14716 = vmatprep.mubr.msk.f32.mxu1 %vm16631_vm2, %v25733_v27  ;;  %v26438_v20 = vld [vmem:[#allocation339_spill] sm:$0xff] }
 0x271   :  { %v20805_v48 = vrot.slane %v4462_v9, %v16753_v24  ;;  %v8562_v59 = vcombine.low %v20331_v39, %v26438_v20  ;;  %v26442_v9 = vld [vmem:[#allocation104_spill] sm:$0xff] }
 0x272   :  { %15370 = vmatmul.mubr.msk.f32.gmra.mrb[62].mxu0 %vm2564_vm9, %v8560_v29  ;;  %v13506_v29 = vcombine.high %v26435_v8, %v26437_v0  ;;  %v4496_v40 = vcombine.low %v26442_v9, %v26441_v26  ;;  %v20826_v8 = vrot.slane %v4478_v25, %v16753_v24  ;;  %v26448_v25 = vld [vmem:[#allocation105_spill] sm:$0xff] }
 0x273   :  { %14717 = vmatmul.mubr.msk.f32.gmra.mrb[24].mxu1 %vm2564_vm9, %v4443_v23  ;;  %15372 = vmatprep.mubr.msk.f32.mxu0 %vm16631_vm2, %v25733_v27  ;;  %26434 = vst [vmem:[#allocation355_spill] sm:$0xff] %v20805_v48  ;;  %v26440_v23 = vld [vmem:[#allocation100_spill] sm:$0xff]  ;;  %v4477_v52 = vcombine.low %v20797_v55, %v20805_v48 }
 0x274   :  { %14719 = vmatprep.mubr.msk.f32.mxu1 %vm16631_vm2, %v25733_v27  ;;  %v4495_v19 = vcombine.low %v26440_v23, %v26439_v2  ;;  %v20838_v26 = vrot.slane %v4496_v40, %v16753_v24  ;;  %v26447_v2 = vld [vmem:[#allocation110_spill] sm:$0xff] }
 0x275   :  { %v4512_v23 = vcombine.low %v26448_v25, %v26447_v2  ;;  %v26459_v25 = vld [vmem:[#allocation125_spill] sm:$0xff] }
 0x276   :  { %15373 = vmatmul.mubr.msk.f32.gmra.mrb[64].mxu0 %vm2564_vm9, %v8561_v34  ;;  %v20829_v34 = vrot.slane %v13506_v29, %v16753_v24  ;;  %v20835_v39 = vrot.slane %v4495_v19, %v16753_v24  ;;  %26445 = vst [vmem:[#allocation426_spill] sm:$0xff] %v20838_v26  ;;  %v26450_v19 = vld [vmem:[#allocation109_spill] sm:$0xff] }
 0x277   :  { %14720 = vmatmul.mubr.msk.f32.gmra.mrb[26].mxu1 %vm2564_vm9, %v4460_v17  ;;  %15375 = vmatprep.mubr.msk.f32.mxu0 %vm16631_vm2, %v25733_v27  ;;  %v26446_v17 = vld [vmem:[#allocation345_spill] sm:$0xff]  ;;  %v20857_v40 = vrot.slane %v4512_v23, %v16753_v24 }
 0x278   :  { %26443 = vst [vmem:[#allocation302_spill] sm:$0xff] %v20829_v34  ;;  %14722 = vmatprep.mubr.msk.f32.mxu1 %vm16631_vm2, %v25733_v27  ;;  %26444 = vst [vmem:[#allocation393_spill] sm:$0xff] %v20835_v39  ;;  %v8563_v20 = vcombine.low %v26446_v17, %v19933_v46  ;;  %v4494_v29 = vcombine.low %v20826_v8, %v20829_v34  ;;  %v4511_v46 = vcombine.low %v20835_v39, %v20838_v26  ;;  %v26455_v26 = vld [vmem:[#allocation116_spill] sm:$0xff]  ;;  %v26456_v39 = vld [vmem:[#allocation118_spill] sm:$0xff] }
 0x279   :  { %26451 = vst [vmem:[#allocation427_spill] sm:$0xff] %v20857_v40 }
 0x27a   :  { %15376 = vmatmul.mubr.msk.f32.gmra.mrb[66].mxu0 %vm2564_vm9, %v8562_v59  ;;  %v26449_v59 = vld [vmem:[#allocation114_spill] sm:$0xff] }
 0x27b   :  { %14723 = vmatmul.mubr.msk.f32.gmra.mrb[28].mxu1 %vm2564_vm9, %v4477_v52  ;;  %15378 = vmatprep.mubr.msk.f32.mxu0 %vm16631_vm2, %v25733_v27  ;;  %v4513_v9 = vcombine.low %v26450_v19, %v26449_v59  ;;  %v26452_v52 = vld [vmem:[#allocation419_spill] sm:$0xff]  ;;  %v26454_v19 = vld [vmem:[#allocation117_spill] sm:$0xff] }
 0x27c   :  { %14725 = vmatprep.mubr.msk.f32.mxu1 %vm16631_vm2, %v25733_v27  ;;  %v8564_v17 = vcombine.low %v20354_v32, %v26452_v52  ;;  %v26453_v59 = vld [vmem:[#allocation115_spill] sm:$0xff]  ;;  %v26457_v32 = vld [vmem:[#allocation420_spill] sm:$0xff] }
 0x27d   :  { %v20865_v2 = vrot.slane %v4513_v9, %v16753_v24  ;;  %v4529_v34 = vcombine.low %v26454_v19, %v26453_v59  ;;  %v8565_v23 = vcombine.low %v26457_v32, %v20378_v10  ;;  %v26460_v9 = vld [vmem:[#allocation121_spill] sm:$0xff]  ;;  %v26464_v19 = vld [vmem:[#allocation130_spill] sm:$0xff] }
 0x27e   :  { %15379 = vmatmul.mubr.msk.f32.gmra.mrb[68].mxu0 %vm2564_vm9, %v8563_v20  ;;  %v4530_v20 = vcombine.low %v26456_v39, %v26455_v26  ;;  %v4547_v48 = vcombine.low %v26460_v9, %v26459_v25  ;;  %v26463_v25 = vld [vmem:[#allocation375_spill] sm:$0xff] }
 0x27f   :  { %14726 = vmatmul.mubr.msk.f32.gmra.mrb[30].mxu1 %vm2564_vm9, %v4494_v29  ;;  %15381 = vmatprep.mubr.msk.f32.mxu0 %vm16631_vm2, %v25733_v27  ;;  %v26458_v29 = vld [vmem:[#allocation120_spill] sm:$0xff]  ;;  %v4528_v59 = vcombine.low %v20857_v40, %v20865_v2  ;;  %v20886_v39 = vrot.slane %v4529_v34, %v16753_v24 }
 0x280   :  { %14728 = vmatprep.mubr.msk.f32.mxu1 %vm16631_vm2, %v25733_v27  ;;  %v13507_v52 = vcombine.high %v26455_v26, %v26458_v29  ;;  %v20898_v26 = vrot.slane %v4547_v48, %v16753_v24  ;;  %v26465_v34 = vld [vmem:[#allocation128_spill] sm:$0xff] }
 0x281   :  { %v4563_v32 = vcombine.low %v26465_v34, %v26464_v19  ;;  %v26470_v34 = vld [vmem:[#allocation134_spill] sm:$0xff] }
 0x282   :  { %15382 = vmatmul.mubr.msk.f32.gmra.mrb[70].mxu0 %vm2564_vm9, %v8564_v17  ;;  %v20889_v17 = vrot.slane %v4530_v20, %v16753_v24  ;;  %v20895_v10 = vrot.slane %v13507_v52, %v16753_v24  ;;  %26462 = vst [vmem:[#allocation402_spill] sm:$0xff] %v20898_v26  ;;  %v26467_v52 = vld [vmem:[#allocation129_spill] sm:$0xff] }
 0x283   :  { %14729 = vmatmul.mubr.msk.f32.gmra.mrb[32].mxu1 %vm2564_vm9, %v4511_v46  ;;  %15384 = vmatprep.mubr.msk.f32.mxu0 %vm16631_vm2, %v25733_v27  ;;  %v8566_v46 = vcombine.low %v19984_v16, %v26463_v25  ;;  %v20917_v48 = vrot.slane %v4563_v32, %v16753_v24  ;;  %v26474_v32 = vld [vmem:[#allocation140_spill] sm:$0xff] }
 0x284   :  { %14731 = vmatprep.mubr.msk.f32.mxu1 %vm16631_vm2, %v25733_v27  ;;  %26461 = vst [vmem:[#allocation407_spill] sm:$0xff] %v20895_v10  ;;  %v4545_v20 = vcombine.low %v20886_v39, %v20889_v17  ;;  %v4562_v16 = vcombine.low %v20895_v10, %v20898_v26  ;;  %v26472_v10 = vld [vmem:[#allocation138_spill] sm:$0xff]  ;;  %v26473_v26 = vld [vmem:[#allocation137_spill] sm:$0xff] }
 0x286   :  { %15385 = vmatmul.mubr.msk.f32.gmra.mrb[72].mxu0 %vm2564_vm9, %v8565_v23  ;;  %v26466_v23 = vld [vmem:[#allocation136_spill] sm:$0xff] }
 0x287   :  { %14732 = vmatmul.mubr.msk.f32.gmra.mrb[34].mxu1 %vm2564_vm9, %v4528_v59  ;;  %15387 = vmatprep.mubr.msk.f32.mxu0 %vm16631_vm2, %v25733_v27  ;;  %v4564_v9 = vcombine.low %v26467_v52, %v26466_v23  ;;  %v26468_v59 = vld [vmem:[#allocation421_spill] sm:$0xff]  ;;  %v26471_v23 = vld [vmem:[#allocation135_spill] sm:$0xff] }
 0x288   :  { %14734 = vmatprep.mubr.msk.f32.mxu1 %vm16631_vm2, %v25733_v27  ;;  %v8567_v25 = vcombine.low %v26468_v59, %v20402_v56  ;;  %v4580_v40 = vcombine.low %v26471_v23, %v26470_v34  ;;  %v8568_v56 = vcombine.low %v26324_v28, %v26327_v18  ;;  %v26476_v52 = vld [vmem:[#allocation145_spill] sm:$0xff]  ;;  %v26481_v23 = vld [vmem:[#allocation150_spill] sm:$0xff] }
 0x289   :  { %v20925_v19 = vrot.slane %v4564_v9, %v16753_v24  ;;  %v13508_v9 = vcombine.high %v26474_v32, %v26476_v52 }
 0x28a   :  { %15388 = vmatmul.mubr.msk.f32.gmra.mrb[74].mxu0 %vm2564_vm9, %v8566_v46  ;;  %v4581_v46 = vcombine.low %v26473_v26, %v26472_v10  ;;  %v20946_v10 = vrot.slane %v4580_v40, %v16753_v24  ;;  %v26482_v40 = vld [vmem:[#allocation147_spill] sm:$0xff] }
 0x28b   :  { %14735 = vmatmul.mubr.msk.f32.gmra.mrb[36].mxu1 %vm2564_vm9, %v4545_v20  ;;  %15390 = vmatprep.mubr.msk.f32.mxu0 %vm16631_vm2, %v25733_v27  ;;  %26469 = vst [vmem:[#allocation422_spill] sm:$0xff] %v20925_v19  ;;  %v26475_v20 = vld [vmem:[#allocation142_spill] sm:$0xff]  ;;  %v4579_v34 = vcombine.low %v20917_v48, %v20925_v19  ;;  %v20958_v18 = vrot.slane %v13508_v9, %v16753_v24  ;;  %v26491_v19 = vld [vmem:[#allocation169_spill] sm:$0xff] }
 0x28c   :  { %14737 = vmatprep.mubr.msk.f32.mxu1 %vm16631_vm2, %v25733_v27  ;;  %v4597_v59 = vcombine.low %v26475_v20, %v26474_v32  ;;  %v20949_v26 = vrot.slane %v4581_v46, %v16753_v24  ;;  %v4614_v32 = vcombine.low %v26482_v40, %v26481_v23  ;;  %v26484_v20 = vld [vmem:[#allocation149_spill] sm:$0xff]  ;;  %v26488_v40 = vld [vmem:[#allocation154_spill] sm:$0xff] }
 0x28d   :  { %26479 = vst [vmem:[#allocation15_spill] sm:$0xff] %v20958_v18 }
 0x28e   :  { %15391 = vmatmul.mubr.msk.f32.gmra.mrb[76].mxu0 %vm2564_vm9, %v8567_v25  ;;  %26477 = vst [vmem:[#allocation408_spill] sm:$0xff] %v20949_v26  ;;  %v20955_v28 = vrot.slane %v4597_v59, %v16753_v24  ;;  %v4596_v46 = vcombine.low %v20946_v10, %v20949_v26  ;;  %v20977_v9 = vrot.slane %v4614_v32, %v16753_v24  ;;  %v26492_v32 = vld [vmem:[#allocation181_spill] sm:$0xff]  ;;  %v26493_v26 = vld [vmem:[#allocation179_spill] sm:$0xff] }
 0x28f   :  { %14738 = vmatmul.mubr.msk.f32.gmra.mrb[38].mxu1 %vm2564_vm9, %v4562_v16  ;;  %15393 = vmatprep.mubr.msk.f32.mxu0 %vm16631_vm2, %v25733_v27  ;;  %v26480_v16 = vld [vmem:[#allocation164_spill] sm:$0xff] }
 0x290   :  { %14740 = vmatprep.mubr.msk.f32.mxu1 %vm16631_vm2, %v25733_v27  ;;  %26478 = vst [vmem:[#allocation8_spill] sm:$0xff] %v20955_v28  ;;  %v8569_v25 = vcombine.low %v20418_v4, %v26480_v16  ;;  %v4613_v4 = vcombine.low %v20955_v28, %v20958_v18  ;;  %26485 = vst [vmem:[#allocation9_spill] sm:$0xff] %v20977_v9  ;;  %v26490_v18 = vld [vmem:[#allocation167_spill] sm:$0xff]  ;;  %v20999_v28 = vcombine.high %v20156_v36, %v20156_v36 }
 0x292   :  { %15394 = vmatmul.mubr.msk.f32.gmra.mrb[78].mxu0 %vm2564_vm9, %v8568_v56  ;;  %v26483_v56 = vld [vmem:[#allocation152_spill] sm:$0xff]  ;;  %26495 = vst [vmem:[#allocation10_spill] sm:$0xff] %v20999_v28 }
 0x293   :  { %14741 = vmatmul.mubr.msk.f32.gmra.mrb[40].mxu1 %vm2564_vm9, %v4579_v34  ;;  %15396 = vmatprep.mubr.msk.f32.mxu0 %vm16631_vm2, %v25733_v27  ;;  %v4615_v59 = vcombine.low %v26484_v20, %v26483_v56  ;;  %v26486_v34 = vld [vmem:[#allocation425_spill] sm:$0xff]  ;;  %v26489_v56 = vld [vmem:[#allocation151_spill] sm:$0xff] }
 0x294   :  { %14743 = vmatprep.mubr.msk.f32.mxu1 %vm16631_vm2, %v25733_v27  ;;  %v8570_v16 = vcombine.low %v26486_v34, %v26335_v47  ;;  %v4631_v20 = vcombine.low %v26489_v56, %v26488_v40  ;;  %v4648_v47 = vcombine.low %v26493_v26, %v26492_v32 }
 0x295   :  { %v20985_v23 = vrot.slane %v4615_v59, %v16753_v24  ;;  %v8571_v59 = vcombine.low %v20441_v41, %v20118_v21 }
 0x296   :  { %15397 = vmatmul.mubr.msk.f32.gmra.mrb[80].mxu0 %vm2564_vm9, %v8569_v25  ;;  %v4632_v25 = vcombine.low %v26491_v19, %v26490_v18  ;;  %v21010_v26 = vrot.slane %v4631_v20, %v16753_v24  ;;  %v4656_v21 = vrot.slane %v4648_v47, %v16753_v24  ;;  %v8574_v20 = vcombine.low %v20156_v36, %v20999_v28  ;;  %v26510_v36 = vld [vmem:[#allocation193_spill] sm:$0xff] }
 0x297   :  { %14744 = vmatmul.mubr.msk.f32.gmra.mrb[42].mxu1 %vm2564_vm9, %v4596_v46  ;;  %15399 = vmatprep.mubr.msk.f32.mxu0 %vm16631_vm2, %v25733_v27  ;;  %26487 = vst [vmem:[#allocation16_spill] sm:$0xff] %v20985_v23  ;;  %v26494_v46 = vld [vmem:[#allocation184_spill] sm:$0xff]  ;;  %v4630_v19 = vcombine.low %v20977_v9, %v20985_v23 }
 0x298   :  { %14746 = vmatprep.mubr.msk.f32.mxu1 %vm16631_vm2, %v25733_v27  ;;  %v4649_v34 = vcombine.low %v26494_v46, %v26290_v38  ;;  %26496 = vst [vmem:[#allocation20_spill] sm:$0xff] %v21010_v26  ;;  %v4646_v18 = vrot.slane %v4632_v25, %v16753_v24  ;;  %v26498_v25 = vld [vmem:[#allocation428_spill] sm:$0xff] }
 0x299   :  { %v8572_v32 = vcombine.low %v26498_v25, %v20465_v6  ;;  %v26511_v9 = vld [vmem:[#allocation192_spill] sm:$0xff] }
 0x29a   :  { %15400 = vmatmul.mubr.msk.f32.gmra.mrb[82].mxu0 %vm2564_vm9, %v8570_v16  ;;  %v95_v16 = vld [vmem:[%s24822_s0 + $0x1f0] sm:$0xff]  ;;  %v4663_v41 = vrot.slane %v4649_v34, %v16753_v24  ;;  %v4647_v47 = vcombine.low %v21010_v26, %v4646_v18  ;;  %v8581_v18 = vrot.slane %v8574_v20, %v16753_v24  ;;  %v4700_v28 = vcombine.low %v26511_v9, %v26510_v36 }
 0x29b   :  { %14747 = vmatmul.mubr.msk.f32.gmra.mrb[44].mxu1 %vm2564_vm9, %v4613_v4  ;;  %15402 = vmatprep.mubr.msk.f32.mxu0 %vm16631_vm2, %v25733_v27  ;;  %v26497_v4 = vld [vmem:[#allocation174_spill] sm:$0xff]  ;;  %v8454_v46 = vcombine.high %v95_v16, %v95_v16  ;;  %v21028_v23 = vrot.slane %v95_v16, %v16753_v24  ;;  %v26501_v34 = vld [vmem:[#allocation175_spill] sm:$0xff] }
 0x29c   :  { %14749 = vmatprep.mubr.msk.f32.mxu1 %vm16631_vm2, %v25733_v27  ;;  %v13509_v40 = vcombine.high %v26290_v38, %v26497_v4  ;;  %v26500_v38 = vld [vmem:[#allocation182_spill] sm:$0xff]  ;;  %v4664_v6 = vcombine.low %v4656_v21, %v4663_v41  ;;  %v26506_v21 = vld [vmem:[#allocation185_spill] sm:$0xff] }
 0x29d   :  { %26499 = vst [vmem:[#allocation410_spill] sm:$0xff] %v21028_v23  ;;  %v4666_v4 = vcombine.low %v26501_v34, %v26500_v38  ;;  %v21047_v25 = vrot.slane %v8454_v46, %v16753_v24  ;;  %v21051_v38 = vcombine.high %v21028_v23, %v21028_v23  ;;  %v26508_v20 = vld [vmem:[#allocation186_spill] sm:$0xff]  ;;  %v8582_v46 = vcombine.low %v20179_v60, %v8581_v18 }
 0x29e   :  { %15403 = vmatmul.mubr.msk.f32.gmra.mrb[84].mxu0 %vm2564_vm9, %v8571_v59  ;;  %v96_v59 = vld [vmem:[%s24822_s0 + $0x1f8] sm:$0xff]  ;;  %v4673_v16 = vrot.slane %v13509_v40, %v16753_v24  ;;  %v26507_v40 = vld [vmem:[#allocation190_spill] sm:$0xff] }
 0x29f   :  { %14750 = vmatmul.mubr.msk.f32.gmra.mrb[46].mxu1 %vm2564_vm9, %v4630_v19  ;;  %15405 = vmatprep.mubr.msk.f32.mxu0 %vm16631_vm2, %v25733_v27  ;;  %v8573_v19 = vcombine.low %v20143_v51, %v20176_v44  ;;  %26502 = vst [vmem:[#allocation143_spill] sm:$0xff] %v21047_v25  ;;  %v8471_v34 = vcombine.high %v96_v59, %v96_v59  ;;  %v26505_v44 = vld [vmem:[#allocation187_spill] sm:$0xff] }
 0x2a0   :  { %14752 = vmatprep.mubr.msk.f32.mxu1 %vm16631_vm2, %v25733_v27  ;;  %v21054_v26 = vrot.slane %v96_v59, %v16753_v24  ;;  %v21060_v51 = vrot.slane %v4666_v4, %v16753_v24  ;;  %v4682_v41 = vcombine.low %v26506_v21, %v26505_v44  ;;  %v26509_v59 = vld [vmem:[#allocation189_spill] sm:$0xff]  ;;  %v8584_v4 = vcombine.low %v20166_v33, %v21028_v23 }
 0x2a1   :  { %v8585_v44 = vcombine.low %v21051_v38, %v21047_v25  ;;  %v21080_v21 = vcombine.high %v21047_v25, %v21047_v25  ;;  %v21083_v60 = vrot.slane %v8471_v34, %v16753_v24  ;;  %v21103_v34 = vrot.slane %v4700_v28, %v16753_v24 }
 0x2a2   :  { %15406 = vmatmul.mubr.msk.f32.gmra.mrb[86].mxu0 %vm2564_vm9, %v8572_v32  ;;  %26503 = vst [vmem:[#allocation19_spill] sm:$0xff] %v21054_v26  ;;  %26504 = vst [vmem:[#allocation12_spill] sm:$0xff] %v21060_v51  ;;  %v4683_v32 = vcombine.low %v26508_v20, %v26507_v40  ;;  %v4681_v36 = vcombine.low %v4673_v16, %v21060_v51  ;;  %v21094_v9 = vrot.slane %v4682_v41, %v16753_v24  ;;  %v26518_v16 = vld [vmem:[#allocation195_spill] sm:$0xff] }
 0x2a3   :  { %14753 = vmatmul.mubr.msk.f32.gmra.mrb[48].mxu1 %vm2564_vm9, %v4647_v47  ;;  %15408 = vmatprep.mubr.msk.f32.mxu0 %vm16631_vm2, %v25733_v27  ;;  %v4699_v47 = vcombine.low %v26300_v61, %v26509_v59  ;;  %26512 = vst [vmem:[#allocation411_spill] sm:$0xff] %v21080_v21  ;;  %26513 = vst [vmem:[#allocation424_spill] sm:$0xff] %v21083_v60  ;;  %v21087_v61 = vcombine.high %v21054_v26, %v21054_v26 }
 0x2a4   :  { %14755 = vmatprep.mubr.msk.f32.mxu1 %vm16631_vm2, %v25733_v27  ;;  %26515 = vst [vmem:[#allocation13_spill] sm:$0xff] %v21094_v9  ;;  %26517 = vst [vmem:[#allocation412_spill] sm:$0xff] %v21103_v34  ;;  %v4716_v40 = vcombine.low %v26518_v16, %v26188_v1  ;;  %v8592_v41 = vrot.slane %v8584_v4, %v16753_v24  ;;  %v8601_v59 = vcombine.low %v21080_v21, %v21054_v26  ;;  %v26522_v16 = vld [vmem:[#allocation200_spill] sm:$0xff] }
 0x2a5   :  { %26514 = vst [vmem:[#allocation21_spill] sm:$0xff] %v21087_v61  ;;  %v21100_v18 = vrot.slane %v4699_v47, %v16753_v24  ;;  %v8602_v47 = vcombine.low %v21087_v61, %v21083_v60  ;;  %v26687_v61 = vld [vmem:[#allocation171_spill] sm:$0xff] }
 0x2a6   :  { %15409 = vmatmul.mubr.msk.f32.gmra.mrb[88].mxu0 %vm2564_vm9, %v8573_v19  ;;  %v4697_v19 = vrot.slane %v4683_v32, %v16753_v24  ;;  %v8599_v32 = vrot.slane %v8585_v44, %v16753_v24  ;;  %v8609_v44 = vrot.slane %v8601_v59, %v16753_v24  ;;  %v26526_v59 = vld [vmem:[#allocation204_spill] sm:$0xff] }
 0x2a7   :  { %14756 = vmatmul.mubr.msk.f32.gmra.mrb[50].mxu1 %vm2564_vm9, %v4664_v6  ;;  %15411 = vmatprep.mubr.msk.f32.mxu0 %vm16631_vm2, %v25733_v27  ;;  %26516 = vst [vmem:[#allocation413_spill] sm:$0xff] %v21100_v18  ;;  %v8583_v6 = vcombine.low %v20210_v31, %v20230_v13  ;;  %v13510_v13 = vcombine.high %v26188_v1, %v26301_v42  ;;  %v26524_v42 = vld [vmem:[#allocation201_spill] sm:$0xff] }
 0x2a8   :  { %14758 = vmatprep.mubr.msk.f32.mxu1 %vm16631_vm2, %v25733_v27  ;;  %v4698_v28 = vcombine.low %v21094_v9, %v4697_v19  ;;  %v4715_v31 = vcombine.low %v21100_v18, %v21103_v34  ;;  %v8600_v4 = vcombine.low %v8592_v41, %v8599_v32  ;;  %v26521_v19 = vld [vmem:[#allocation203_spill] sm:$0xff]  ;;  %v26525_v32 = vld [vmem:[#allocation209_spill] sm:$0xff]  ;;  %v26528_v18 = vld [vmem:[#allocation208_spill] sm:$0xff] }
 0x2a9   :  { %v21136_v1 = vrot.slane %v13510_v13, %v16753_v24  ;;  %v4733_v34 = vcombine.low %v26522_v16, %v26521_v19  ;;  %v26535_v16 = vld [vmem:[#allocation215_spill] sm:$0xff]  ;;  %v26686_v9 = vld [vmem:[#allocation178_spill] sm:$0xff] }
 0x2aa   :  { %15412 = vmatmul.mubr.msk.f32.gmra.mrb[90].mxu0 %vm2564_vm9, %v8582_v46  ;;  %v21128_v46 = vrot.slane %v4716_v40, %v16753_v24  ;;  %v9164_v26 = vcombine.low %v26687_v61, %v26686_v9 }
 0x2ab   :  { %14759 = vmatmul.mubr.msk.f32.gmra.mrb[52].mxu1 %vm2564_vm9, %v4681_v36  ;;  %15414 = vmatprep.mubr.msk.f32.mxu0 %vm16631_vm2, %v25733_v27  ;;  %v8616_v36 = vrot.slane %v8602_v47, %v16753_v24  ;;  %26520 = vst [vmem:[#allocation14_spill] sm:$0xff] %v21136_v1  ;;  %v4750_v47 = vcombine.low %v26526_v59, %v26525_v32  ;;  %v26537_v32 = vld [vmem:[#allocation32_spill] sm:$0xff] }
 0x2ac   :  { %14761 = vmatprep.mubr.msk.f32.mxu1 %vm16631_vm2, %v25733_v27  ;;  %26519 = vst [vmem:[#allocation23_spill] sm:$0xff] %v21128_v46  ;;  %v4732_v13 = vcombine.low %v21128_v46, %v21136_v1 }
 0x2ad   :  { %v8617_v41 = vcombine.low %v8609_v44, %v8616_v36  ;;  %v26533_v44 = vld [vmem:[#allocation214_spill] sm:$0xff]  ;;  %v26534_v36 = vld [vmem:[#allocation216_spill] sm:$0xff] }
 0x2ae   :  { %15415 = vmatmul.mubr.msk.f32.gmra.mrb[92].mxu0 %vm2564_vm9, %v8583_v6  ;;  %v26523_v6 = vld [vmem:[#allocation205_spill] sm:$0xff]  ;;  %v4767_v19 = vcombine.low %v26534_v36, %v26533_v44  ;;  %v26541_v44 = vld [vmem:[#allocation42_spill] sm:$0xff] }
 0x2af   :  { %14762 = vmatmul.mubr.msk.f32.gmra.mrb[54].mxu1 %vm2564_vm9, %v4698_v28  ;;  %15417 = vmatprep.mubr.msk.f32.mxu0 %vm16631_vm2, %v25733_v27  ;;  %v4734_v40 = vcombine.low %v26524_v42, %v26523_v6  ;;  %v26527_v28 = vld [vmem:[#allocation213_spill] sm:$0xff]  ;;  %v21155_v42 = vrot.slane %v4733_v34, %v16753_v24  ;;  %v26542_v36 = vld [vmem:[#allocation38_spill] sm:$0xff] }
 0x2b0   :  { %14764 = vmatprep.mubr.msk.f32.mxu1 %vm16631_vm2, %v25733_v27  ;;  %v4751_v51 = vcombine.low %v26528_v18, %v26527_v28  ;;  %v21164_v18 = vrot.slane %v4750_v47, %v16753_v24  ;;  %v26536_v6 = vld [vmem:[#allocation217_spill] sm:$0xff]  ;;  %v26538_v47 = vld [vmem:[#allocation35_spill] sm:$0xff] }
 0x2b1   :  { %26529 = vst [vmem:[#allocation25_spill] sm:$0xff] %v21155_v42  ;;  %v26539_v28 = vcombine.low %v26537_v32, %v26538_v47  ;;  %v26546_v32 = vld [vmem:[#allocation224_spill] sm:$0xff] }
 0x2b2   :  { %15418 = vmatmul.mubr.msk.f32.gmra.mrb[94].mxu0 %vm2564_vm9, %v8600_v4  ;;  %v21158_v4 = vrot.slane %v4734_v40, %v16753_v24  ;;  %26531 = vst [vmem:[#allocation414_spill] sm:$0xff] %v21164_v18  ;;  %v4768_v40 = vcombine.low %v26536_v6, %v26535_v16  ;;  %v9127_v6 = vcombine.low %v26542_v36, %v26541_v44  ;;  %v26551_v36 = vld [vmem:[#allocation237_spill] sm:$0xff] }
 0x2b3   :  { %14765 = vmatmul.mubr.msk.f32.gmra.mrb[56].mxu1 %vm2564_vm9, %v4715_v31  ;;  %15420 = vmatprep.mubr.msk.f32.mxu0 %vm16631_vm2, %v25733_v27  ;;  %v21167_v31 = vrot.slane %v4751_v51, %v16753_v24  ;;  %v13839_v51 = vld [vmem:[%s24823_s1 + $0x20] sm:$0xf] }
 0x2b4   :  { %26530 = vst [vmem:[#allocation24_spill] sm:$0xff] %v21158_v4  ;;  %14767 = vmatprep.mubr.msk.f32.mxu1 %vm16631_vm2, %v25733_v27  ;;  %v4749_v34 = vcombine.low %v21155_v42, %v21158_v4  ;;  %v21197_v1 = vrot.slane %v4768_v40, %v16753_v24  ;;  %v26544_v4 = vld [vmem:[#allocation221_spill] sm:$0xff]  ;;  %v26550_v40 = vld [vmem:[#allocation231_spill] sm:$0xff]  ;;  %v26552_v42 = vld [vmem:[#allocation234_spill] sm:$0xff] }
 0x2b5   :  { %26532 = vst [vmem:[#allocation27_spill] sm:$0xff] %v21167_v31 }
 0x2b6   :  { %15421 = vmatmul.mubr.msk.f32.gmra.mrb[96].mxu0 %vm2564_vm9, %v8617_v41  ;;  %v4766_v41 = vcombine.low %v21164_v18, %v21167_v31  ;;  %26543 = vst [vmem:[#allocation28_spill] sm:$0xff] %v21197_v1  ;;  %v13511_v18 = vcombine.high %v26535_v16, %v26544_v4  ;;  %v26545_v31 = vld [vmem:[#allocation226_spill] sm:$0xff]  ;;  %v4802_v16 = vcombine.low %v26552_v42, %v26551_v36  ;;  %v26559_v36 = vld [vmem:[#allocation243_spill] sm:$0xff] }
 0x2b7   :  { %14768 = vmatmul.mubr.msk.f32.gmra.mrb[58].mxu1 %vm2564_vm9, %v4732_v13  ;;  %15425 = vmatprep.mubr.msk.f32.mxu0 %vm16631_vm2, %v25733_v27  ;;  %v21190_v13 = vrot.slane %v4767_v19, %v16753_v24  ;;  %v4785_v47 = vcombine.low %v26546_v32, %v26545_v31  ;;  %v26547_v19 = vld [vmem:[#allocation48_spill] sm:$0xff] }
 0x2b8   :  { %14770 = vmatprep.mubr.msk.f32.mxu1 %vm16631_vm2, %v25733_v27  ;;  %v21220_v32 = vrot.slane %v13511_v18, %v16753_v24  ;;  %v26560_v18 = vld [vmem:[#allocation244_spill] sm:$0xff] }
 0x2b9   :  { %26540 = vst [vmem:[#allocation26_spill] sm:$0xff] %v21190_v13  ;;  %v4783_v31 = vcombine.low %v21190_v13, %v21197_v1  ;;  %v4818_v42 = vcombine.low %v26560_v18, %v26559_v36  ;;  %v26574_v13 = vld [vmem:[#allocation273_spill] sm:$0xff] }
 0x2ba   :  { %15426 = vmatmul.mubr.msk.f32.vlgmr.msra.gmra.mrb[0].mxu0 %vm2564_vm9, %v26539_v28  ;;  %v26549_v28 = vld [vmem:[#allocation236_spill] sm:$0xff]  ;;  %26553 = vst [vmem:[#allocation29_spill] sm:$0xff] %v21220_v32 }
 0x2bb   :  { %14771 = vmatmul.mubr.msk.f32.gmra.mrb[60].mxu1 %vm2564_vm9, %v4749_v34  ;;  %15573 = vmatpush3.msk.msra.mxu0 %vm2663_vm0, %v13839_v51  ;;  %v26548_v34 = vld [vmem:[#allocation43_spill] sm:$0xff]  ;;  %v4801_v44 = vcombine.low %v26550_v40, %v26549_v28 }
 0x2bc   :  { %14773 = vmatprep.mubr.msk.f32.mxu1 %vm16631_vm2, %v25733_v27  ;;  %15428 = vmatprep.mubr.msk.f32.mxu0 %vm16631_vm2, %v25733_v27  ;;  %v9128_v51 = vcombine.low %v26548_v34, %v26547_v19  ;;  %v26557_v34 = vld [vmem:[#allocation53_spill] sm:$0xff]  ;;  %v26558_v28 = vld [vmem:[#allocation51_spill] sm:$0xff] }
 0x2bd   :  { %v21229_v19 = vrot.slane %v4801_v44, %v16753_v24  ;;  %v9129_v40 = vcombine.low %v26558_v28, %v26557_v34  ;;  %v26562_v44 = vld [vmem:[#allocation248_spill] sm:$0xff]  ;;  %v21251_v34 = vrot.slane %v4818_v42, %v16753_v24  ;;  %v26570_v42 = vld [vmem:[#allocation66_spill] sm:$0xff] }
 0x2be   :  { %15429 = vmatmul.mubr.msk.f32.gmra.mrb[2].mxu0 %vm2564_vm9, %v9127_v6  ;;  %v21223_v6 = vrot.slane %v4785_v47, %v16753_v24  ;;  %v26565_v28 = vld [vmem:[#allocation56_spill] sm:$0xff] }
 0x2bf   :  { %14774 = vmatmul.mubr.msk.f32.gmra.mrb[62].mxu1 %vm2564_vm9, %v4766_v41  ;;  %15431 = vmatprep.mubr.msk.f32.mxu0 %vm16631_vm2, %v25733_v27  ;;  %26555 = vst [vmem:[#allocation34_spill] sm:$0xff] %v21229_v19  ;;  %v21232_v41 = vrot.slane %v4802_v16, %v16753_v24  ;;  %26563 = vst [vmem:[#allocation39_spill] sm:$0xff] %v21251_v34 }
 0x2c0   :  { %26554 = vst [vmem:[#allocation415_spill] sm:$0xff] %v21223_v6  ;;  %14776 = vmatprep.mubr.msk.f32.mxu1 %vm16631_vm2, %v25733_v27  ;;  %v4800_v47 = vcombine.low %v21220_v32, %v21223_v6  ;;  %v26573_v6 = vld [vmem:[#allocation267_spill] sm:$0xff] }
 0x2c1   :  { %26556 = vst [vmem:[#allocation31_spill] sm:$0xff] %v21232_v41  ;;  %v4817_v16 = vcombine.low %v21229_v19, %v21232_v41  ;;  %v26569_v41 = vld [vmem:[#allocation257_spill] sm:$0xff] }
 0x2c2   :  { %15432 = vmatmul.mubr.msk.f32.gmra.mrb[4].mxu0 %vm2564_vm9, %v9128_v51  ;;  %v26561_v51 = vld [vmem:[#allocation246_spill] sm:$0xff] }
 0x2c3   :  { %14777 = vmatmul.mubr.msk.f32.gmra.mrb[64].mxu1 %vm2564_vm9, %v4783_v31  ;;  %15434 = vmatprep.mubr.msk.f32.mxu0 %vm16631_vm2, %v25733_v27  ;;  %v4819_v1 = vcombine.low %v26562_v44, %v26561_v51  ;;  %v26564_v31 = vld [vmem:[#allocation61_spill] sm:$0xff]  ;;  %v26568_v44 = vld [vmem:[#allocation252_spill] sm:$0xff] }
 0x2c4   :  { %14779 = vmatprep.mubr.msk.f32.mxu1 %vm16631_vm2, %v25733_v27  ;;  %v9130_v36 = vcombine.low %v26565_v28, %v26564_v31  ;;  %v26567_v51 = vld [vmem:[#allocation249_spill] sm:$0xff]  ;;  %v26571_v31 = vld [vmem:[#allocation64_spill] sm:$0xff]  ;;  %v26572_v28 = vld [vmem:[#allocation271_spill] sm:$0xff] }
 0x2c5   :  { %v21259_v18 = vrot.slane %v4819_v1, %v16753_v24  ;;  %v4835_v32 = vcombine.low %v26568_v44, %v26567_v51  ;;  %v4852_v19 = vcombine.low %v26573_v6, %v26572_v28  ;;  %v26575_v1 = vld [vmem:[#allocation268_spill] sm:$0xff]  ;;  %v26582_v28 = vld [vmem:[#allocation278_spill] sm:$0xff] }
 0x2c6   :  { %15435 = vmatmul.mubr.msk.f32.gmra.mrb[6].mxu0 %vm2564_vm9, %v9129_v40  ;;  %v13512_v40 = vcombine.high %v26567_v51, %v26569_v41  ;;  %v4853_v4 = vcombine.low %v26575_v1, %v26574_v13  ;;  %v26597_v41 = vld [vmem:[#allocation305_spill] sm:$0xff] }
 0x2c7   :  { %14780 = vmatmul.mubr.msk.f32.gmra.mrb[66].mxu1 %vm2564_vm9, %v4800_v47  ;;  %15437 = vmatprep.mubr.msk.f32.mxu0 %vm16631_vm2, %v25733_v27  ;;  %26566 = vst [vmem:[#allocation36_spill] sm:$0xff] %v21259_v18  ;;  %v9131_v47 = vcombine.low %v26571_v31, %v26570_v42  ;;  %v4834_v44 = vcombine.low %v21251_v34, %v21259_v18  ;;  %v26581_v42 = vld [vmem:[#allocation67_spill] sm:$0xff] }
 0x2c8   :  { %14782 = vmatprep.mubr.msk.f32.mxu1 %vm16631_vm2, %v25733_v27  ;;  %v21280_v51 = vrot.slane %v4835_v32, %v16753_v24  ;;  %v21289_v13 = vrot.slane %v4852_v19, %v16753_v24  ;;  %v21292_v6 = vrot.slane %v4853_v4, %v16753_v24  ;;  %v26583_v32 = vld [vmem:[#allocation269_spill] sm:$0xff]  ;;  %v26585_v19 = vld [vmem:[#allocation282_spill] sm:$0xff] }
 0x2c9   :  { %v4869_v1 = vcombine.low %v26583_v32, %v26582_v28 }
 0x2ca   :  { %15438 = vmatmul.mubr.msk.f32.gmra.mrb[8].mxu0 %vm2564_vm9, %v9130_v36  ;;  %26576 = vst [vmem:[#allocation46_spill] sm:$0xff] %v21280_v51  ;;  %v21283_v36 = vrot.slane %v13512_v40, %v16753_v24  ;;  %26578 = vst [vmem:[#allocation41_spill] sm:$0xff] %v21289_v13  ;;  %v4868_v4 = vcombine.low %v21289_v13, %v21292_v6  ;;  %v26593_v13 = vld [vmem:[#allocation294_spill] sm:$0xff] }
 0x2cb   :  { %14783 = vmatmul.mubr.msk.f32.gmra.mrb[68].mxu1 %vm2564_vm9, %v4817_v16  ;;  %15440 = vmatprep.mubr.msk.f32.mxu0 %vm16631_vm2, %v25733_v27  ;;  %26579 = vst [vmem:[#allocation44_spill] sm:$0xff] %v21292_v6  ;;  %v26580_v16 = vld [vmem:[#allocation73_spill] sm:$0xff]  ;;  %v26592_v6 = vld [vmem:[#allocation291_spill] sm:$0xff] }
 0x2cc   :  { %26577 = vst [vmem:[#allocation37_spill] sm:$0xff] %v21283_v36  ;;  %14785 = vmatprep.mubr.msk.f32.mxu1 %vm16631_vm2, %v25733_v27  ;;  %v9132_v31 = vcombine.low %v26581_v42, %v26580_v16  ;;  %v4851_v40 = vcombine.low %v21280_v51, %v21283_v36  ;;  %v21311_v16 = vrot.slane %v4869_v1, %v16753_v24  ;;  %v26588_v42 = vld [vmem:[#allocation78_spill] sm:$0xff]  ;;  %v26594_v1 = vld [vmem:[#allocation85_spill] sm:$0xff] }
 0x2cd   :  { %v26591_v36 = vld [vmem:[#allocation286_spill] sm:$0xff] }
 0x2ce   :  { %15441 = vmatmul.mubr.msk.f32.gmra.mrb[10].mxu0 %vm2564_vm9, %v9131_v47  ;;  %v26584_v47 = vld [vmem:[#allocation280_spill] sm:$0xff]  ;;  %26586 = vst [vmem:[#allocation47_spill] sm:$0xff] %v21311_v16 }
 0x2cf   :  { %14786 = vmatmul.mubr.msk.f32.gmra.mrb[70].mxu1 %vm2564_vm9, %v4834_v44  ;;  %15443 = vmatprep.mubr.msk.f32.mxu0 %vm16631_vm2, %v25733_v27  ;;  %v4870_v18 = vcombine.low %v26585_v19, %v26584_v47  ;;  %v26587_v44 = vld [vmem:[#allocation79_spill] sm:$0xff]  ;;  %v26590_v19 = vld [vmem:[#allocation290_spill] sm:$0xff] }
 0x2d0   :  { %14788 = vmatprep.mubr.msk.f32.mxu1 %vm16631_vm2, %v25733_v27  ;;  %v9133_v28 = vcombine.low %v26588_v42, %v26587_v44  ;;  %v4886_v32 = vcombine.low %v26591_v36, %v26590_v19  ;;  %v26595_v44 = vld [vmem:[#allocation81_spill] sm:$0xff]  ;;  %v26596_v42 = vld [vmem:[#allocation298_spill] sm:$0xff] }
 0x2d1   :  { %v21319_v47 = vrot.slane %v4870_v18, %v16753_v24  ;;  %v13513_v51 = vcombine.high %v26592_v6, %v26596_v42  ;;  %v26598_v18 = vld [vmem:[#allocation300_spill] sm:$0xff]  ;;  %v26604_v19 = vld [vmem:[#allocation89_spill] sm:$0xff]  ;;  %v26621_v42 = vld [vmem:[#allocation335_spill] sm:$0xff] }
 0x2d2   :  { %15444 = vmatmul.mubr.msk.f32.gmra.mrb[12].mxu0 %vm2564_vm9, %v9132_v31  ;;  %v4887_v31 = vcombine.low %v26593_v13, %v26592_v6  ;;  %v4904_v34 = vcombine.low %v26598_v18, %v26597_v41  ;;  %v21340_v13 = vrot.slane %v4886_v32, %v16753_v24  ;;  %v26606_v32 = vld [vmem:[#allocation311_spill] sm:$0xff] }
 0x2d3   :  { %14789 = vmatmul.mubr.msk.f32.gmra.mrb[72].mxu1 %vm2564_vm9, %v4851_v40  ;;  %15446 = vmatprep.mubr.msk.f32.mxu0 %vm16631_vm2, %v25733_v27  ;;  %26589 = vst [vmem:[#allocation45_spill] sm:$0xff] %v21319_v47  ;;  %v9134_v40 = vcombine.low %v26595_v44, %v26594_v1  ;;  %v4885_v36 = vcombine.low %v21311_v16, %v21319_v47  ;;  %v26605_v44 = vld [vmem:[#allocation316_spill] sm:$0xff]  ;;  %v26620_v47 = vld [vmem:[#allocation330_spill] sm:$0xff] }
 0x2d4   :  { %14791 = vmatprep.mubr.msk.f32.mxu1 %vm16631_vm2, %v25733_v27  ;;  %26599 = vst [vmem:[#allocation49_spill] sm:$0xff] %v21340_v13  ;;  %v21349_v41 = vrot.slane %v13513_v51, %v16753_v24  ;;  %v21352_v6 = vrot.slane %v4904_v34, %v16753_v24  ;;  %v4920_v18 = vcombine.low %v26606_v32, %v26605_v44  ;;  %v26608_v51 = vld [vmem:[#allocation314_spill] sm:$0xff] }
 0x2d6   :  { %15447 = vmatmul.mubr.msk.f32.gmra.mrb[14].mxu0 %vm2564_vm9, %v9133_v28  ;;  %v21343_v28 = vrot.slane %v4887_v31, %v16753_v24  ;;  %26601 = vst [vmem:[#allocation176_spill] sm:$0xff] %v21349_v41  ;;  %26602 = vst [vmem:[#allocation58_spill] sm:$0xff] %v21352_v6  ;;  %v4919_v34 = vcombine.low %v21349_v41, %v21352_v6  ;;  %v26615_v41 = vld [vmem:[#allocation326_spill] sm:$0xff]  ;;  %v26616_v6 = vld [vmem:[#allocation325_spill] sm:$0xff] }
 0x2d7   :  { %14792 = vmatmul.mubr.msk.f32.gmra.mrb[74].mxu1 %vm2564_vm9, %v4868_v4  ;;  %15449 = vmatprep.mubr.msk.f32.mxu0 %vm16631_vm2, %v25733_v27  ;;  %v26603_v4 = vld [vmem:[#allocation92_spill] sm:$0xff] }
 0x2d8   :  { %26600 = vst [vmem:[#allocation50_spill] sm:$0xff] %v21343_v28  ;;  %14794 = vmatprep.mubr.msk.f32.mxu1 %vm16631_vm2, %v25733_v27  ;;  %v9135_v1 = vcombine.low %v26604_v19, %v26603_v4  ;;  %v4902_v31 = vcombine.low %v21340_v13, %v21343_v28  ;;  %v21371_v4 = vrot.slane %v4920_v18, %v16753_v24  ;;  %v26611_v19 = vld [vmem:[#allocation93_spill] sm:$0xff]  ;;  %v26617_v18 = vld [vmem:[#allocation108_spill] sm:$0xff] }
 0x2da   :  { %15450 = vmatmul.mubr.msk.f32.gmra.mrb[16].mxu0 %vm2564_vm9, %v9134_v40  ;;  %v26607_v40 = vld [vmem:[#allocation317_spill] sm:$0xff]  ;;  %26609 = vst [vmem:[#allocation54_spill] sm:$0xff] %v21371_v4 }
 0x2db   :  { %14795 = vmatmul.mubr.msk.f32.gmra.mrb[76].mxu1 %vm2564_vm9, %v4885_v36  ;;  %15452 = vmatprep.mubr.msk.f32.mxu0 %vm16631_vm2, %v25733_v27  ;;  %v4921_v16 = vcombine.low %v26608_v51, %v26607_v40  ;;  %v26610_v36 = vld [vmem:[#allocation98_spill] sm:$0xff]  ;;  %v26614_v51 = vld [vmem:[#allocation324_spill] sm:$0xff] }
 0x2dc   :  { %14797 = vmatprep.mubr.msk.f32.mxu1 %vm16631_vm2, %v25733_v27  ;;  %v9136_v44 = vcombine.low %v26611_v19, %v26610_v36  ;;  %v26613_v40 = vld [vmem:[#allocation322_spill] sm:$0xff]  ;;  %v26618_v36 = vld [vmem:[#allocation101_spill] sm:$0xff]  ;;  %v26619_v19 = vld [vmem:[#allocation328_spill] sm:$0xff] }
 0x2dd   :  { %v21379_v32 = vrot.slane %v4921_v16, %v16753_v24  ;;  %v4937_v28 = vcombine.low %v26614_v51, %v26613_v40  ;;  %v4954_v13 = vcombine.low %v26620_v47, %v26619_v19  ;;  %v13514_v16 = vcombine.high %v26619_v19, %v26621_v42  ;;  %v26627_v40 = vld [vmem:[#allocation111_spill] sm:$0xff]  ;;  %v26643_v42 = vld [vmem:[#allocation366_spill] sm:$0xff] }
 0x2de   :  { %15453 = vmatmul.mubr.msk.f32.gmra.mrb[18].mxu0 %vm2564_vm9, %v9135_v1  ;;  %v4938_v1 = vcombine.low %v26616_v6, %v26615_v41 }
 0x2df   :  { %14798 = vmatmul.mubr.msk.f32.gmra.mrb[78].mxu1 %vm2564_vm9, %v4902_v31  ;;  %15455 = vmatprep.mubr.msk.f32.mxu0 %vm16631_vm2, %v25733_v27  ;;  %26612 = vst [vmem:[#allocation60_spill] sm:$0xff] %v21379_v32  ;;  %v9137_v31 = vcombine.low %v26618_v36, %v26617_v18  ;;  %v4936_v51 = vcombine.low %v21371_v4, %v21379_v32  ;;  %v26628_v36 = vld [vmem:[#allocation353_spill] sm:$0xff] }
 0x2e0   :  { %14800 = vmatprep.mubr.msk.f32.mxu1 %vm16631_vm2, %v25733_v27  ;;  %v21400_v41 = vrot.slane %v4937_v28, %v16753_v24  ;;  %v21403_v6 = vrot.slane %v4938_v1, %v16753_v24  ;;  %v21409_v47 = vrot.slane %v4954_v13, %v16753_v24  ;;  %v26629_v28 = vld [vmem:[#allocation348_spill] sm:$0xff]  ;;  %v26631_v13 = vld [vmem:[#allocation349_spill] sm:$0xff] }
 0x2e1   :  { %v4971_v19 = vcombine.low %v26629_v28, %v26628_v36  ;;  %v26644_v4 = vld [vmem:[#allocation373_spill] sm:$0xff] }
 0x2e2   :  { %15456 = vmatmul.mubr.msk.f32.gmra.mrb[20].mxu0 %vm2564_vm9, %v9136_v44  ;;  %26622 = vst [vmem:[#allocation57_spill] sm:$0xff] %v21400_v41  ;;  %26623 = vst [vmem:[#allocation196_spill] sm:$0xff] %v21403_v6  ;;  %v26626_v44 = vld [vmem:[#allocation112_spill] sm:$0xff]  ;;  %v4953_v1 = vcombine.low %v21400_v41, %v21403_v6 }
 0x2e3   :  { %14801 = vmatmul.mubr.msk.f32.gmra.mrb[80].mxu1 %vm2564_vm9, %v4919_v34  ;;  %15458 = vmatprep.mubr.msk.f32.mxu0 %vm16631_vm2, %v25733_v27  ;;  %26624 = vst [vmem:[#allocation63_spill] sm:$0xff] %v21409_v47  ;;  %v21412_v34 = vrot.slane %v13514_v16, %v16753_v24  ;;  %v9138_v18 = vcombine.low %v26627_v40, %v26626_v44  ;;  %v26634_v40 = vld [vmem:[#allocation113_spill] sm:$0xff] }
 0x2e4   :  { %14803 = vmatprep.mubr.msk.f32.mxu1 %vm16631_vm2, %v25733_v27  ;;  %v21431_v44 = vrot.slane %v4971_v19, %v16753_v24  ;;  %v26640_v19 = vld [vmem:[#allocation126_spill] sm:$0xff] }
 0x2e5   :  { %26625 = vst [vmem:[#allocation59_spill] sm:$0xff] %v21412_v34  ;;  %v4970_v16 = vcombine.low %v21409_v47, %v21412_v34  ;;  %v26638_v34 = vld [vmem:[#allocation357_spill] sm:$0xff]  ;;  %v26639_v47 = vld [vmem:[#allocation362_spill] sm:$0xff] }
 0x2e6   :  { %15459 = vmatmul.mubr.msk.f32.gmra.mrb[22].mxu0 %vm2564_vm9, %v9137_v31  ;;  %v26630_v31 = vld [vmem:[#allocation354_spill] sm:$0xff]  ;;  %26632 = vst [vmem:[#allocation68_spill] sm:$0xff] %v21431_v44 }
 0x2e7   :  { %14804 = vmatmul.mubr.msk.f32.gmra.mrb[82].mxu1 %vm2564_vm9, %v4936_v51  ;;  %15461 = vmatprep.mubr.msk.f32.mxu0 %vm16631_vm2, %v25733_v27  ;;  %v4972_v32 = vcombine.low %v26631_v13, %v26630_v31  ;;  %v26633_v51 = vld [vmem:[#allocation119_spill] sm:$0xff]  ;;  %v26636_v31 = vld [vmem:[#allocation358_spill] sm:$0xff] }
 0x2e8   :  { %14806 = vmatprep.mubr.msk.f32.mxu1 %vm16631_vm2, %v25733_v27  ;;  %v9139_v36 = vcombine.low %v26634_v40, %v26633_v51  ;;  %v26637_v13 = vld [vmem:[#allocation350_spill] sm:$0xff]  ;;  %v26642_v40 = vld [vmem:[#allocation372_spill] sm:$0xff] }
 0x2e9   :  { %v21439_v28 = vrot.slane %v4972_v32, %v16753_v24  ;;  %v4988_v6 = vcombine.low %v26637_v13, %v26636_v31  ;;  %v26641_v51 = vld [vmem:[#allocation122_spill] sm:$0xff]  ;;  %v5005_v41 = vcombine.low %v26643_v42, %v26642_v40  ;;  %v26645_v32 = vld [vmem:[#allocation376_spill] sm:$0xff]  ;;  %v26652_v40 = vld [vmem:[#allocation381_spill] sm:$0xff] }
 0x2ea   :  { %15462 = vmatmul.mubr.msk.f32.gmra.mrb[24].mxu0 %vm2564_vm9, %v9138_v18  ;;  %v4989_v18 = vcombine.low %v26639_v47, %v26638_v34  ;;  %v5006_v59 = vcombine.low %v26645_v32, %v26644_v4 }
 0x2eb   :  { %14807 = vmatmul.mubr.msk.f32.gmra.mrb[84].mxu1 %vm2564_vm9, %v4953_v1  ;;  %15464 = vmatprep.mubr.msk.f32.mxu0 %vm16631_vm2, %v25733_v27  ;;  %26635 = vst [vmem:[#allocation65_spill] sm:$0xff] %v21439_v28  ;;  %v9140_v1 = vcombine.low %v26641_v51, %v26640_v19  ;;  %v4987_v31 = vcombine.low %v21431_v44, %v21439_v28  ;;  %v26651_v19 = vld [vmem:[#allocation127_spill] sm:$0xff] }
 0x2ec   :  { %14809 = vmatprep.mubr.msk.f32.mxu1 %vm16631_vm2, %v25733_v27  ;;  %v21460_v47 = vrot.slane %v4988_v6, %v16753_v24  ;;  %v21463_v34 = vrot.slane %v4989_v18, %v16753_v24  ;;  %v21469_v42 = vrot.slane %v5005_v41, %v16753_v24  ;;  %v13515_v6 = vcombine.high %v26644_v4, %v26652_v40  ;;  %v26654_v41 = vld [vmem:[#allocation383_spill] sm:$0xff] }
 0x2ed   :  { %v26664_v40 = vld [vmem:[#allocation11_spill] sm:$0xff] }
 0x2ee   :  { %15465 = vmatmul.mubr.msk.f32.gmra.mrb[26].mxu0 %vm2564_vm9, %v9139_v36  ;;  %26646 = vst [vmem:[#allocation194_spill] sm:$0xff] %v21460_v47  ;;  %26647 = vst [vmem:[#allocation69_spill] sm:$0xff] %v21463_v34  ;;  %v26650_v36 = vld [vmem:[#allocation131_spill] sm:$0xff]  ;;  %v5004_v18 = vcombine.low %v21460_v47, %v21463_v34  ;;  %v21491_v4 = vrot.slane %v13515_v6, %v16753_v24  ;;  %v26663_v6 = vld [vmem:[#allocation18_spill] sm:$0xff] }
 0x2ef   :  { %14810 = vmatmul.mubr.msk.f32.gmra.mrb[86].mxu1 %vm2564_vm9, %v4970_v16  ;;  %15467 = vmatprep.mubr.msk.f32.mxu0 %vm16631_vm2, %v25733_v27  ;;  %26648 = vst [vmem:[#allocation71_spill] sm:$0xff] %v21469_v42  ;;  %v21472_v16 = vrot.slane %v5006_v59, %v16753_v24  ;;  %v9141_v51 = vcombine.low %v26651_v19, %v26650_v36  ;;  %v26657_v36 = vld [vmem:[#allocation133_spill] sm:$0xff]  ;;  %v26660_v47 = vld [vmem:[#allocation395_spill] sm:$0xff] }
 0x2f0   :  { %14812 = vmatprep.mubr.msk.f32.mxu1 %vm16631_vm2, %v25733_v27  ;;  %26655 = vst [vmem:[#allocation72_spill] sm:$0xff] %v21491_v4 }
 0x2f1   :  { %26649 = vst [vmem:[#allocation70_spill] sm:$0xff] %v21472_v16  ;;  %v5021_v59 = vcombine.low %v21469_v42, %v21472_v16  ;;  %v26661_v16 = vld [vmem:[#allocation401_spill] sm:$0xff]  ;;  %v26662_v42 = vld [vmem:[#allocation396_spill] sm:$0xff] }
 0x2f2   :  { %15468 = vmatmul.mubr.msk.f32.gmra.mrb[28].mxu0 %vm2564_vm9, %v9140_v1  ;;  %v26653_v1 = vld [vmem:[#allocation388_spill] sm:$0xff] }
 0x2f3   :  { %14813 = vmatmul.mubr.msk.f32.gmra.mrb[88].mxu1 %vm2564_vm9, %v4987_v31  ;;  %15470 = vmatprep.mubr.msk.f32.mxu0 %vm16631_vm2, %v25733_v27  ;;  %v5023_v32 = vcombine.low %v26654_v41, %v26653_v1  ;;  %v26656_v31 = vld [vmem:[#allocation139_spill] sm:$0xff]  ;;  %v26659_v41 = vld [vmem:[#allocation400_spill] sm:$0xff] }
 0x2f4   :  { %14815 = vmatprep.mubr.msk.f32.mxu1 %vm16631_vm2, %v25733_v27  ;;  %v9142_v19 = vcombine.low %v26657_v36, %v26656_v31  ;;  %v5039_v34 = vcombine.low %v26660_v47, %v26659_v41  ;;  %v5588_v31 = vcombine.low %v26664_v40, %v26663_v6  ;;  %v26666_v36 = vld [vmem:[#allocation141_spill] sm:$0xff]  ;;  %v26669_v40 = vld [vmem:[#allocation22_spill] sm:$0xff]  ;;  %v9082_v41 = vrot.slane %v20541_v45, 7 }
 0x2f5   :  { %v21499_v1 = vrot.slane %v5023_v32, %v16753_v24  ;;  %v26670_v6 = vld [vmem:[#allocation153_spill] sm:$0xff]  ;;  %v9091_v45 = vrot.slane %v20548_v15, 7 }
 0x2f6   :  { %15471 = vmatmul.mubr.msk.f32.gmra.mrb[30].mxu0 %vm2564_vm9, %v9141_v51  ;;  %v5040_v51 = vcombine.low %v26662_v42, %v26661_v16  ;;  %v21518_v47 = vrot.slane %v5039_v34, %v16753_v24  ;;  %v26672_v34 = vld [vmem:[#allocation191_spill] sm:$0xff]  ;;  %v9084_v44 = vrot.slane %v9082_v41, 2 }
 0x2f7   :  { %14816 = vmatmul.mubr.msk.f32.gmra.mrb[90].mxu1 %vm2564_vm9, %v5004_v18  ;;  %15473 = vmatprep.mubr.msk.f32.mxu0 %vm16631_vm2, %v25733_v27  ;;  %26658 = vst [vmem:[#allocation416_spill] sm:$0xff] %v21499_v1  ;;  %v26665_v18 = vld [vmem:[#allocation144_spill] sm:$0xff]  ;;  %v5038_v32 = vcombine.low %v21491_v4, %v21499_v1  ;;  %v13786_v4 = vrot.slane %v26672_v34, 9  ;;  %v9088_v1 = vrot.slane %v20545_v14, 7 }
 0x2f8   :  { %14818 = vmatprep.mubr.msk.f32.mxu1 %vm16631_vm2, %v25733_v27  ;;  %v9143_v28 = vcombine.low %v26666_v36, %v26665_v18  ;;  %26667 = vst [vmem:[#allocation74_spill] sm:$0xff] %v21518_v47  ;;  %v21521_v16 = vrot.slane %v5040_v51, %v16753_v24  ;;  %v26671_v18 = vld [vmem:[#allocation146_spill] sm:$0xff]  ;;  %v9085_v51 = vrot.slane %v20514_v5, 7  ;;  %v26675_v5 = vld [vmem:[#allocation168_spill] sm:$0xff] }
 0x2f9   :  { %v9144_v36 = vcombine.low %v26671_v18, %v26670_v6  ;;  %v26674_v6 = vld [vmem:[#allocation155_spill] sm:$0xff]  ;;  %v26677_v34 = vld [vmem:[#allocation172_spill] sm:$0xff]  ;;  %v9083_v15 = vsel %vm16821_vm8, %v13786_v4, %v9082_v41  ;;  %v9090_v46 = vrot.slane %v9088_v1, 2  ;;  %v26681_v4 = vld [vmem:[#allocation254_spill] sm:$0xff] }
 0x2fa   :  { %15474 = vmatmul.mubr.msk.f32.gmra.mrb[32].mxu0 %vm2564_vm9, %v9142_v19  ;;  %26668 = vst [vmem:[#allocation80_spill] sm:$0xff] %v21521_v16  ;;  %v5597_v19 = vcombine.low %v26368_v7, %v26669_v40  ;;  %v5055_v7 = vcombine.low %v21518_v47, %v21521_v16  ;;  %v26673_v40 = vld [vmem:[#allocation158_spill] sm:$0xff]  ;;  %v9087_v13 = vrot.slane %v9085_v51, 2  ;;  %v26682_v41 = vld [vmem:[#allocation173_spill] sm:$0xff] }
 0x2fb   :  { %14819 = vmatmul.mubr.msk.f32.gmra.mrb[92].mxu1 %vm2564_vm9, %v5021_v59  ;;  %15476 = vmatprep.mubr.msk.f32.mxu0 %vm16631_vm2, %v25733_v27  ;;  %v5595_v59 = vrot.slane %v5588_v31, %v16753_v24  ;;  %v9145_v18 = vcombine.low %v26674_v6, %v26673_v40  ;;  %v26678_v16 = vld [vmem:[#allocation170_spill] sm:$0xff] }
 0x2fc   :  { %14821 = vmatprep.mubr.msk.f32.mxu1 %vm16631_vm2, %v25733_v27  ;;  %v9148_v47 = vcombine.low %v26678_v16, %v26677_v34  ;;  %v9097_v16 = vrot.slane %v20576_v35, 7  ;;  %v26685_v40 = vld [vmem:[#allocation30_spill] sm:$0xff] }
 0x2fd   :  { %v5596_v31 = vcombine.low %v5595_v59, %v20528_v30  ;;  %v9093_v30 = vrot.slane %v9091_v45, 2 }
 0x2fe   :  { %15477 = vmatmul.mubr.msk.f32.gmra.mrb[34].mxu0 %vm2564_vm9, %v9143_v28  ;;  %v5604_v28 = vrot.slane %v5597_v19, %v16753_v24  ;;  %v9094_v19 = vrot.slane %v20580_v37, 7  ;;  %v9162_v37 = vrot.slane %v9148_v47, %v16753_v24  ;;  %v9099_v9 = vrot.slane %v9097_v16, 2 }
 0x2ff   :  { %14822 = vmatmul.mubr.msk.f32.gmra.mrb[94].mxu1 %vm2564_vm9, %v5038_v32  ;;  %15479 = vmatprep.mubr.msk.f32.mxu0 %vm16631_vm2, %v25733_v27  ;;  %v26676_v32 = vld [vmem:[#allocation165_spill] sm:$0xff] }
 0x300   :  { %14824 = vmatprep.mubr.msk.f32.mxu1 %vm16631_vm2, %v25733_v27  ;;  %v9147_v14 = vcombine.low %v26676_v32, %v26675_v5  ;;  %v21560_v5 = vcombine.high %v20576_v35, %v20576_v35  ;;  %v5605_v59 = vcombine.low %v26681_v4, %v5604_v28  ;;  %v26688_v35 = vld [vmem:[#allocation180_spill] sm:$0xff]  ;;  %v9086_v28 = vsel %vm16821_vm8, %v9084_v44, %v9085_v51 }
 0x301   :  { %v9165_v60 = vcombine.low %v26688_v35, %v9083_v15  ;;  %v9089_v4 = vsel %vm16821_vm8, %v9087_v13, %v9088_v1  ;;  %v9096_v61 = vrot.slane %v9094_v19, 2  ;;  %v16604_v35 = vld [vmem:[%s24823_s1 + $0x10] sm:$0xf]  ;;  %v9172_v1 = vrot.slane %v9164_v26, %v16753_v24 }
 0x302   :  { %15480 = vmatmul.mubr.msk.f32.gmra.mrb[36].mxu0 %vm2564_vm9, %v9144_v36  ;;  %26680 = vst [vmem:[#allocation75_spill] sm:$0xff] %v21560_v5  ;;  %v26683_v36 = vld [vmem:[#allocation159_spill] sm:$0xff]  ;;  %v9155_v32 = vrot.slane %v9147_v14, %v16753_v24  ;;  %v9095_v14 = vsel %vm16821_vm8, %v9093_v30, %v9094_v19  ;;  %v9100_v15 = vrot.slane %v21560_v5, 7  ;;  %v9181_v51 = vcombine.low %v9086_v28, %v9089_v4  ;;  %v26690_v19 = vld [vmem:[#allocation310_spill] sm:$0xff] }
 0x303   :  { %14825 = vmatmul.mubr.msk.f32.gmra.mrb[96].mxu1 %vm2564_vm9, %v5055_v7  ;;  %15482 = vmatprep.mubr.msk.f32.mxu0 %vm16631_vm2, %v25733_v27  ;;  %v9146_v34 = vcombine.low %v26683_v36, %v26682_v41  ;;  %v26684_v7 = vld [vmem:[#allocation33_spill] sm:$0xff]  ;;  %v9092_v41 = vsel %vm16821_vm8, %v9090_v46, %v9091_v45  ;;  %v9179_v47 = vrot.slane %v9165_v60, %v16753_v24 }
 0x304   :  { %14829 = vmatprep.mubr.msk.f32.mxu1 %vm16631_vm2, %v25733_v27  ;;  %v5607_v6 = vcombine.low %v26685_v40, %v26684_v7  ;;  %v26689_v46 = vld [vmem:[#allocation309_spill] sm:$0xff]  ;;  %v9163_v13 = vcombine.low %v9155_v32, %v9162_v37  ;;  %v9182_v45 = vcombine.low %v9092_v41, %v9095_v14  ;;  %v9098_v37 = vsel %vm16821_vm8, %v9096_v61, %v9097_v16  ;;  %v26691_v16 = vld [vmem:[#allocation40_spill] sm:$0xff]  ;;  %v26695_v41 = vld [vmem:[#allocation207_spill] sm:$0xff] }
 0x305   :  { %v21596_v44 = vcombine.low %v26689_v46, %v20594_v58  ;;  %v9101_v58 = vsel %vm16821_vm8, %v9099_v9, %v9100_v15  ;;  %v9180_v26 = vcombine.low %v9172_v1, %v9179_v47  ;;  %v9189_v60 = vrot.slane %v9181_v51, %v16753_v24  ;;  %v26696_v14 = vld [vmem:[#allocation198_spill] sm:$0xff]  ;;  %v26697_v9 = vld [vmem:[#allocation369_spill] sm:$0xff]  ;;  %v26699_v1 = vld [vmem:[#allocation211_spill] sm:$0xff] }
 0x306   :  { %15483 = vmatmul.mubr.msk.f32.gmra.mrb[38].mxu0 %vm2564_vm9, %v9145_v18  ;;  %v9196_v18 = vrot.slane %v9182_v45, %v16753_v24  ;;  %v9198_v30 = vcombine.low %v9098_v37, %v9101_v58  ;;  %v5617_v36 = vcombine.low %v26388_v12, %v26691_v16  ;;  %v21629_v40 = vcombine.low %v20626_v57, %v20646_v22  ;;  %v26692_v12 = vld [vmem:[#allocation197_spill] sm:$0xff]  ;;  %v26693_v57 = vld [vmem:[#allocation55_spill] sm:$0xff]  ;;  %v26694_v22 = vld [vmem:[#allocation52_spill] sm:$0xff] }
 0x307   :  { %14830 = vmatmul.mubr.msk.f32.vlgmr.msra.gmra.mrb[0].mxu1 %vm2564_vm9, %v5596_v31  ;;  %15485 = vmatprep.mubr.msk.f32.mxu0 %vm16631_vm2, %v25733_v27  ;;  %v5614_v31 = vrot.slane %v5607_v6, %v16753_v24  ;;  %v5627_v4 = vcombine.low %v26694_v22, %v26693_v57  ;;  %v9207_v61 = vcombine.low %v26696_v14, %v26695_v41  ;;  %v26698_v46 = vld [vmem:[#allocation62_spill] sm:$0xff]  ;;  %v26703_v58 = vld [vmem:[#allocation399_spill] sm:$0xff] }
 0x308   :  { %14832 = vmatprep.mubr.msk.f32.mxu1 %vm16631_vm2, %v25733_v27  ;;  %15776 = vmatpush3.msk.msra.mxu1 %vm2663_vm0, %v16604_v35  ;;  %v9205_v7 = vrot.slane %v9198_v30, %v16753_v24  ;;  %v5624_v6 = vrot.slane %v5617_v36, %v16753_v24  ;;  %v21653_v15 = vcombine.low %v26697_v9, %v20677_v50  ;;  %v26700_v47 = vld [vmem:[#allocation210_spill] sm:$0xff]  ;;  %v26707_v36 = vld [vmem:[#allocation379_spill] sm:$0xff] }
 0x309   :  { %15721 = vmatprep.subr.mxu1 %v25733_v27  ;;  %v5634_v35 = vrot.slane %v5627_v4, %v16753_v24  ;;  %v9208_v51 = vcombine.low %v26700_v47, %v26699_v1  ;;  %v26705_v30 = vld [vmem:[#allocation222_spill] sm:$0xff]  ;;  %v26711_v57 = vld [vmem:[#allocation247_spill] sm:$0xff] }
 0x30a   :  { %15486 = vmatmul.mubr.msk.f32.gmra.mrb[40].mxu0 %vm2564_vm9, %v9146_v34  ;;  %v9197_v34 = vcombine.low %v9189_v60, %v9196_v18  ;;  %v9206_v32 = vcombine.low %v9205_v7, %v26692_v12  ;;  %v5625_v28 = vcombine.low %v5624_v6, %v20655_v3  ;;  %v26704_v60 = vld [vmem:[#allocation76_spill] sm:$0xff]  ;;  %v26709_v6 = vld [vmem:[#allocation223_spill] sm:$0xff]  ;;  %v26712_v22 = vld [vmem:[#allocation238_spill] sm:$0xff] }
 0x30b   :  { %14833 = vmatmul.mubr.msk.f32.gmra.mrb[2].mxu1 %vm2564_vm9, %v5605_v59  ;;  %15488 = vmatprep.mubr.msk.f32.mxu0 %vm16631_vm2, %v25733_v27  ;;  %v5615_v59 = vcombine.low %v26690_v19, %v5614_v31  ;;  %v5635_v50 = vcombine.low %v5634_v35, %v20706_v54  ;;  %v26702_v31 = vld [vmem:[#allocation212_spill] sm:$0xff]  ;;  %v5646_v18 = vcombine.low %v26418_v53, %v26704_v60  ;;  %v26708_v53 = vld [vmem:[#allocation235_spill] sm:$0xff]  ;;  %v26715_v9 = vld [vmem:[#allocation250_spill] sm:$0xff] }
 0x30c   :  { %14835 = vmatprep.mubr.msk.f32.mxu1 %vm16631_vm2, %v25733_v27  ;;  %v9211_v12 = vcombine.low %v26709_v6, %v26708_v53  ;;  %v9212_v4 = vcombine.low %v26712_v22, %v26711_v57  ;;  %v26713_v41 = vld [vmem:[#allocation423_spill] sm:$0xff]  ;;  %v26717_v1 = vld [vmem:[#allocation270_spill] sm:$0xff]  ;;  %v26723_v60 = vld [vmem:[#allocation272_spill] sm:$0xff]  ;;  %v21777_v22 = vcombine.low %v20865_v2, %v20886_v39 }
 0x30d   :  { %v5653_v7 = vrot.slane %v5646_v18, %v16753_v24  ;;  %v21715_v14 = vcombine.low %v26713_v41, %v20775_v43  ;;  %v26716_v43 = vld [vmem:[#allocation102_spill] sm:$0xff]  ;;  %v26732_v41 = vld [vmem:[#allocation227_spill] sm:$0xff] }
 0x30e   :  { %15489 = vmatmul.mubr.msk.f32.gmra.mrb[42].mxu0 %vm2564_vm9, %v9163_v13  ;;  %v5636_v13 = vcombine.low %v26406_v49, %v26698_v46  ;;  %v26701_v49 = vld [vmem:[#allocation218_spill] sm:$0xff]  ;;  %v26738_v2 = vld [vmem:[#allocation315_spill] sm:$0xff] }
 0x30f   :  { %14836 = vmatmul.mubr.msk.f32.gmra.mrb[4].mxu1 %vm2564_vm9, %v21596_v44  ;;  %15491 = vmatprep.mubr.msk.f32.mxu0 %vm16631_vm2, %v25733_v27  ;;  %v9209_v37 = vcombine.low %v26702_v31, %v26701_v49  ;;  %v26718_v47 = vld [vmem:[#allocation262_spill] sm:$0xff]  ;;  %v26721_v31 = vld [vmem:[#allocation105_spill] sm:$0xff] }
 0x310   :  { %14838 = vmatprep.mubr.msk.f32.mxu1 %vm16631_vm2, %v25733_v27  ;;  %v5643_v45 = vrot.slane %v5636_v13, %v16753_v24  ;;  %v5666_v13 = vcombine.low %v26437_v0, %v26716_v43  ;;  %v26720_v0 = vld [vmem:[#allocation107_spill] sm:$0xff]  ;;  %v26727_v53 = vld [vmem:[#allocation426_spill] sm:$0xff] }
 0x311   :  { %v26739_v39 = vld [vmem:[#allocation306_spill] sm:$0xff] }
 0x312   :  { %15492 = vmatmul.mubr.msk.f32.gmra.mrb[44].mxu0 %vm2564_vm9, %v9180_v26  ;;  %v5644_v26 = vcombine.low %v26703_v58, %v5643_v45  ;;  %v5673_v49 = vrot.slane %v5666_v13, %v16753_v24  ;;  %v9218_v13 = vcombine.low %v26739_v39, %v26738_v2  ;;  %v26756_v2 = vld [vmem:[#allocation352_spill] sm:$0xff] }
 0x313   :  { %14839 = vmatmul.mubr.msk.f32.gmra.mrb[6].mxu1 %vm2564_vm9, %v5615_v59  ;;  %15494 = vmatprep.mubr.msk.f32.mxu0 %vm16631_vm2, %v25733_v27  ;;  %v26706_v59 = vld [vmem:[#allocation219_spill] sm:$0xff] }
 0x314   :  { %14841 = vmatprep.mubr.msk.f32.mxu1 %vm16631_vm2, %v25733_v27  ;;  %v9210_v16 = vcombine.low %v26706_v59, %v26705_v30 }
 0x316   :  { %15495 = vmatmul.mubr.msk.f32.gmra.mrb[46].mxu0 %vm2564_vm9, %v9197_v34  ;;  %v21690_v34 = vcombine.low %v26707_v36, %v20737_v63  ;;  %v26710_v63 = vld [vmem:[#allocation86_spill] sm:$0xff]  ;;  %v26726_v36 = vld [vmem:[#allocation283_spill] sm:$0xff] }
 0x317   :  { %14842 = vmatmul.mubr.msk.f32.gmra.mrb[8].mxu1 %vm2564_vm9, %v21629_v40  ;;  %15497 = vmatprep.mubr.msk.f32.mxu0 %vm16631_vm2, %v25733_v27 }
 0x318   :  { %14844 = vmatprep.mubr.msk.f32.mxu1 %vm16631_vm2, %v25733_v27 }
 0x31a   :  { %15498 = vmatmul.mubr.msk.f32.gmra.mrb[48].mxu0 %vm2564_vm9, %v9206_v32  ;;  %v5654_v32 = vcombine.low %v20745_v11, %v5653_v7 }
 0x31b   :  { %14845 = vmatmul.mubr.msk.f32.gmra.mrb[10].mxu1 %vm2564_vm9, %v5625_v28  ;;  %15500 = vmatprep.mubr.msk.f32.mxu0 %vm16631_vm2, %v25733_v27  ;;  %v5656_v28 = vcombine.low %v26425_v62, %v26710_v63  ;;  %v26714_v62 = vld [vmem:[#allocation261_spill] sm:$0xff]  ;;  %v26729_v63 = vld [vmem:[#allocation304_spill] sm:$0xff] }
 0x31c   :  { %14847 = vmatprep.mubr.msk.f32.mxu1 %vm16631_vm2, %v25733_v27  ;;  %v9213_v35 = vcombine.low %v26715_v9, %v26714_v62  ;;  %v26734_v9 = vld [vmem:[#allocation229_spill] sm:$0xff] }
 0x31e   :  { %15501 = vmatmul.mubr.msk.f32.gmra.mrb[50].mxu0 %vm2564_vm9, %v9207_v61  ;;  %v5663_v61 = vrot.slane %v5656_v28, %v16753_v24  ;;  %v26730_v28 = vld [vmem:[#allocation296_spill] sm:$0xff] }
 0x31f   :  { %14848 = vmatmul.mubr.msk.f32.gmra.mrb[12].mxu1 %vm2564_vm9, %v21653_v15  ;;  %15503 = vmatprep.mubr.msk.f32.mxu0 %vm16631_vm2, %v25733_v27  ;;  %v9217_v57 = vcombine.low %v26730_v28, %v26729_v63  ;;  %v26750_v28 = vld [vmem:[#allocation156_spill] sm:$0xff] }
 0x320   :  { %14850 = vmatprep.mubr.msk.f32.mxu1 %vm16631_vm2, %v25733_v27  ;;  %v5664_v46 = vcombine.low %v5663_v61, %v20797_v55 }
 0x322   :  { %15504 = vmatmul.mubr.msk.f32.gmra.mrb[52].mxu0 %vm2564_vm9, %v9208_v51  ;;  %v9214_v51 = vcombine.low %v26718_v47, %v26717_v1  ;;  %v26740_v47 = vld [vmem:[#allocation132_spill] sm:$0xff] }
 0x323   :  { %14851 = vmatmul.mubr.msk.f32.gmra.mrb[14].mxu1 %vm2564_vm9, %v5635_v50  ;;  %15506 = vmatprep.mubr.msk.f32.mxu0 %vm16631_vm2, %v25733_v27  ;;  %v26719_v50 = vld [vmem:[#allocation355_spill] sm:$0xff] }
 0x324   :  { %14853 = vmatprep.mubr.msk.f32.mxu1 %vm16631_vm2, %v25733_v27  ;;  %v21740_v45 = vcombine.low %v26719_v50, %v20826_v8  ;;  %v26724_v8 = vld [vmem:[#allocation393_spill] sm:$0xff] }
 0x325   :  { %v5674_v30 = vcombine.low %v5673_v49, %v26724_v8 }
 0x326   :  { %15507 = vmatmul.mubr.msk.f32.gmra.mrb[54].mxu0 %vm2564_vm9, %v9209_v37  ;;  %v5675_v37 = vcombine.low %v26721_v31, %v26720_v0  ;;  %v26742_v0 = vld [vmem:[#allocation327_spill] sm:$0xff]  ;;  %v26743_v31 = vld [vmem:[#allocation318_spill] sm:$0xff] }
 0x327   :  { %14854 = vmatmul.mubr.msk.f32.gmra.mrb[16].mxu1 %vm2564_vm9, %v5644_v26  ;;  %15509 = vmatprep.mubr.msk.f32.mxu0 %vm16631_vm2, %v25733_v27  ;;  %v26722_v26 = vld [vmem:[#allocation281_spill] sm:$0xff] }
 0x328   :  { %14856 = vmatprep.mubr.msk.f32.mxu1 %vm16631_vm2, %v25733_v27  ;;  %v9215_v18 = vcombine.low %v26723_v60, %v26722_v26  ;;  %v5682_v59 = vrot.slane %v5675_v37, %v16753_v24  ;;  %v9219_v37 = vcombine.low %v26743_v31, %v26742_v0  ;;  %v26744_v26 = vld [vmem:[#allocation402_spill] sm:$0xff]  ;;  %v26761_v31 = vld [vmem:[#allocation163_spill] sm:$0xff] }
 0x329   :  { %v21816_v60 = vcombine.low %v26744_v26, %v20917_v48 }
 0x32a   :  { %15510 = vmatmul.mubr.msk.f32.gmra.mrb[56].mxu0 %vm2564_vm9, %v9210_v16  ;;  %v26725_v16 = vld [vmem:[#allocation293_spill] sm:$0xff]  ;;  %v5683_v6 = vcombine.low %v26727_v53, %v5682_v59 }
 0x32b   :  { %14857 = vmatmul.mubr.msk.f32.gmra.mrb[18].mxu1 %vm2564_vm9, %v21690_v34  ;;  %15512 = vmatprep.mubr.msk.f32.mxu0 %vm16631_vm2, %v25733_v27  ;;  %v9216_v7 = vcombine.low %v26726_v36, %v26725_v16  ;;  %v26746_v59 = vld [vmem:[#allocation329_spill] sm:$0xff]  ;;  %v26747_v36 = vld [vmem:[#allocation148_spill] sm:$0xff] }
 0x32c   :  { %14859 = vmatprep.mubr.msk.f32.mxu1 %vm16631_vm2, %v25733_v27 }
 0x32e   :  { %15513 = vmatmul.mubr.msk.f32.gmra.mrb[58].mxu0 %vm2564_vm9, %v9211_v12  ;;  %v26728_v12 = vld [vmem:[#allocation124_spill] sm:$0xff] }
 0x32f   :  { %14860 = vmatmul.mubr.msk.f32.gmra.mrb[20].mxu1 %vm2564_vm9, %v5654_v32  ;;  %15515 = vmatprep.mubr.msk.f32.mxu0 %vm16631_vm2, %v25733_v27  ;;  %v5685_v32 = vcombine.low %v26458_v29, %v26728_v12  ;;  %v26731_v29 = vld [vmem:[#allocation220_spill] sm:$0xff]  ;;  %v26748_v12 = vld [vmem:[#allocation351_spill] sm:$0xff] }
 0x330   :  { %14862 = vmatprep.mubr.msk.f32.mxu1 %vm16631_vm2, %v25733_v27  ;;  %v26733_v61 = vcombine.low %v26731_v29, %v26732_v41  ;;  %v26753_v41 = vld [vmem:[#allocation10_spill] sm:$0xff] }
 0x332   :  { %15516 = vmatmul.mubr.msk.f32.gmra.mrb[60].mxu0 %vm2564_vm9, %v9212_v4  ;;  %v5692_v4 = vrot.slane %v5685_v32, %v16753_v24  ;;  %v21786_v62 = vrot.slane %v26733_v61, %v16753_v24  ;;  %v26749_v32 = vld [vmem:[#allocation342_spill] sm:$0xff]  ;;  %v6395_v61 = vrot.slane %v26753_v41, 7 }
 0x333   :  { %14863 = vmatmul.mubr.msk.f32.gmra.mrb[22].mxu1 %vm2564_vm9, %v21715_v14  ;;  %15518 = vmatprep.mubr.msk.f32.mxu0 %vm16631_vm2, %v25733_v27  ;;  %v9221_v63 = vcombine.low %v26749_v32, %v26748_v12  ;;  %v26767_v12 = vld [vmem:[#allocation429_spill] sm:$0xff] }
 0x334   :  { %14865 = vmatprep.mubr.msk.f32.mxu1 %vm16631_vm2, %v25733_v27  ;;  %v5693_v1 = vcombine.low %v20889_v17, %v5692_v4  ;;  %v26752_v4 = vld [vmem:[#allocation408_spill] sm:$0xff]  ;;  %v6401_v32 = vrot.slane %v26767_v12, 7 }
 0x336   :  { %15519 = vmatmul.mubr.msk.f32.gmra.mrb[62].mxu0 %vm2564_vm9, %v9213_v35  ;;  %v26735_v35 = vld [vmem:[#allocation232_spill] sm:$0xff] }
 0x337   :  { %14866 = vmatmul.mubr.msk.f32.gmra.mrb[24].mxu1 %vm2564_vm9, %v5664_v46  ;;  %15521 = vmatprep.mubr.msk.f32.mxu0 %vm16631_vm2, %v25733_v27  ;;  %v26736_v46 = vcombine.low %v26734_v9, %v26735_v35  ;;  %v26754_v9 = vld [vmem:[#allocation9_spill] sm:$0xff] }
 0x338   :  { %14868 = vmatprep.mubr.msk.f32.mxu1 %vm16631_vm2, %v25733_v27 }
 0x339   :  { %v21792_v43 = vrot.slane %v26736_v46, %v16753_v24  ;;  %v26755_v46 = vld [vmem:[#allocation363_spill] sm:$0xff] }
 0x33a   :  { %15522 = vmatmul.mubr.msk.f32.gmra.mrb[64].mxu0 %vm2564_vm9, %v9214_v51  ;;  %v26741_v51 = vld [vmem:[#allocation129_spill] sm:$0xff]  ;;  %v9222_v39 = vcombine.low %v26756_v2, %v26755_v46 }
 0x33b   :  { %14869 = vmatmul.mubr.msk.f32.gmra.mrb[26].mxu1 %vm2564_vm9, %v21740_v45  ;;  %15524 = vmatprep.mubr.msk.f32.mxu0 %vm16631_vm2, %v25733_v27  ;;  %26737 = vst [vmem:[#allocation417_spill] sm:$0xff] %v21792_v43  ;;  %v5695_v50 = vcombine.low %v26741_v51, %v26740_v47  ;;  %v26759_v51 = vld [vmem:[#allocation161_spill] sm:$0xff] }
 0x33c   :  { %14871 = vmatprep.mubr.msk.f32.mxu1 %vm16631_vm2, %v25733_v27 }
 0x33e   :  { %15525 = vmatmul.mubr.msk.f32.gmra.mrb[66].mxu0 %vm2564_vm9, %v9215_v18  ;;  %v5702_v18 = vrot.slane %v5695_v50, %v16753_v24  ;;  %v26760_v50 = vld [vmem:[#allocation162_spill] sm:$0xff] }
 0x33f   :  { %14872 = vmatmul.mubr.msk.f32.gmra.mrb[28].mxu1 %vm2564_vm9, %v5674_v30  ;;  %15527 = vmatprep.mubr.msk.f32.mxu0 %vm16631_vm2, %v25733_v27  ;;  %v26745_v30 = vld [vmem:[#allocation341_spill] sm:$0xff]  ;;  %v5724_v0 = vcombine.low %v26760_v50, %v26759_v51 }
 0x340   :  { %14874 = vmatprep.mubr.msk.f32.mxu1 %vm16631_vm2, %v25733_v27  ;;  %v9220_v16 = vcombine.low %v26746_v59, %v26745_v30  ;;  %v5703_v48 = vcombine.low %v5702_v18, %v20946_v10  ;;  %v26763_v18 = vld [vmem:[#allocation177_spill] sm:$0xff]  ;;  %v26764_v30 = vld [vmem:[#allocation174_spill] sm:$0xff] }
 0x341   :  { %v5741_v59 = vcombine.low %v26764_v30, %v26763_v18  ;;  %v5738_v50 = vrot.slane %v5724_v0, %v16753_v24 }
 0x342   :  { %15528 = vmatmul.mubr.msk.f32.gmra.mrb[68].mxu0 %vm2564_vm9, %v9216_v7  ;;  %v5705_v7 = vcombine.low %v26476_v52, %v26747_v36  ;;  %v5714_v52 = vcombine.low %v26489_v56, %v26750_v28 }
 0x343   :  { %14875 = vmatmul.mubr.msk.f32.gmra.mrb[30].mxu1 %vm2564_vm9, %v5683_v6  ;;  %15530 = vmatprep.mubr.msk.f32.mxu0 %vm16631_vm2, %v25733_v27  ;;  %v5755_v18 = vrot.slane %v5741_v59, %v16753_v24  ;;  %v26776_v59 = vld [vmem:[#allocation387_spill] sm:$0xff] }
 0x344   :  { %14877 = vmatprep.mubr.msk.f32.mxu1 %vm16631_vm2, %v25733_v27  ;;  %v5712_v6 = vrot.slane %v5705_v7, %v16753_v24  ;;  %v5721_v56 = vrot.slane %v5714_v52, %v16753_v24  ;;  %v6397_v7 = vrot.slane %v6395_v61, 2  ;;  %v26769_v52 = vld [vmem:[#allocation431_spill] sm:$0xff] }
 0x346   :  { %15531 = vmatmul.mubr.msk.f32.gmra.mrb[70].mxu0 %vm2564_vm9, %v9217_v57  ;;  %v26751_v57 = vld [vmem:[#allocation8_spill] sm:$0xff]  ;;  %v5713_v35 = vcombine.low %v5712_v6, %v26754_v9 }
 0x347   :  { %14878 = vmatmul.mubr.msk.f32.gmra.mrb[32].mxu1 %vm2564_vm9, %v21777_v22  ;;  %15533 = vmatprep.mubr.msk.f32.mxu0 %vm16631_vm2, %v25733_v27  ;;  %v21844_v29 = vcombine.low %v26752_v4, %v26751_v57  ;;  %v6407_v57 = vrot.slane %v26769_v52, 7  ;;  %v26770_v4 = vld [vmem:[#allocation16_spill] sm:$0xff] }
 0x348   :  { %14880 = vmatprep.mubr.msk.f32.mxu1 %vm16631_vm2, %v25733_v27  ;;  %v5722_v46 = vcombine.low %v26770_v4, %v5721_v56 }
 0x349   :  { %v6409_v0 = vrot.slane %v6407_v57, 2 }
 0x34a   :  { %15534 = vmatmul.mubr.msk.f32.gmra.mrb[72].mxu0 %vm2564_vm9, %v9218_v13  ;;  %v26757_v13 = vld [vmem:[#allocation160_spill] sm:$0xff] }
 0x34b   :  { %14881 = vmatmul.mubr.msk.f32.gmra.mrb[34].mxu1 %vm2564_vm9, %v5693_v1  ;;  %15536 = vmatprep.mubr.msk.f32.mxu0 %vm16631_vm2, %v25733_v27  ;;  %v26758_v1 = vld [vmem:[#allocation157_spill] sm:$0xff] }
 0x34c   :  { %14883 = vmatprep.mubr.msk.f32.mxu1 %vm16631_vm2, %v25733_v27  ;;  %v5723_v47 = vcombine.low %v26758_v1, %v26757_v13  ;;  %v26771_v13 = vld [vmem:[#allocation374_spill] sm:$0xff]  ;;  %v26772_v1 = vld [vmem:[#allocation365_spill] sm:$0xff] }
 0x34d   :  { %v9223_v51 = vcombine.low %v26772_v1, %v26771_v13  ;;  %v9104_v13 = vrot.slane %v21051_v38, 7  ;;  %v26777_v1 = vld [vmem:[#allocation377_spill] sm:$0xff]  ;;  %v26780_v38 = vld [vmem:[#allocation398_spill] sm:$0xff] }
 0x34e   :  { %15537 = vmatmul.mubr.msk.f32.gmra.mrb[74].mxu0 %vm2564_vm9, %v9219_v37  ;;  %v26762_v37 = vld [vmem:[#allocation166_spill] sm:$0xff]  ;;  %v5731_v2 = vrot.slane %v5723_v47, %v16753_v24  ;;  %v6403_v47 = vrot.slane %v6401_v32, 2  ;;  %v9224_v49 = vcombine.low %v26777_v1, %v26776_v59  ;;  %v26782_v59 = vld [vmem:[#allocation188_spill] sm:$0xff] }
 0x34f   :  { %14884 = vmatmul.mubr.msk.f32.gmra.mrb[36].mxu1 %vm2564_vm9, %v21816_v60  ;;  %15539 = vmatprep.mubr.msk.f32.mxu0 %vm16631_vm2, %v25733_v27  ;;  %v5740_v26 = vcombine.low %v26762_v37, %v26761_v31  ;;  %v5758_v1 = vcombine.low %v26508_v20, %v26782_v59  ;;  %v26790_v59 = vld [vmem:[#allocation13_spill] sm:$0xff] }
 0x350   :  { %14886 = vmatprep.mubr.msk.f32.mxu1 %vm16631_vm2, %v25733_v27 }
 0x351   :  { %v21885_v37 = vrot.slane %v5740_v26, %v16753_v24  ;;  %v6410_v26 = vrot.slane %v20166_v33, 7 }
 0x352   :  { %15540 = vmatmul.mubr.msk.f32.gmra.mrb[76].mxu0 %vm2564_vm9, %v9220_v16  ;;  %v26765_v16 = vld [vmem:[#allocation183_spill] sm:$0xff] }
 0x353   :  { %14887 = vmatmul.mubr.msk.f32.gmra.mrb[38].mxu1 %vm2564_vm9, %v5703_v48  ;;  %15542 = vmatprep.mubr.msk.f32.mxu0 %vm16631_vm2, %v25733_v27  ;;  %v13618_v36 = vrot.slane %v26765_v16, 9  ;;  %v26766_v48 = vld [vmem:[#allocation385_spill] sm:$0xff]  ;;  %26773 = vst [vmem:[#allocation84_spill] sm:$0xff] %v21885_v37  ;;  %v6412_v20 = vrot.slane %v6410_v26, 2 }
 0x354   :  { %14889 = vmatprep.mubr.msk.f32.mxu1 %vm16631_vm2, %v25733_v27  ;;  %v6398_v6 = vrot.slane %v26766_v48, 7 }
 0x355   :  { %v21892_v56 = vsel %vm16821_vm8, %v13618_v36, %v6395_v61  ;;  %v9107_v61 = vrot.slane %v21047_v25, 7  ;;  %v26778_v36 = vld [vmem:[#allocation432_spill] sm:$0xff] }
 0x356   :  { %15543 = vmatmul.mubr.msk.f32.gmra.mrb[78].mxu0 %vm2564_vm9, %v9221_v63  ;;  %v26768_v63 = vld [vmem:[#allocation430_spill] sm:$0xff]  ;;  %26774 = vst [vmem:[#allocation82_spill] sm:$0xff] %v21892_v56  ;;  %v6413_v5 = vrot.slane %v26778_v36, 7  ;;  %v26791_v25 = vld [vmem:[#allocation12_spill] sm:$0xff] }
 0x357   :  { %14890 = vmatmul.mubr.msk.f32.gmra.mrb[40].mxu1 %vm2564_vm9, %v21844_v29  ;;  %15545 = vmatprep.mubr.msk.f32.mxu0 %vm16631_vm2, %v25733_v27  ;;  %v6404_v28 = vrot.slane %v26768_v63, 7 }
 0x358   :  { %14892 = vmatprep.mubr.msk.f32.mxu1 %vm16631_vm2, %v25733_v27 }
 0x359   :  { %v6406_v30 = vrot.slane %v6404_v28, 2 }
 0x35a   :  { %15546 = vmatmul.mubr.msk.f32.gmra.mrb[80].mxu0 %vm2564_vm9, %v9222_v39  ;;  %v6400_v39 = vrot.slane %v6398_v6, 2 }
 0x35b   :  { %14893 = vmatmul.mubr.msk.f32.gmra.mrb[42].mxu1 %vm2564_vm9, %v5713_v35  ;;  %15548 = vmatprep.mubr.msk.f32.mxu0 %vm16631_vm2, %v25733_v27  ;;  %v21896_v35 = vsel %vm16821_vm8, %v6397_v7, %v6398_v6  ;;  %v21906_v7 = vcombine.low %v5731_v2, %v5738_v50  ;;  %v5756_v6 = vcombine.low %v21885_v37, %v5755_v18 }
 0x35c   :  { %14895 = vmatprep.mubr.msk.f32.mxu1 %vm16631_vm2, %v25733_v27  ;;  %26775 = vst [vmem:[#allocation88_spill] sm:$0xff] %v21896_v35  ;;  %v9227_v36 = vcombine.low %v21892_v56, %v21896_v35  ;;  %v21925_v2 = vsel %vm16821_vm8, %v6403_v47, %v6404_v28  ;;  %v21929_v50 = vsel %vm16821_vm8, %v6406_v30, %v6407_v57  ;;  %v26786_v28 = vld [vmem:[#allocation424_spill] sm:$0xff]  ;;  %v26788_v47 = vld [vmem:[#allocation19_spill] sm:$0xff]  ;;  %v26792_v35 = vld [vmem:[#allocation406_spill] sm:$0xff] }
 0x35d   :  { %26779 = vst [vmem:[#allocation83_spill] sm:$0xff] %v21906_v7  ;;  %26783 = vst [vmem:[#allocation418_spill] sm:$0xff] %v21925_v2  ;;  %v21933_v18 = vsel %vm16821_vm8, %v6409_v0, %v6410_v26  ;;  %v21944_v57 = vcombine.high %v26786_v28, %v26786_v28  ;;  %v9113_v30 = vrot.slane %v26788_v47, 7  ;;  %v26789_v0 = vld [vmem:[#allocation21_spill] sm:$0xff]  ;;  %v9119_v26 = vrot.slane %v26786_v28, 7  ;;  %v26793_v56 = vld [vmem:[#allocation123_spill] sm:$0xff] }
 0x35e   :  { %15549 = vmatmul.mubr.msk.f32.gmra.mrb[82].mxu0 %vm2564_vm9, %v9223_v51  ;;  %v26781_v51 = vld [vmem:[#allocation389_spill] sm:$0xff]  ;;  %26784 = vst [vmem:[#allocation87_spill] sm:$0xff] %v21929_v50  ;;  %26785 = vst [vmem:[#allocation90_spill] sm:$0xff] %v21933_v18  ;;  %v9226_v37 = vcombine.low %v26793_v56, %v26792_v35  ;;  %v21963_v28 = vsel %vm16821_vm8, %v6412_v20, %v6413_v5 }
 0x35f   :  { %14896 = vmatmul.mubr.msk.f32.gmra.mrb[44].mxu1 %vm2564_vm9, %v5722_v46  ;;  %15551 = vmatprep.mubr.msk.f32.mxu0 %vm16631_vm2, %v25733_v27  ;;  %v9225_v43 = vcombine.low %v26781_v51, %v26780_v38  ;;  %v21921_v46 = vsel %vm16821_vm8, %v6400_v39, %v6401_v32  ;;  %v13787_v38 = vrot.slane %v21028_v23, 9  ;;  %v9106_v51 = vrot.slane %v9104_v13, 2  ;;  %26787 = vst [vmem:[#allocation94_spill] sm:$0xff] %v21944_v57 }
 0x360   :  { %14898 = vmatprep.mubr.msk.f32.mxu1 %vm16631_vm2, %v25733_v27  ;;  %v9109_v32 = vrot.slane %v9107_v61, 2  ;;  %v9110_v39 = vrot.slane %v21080_v21, 7  ;;  %v5757_v21 = vcombine.low %v26791_v25, %v26790_v59  ;;  %v5765_v23 = vrot.slane %v5758_v1, %v16753_v24  ;;  %v26797_v59 = vld [vmem:[#allocation199_spill] sm:$0xff] }
 0x361   :  { %v9236_v47 = vcombine.low %v21921_v46, %v21925_v2  ;;  %v9105_v25 = vsel %vm16821_vm8, %v13787_v38, %v9104_v13  ;;  %v9108_v56 = vsel %vm16821_vm8, %v9106_v51, %v9107_v61  ;;  %v9121_v20 = vrot.slane %v9119_v26, 2  ;;  %v26794_v13 = vld [vmem:[#allocation413_spill] sm:$0xff] }
 0x362   :  { %15552 = vmatmul.mubr.msk.f32.gmra.mrb[84].mxu0 %vm2564_vm9, %v9224_v49  ;;  %v9116_v49 = vrot.slane %v26789_v0, 7  ;;  %v9237_v0 = vcombine.low %v21929_v50, %v21933_v18  ;;  %v9111_v35 = vsel %vm16821_vm8, %v9109_v32, %v9110_v39  ;;  %v9112_v1 = vrot.slane %v9110_v39, 2  ;;  %v26795_v61 = vld [vmem:[#allocation409_spill] sm:$0xff] }
 0x363   :  { %14899 = vmatmul.mubr.msk.f32.gmra.mrb[46].mxu1 %vm2564_vm9, %v21906_v7  ;;  %15554 = vmatprep.mubr.msk.f32.mxu0 %vm16631_vm2, %v25733_v27  ;;  %v9234_v7 = vrot.slane %v9227_v36, %v16753_v24  ;;  %v9115_v36 = vrot.slane %v9113_v30, 2  ;;  %v5766_v38 = vcombine.low %v5765_v23, %v26794_v13  ;;  %v9244_v32 = vrot.slane %v9236_v47, %v16753_v24 }
 0x364   :  { %14901 = vmatprep.mubr.msk.f32.mxu1 %vm16631_vm2, %v25733_v27  ;;  %v9118_v5 = vrot.slane %v9116_v49, 2  ;;  %v9251_v39 = vrot.slane %v9237_v0, %v16753_v24  ;;  %v9253_v2 = vcombine.low %v21963_v28, %v9105_v25  ;;  %v9254_v50 = vcombine.low %v9108_v56, %v9111_v35  ;;  %v26799_v56 = vld [vmem:[#allocation412_spill] sm:$0xff]  ;;  %v26800_v35 = vld [vmem:[#allocation206_spill] sm:$0xff] }
 0x365   :  { %v9235_v51 = vcombine.low %v26795_v61, %v9234_v7  ;;  %v9117_v23 = vsel %vm16821_vm8, %v9115_v36, %v9116_v49  ;;  %v26798_v49 = vld [vmem:[#allocation23_spill] sm:$0xff] }
 0x366   :  { %15555 = vmatmul.mubr.msk.f32.gmra.mrb[86].mxu0 %vm2564_vm9, %v9225_v43  ;;  %v9122_v43 = vrot.slane %v21944_v57, 7  ;;  %v9114_v57 = vsel %vm16821_vm8, %v9112_v1, %v9113_v30  ;;  %v9252_v47 = vcombine.low %v9244_v32, %v9251_v39  ;;  %v9268_v30 = vrot.slane %v9254_v50, %v16753_v24  ;;  %v26801_v1 = vld [vmem:[#allocation204_spill] sm:$0xff]  ;;  %v26805_v32 = vld [vmem:[#allocation221_spill] sm:$0xff] }
 0x367   :  { %14902 = vmatmul.mubr.msk.f32.gmra.mrb[48].mxu1 %vm2564_vm9, %v5756_v6  ;;  %15557 = vmatprep.mubr.msk.f32.mxu0 %vm16631_vm2, %v25733_v27  ;;  %v26796_v6 = vld [vmem:[#allocation202_spill] sm:$0xff]  ;;  %v9270_v0 = vcombine.low %v9114_v57, %v9117_v23  ;;  %v5777_v36 = vcombine.low %v26801_v1, %v26800_v35 }
 0x368   :  { %14904 = vmatprep.mubr.msk.f32.mxu1 %vm16631_vm2, %v25733_v27  ;;  %v5768_v18 = vcombine.low %v26797_v59, %v26796_v6  ;;  %v9123_v7 = vsel %vm16821_vm8, %v9121_v20, %v9122_v43  ;;  %v26806_v6 = vld [vmem:[#allocation26_spill] sm:$0xff]  ;;  %v26807_v59 = vld [vmem:[#allocation27_spill] sm:$0xff] }
 0x369   :  { %v9278_v50 = vrot.slane %v9270_v0, %v16753_v24  ;;  %v22038_v23 = vcombine.low %v26807_v59, %v26806_v6  ;;  %v26810_v0 = vld [vmem:[#allocation240_spill] sm:$0xff]  ;;  %v26814_v35 = vld [vmem:[#allocation334_spill] sm:$0xff]  ;;  %v26823_v59 = vld [vmem:[#allocation41_spill] sm:$0xff] }
 0x36a   :  { %15558 = vmatmul.mubr.msk.f32.gmra.mrb[88].mxu0 %vm2564_vm9, %v9226_v37  ;;  %v9120_v37 = vsel %vm16821_vm8, %v9118_v5, %v9119_v26  ;;  %v22005_v26 = vcombine.low %v26799_v56, %v26798_v49  ;;  %v5775_v42 = vrot.slane %v5768_v18, %v16753_v24  ;;  %v26802_v5 = vld [vmem:[#allocation25_spill] sm:$0xff]  ;;  %v5784_v18 = vrot.slane %v5777_v36, %v16753_v24  ;;  %v26815_v36 = vld [vmem:[#allocation39_spill] sm:$0xff] }
 0x36b   :  { %14905 = vmatmul.mubr.msk.f32.gmra.mrb[50].mxu1 %vm2564_vm9, %v5757_v21  ;;  %15560 = vmatprep.mubr.msk.f32.mxu0 %vm16631_vm2, %v25733_v27  ;;  %v9261_v21 = vrot.slane %v9253_v2, %v16753_v24  ;;  %v9271_v25 = vcombine.low %v9120_v37, %v9123_v7  ;;  %v26808_v7 = vld [vmem:[#allocation333_spill] sm:$0xff]  ;;  %v9750_v1 = vcombine.low %v26814_v35, %v20655_v3  ;;  %v26819_v3 = vld [vmem:[#allocation36_spill] sm:$0xff]  ;;  %v26830_v35 = vld [vmem:[#allocation370_spill] sm:$0xff] }
 0x36c   :  { %14907 = vmatprep.mubr.msk.f32.mxu1 %vm16631_vm2, %v25733_v27  ;;  %v5776_v20 = vcombine.low %v5775_v42, %v26802_v5 }
 0x36d   :  { %v9269_v2 = vcombine.low %v9261_v21, %v9268_v30  ;;  %v9285_v57 = vrot.slane %v9271_v25, %v16753_v24  ;;  %v26809_v21 = vld [vmem:[#allocation28_spill] sm:$0xff]  ;;  %v26811_v25 = vld [vmem:[#allocation234_spill] sm:$0xff] }
 0x36e   :  { %15561 = vmatmul.mubr.msk.f32.gmra.mrb[90].mxu0 %vm2564_vm9, %v9235_v51  ;;  %v26804_v51 = vld [vmem:[#allocation225_spill] sm:$0xff]  ;;  %v5797_v49 = vcombine.low %v26811_v25, %v26810_v0  ;;  %v26827_v25 = vld [vmem:[#allocation298_spill] sm:$0xff] }
 0x36f   :  { %14908 = vmatmul.mubr.msk.f32.gmra.mrb[52].mxu1 %vm2564_vm9, %v5766_v38  ;;  %15563 = vmatprep.mubr.msk.f32.mxu0 %vm16631_vm2, %v25733_v27  ;;  %v9286_v43 = vcombine.low %v9278_v50, %v9285_v57  ;;  %v26803_v38 = vld [vmem:[#allocation24_spill] sm:$0xff]  ;;  %v5787_v39 = vcombine.low %v26805_v32, %v26804_v51  ;;  %v26817_v57 = vld [vmem:[#allocation257_spill] sm:$0xff] }
 0x370   :  { %14910 = vmatprep.mubr.msk.f32.mxu1 %vm16631_vm2, %v25733_v27  ;;  %v5785_v61 = vcombine.low %v26803_v38, %v5784_v18  ;;  %v5804_v42 = vrot.slane %v5797_v49, %v16753_v24  ;;  %v26816_v50 = vld [vmem:[#allocation260_spill] sm:$0xff]  ;;  %v26821_v51 = vld [vmem:[#allocation269_spill] sm:$0xff] }
 0x371   :  { %v5794_v37 = vrot.slane %v5787_v39, %v16753_v24  ;;  %v26822_v39 = vld [vmem:[#allocation258_spill] sm:$0xff]  ;;  %v26826_v0 = vld [vmem:[#allocation301_spill] sm:$0xff] }
 0x372   :  { %15564 = vmatmul.mubr.msk.f32.gmra.mrb[92].mxu0 %vm2564_vm9, %v9252_v47  ;;  %v9749_v47 = vcombine.low %v26690_v19, %v26808_v7  ;;  %v26813_v19 = vld [vmem:[#allocation415_spill] sm:$0xff]  ;;  %v9751_v6 = vcombine.low %v26822_v39, %v20706_v54  ;;  %v26825_v54 = vld [vmem:[#allocation44_spill] sm:$0xff]  ;;  %v5826_v49 = vcombine.low %v26827_v25, %v26826_v0  ;;  %v26843_v0 = vld [vmem:[#allocation350_spill] sm:$0xff] }
 0x373   :  { %14911 = vmatmul.mubr.msk.f32.gmra.mrb[54].mxu1 %vm2564_vm9, %v22005_v26  ;;  %15566 = vmatprep.mubr.msk.f32.mxu0 %vm16631_vm2, %v25733_v27  ;;  %v5795_v30 = vcombine.low %v26809_v21, %v5794_v37 }
 0x374   :  { %14913 = vmatprep.mubr.msk.f32.mxu1 %vm16631_vm2, %v25733_v27 }
 0x376   :  { %15567 = vmatmul.mubr.msk.f32.gmra.mrb[94].mxu0 %vm2564_vm9, %v9269_v2  ;;  %v5805_v2 = vcombine.low %v5804_v42, %v26815_v36  ;;  %v5833_v42 = vrot.slane %v5826_v49, %v16753_v24  ;;  %v26844_v49 = vld [vmem:[#allocation302_spill] sm:$0xff] }
 0x377   :  { %14914 = vmatmul.mubr.msk.f32.gmra.mrb[56].mxu1 %vm2564_vm9, %v5776_v20  ;;  %15569 = vmatprep.mubr.msk.f32.mxu0 %vm16631_vm2, %v25733_v27  ;;  %v5807_v20 = vcombine.low %v26817_v57, %v26816_v50  ;;  %v26832_v57 = vld [vmem:[#allocation321_spill] sm:$0xff] }
 0x378   :  { %14916 = vmatprep.mubr.msk.f32.mxu1 %vm16631_vm2, %v25733_v27 }
 0x37a   :  { %15570 = vmatmul.mubr.msk.f32.gmra.mrb[96].mxu0 %vm2564_vm9, %v9286_v43  ;;  %v5814_v43 = vrot.slane %v5807_v20, %v16753_v24  ;;  %v26833_v20 = vld [vmem:[#allocation314_spill] sm:$0xff] }
 0x37b   :  { %14917 = vmatmul.mubr.msk.f32.gmra.mrb[58].mxu1 %vm2564_vm9, %v5785_v61  ;;  %15574 = vmatprep.mubr.msk.f32.mxu0 %vm16631_vm2, %v25733_v27  ;;  %v26820_v61 = vld [vmem:[#allocation277_spill] sm:$0xff] }
 0x37c   :  { %14919 = vmatprep.mubr.msk.f32.mxu1 %vm16631_vm2, %v25733_v27  ;;  %v5816_v32 = vcombine.low %v26821_v51, %v26820_v61  ;;  %v5815_v37 = vcombine.low %v5814_v43, %v26823_v59  ;;  %v26836_v61 = vld [vmem:[#allocation392_spill] sm:$0xff] }
 0x37d   :  { %v9754_v51 = vcombine.low %v26836_v61, %v20797_v55  ;;  %v26841_v55 = vld [vmem:[#allocation196_spill] sm:$0xff]  ;;  %v26852_v61 = vld [vmem:[#allocation407_spill] sm:$0xff] }
 0x37e   :  { %15575 = vmatmul.mubr.msk.f32.vlgmr.msra.gmra.mrb[0].mxu0 %vm2564_vm9, %v21596_v44  ;;  %v26812_v44 = vld [vmem:[#allocation34_spill] sm:$0xff]  ;;  %v5823_v7 = vrot.slane %v5816_v32, %v16753_v24  ;;  %v26837_v32 = vld [vmem:[#allocation57_spill] sm:$0xff] }
 0x37f   :  { %14920 = vmatmul.mubr.msk.f32.gmra.mrb[60].mxu1 %vm2564_vm9, %v22038_v23  ;;  %15577 = vmatprep.mubr.msk.f32.mxu0 %vm16631_vm2, %v25733_v27  ;;  %v22062_v56 = vcombine.low %v26813_v19, %v26812_v44  ;;  %v26828_v44 = vld [vmem:[#allocation49_spill] sm:$0xff] }
 0x380   :  { %14922 = vmatprep.mubr.msk.f32.mxu1 %vm16631_vm2, %v25733_v27  ;;  %v26829_v19 = vld [vmem:[#allocation45_spill] sm:$0xff] }
 0x382   :  { %15578 = vmatmul.mubr.msk.f32.gmra.mrb[2].mxu0 %vm2564_vm9, %v9749_v47  ;;  %v26824_v47 = vld [vmem:[#allocation338_spill] sm:$0xff] }
 0x383   :  { %14923 = vmatmul.mubr.msk.f32.gmra.mrb[62].mxu1 %vm2564_vm9, %v5795_v30  ;;  %15580 = vmatprep.mubr.msk.f32.mxu0 %vm16631_vm2, %v25733_v27  ;;  %v5824_v30 = vcombine.low %v26825_v54, %v5823_v7 }
 0x384   :  { %14925 = vmatprep.mubr.msk.f32.mxu1 %vm16631_vm2, %v25733_v27 }
 0x386   :  { %15581 = vmatmul.mubr.msk.f32.gmra.mrb[4].mxu0 %vm2564_vm9, %v21629_v40  ;;  %v26818_v40 = vld [vmem:[#allocation46_spill] sm:$0xff] }
 0x387   :  { %14926 = vmatmul.mubr.msk.f32.gmra.mrb[64].mxu1 %vm2564_vm9, %v22062_v56  ;;  %15583 = vmatprep.mubr.msk.f32.mxu0 %vm16631_vm2, %v25733_v27  ;;  %v22086_v18 = vcombine.low %v26819_v3, %v26818_v40  ;;  %v5836_v40 = vcombine.low %v26833_v20, %v26832_v57  ;;  %v26848_v57 = vld [vmem:[#allocation384_spill] sm:$0xff]  ;;  %v26849_v20 = vld [vmem:[#allocation381_spill] sm:$0xff] }
 0x388   :  { %14928 = vmatprep.mubr.msk.f32.mxu1 %vm16631_vm2, %v25733_v27 }
 0x389   :  { %v5843_v43 = vrot.slane %v5836_v40, %v16753_v24  ;;  %v5865_v40 = vcombine.low %v26849_v20, %v26848_v57  ;;  %v26863_v20 = vld [vmem:[#allocation251_spill] sm:$0xff] }
 0x38a   :  { %15584 = vmatmul.mubr.msk.f32.gmra.mrb[6].mxu0 %vm2564_vm9, %v9750_v1  ;;  %v9753_v1 = vcombine.low %v20745_v11, %v26830_v35  ;;  %v26835_v11 = vld [vmem:[#allocation58_spill] sm:$0xff] }
 0x38b   :  { %14929 = vmatmul.mubr.msk.f32.gmra.mrb[66].mxu1 %vm2564_vm9, %v5805_v2  ;;  %15586 = vmatprep.mubr.msk.f32.mxu0 %vm16631_vm2, %v25733_v27  ;;  %v26831_v2 = vld [vmem:[#allocation50_spill] sm:$0xff]  ;;  %v5844_v39 = vcombine.low %v5843_v43, %v26837_v32  ;;  %v5872_v43 = vrot.slane %v5865_v40, %v16753_v24 }
 0x38c   :  { %14931 = vmatprep.mubr.msk.f32.mxu1 %vm16631_vm2, %v25733_v27  ;;  %v5834_v50 = vcombine.low %v26831_v2, %v5833_v42  ;;  %v26864_v40 = vld [vmem:[#allocation242_spill] sm:$0xff] }
 0x38e   :  { %15587 = vmatmul.mubr.msk.f32.gmra.mrb[8].mxu0 %vm2564_vm9, %v21653_v15  ;;  %v9752_v15 = vcombine.low %v26703_v58, %v26824_v47  ;;  %v22122_v58 = vcombine.low %v26829_v19, %v26828_v44  ;;  %v9755_v44 = vcombine.low %v26844_v49, %v26724_v8  ;;  %v26845_v19 = vld [vmem:[#allocation68_spill] sm:$0xff]  ;;  %v26847_v8 = vld [vmem:[#allocation65_spill] sm:$0xff] }
 0x38f   :  { %14932 = vmatmul.mubr.msk.f32.gmra.mrb[68].mxu1 %vm2564_vm9, %v22086_v18  ;;  %15589 = vmatprep.mubr.msk.f32.mxu0 %vm16631_vm2, %v25733_v27 }
 0x390   :  { %14934 = vmatprep.mubr.msk.f32.mxu1 %vm16631_vm2, %v25733_v27 }
 0x392   :  { %15590 = vmatmul.mubr.msk.f32.gmra.mrb[10].mxu0 %vm2564_vm9, %v9751_v6  ;;  %v26838_v6 = vld [vmem:[#allocation340_spill] sm:$0xff] }
 0x393   :  { %14935 = vmatmul.mubr.msk.f32.gmra.mrb[70].mxu1 %vm2564_vm9, %v5815_v37  ;;  %15592 = vmatprep.mubr.msk.f32.mxu0 %vm16631_vm2, %v25733_v27  ;;  %v26839_v37 = vld [vmem:[#allocation335_spill] sm:$0xff] }
 0x394   :  { %14937 = vmatprep.mubr.msk.f32.mxu1 %vm16631_vm2, %v25733_v27  ;;  %v5846_v7 = vcombine.low %v26839_v37, %v26838_v6  ;;  %v26854_v37 = vld [vmem:[#allocation70_spill] sm:$0xff] }
 0x396   :  { %15593 = vmatmul.mubr.msk.f32.gmra.mrb[12].mxu0 %vm2564_vm9, %v9752_v15  ;;  %v5853_v15 = vrot.slane %v5846_v7, %v16753_v24  ;;  %v5873_v7 = vcombine.low %v26854_v37, %v5872_v43  ;;  %v26866_v43 = vld [vmem:[#allocation255_spill] sm:$0xff] }
 0x397   :  { %14938 = vmatmul.mubr.msk.f32.gmra.mrb[72].mxu1 %vm2564_vm9, %v5824_v30  ;;  %15595 = vmatprep.mubr.msk.f32.mxu0 %vm16631_vm2, %v25733_v27  ;;  %v26842_v30 = vld [vmem:[#allocation356_spill] sm:$0xff] }
 0x398   :  { %14940 = vmatprep.mubr.msk.f32.mxu1 %vm16631_vm2, %v25733_v27  ;;  %v5855_v25 = vcombine.low %v26843_v0, %v26842_v30  ;;  %v5854_v42 = vcombine.low %v5853_v15, %v26845_v19  ;;  %v26857_v30 = vld [vmem:[#allocation422_spill] sm:$0xff] }
 0x399   :  { %v9758_v0 = vcombine.low %v26857_v30, %v20946_v10 }
 0x39a   :  { %15596 = vmatmul.mubr.msk.f32.gmra.mrb[14].mxu0 %vm2564_vm9, %v21690_v34  ;;  %v26834_v34 = vld [vmem:[#allocation54_spill] sm:$0xff]  ;;  %v5862_v35 = vrot.slane %v5855_v25, %v16753_v24 }
 0x39b   :  { %14941 = vmatmul.mubr.msk.f32.gmra.mrb[74].mxu1 %vm2564_vm9, %v22122_v58  ;;  %15598 = vmatprep.mubr.msk.f32.mxu0 %vm16631_vm2, %v25733_v27  ;;  %v22146_v3 = vcombine.low %v26835_v11, %v26834_v34  ;;  %v26850_v34 = vld [vmem:[#allocation71_spill] sm:$0xff]  ;;  %v26851_v11 = vld [vmem:[#allocation69_spill] sm:$0xff] }
 0x39c   :  { %14943 = vmatprep.mubr.msk.f32.mxu1 %vm16631_vm2, %v25733_v27 }
 0x39e   :  { %15599 = vmatmul.mubr.msk.f32.gmra.mrb[16].mxu0 %vm2564_vm9, %v9753_v1  ;;  %v26846_v1 = vld [vmem:[#allocation427_spill] sm:$0xff] }
 0x39f   :  { %14944 = vmatmul.mubr.msk.f32.gmra.mrb[76].mxu1 %vm2564_vm9, %v5834_v50  ;;  %15601 = vmatprep.mubr.msk.f32.mxu0 %vm16631_vm2, %v25733_v27  ;;  %v5863_v50 = vcombine.low %v26847_v8, %v5862_v35 }
 0x3a0   :  { %14946 = vmatprep.mubr.msk.f32.mxu1 %vm16631_vm2, %v25733_v27 }
 0x3a2   :  { %15602 = vmatmul.mubr.msk.f32.gmra.mrb[18].mxu0 %vm2564_vm9, %v21715_v14  ;;  %v26840_v14 = vld [vmem:[#allocation63_spill] sm:$0xff] }
 0x3a3   :  { %14947 = vmatmul.mubr.msk.f32.gmra.mrb[78].mxu1 %vm2564_vm9, %v22146_v3  ;;  %15604 = vmatprep.mubr.msk.f32.mxu0 %vm16631_vm2, %v25733_v27  ;;  %v22170_v47 = vcombine.low %v26841_v55, %v26840_v14  ;;  %v5876_v14 = vcombine.low %v26753_v41, %v26766_v48  ;;  %v26856_v55 = vld [vmem:[#allocation416_spill] sm:$0xff]  ;;  %v5892_v41 = vcombine.low %v26767_v12, %v26768_v63 }
 0x3a4   :  { %14949 = vmatprep.mubr.msk.f32.mxu1 %vm16631_vm2, %v25733_v27  ;;  %v5893_v48 = vcombine.low %v26769_v52, %v20166_v33  ;;  %v26859_v52 = vld [vmem:[#allocation233_spill] sm:$0xff] }
 0x3a5   :  { %v22238_v15 = vrot.slane %v5876_v14, %v16753_v24  ;;  %v5900_v12 = vrot.slane %v5892_v41, %v16753_v24  ;;  %v26871_v14 = vld [vmem:[#allocation20_spill] sm:$0xff]  ;;  %v26873_v41 = vld [vmem:[#allocation417_spill] sm:$0xff] }
 0x3a6   :  { %15605 = vmatmul.mubr.msk.f32.gmra.mrb[20].mxu0 %vm2564_vm9, %v9754_v51  ;;  %v9757_v51 = vcombine.low %v20889_v17, %v26852_v61  ;;  %v5907_v63 = vrot.slane %v5893_v48, %v16753_v24  ;;  %v26874_v48 = vcombine.low %v21786_v62, %v26873_v41  ;;  %v26890_v41 = vld [vmem:[#allocation287_spill] sm:$0xff] }
 0x3a7   :  { %14950 = vmatmul.mubr.msk.f32.gmra.mrb[80].mxu1 %vm2564_vm9, %v5844_v39  ;;  %15607 = vmatprep.mubr.msk.f32.mxu0 %vm16631_vm2, %v25733_v27  ;;  %v26853_v39 = vld [vmem:[#allocation396_spill] sm:$0xff] }
 0x3a8   :  { %14952 = vmatprep.mubr.msk.f32.mxu1 %vm16631_vm2, %v25733_v27  ;;  %v5875_v6 = vcombine.low %v26853_v39, %v26765_v16  ;;  %v22263_v49 = vcombine.low %v5900_v12, %v5907_v63  ;;  %v26869_v39 = vld [vmem:[#allocation265_spill] sm:$0xff]  ;;  %v26875_v12 = vld [vmem:[#allocation274_spill] sm:$0xff] }
 0x3a9   :  { %v26876_v63 = vld [vmem:[#allocation266_spill] sm:$0xff] }
 0x3aa   :  { %15608 = vmatmul.mubr.msk.f32.gmra.mrb[22].mxu0 %vm2564_vm9, %v21740_v45  ;;  %v9756_v45 = vcombine.low %v26727_v53, %v26846_v1  ;;  %v22206_v53 = vcombine.low %v26851_v11, %v26850_v34  ;;  %v5883_v16 = vrot.slane %v5875_v6, %v16753_v24  ;;  %v6978_v34 = vcombine.low %v26864_v40, %v26863_v20  ;;  %v26865_v11 = vld [vmem:[#allocation256_spill] sm:$0xff] }
 0x3ab   :  { %14953 = vmatmul.mubr.msk.f32.gmra.mrb[82].mxu1 %vm2564_vm9, %v22170_v47  ;;  %15610 = vmatprep.mubr.msk.f32.mxu0 %vm16631_vm2, %v25733_v27  ;;  %v6979_v61 = vcombine.low %v26866_v43, %v26865_v11  ;;  %v26870_v6 = vld [vmem:[#allocation264_spill] sm:$0xff]  ;;  %v7012_v62 = vcombine.low %v26876_v63, %v26875_v12  ;;  %v26883_v11 = vld [vmem:[#allocation83_spill] sm:$0xff]  ;;  %v26894_v12 = vld [vmem:[#allocation297_spill] sm:$0xff] }
 0x3ac   :  { %14955 = vmatprep.mubr.msk.f32.mxu1 %vm16631_vm2, %v25733_v27  ;;  %v5891_v25 = vcombine.low %v5883_v16, %v22238_v15  ;;  %v26884_v43 = vld [vmem:[#allocation84_spill] sm:$0xff] }
 0x3ae   :  { %15611 = vmatmul.mubr.msk.f32.gmra.mrb[24].mxu0 %vm2564_vm9, %v9755_v44  ;;  %v26860_v44 = vld [vmem:[#allocation245_spill] sm:$0xff] }
 0x3af   :  { %14956 = vmatmul.mubr.msk.f32.gmra.mrb[84].mxu1 %vm2564_vm9, %v5854_v42  ;;  %15613 = vmatprep.mubr.msk.f32.mxu0 %vm16631_vm2, %v25733_v27  ;;  %v26861_v42 = vld [vmem:[#allocation241_spill] sm:$0xff] }
 0x3b0   :  { %14958 = vmatprep.mubr.msk.f32.mxu1 %vm16631_vm2, %v25733_v27  ;;  %v6962_v35 = vcombine.low %v26861_v42, %v26860_v44  ;;  %v26879_v42 = vld [vmem:[#allocation289_spill] sm:$0xff] }
 0x3b2   :  { %15614 = vmatmul.mubr.msk.f32.gmra.mrb[26].mxu0 %vm2564_vm9, %v9756_v45  ;;  %v26862_v45 = vld [vmem:[#allocation15_spill] sm:$0xff]  ;;  %v6976_v57 = vrot.slane %v6962_v35, %v16753_v24  ;;  %v26880_v35 = vld [vmem:[#allocation253_spill] sm:$0xff] }
 0x3b3   :  { %14959 = vmatmul.mubr.msk.f32.gmra.mrb[86].mxu1 %vm2564_vm9, %v5863_v50  ;;  %15616 = vmatprep.mubr.msk.f32.mxu0 %vm16631_vm2, %v25733_v27  ;;  %v9759_v50 = vcombine.low %v26862_v45, %v26754_v9 }
 0x3b4   :  { %14961 = vmatprep.mubr.msk.f32.mxu1 %vm16631_vm2, %v25733_v27 }
 0x3b6   :  { %15617 = vmatmul.mubr.msk.f32.gmra.mrb[28].mxu0 %vm2564_vm9, %v21777_v22  ;;  %v26855_v22 = vld [vmem:[#allocation74_spill] sm:$0xff] }
 0x3b7   :  { %14962 = vmatmul.mubr.msk.f32.gmra.mrb[88].mxu1 %vm2564_vm9, %v22206_v53  ;;  %15619 = vmatprep.mubr.msk.f32.mxu0 %vm16631_vm2, %v25733_v27  ;;  %v22230_v17 = vcombine.low %v26856_v55, %v26855_v22  ;;  %v9760_v22 = vcombine.low %v26770_v4, %v26871_v14  ;;  %v26872_v55 = vld [vmem:[#allocation191_spill] sm:$0xff]  ;;  %v26887_v14 = vld [vmem:[#allocation284_spill] sm:$0xff] }
 0x3b8   :  { %14964 = vmatprep.mubr.msk.f32.mxu1 %vm16631_vm2, %v25733_v27  ;;  %v13840_v16 = vcombine.high %v26761_v31, %v26872_v55 }
 0x3ba   :  { %15620 = vmatmul.mubr.msk.f32.gmra.mrb[30].mxu0 %vm2564_vm9, %v9757_v51  ;;  %v26868_v51 = vld [vmem:[#allocation259_spill] sm:$0xff] }
 0x3bb   :  { %14965 = vmatmul.mubr.msk.f32.gmra.mrb[90].mxu1 %vm2564_vm9, %v5873_v7  ;;  %15622 = vmatprep.mubr.msk.f32.mxu0 %vm16631_vm2, %v25733_v27  ;;  %v6996_v7 = vcombine.low %v26870_v6, %v26869_v39  ;;  %v26886_v39 = vld [vmem:[#allocation285_spill] sm:$0xff] }
 0x3bc   :  { %14967 = vmatprep.mubr.msk.f32.mxu1 %vm16631_vm2, %v25733_v27 }
 0x3bd   :  { %v7010_v31 = vrot.slane %v6996_v7, %v16753_v24 }
 0x3be   :  { %15623 = vmatmul.mubr.msk.f32.gmra.mrb[32].mxu0 %vm2564_vm9, %v21816_v60  ;;  %v26858_v60 = vld [vmem:[#allocation239_spill] sm:$0xff] }
 0x3bf   :  { %14968 = vmatmul.mubr.msk.f32.gmra.mrb[92].mxu1 %vm2564_vm9, %v22230_v17  ;;  %15625 = vmatprep.mubr.msk.f32.mxu0 %vm16631_vm2, %v25733_v27  ;;  %v6961_v10 = vcombine.low %v26859_v52, %v26858_v60  ;;  %v9768_v60 = vrot.slane %v13840_v16, %v16753_v24  ;;  %v26877_v52 = vld [vmem:[#allocation230_spill] sm:$0xff]  ;;  %v26889_v16 = vld [vmem:[#allocation288_spill] sm:$0xff] }
 0x3c0   :  { %14970 = vmatprep.mubr.msk.f32.mxu1 %vm16631_vm2, %v25733_v27 }
 0x3c1   :  { %v6969_v1 = vrot.slane %v6961_v10, %v16753_v24  ;;  %v26878_v10 = vld [vmem:[#allocation228_spill] sm:$0xff] }
 0x3c2   :  { %15626 = vmatmul.mubr.msk.f32.gmra.mrb[34].mxu0 %vm2564_vm9, %v9758_v0  ;;  %v6986_v0 = vrot.slane %v6978_v34, %v16753_v24  ;;  %v9770_v44 = vcombine.low %v26878_v10, %v26877_v52  ;;  %v7020_v34 = vrot.slane %v7012_v62, %v16753_v24 }
 0x3c3   :  { %14971 = vmatmul.mubr.msk.f32.gmra.mrb[94].mxu1 %vm2564_vm9, %v5891_v25  ;;  %15628 = vmatprep.mubr.msk.f32.mxu0 %vm16631_vm2, %v25733_v27  ;;  %v6977_v30 = vcombine.low %v6969_v1, %v6976_v57  ;;  %v6993_v25 = vrot.slane %v6979_v61, %v16753_v24  ;;  %v9771_v1 = vcombine.low %v26880_v35, %v26879_v42  ;;  %v26882_v57 = vld [vmem:[#allocation275_spill] sm:$0xff] }
 0x3c4   :  { %14973 = vmatprep.mubr.msk.f32.mxu1 %vm16631_vm2, %v25733_v27  ;;  %v9769_v61 = vcombine.low %v26884_v43, %v9768_v60 }
 0x3c5   :  { %v6994_v45 = vcombine.low %v6986_v0, %v6993_v25  ;;  %v26891_v0 = vld [vmem:[#allocation295_spill] sm:$0xff]  ;;  %v26892_v25 = vld [vmem:[#allocation292_spill] sm:$0xff] }
 0x3c6   :  { %15629 = vmatmul.mubr.msk.f32.gmra.mrb[36].mxu0 %vm2564_vm9, %v21844_v29  ;;  %v26867_v29 = vld [vmem:[#allocation263_spill] sm:$0xff] }
 0x3c7   :  { %14974 = vmatmul.mubr.msk.f32.gmra.mrb[96].mxu1 %vm2564_vm9, %v22263_v49  ;;  %15631 = vmatprep.mubr.msk.f32.mxu0 %vm16631_vm2, %v25733_v27  ;;  %v6995_v9 = vcombine.low %v26868_v51, %v26867_v29  ;;  %v9778_v29 = vrot.slane %v9770_v44, %v16753_v24  ;;  %v9785_v51 = vrot.slane %v9771_v1, %v16753_v24 }
 0x3c8   :  { %15071 = vmatprep.mubr.msk.f32.mxu1 %vm16631_vm2, %v25733_v27 }
 0x3c9   :  { %v7003_v4 = vrot.slane %v6995_v9, %v16753_v24  ;;  %v26885_v9 = vld [vmem:[#allocation75_spill] sm:$0xff] }
 0x3ca   :  { %15632 = vmatmul.mubr.msk.f32.gmra.mrb[38].mxu0 %vm2564_vm9, %v9759_v50  ;;  %v26881_v50 = vld [vmem:[#allocation279_spill] sm:$0xff]  ;;  %v9787_v6 = vcombine.low %v26886_v39, %v26885_v9  ;;  %v26899_v39 = vld [vmem:[#allocation77_spill] sm:$0xff] }
 0x3cb   :  { %15072 = vmatmul.mubr.msk.f32.vlgmr.msra.gmra.mrb[62].mxu1 %vm2564_vm9, %v26874_v48  ;;  %15634 = vmatprep.mubr.msk.f32.mxu0 %vm16631_vm2, %v25733_v27  ;;  %v7013_v20 = vcombine.low %v26882_v57, %v26881_v50  ;;  %v7011_v40 = vcombine.low %v7003_v4, %v7010_v31  ;;  %v7030_v48 = vcombine.low %v26890_v41, %v26889_v16  ;;  %v26893_v31 = vld [vmem:[#allocation299_spill] sm:$0xff]  ;;  %v26903_v41 = vld [vmem:[#allocation14_spill] sm:$0xff] }
 0x3cc   :  { %15074 = vmatprep.mubr.msk.f32.mxu1 %vm16631_vm2, %v25733_v27  ;;  %v7046_v4 = vcombine.low %v26892_v25, %v26891_v0  ;;  %v7047_v63 = vcombine.low %v26894_v12, %v26893_v31  ;;  %v9794_v62 = vrot.slane %v9787_v6, %v16753_v24  ;;  %v26896_v50 = vld [vmem:[#allocation303_spill] sm:$0xff]  ;;  %v26900_v6 = vld [vmem:[#allocation313_spill] sm:$0xff]  ;;  %v26905_v0 = vld [vmem:[#allocation320_spill] sm:$0xff] }
 0x3cd   :  { %v7027_v7 = vrot.slane %v7013_v20, %v16753_v24  ;;  %v7044_v10 = vrot.slane %v7030_v48, %v16753_v24  ;;  %v9796_v48 = vcombine.low %v26903_v41, %v26802_v5  ;;  %v26907_v31 = vld [vmem:[#allocation336_spill] sm:$0xff]  ;;  %v26917_v41 = vld [vmem:[#allocation29_spill] sm:$0xff] }
 0x3ce   :  { %15635 = vmatmul.mubr.msk.f32.gmra.mrb[40].mxu0 %vm2564_vm9, %v9760_v22  ;;  %v26888_v22 = vld [vmem:[#allocation276_spill] sm:$0xff]  ;;  %v7054_v42 = vrot.slane %v7046_v4, %v16753_v24  ;;  %v7061_v35 = vrot.slane %v7047_v63, %v16753_v24  ;;  %v9795_v1 = vcombine.low %v9794_v62, %v26794_v13 }
 0x3cf   :  { %15075 = vmatmul.mubr.msk.f32.gmra.mrb[64].mxu1 %vm2564_vm9, %v6977_v30  ;;  %15637 = vmatprep.mubr.msk.f32.mxu0 %vm16631_vm2, %v25733_v27  ;;  %v7029_v55 = vcombine.low %v26888_v22, %v26887_v14  ;;  %v9786_v30 = vcombine.low %v9778_v29, %v9785_v51  ;;  %v7028_v60 = vcombine.low %v7020_v34, %v7027_v7  ;;  %v26897_v34 = vld [vmem:[#allocation312_spill] sm:$0xff]  ;;  %v26901_v14 = vld [vmem:[#allocation323_spill] sm:$0xff] }
 0x3d0   :  { %15077 = vmatprep.mubr.msk.f32.mxu1 %vm16631_vm2, %v25733_v27  ;;  %v7062_v29 = vcombine.low %v7054_v42, %v7061_v35  ;;  %v7080_v7 = vcombine.low %v26900_v6, %v26899_v39  ;;  %v26902_v22 = vld [vmem:[#allocation319_spill] sm:$0xff]  ;;  %v26906_v4 = vld [vmem:[#allocation332_spill] sm:$0xff]  ;;  %v26908_v42 = vld [vmem:[#allocation414_spill] sm:$0xff] }
 0x3d1   :  { %v7037_v52 = vrot.slane %v7029_v55, %v16753_v24  ;;  %v7081_v55 = vcombine.low %v26902_v22, %v26901_v14  ;;  %v7098_v12 = vcombine.low %v26907_v31, %v26906_v4  ;;  %v9797_v35 = vcombine.low %v26803_v38, %v26908_v42  ;;  %v26914_v39 = vld [vmem:[#allocation344_spill] sm:$0xff]  ;;  %v26916_v14 = vld [vmem:[#allocation359_spill] sm:$0xff] }
 0x3d2   :  { %15638 = vmatmul.mubr.msk.f32.gmra.mrb[42].mxu0 %vm2564_vm9, %v26883_v11  ;;  %v26898_v11 = vld [vmem:[#allocation308_spill] sm:$0xff]  ;;  %v26921_v31 = vld [vmem:[#allocation367_spill] sm:$0xff] }
 0x3d3   :  { %15078 = vmatmul.mubr.msk.f32.gmra.mrb[66].mxu1 %vm2564_vm9, %v6994_v45  ;;  %15640 = vmatprep.mubr.msk.f32.mxu0 %vm16631_vm2, %v25733_v27  ;;  %v26895_v45 = vld [vmem:[#allocation307_spill] sm:$0xff]  ;;  %v7064_v43 = vcombine.low %v26898_v11, %v26897_v34  ;;  %v26912_v34 = vld [vmem:[#allocation346_spill] sm:$0xff]  ;;  %v26920_v4 = vld [vmem:[#allocation368_spill] sm:$0xff] }
 0x3d4   :  { %15080 = vmatprep.mubr.msk.f32.mxu1 %vm16631_vm2, %v25733_v27  ;;  %v7063_v57 = vcombine.low %v26896_v50, %v26895_v45  ;;  %v26910_v45 = vld [vmem:[#allocation337_spill] sm:$0xff]  ;;  %v26923_v42 = vld [vmem:[#allocation371_spill] sm:$0xff] }
 0x3d5   :  { %v7078_v9 = vrot.slane %v7064_v43, %v16753_v24 }
 0x3d6   :  { %15641 = vmatmul.mubr.msk.f32.gmra.mrb[44].mxu0 %vm2564_vm9, %v9769_v61  ;;  %v7071_v13 = vrot.slane %v7063_v57, %v16753_v24 }
 0x3d7   :  { %15081 = vmatmul.mubr.msk.f32.gmra.mrb[68].mxu1 %vm2564_vm9, %v7011_v40  ;;  %15643 = vmatprep.mubr.msk.f32.mxu0 %vm16631_vm2, %v25733_v27  ;;  %v7045_v40 = vcombine.low %v7037_v52, %v7044_v10  ;;  %v7112_v10 = vrot.slane %v7098_v12, %v16753_v24  ;;  %v7149_v12 = vcombine.low %v26921_v31, %v26920_v4 }
 0x3d8   :  { %15083 = vmatprep.mubr.msk.f32.mxu1 %vm16631_vm2, %v25733_v27  ;;  %v7079_v62 = vcombine.low %v7071_v13, %v7078_v9  ;;  %v26913_v9 = vld [vmem:[#allocation97_spill] sm:$0xff] }
 0x3d9   :  { %v7131_v6 = vcombine.low %v26914_v39, %v26913_v9  ;;  %v26927_v9 = vld [vmem:[#allocation390_spill] sm:$0xff] }
 0x3da   :  { %v22354_v44 = vpop.f32.mrb[0].mxu1  ;;  %15644 = vmatmul.mubr.msk.f32.gmra.mrb[46].mxu0 %vm2564_vm9, %v9786_v30  ;;  %v26904_v30 = vld [vmem:[#allocation331_spill] sm:$0xff]  ;;  %v26928_v39 = vld [vmem:[#allocation386_spill] sm:$0xff] }
 0x3db   :  { %v14831_v20 = vpop.f32.mrb[1].mxu1  ;;  %15084 = vmatmul.mubr.msk.f32.gmra.mrb[70].mxu1 %vm2564_vm9, %v7028_v60  ;;  %15646 = vmatprep.mubr.msk.f32.mxu0 %vm16631_vm2, %v25733_v27  ;;  %v7097_v25 = vcombine.low %v26905_v0, %v26904_v30  ;;  %v7088_v60 = vrot.slane %v7080_v7, %v16753_v24  ;;  %v26915_v7 = vld [vmem:[#allocation361_spill] sm:$0xff]  ;;  %v26918_v30 = vld [vmem:[#allocation364_spill] sm:$0xff] }
 0x3dc   :  { %15086 = vmatprep.mubr.msk.f32.mxu1 %vm16631_vm2, %v25733_v27  ;;  %v7132_v22 = vcombine.low %v26916_v14, %v26915_v7  ;;  %v26919_v0 = vld [vmem:[#allocation360_spill] sm:$0xff]  ;;  %v26929_v7 = vld [vmem:[#allocation394_spill] sm:$0xff]  ;;  %v26930_v14 = vld [vmem:[#allocation391_spill] sm:$0xff] }
 0x3dd   :  { %v7105_v52 = vrot.slane %v7097_v25, %v16753_v24  ;;  %v7148_v25 = vcombine.low %v26919_v0, %v26918_v30  ;;  %v26933_v30 = vld [vmem:[#allocation405_spill] sm:$0xff]  ;;  %v26934_v0 = vld [vmem:[#allocation403_spill] sm:$0xff] }
 0x3de   :  { %v22369_v61 = vpop.f32.mrb[2].mxu1  ;;  %15647 = vmatmul.mubr.msk.f32.gmra.mrb[48].mxu0 %vm2564_vm9, %v9795_v1  ;;  %v26909_v1 = vld [vmem:[#allocation343_spill] sm:$0xff] }
 0x3df   :  { %v14834_v51 = vpop.f32.mrb[3].mxu1  ;;  %15087 = vmatmul.mubr.msk.f32.gmra.mrb[72].mxu1 %vm2564_vm9, %v7045_v40  ;;  %15649 = vmatprep.mubr.msk.f32.mxu0 %vm16631_vm2, %v25733_v27  ;;  %v7114_v50 = vcombine.low %v26910_v45, %v26909_v1  ;;  %v26911_v40 = vld [vmem:[#allocation347_spill] sm:$0xff] }
 0x3e0   :  { %15089 = vmatprep.mubr.msk.f32.mxu1 %vm16631_vm2, %v25733_v27  ;;  %v7115_v11 = vcombine.low %v26912_v34, %v26911_v40 }
 0x3e1   :  { %v7122_v38 = vrot.slane %v7114_v50, %v16753_v24  ;;  %v26924_v50 = vld [vmem:[#allocation382_spill] sm:$0xff] }
 0x3e2   :  { %v22383_v16 = vpop.f32.mrb[4].mxu1  ;;  %15650 = vmatmul.mubr.msk.f32.gmra.mrb[50].mxu0 %vm2564_vm9, %v22005_v26  ;;  %v7095_v26 = vrot.slane %v7081_v55, %v16753_v24  ;;  %v7129_v51 = vrot.slane %v7115_v11, %v16753_v24 }
 0x3e3   :  { %v14837_v63 = vpop.f32.mrb[5].mxu1  ;;  %15090 = vmatmul.mubr.msk.f32.gmra.mrb[74].mxu1 %vm2564_vm9, %v7062_v29  ;;  %15652 = vmatprep.mubr.msk.f32.mxu0 %vm16631_vm2, %v25733_v27  ;;  %v7113_v29 = vcombine.low %v7105_v52, %v7112_v10  ;;  %v7163_v52 = vrot.slane %v7149_v12, %v16753_v24  ;;  %v26922_v10 = vld [vmem:[#allocation378_spill] sm:$0xff] }
 0x3e4   :  { %15092 = vmatprep.mubr.msk.f32.mxu1 %vm16631_vm2, %v25733_v27  ;;  %v7096_v20 = vcombine.low %v7088_v60, %v7095_v26  ;;  %v7139_v60 = vrot.slane %v7131_v6, %v16753_v24  ;;  %v7156_v26 = vrot.slane %v7148_v25, %v16753_v24  ;;  %v7182_v6 = vcombine.low %v26928_v39, %v26927_v9  ;;  %v26942_v9 = vld [vmem:[#allocation90_spill] sm:$0xff] }
 0x3e5   :  { %v7200_v25 = vcombine.low %v26934_v0, %v26933_v30  ;;  %v7234_v39 = vcombine.low %v26942_v9, %v21963_v28  ;;  %v26952_v9 = vld [vmem:[#allocation21_spill] sm:$0xff] }
 0x3e6   :  { %v22400_v5 = vpop.f32.mrb[6].mxu1  ;;  %15653 = vmatmul.mubr.msk.f32.gmra.mrb[52].mxu0 %vm2564_vm9, %v9796_v48  ;;  %v9798_v48 = vcombine.low %v26809_v21, %v26917_v41  ;;  %v7164_v34 = vcombine.low %v7156_v26, %v7163_v52  ;;  %v26932_v41 = vld [vmem:[#allocation397_spill] sm:$0xff]  ;;  %v7190_v12 = vrot.slane %v7182_v6, %v16753_v24 }
 0x3e7   :  { %v14840_v57 = vpop.f32.mrb[7].mxu1  ;;  %15093 = vmatmul.mubr.msk.f32.gmra.mrb[76].mxu1 %vm2564_vm9, %v7079_v62  ;;  %15655 = vmatprep.mubr.msk.f32.mxu0 %vm16631_vm2, %v25733_v27  ;;  %v7130_v62 = vcombine.low %v7122_v38, %v7129_v51  ;;  %v26935_v26 = vld [vmem:[#allocation37_spill] sm:$0xff] }
 0x3e8   :  { %15095 = vmatprep.mubr.msk.f32.mxu1 %vm16631_vm2, %v25733_v27  ;;  %v26925_v57 = vld [vmem:[#allocation380_spill] sm:$0xff]  ;;  %v9800_v52 = vcombine.low %v26935_v26, %v26823_v59 }
 0x3ea   :  { %v22416_v43 = vpop.f32.mrb[8].mxu1  ;;  %15656 = vmatmul.mubr.msk.f32.gmra.mrb[54].mxu0 %vm2564_vm9, %v9797_v35  ;;  %v7165_v35 = vcombine.low %v26923_v42, %v26922_v10  ;;  %v26936_v10 = vld [vmem:[#allocation82_spill] sm:$0xff]  ;;  %v26937_v42 = vld [vmem:[#allocation404_spill] sm:$0xff] }
 0x3eb   :  { %v14843_v13 = vpop.f32.mrb[9].mxu1  ;;  %15096 = vmatmul.mubr.msk.f32.gmra.mrb[78].mxu1 %vm2564_vm9, %v7096_v20  ;;  %15658 = vmatprep.mubr.msk.f32.mxu0 %vm16631_vm2, %v25733_v27  ;;  %v7166_v20 = vcombine.low %v26925_v57, %v26924_v50  ;;  %v26938_v50 = vld [vmem:[#allocation88_spill] sm:$0xff] }
 0x3ec   :  { %15098 = vmatprep.mubr.msk.f32.mxu1 %vm16631_vm2, %v25733_v27  ;;  %v7173_v11 = vrot.slane %v7165_v35, %v16753_v24  ;;  %v7216_v35 = vcombine.low %v26937_v42, %v26936_v10 }
 0x3ed   :  { %v7180_v51 = vrot.slane %v7166_v20, %v16753_v24 }
 0x3ee   :  { %v22430_v55 = vpop.f32.mrb[10].mxu1  ;;  %15659 = vmatmul.mubr.msk.f32.gmra.mrb[56].mxu0 %vm2564_vm9, %v22038_v23  ;;  %v7146_v23 = vrot.slane %v7132_v22, %v16753_v24  ;;  %v7183_v22 = vcombine.low %v26930_v14, %v26929_v7  ;;  %v7224_v59 = vrot.slane %v7216_v35, %v16753_v24 }
 0x3ef   :  { %v14846_v63 = vpop.f32.mrb[11].mxu1  ;;  %15099 = vmatmul.mubr.msk.f32.gmra.mrb[80].mxu1 %vm2564_vm9, %v7113_v29  ;;  %15661 = vmatprep.mubr.msk.f32.mxu0 %vm16631_vm2, %v25733_v27  ;;  %v26926_v29 = vld [vmem:[#allocation31_spill] sm:$0xff]  ;;  %v7181_v31 = vcombine.low %v7173_v11, %v7180_v51 }
 0x3f0   :  { %15101 = vmatprep.mubr.msk.f32.mxu1 %vm16631_vm2, %v25733_v27  ;;  %v7147_v45 = vcombine.low %v7139_v60, %v7146_v23  ;;  %v9799_v38 = vcombine.low %v26926_v29, %v26815_v36  ;;  %v26931_v36 = vld [vmem:[#allocation7_spill] sm:$0xff]  ;;  %v7197_v63 = vrot.slane %v7183_v22, %v16753_v24  ;;  %v7214_v23 = vrot.slane %v7200_v25, %v16753_v24 }
 0x3f1   :  { %v7248_v22 = vrot.slane %v7234_v39, %v16753_v24 }
 0x3f2   :  { %v22447_v21 = vpop.f32.mrb[12].mxu1  ;;  %15662 = vmatmul.mubr.msk.f32.gmra.mrb[58].mxu0 %vm2564_vm9, %v9798_v48  ;;  %v7199_v48 = vcombine.low %v26932_v41, %v26931_v36  ;;  %v26943_v36 = vld [vmem:[#allocation176_spill] sm:$0xff] }
 0x3f3   :  { %v14849_v1 = vpop.f32.mrb[13].mxu1  ;;  %15102 = vmatmul.mubr.msk.f32.gmra.mrb[82].mxu1 %vm2564_vm9, %v7130_v62  ;;  %15664 = vmatprep.mubr.msk.f32.mxu0 %vm16631_vm2, %v25733_v27  ;;  %v9802_v41 = vcombine.low %v26831_v2, %v26943_v36  ;;  %v26944_v2 = vld [vmem:[#allocation60_spill] sm:$0xff] }
 0x3f4   :  { %15104 = vmatprep.mubr.msk.f32.mxu1 %vm16631_vm2, %v25733_v27  ;;  %v7207_v60 = vrot.slane %v7199_v48, %v16753_v24 }
 0x3f6   :  { %v22461_v40 = vpop.f32.mrb[14].mxu1  ;;  %15665 = vmatmul.mubr.msk.f32.gmra.mrb[60].mxu0 %vm2564_vm9, %v22062_v56  ;;  %v7215_v20 = vcombine.low %v7207_v60, %v7214_v23 }
 0x3f7   :  { %v14852_v13 = vpop.f32.mrb[15].mxu1  ;;  %15105 = vmatmul.mubr.msk.f32.gmra.mrb[84].mxu1 %vm2564_vm9, %v7147_v45  ;;  %15667 = vmatprep.mubr.msk.f32.mxu0 %vm16631_vm2, %v25733_v27  ;;  %v7198_v45 = vcombine.low %v7190_v12, %v7197_v63 }
 0x3f8   :  { %15107 = vmatprep.mubr.msk.f32.mxu1 %vm16631_vm2, %v25733_v27  ;;  %v26941_v13 = vld [vmem:[#allocation418_spill] sm:$0xff] }
 0x3fa   :  { %v22478_v56 = vpop.f32.mrb[16].mxu1  ;;  %15668 = vmatmul.mubr.msk.f32.gmra.mrb[62].mxu0 %vm2564_vm9, %v9799_v38  ;;  %v26940_v38 = vld [vmem:[#allocation87_spill] sm:$0xff] }
 0x3fb   :  { %v14855_v4 = vpop.f32.mrb[17].mxu1  ;;  %15108 = vmatmul.mubr.msk.f32.gmra.mrb[86].mxu1 %vm2564_vm9, %v7164_v34  ;;  %15670 = vmatprep.mubr.msk.f32.mxu0 %vm16631_vm2, %v25733_v27  ;;  %v26939_v34 = vld [vmem:[#allocation47_spill] sm:$0xff]  ;;  %v7233_v51 = vcombine.low %v26941_v13, %v26940_v38 }
 0x3fc   :  { %15110 = vmatprep.mubr.msk.f32.mxu1 %vm16631_vm2, %v25733_v27  ;;  %v9801_v11 = vcombine.low %v26825_v54, %v26939_v34  ;;  %v9803_v4 = vcombine.low %v26944_v2, %v26837_v32 }
 0x3fd   :  { %v7241_v14 = vrot.slane %v7233_v51, %v16753_v24 }
 0x3fe   :  { %v22492_v62 = vpop.f32.mrb[18].mxu1  ;;  %15671 = vmatmul.mubr.msk.f32.gmra.mrb[64].mxu0 %vm2564_vm9, %v22086_v18  ;;  %v7217_v18 = vcombine.low %v26938_v50, %v21921_v46 }
 0x3ff   :  { %v14858_v1 = vpop.f32.mrb[19].mxu1  ;;  %15111 = vmatmul.mubr.msk.f32.gmra.mrb[88].mxu1 %vm2564_vm9, %v7181_v31  ;;  %15673 = vmatprep.mubr.msk.f32.mxu0 %vm16631_vm2, %v25733_v27  ;;  %v7249_v30 = vcombine.low %v7241_v14, %v7248_v22 }
 0x400   :  { %15113 = vmatprep.mubr.msk.f32.mxu1 %vm16631_vm2, %v25733_v27  ;;  %v7231_v46 = vrot.slane %v7217_v18, %v16753_v24  ;;  %v26947_v1 = vld [vmem:[#allocation72_spill] sm:$0xff] }
 0x402   :  { %v22509_v57 = vpop.f32.mrb[20].mxu1  ;;  %15674 = vmatmul.mubr.msk.f32.gmra.mrb[66].mxu0 %vm2564_vm9, %v9800_v52  ;;  %v7232_v7 = vcombine.low %v7224_v59, %v7231_v46  ;;  %v26946_v52 = vld [vmem:[#allocation194_spill] sm:$0xff] }
 0x403   :  { %v14861_v29 = vpop.f32.mrb[21].mxu1  ;;  %15114 = vmatmul.mubr.msk.f32.gmra.mrb[90].mxu1 %vm2564_vm9, %v7198_v45  ;;  %15676 = vmatprep.mubr.msk.f32.mxu0 %vm16631_vm2, %v25733_v27  ;;  %v9805_v10 = vcombine.low %v26847_v8, %v26946_v52  ;;  %v9806_v8 = vcombine.low %v26854_v37, %v26947_v1  ;;  %v26949_v59 = vld [vmem:[#allocation410_spill] sm:$0xff] }
 0x404   :  { %15116 = vmatprep.mubr.msk.f32.mxu1 %vm16631_vm2, %v25733_v27  ;;  %v13841_v34 = vcombine.high %v20166_v33, %v26949_v59  ;;  %v26951_v29 = vld [vmem:[#allocation143_spill] sm:$0xff]  ;;  %v26955_v33 = vld [vmem:[#allocation424_spill] sm:$0xff] }
 0x406   :  { %v22525_v6 = vpop.f32.mrb[22].mxu1  ;;  %15677 = vmatmul.mubr.msk.f32.gmra.mrb[68].mxu0 %vm2564_vm9, %v9801_v11  ;;  %v26950_v11 = vld [vmem:[#allocation411_spill] sm:$0xff]  ;;  %v9816_v51 = vrot.slane %v13841_v34, %v16753_v24 }
 0x407   :  { %v14864_v54 = vpop.f32.mrb[23].mxu1  ;;  %15117 = vmatmul.mubr.msk.f32.gmra.mrb[92].mxu1 %vm2564_vm9, %v7215_v20  ;;  %15679 = vmatprep.mubr.msk.f32.mxu0 %vm16631_vm2, %v25733_v27  ;;  %v9809_v46 = vcombine.low %v26951_v29, %v26950_v11 }
 0x408   :  { %15119 = vmatprep.mubr.msk.f32.mxu1 %vm16631_vm2, %v25733_v27  ;;  %v26954_v54 = vld [vmem:[#allocation94_spill] sm:$0xff] }
 0x40a   :  { %v22535_v28 = vpop.f32.mrb[24].mxu1  ;;  %15680 = vmatmul.mubr.msk.f32.gmra.mrb[70].mxu0 %vm2564_vm9, %v22122_v58 }
 0x40b   :  { %v14867_v48 = vpop.f32.mrb[25].mxu1  ;;  %15120 = vmatmul.mubr.msk.f32.gmra.mrb[94].mxu1 %vm2564_vm9, %v7232_v7  ;;  %15682 = vmatprep.mubr.msk.f32.mxu0 %vm16631_vm2, %v25733_v27  ;;  %v9826_v7 = vcombine.low %v26955_v33, %v26954_v54 }
 0x40c   :  { %15122 = vmatprep.mubr.msk.f32.mxu1 %vm16631_vm2, %v25733_v27 }
 0x40d   :  { %v9840_v48 = vrot.slane %v9826_v7, %v16753_v24 }
 0x40e   :  { %v22546_v0 = vpop.f32.mrb[26].mxu1  ;;  %15683 = vmatmul.mubr.msk.f32.gmra.mrb[72].mxu0 %vm2564_vm9, %v9802_v41 }
 0x40f   :  { %v14870_v25 = vpop.f32.mrb[27].mxu1  ;;  %15123 = vmatmul.mubr.msk.f32.gmra.mrb[96].mxu1 %vm2564_vm9, %v7249_v30  ;;  %15685 = vmatprep.mubr.msk.f32.mxu0 %vm16631_vm2, %v25733_v27 }
 0x410   :  { %15723 = vmatprep.mubr.msk.f32.mxu1 %vm16631_vm2, %v25733_v27 }
 0x412   :  { %v22554_v58 = vpop.f32.mrb[28].mxu1  ;;  %15686 = vmatmul.mubr.msk.f32.gmra.mrb[74].mxu0 %vm2564_vm9, %v22146_v3  ;;  %v26945_v3 = vld [vmem:[#allocation59_spill] sm:$0xff] }
 0x413   :  { %v14873_v31 = vpop.f32.mrb[29].mxu1  ;;  %15688 = vmatprep.mubr.msk.f32.mxu0 %vm16631_vm2, %v25733_v27  ;;  %v9804_v32 = vcombine.low %v26945_v3, %v26845_v19 }
 0x416   :  { %v22562_v12 = vpop.f32.mrb[30].mxu1  ;;  %15689 = vmatmul.mubr.msk.f32.gmra.mrb[76].mxu0 %vm2564_vm9, %v9803_v4 }
 0x417   :  { %v14876_v63 = vpop.f32.mrb[31].mxu1  ;;  %15691 = vmatprep.mubr.msk.f32.mxu0 %vm16631_vm2, %v25733_v27 }
 0x41a   :  { %v22567_v60 = vpop.f32.mrb[32].mxu1  ;;  %15692 = vmatmul.mubr.msk.f32.gmra.mrb[78].mxu0 %vm2564_vm9, %v22170_v47 }
 0x41b   :  { %v14879_v23 = vpop.f32.mrb[33].mxu1  ;;  %15694 = vmatprep.mubr.msk.f32.mxu0 %vm16631_vm2, %v25733_v27 }
 0x41e   :  { %v22575_v26 = vpop.f32.mrb[34].mxu1  ;;  %15695 = vmatmul.mubr.msk.f32.gmra.mrb[80].mxu0 %vm2564_vm9, %v9804_v32 }
 0x41f   :  { %v14882_v42 = vpop.f32.mrb[35].mxu1  ;;  %15697 = vmatprep.mubr.msk.f32.mxu0 %vm16631_vm2, %v25733_v27 }
 0x422   :  { %v22582_v35 = vpop.f32.mrb[36].mxu1  ;;  %15698 = vmatmul.mubr.msk.f32.gmra.mrb[82].mxu0 %vm2564_vm9, %v9805_v10 }
 0x423   :  { %v14885_v47 = vpop.f32.mrb[37].mxu1  ;;  %15700 = vmatprep.mubr.msk.f32.mxu0 %vm16631_vm2, %v25733_v27 }
 0x426   :  { %v22587_v19 = vpop.f32.mrb[38].mxu1  ;;  %15701 = vmatmul.mubr.msk.f32.gmra.mrb[84].mxu0 %vm2564_vm9, %v22206_v53  ;;  %v26948_v53 = vld [vmem:[#allocation80_spill] sm:$0xff] }
 0x427   :  { %v14888_v45 = vpop.f32.mrb[39].mxu1  ;;  %15703 = vmatprep.mubr.msk.f32.mxu0 %vm16631_vm2, %v25733_v27  ;;  %v9807_v37 = vcombine.low %v26948_v53, %v22238_v15  ;;  %v26953_v15 = vld [vmem:[#allocation19_spill] sm:$0xff] }
 0x428   :  { %v9825_v39 = vcombine.low %v26953_v15, %v26952_v9 }
 0x42a   :  { %v22595_v50 = vpop.f32.mrb[40].mxu1  ;;  %15704 = vmatmul.mubr.msk.f32.gmra.mrb[86].mxu0 %vm2564_vm9, %v9806_v8  ;;  %v9833_v41 = vrot.slane %v9825_v39, %v16753_v24 }
 0x42b   :  { %v14891_v18 = vpop.f32.mrb[41].mxu1  ;;  %15706 = vmatprep.mubr.msk.f32.mxu0 %vm16631_vm2, %v25733_v27 }
 0x42c   :  { %v9841_v2 = vcombine.low %v9833_v41, %v9840_v48 }
 0x42e   :  { %v22600_v20 = vpop.f32.mrb[42].mxu1  ;;  %15707 = vmatmul.mubr.msk.f32.gmra.mrb[88].mxu0 %vm2564_vm9, %v22230_v17  ;;  %v9823_v17 = vrot.slane %v9809_v46, %v16753_v24 }
 0x42f   :  { %v14894_v38 = vpop.f32.mrb[43].mxu1  ;;  %15709 = vmatprep.mubr.msk.f32.mxu0 %vm16631_vm2, %v25733_v27 }
 0x430   :  { %v9824_v36 = vcombine.low %v9816_v51, %v9823_v17 }
 0x432   :  { %v22612_v13 = vpop.f32.mrb[44].mxu1  ;;  %15710 = vmatmul.mubr.msk.f32.gmra.mrb[90].mxu0 %vm2564_vm9, %v9807_v37 }
 0x433   :  { %v14897_v14 = vpop.f32.mrb[45].mxu1  ;;  %15712 = vmatprep.mubr.msk.f32.mxu0 %vm16631_vm2, %v25733_v27 }
 0x436   :  { %v22623_v22 = vpop.f32.mrb[46].mxu1  ;;  %15713 = vmatmul.mubr.msk.f32.gmra.mrb[92].mxu0 %vm2564_vm9, %v22263_v49 }
 0x437   :  { %v14900_v30 = vpop.f32.mrb[47].mxu1  ;;  %15715 = vmatprep.mubr.msk.f32.mxu0 %vm16631_vm2, %v25733_v27 }
 0x43a   :  { %v22631_v25 = vpop.f32.mrb[48].mxu1  ;;  %15716 = vmatmul.mubr.msk.f32.gmra.mrb[94].mxu0 %vm2564_vm9, %v9824_v36 }
 0x43b   :  { %v14903_v4 = vpop.f32.mrb[49].mxu1  ;;  %15718 = vmatprep.mubr.msk.f32.mxu0 %vm16631_vm2, %v25733_v27 }
 0x43e   :  { %v22636_v31 = vpop.f32.mrb[50].mxu1  ;;  %15719 = vmatmul.mubr.msk.f32.gmra.mrb[96].mxu0 %vm2564_vm9, %v9841_v2 }
 0x43f   :  { %v14906_v49 = vpop.f32.mrb[51].mxu1 }
 0x442   :  { %v22639_v63 = vpop.f32.mrb[52].mxu1 }
 0x443   :  { %v14909_v3 = vpop.f32.mrb[53].mxu1 }
 0x446   :  { %v22641_v32 = vpop.f32.mrb[54].mxu1 }
 0x447   :  { %v14912_v23 = vpop.f32.mrb[55].mxu1 }
 0x44a   :  { %v22643_v52 = vpop.f32.mrb[56].mxu1 }
 0x44b   :  { %v14915_v10 = vpop.f32.mrb[57].mxu1 }
 0x44e   :  { %v22645_v42 = vpop.f32.mrb[58].mxu1 }
 0x44f   :  { %v14918_v47 = vpop.f32.mrb[59].mxu1 }
 0x451   :  { %v9969_v1 = vpop.f32.mrb[0].mxu0 }
 0x452   :  { %v22647_v8 = vpop.f32.mrb[60].mxu1  ;;  %v22650_v45 = vadd.f32 %v9969_v1, %v22354_v44  ;;  %v15576_v18 = vpop.f32.mrb[1].mxu0 }
 0x453   :  { %v14921_v53 = vpop.f32.mrb[61].mxu1 }
 0x455   :  { %v9974_v37 = vpop.f32.mrb[2].mxu0 }
 0x456   :  { %v22653_v59 = vadd.f32 %v9974_v37, %v22369_v61  ;;  %v15579_v34 = vpop.f32.mrb[3].mxu0 }
 0x459   :  { %v9979_v11 = vpop.f32.mrb[4].mxu0 }
 0x45a   :  { %v22656_v29 = vadd.f32 %v9979_v11, %v22383_v16  ;;  %v15582_v46 = vpop.f32.mrb[5].mxu0 }
 0x45d   :  { %v9984_v38 = vpop.f32.mrb[6].mxu0 }
 0x45e   :  { %v22659_v51 = vadd.f32 %v9984_v38, %v22400_v5  ;;  %v15585_v17 = vpop.f32.mrb[7].mxu0 }
 0x461   :  { %v9989_v9 = vpop.f32.mrb[8].mxu0 }
 0x462   :  { %v22662_v44 = vadd.f32 %v9989_v9, %v22416_v43  ;;  %v15588_v15 = vpop.f32.mrb[9].mxu0 }
 0x465   :  { %v9994_v39 = vpop.f32.mrb[10].mxu0 }
 0x466   :  { %v22665_v61 = vadd.f32 %v9994_v39, %v22430_v55  ;;  %v15591_v54 = vpop.f32.mrb[11].mxu0 }
 0x469   :  { %v9999_v33 = vpop.f32.mrb[12].mxu0 }
 0x46a   :  { %v22668_v16 = vadd.f32 %v9999_v33, %v22447_v21  ;;  %v15594_v7 = vpop.f32.mrb[13].mxu0 }
 0x46d   :  { %v10004_v14 = vpop.f32.mrb[14].mxu0 }
 0x46e   :  { %v22671_v5 = vadd.f32 %v10004_v14, %v22461_v40  ;;  %v15597_v36 = vpop.f32.mrb[15].mxu0 }
 0x471   :  { %v10009_v41 = vpop.f32.mrb[16].mxu0 }
 0x472   :  { %v22674_v43 = vadd.f32 %v10009_v41, %v22478_v56  ;;  %v15600_v48 = vpop.f32.mrb[17].mxu0 }
 0x475   :  { %v10014_v30 = vpop.f32.mrb[18].mxu0 }
 0x476   :  { %v22677_v55 = vadd.f32 %v10014_v30, %v22492_v62  ;;  %v15603_v2 = vpop.f32.mrb[19].mxu0 }
 0x477   :  { %v10263_v2 = vsel %vm10262_vm10, %v22650_v45, 0.0 }
 0x479   :  { %v10019_v4 = vpop.f32.mrb[20].mxu0 }
 0x47a   :  { %v22680_v21 = vadd.f32 %v10019_v4, %v22509_v57  ;;  %v15606_v49 = vpop.f32.mrb[21].mxu0 }
 0x47d   :  { %v10024_v3 = vpop.f32.mrb[22].mxu0 }
 0x47e   :  { %v22683_v40 = vadd.f32 %v10024_v3, %v22525_v6  ;;  %v15609_v23 = vpop.f32.mrb[23].mxu0 }
 0x481   :  { %v10029_v10 = vpop.f32.mrb[24].mxu0 }
 0x482   :  { %v22686_v56 = vadd.f32 %v10029_v10, %v22535_v28  ;;  %v15612_v47 = vpop.f32.mrb[25].mxu0  ;;  %v10268_v10 = vsel %vm10262_vm10, %v22659_v51, 0.0 }
 0x485   :  { %v10034_v1 = vpop.f32.mrb[26].mxu0 }
 0x486   :  { %v22689_v62 = vadd.f32 %v10034_v1, %v22546_v0  ;;  %v15615_v18 = vpop.f32.mrb[27].mxu0 }
 0x487   :  { %v10270_v18 = vsel %vm10262_vm10, %v22662_v44, 0.0 }
 0x489   :  { %v10039_v53 = vpop.f32.mrb[28].mxu0 }
 0x48a   :  { %v22692_v57 = vadd.f32 %v10039_v53, %v22554_v58  ;;  %v15618_v37 = vpop.f32.mrb[29].mxu0 }
 0x48d   :  { %v10044_v34 = vpop.f32.mrb[30].mxu0 }
 0x48e   :  { %v22695_v6 = vadd.f32 %v10044_v34, %v22562_v12  ;;  %v15621_v11 = vpop.f32.mrb[31].mxu0 }
 0x491   :  { %v10049_v46 = vpop.f32.mrb[32].mxu0 }
 0x492   :  { %v22698_v28 = vadd.f32 %v10049_v46, %v22567_v60  ;;  %v15624_v38 = vpop.f32.mrb[33].mxu0  ;;  %v10272_v46 = vsel %vm10262_vm10, %v22665_v61, 0.0 }
 0x495   :  { %v10054_v17 = vpop.f32.mrb[34].mxu0 }
 0x496   :  { %v22701_v0 = vadd.f32 %v10054_v17, %v22575_v26  ;;  %v15627_v9 = vpop.f32.mrb[35].mxu0 }
 0x497   :  { %v10274_v9 = vsel %vm10262_vm10, %v22668_v16, 0.0 }
 0x499   :  { %v10059_v15 = vpop.f32.mrb[36].mxu0 }
 0x49a   :  { %v22704_v58 = vadd.f32 %v10059_v15, %v22582_v35  ;;  %v15630_v39 = vpop.f32.mrb[37].mxu0  ;;  %v10264_v35 = vsel %vm10262_vm10, %v22653_v59, 0.0 }
 0x49b   :  { %v10265_v3 = vadd.f32 %v10264_v35, %v10263_v2 }
 0x49d   :  { %v10064_v54 = vpop.f32.mrb[38].mxu0 }
 0x49e   :  { %v22706_v33 = vpop.f32.mrb[62].mxu1  ;;  %v22709_v12 = vadd.f32 %v10064_v54, %v22587_v19  ;;  %v15633_v7 = vpop.f32.mrb[39].mxu0  ;;  %v10266_v19 = vsel %vm10262_vm10, %v22656_v29, 0.0 }
 0x49f   :  { %v15073_v60 = vpop.f32.mrb[63].mxu1  ;;  %v10267_v47 = vadd.f32 %v10266_v19, %v10265_v3 }
 0x4a0   :  { %v10276_v60 = vsel %vm10262_vm10, %v22671_v5, 0.0 }
 0x4a1   :  { %v10069_v14 = vpop.f32.mrb[40].mxu0  ;;  %v10269_v11 = vadd.f32 %v10268_v10, %v10267_v47  ;;  %v10282_v10 = vsel %vm10262_vm10, %v22680_v21, 0.0 }
 0x4a2   :  { %v22711_v36 = vpop.f32.mrb[64].mxu1  ;;  %v22714_v26 = vadd.f32 %v10069_v14, %v22595_v50  ;;  %v15636_v41 = vpop.f32.mrb[41].mxu0 }
 0x4a3   :  { %v15076_v48 = vpop.f32.mrb[65].mxu1  ;;  %v10271_v38 = vadd.f32 %v10270_v18, %v10269_v11  ;;  %v10284_v11 = vsel %vm10262_vm10, %v22683_v40, 0.0 }
 0x4a4   :  { %v10278_v48 = vsel %vm10262_vm10, %v22674_v43, 0.0 }
 0x4a5   :  { %v10074_v30 = vpop.f32.mrb[42].mxu0  ;;  %v10273_v7 = vadd.f32 %v10272_v46, %v10271_v38  ;;  %v10286_v38 = vsel %vm10262_vm10, %v22686_v56, 0.0 }
 0x4a6   :  { %v22722_v4 = vpop.f32.mrb[66].mxu1  ;;  %v22725_v49 = vadd.f32 %v10074_v30, %v22600_v20  ;;  %v15639_v50 = vpop.f32.mrb[43].mxu0 }
 0x4a7   :  { %v15079_v23 = vpop.f32.mrb[67].mxu1  ;;  %v10275_v14 = vadd.f32 %v10274_v9, %v10273_v7  ;;  %v10280_v50 = vsel %vm10262_vm10, %v22677_v55, 0.0 }
 0x4a9   :  { %v10079_v1 = vpop.f32.mrb[44].mxu0  ;;  %v10277_v19 = vadd.f32 %v10276_v60, %v10275_v14 }
 0x4aa   :  { %v22731_v53 = vpop.f32.mrb[68].mxu1  ;;  %v22734_v37 = vadd.f32 %v10079_v1, %v22612_v13  ;;  %v15642_v34 = vpop.f32.mrb[45].mxu0 }
 0x4ab   :  { %v15082_v20 = vpop.f32.mrb[69].mxu1  ;;  %v10279_v3 = vadd.f32 %v10278_v48, %v10277_v19 }
 0x4ad   :  { %v10084_v17 = vpop.f32.mrb[46].mxu0  ;;  %v10281_v34 = vadd.f32 %v10280_v50, %v10279_v3  ;;  %v10292_v50 = vsel %vm10262_vm10, %v22695_v6, 0.0 }
 0x4ae   :  { %v22740_v15 = vpop.f32.mrb[70].mxu1  ;;  %v22743_v39 = vadd.f32 %v10084_v17, %v22623_v22  ;;  %v15645_v54 = vpop.f32.mrb[47].mxu0 }
 0x4af   :  { %v15085_v13 = vpop.f32.mrb[71].mxu1  ;;  %v10283_v20 = vadd.f32 %v10282_v10, %v10281_v34  ;;  %v10294_v10 = vsel %vm10262_vm10, %v22698_v28, 0.0 }
 0x4b0   :  { %v10288_v13 = vsel %vm10262_vm10, %v22689_v62, 0.0 }
 0x4b1   :  { %v10089_v41 = vpop.f32.mrb[48].mxu0  ;;  %v10285_v7 = vadd.f32 %v10284_v11, %v10283_v20  ;;  %v10296_v20 = vsel %vm10262_vm10, %v22701_v0, 0.0 }
 0x4b2   :  { %v22749_v35 = vpop.f32.mrb[72].mxu1  ;;  %v22752_v30 = vadd.f32 %v10089_v41, %v22631_v25  ;;  %v15648_v2 = vpop.f32.mrb[49].mxu0  ;;  %v10290_v41 = vsel %vm10262_vm10, %v22692_v57, 0.0 }
 0x4b3   :  { %v15088_v22 = vpop.f32.mrb[73].mxu1  ;;  %v10287_v60 = vadd.f32 %v10286_v38, %v10285_v7 }
 0x4b5   :  { %v10094_v23 = vpop.f32.mrb[50].mxu0  ;;  %v10289_v22 = vadd.f32 %v10288_v13, %v10287_v60 }
 0x4b6   :  { %v22758_v47 = vpop.f32.mrb[74].mxu1  ;;  %v22761_v1 = vadd.f32 %v10094_v23, %v22636_v31  ;;  %v15651_v18 = vpop.f32.mrb[51].mxu0 }
 0x4b7   :  { %v15091_v25 = vpop.f32.mrb[75].mxu1  ;;  %v10291_v3 = vadd.f32 %v10290_v41, %v10289_v22  ;;  %v10302_v22 = vsel %vm10262_vm10, %v22714_v26, 0.0 }
 0x4b9   :  { %v10099_v46 = vpop.f32.mrb[52].mxu0  ;;  %v10293_v11 = vadd.f32 %v10292_v50, %v10291_v3 }
 0x4ba   :  { %v22767_v17 = vpop.f32.mrb[76].mxu1  ;;  %v22770_v9 = vadd.f32 %v10099_v46, %v22639_v63  ;;  %v15654_v54 = vpop.f32.mrb[53].mxu0 }
 0x4bb   :  { %v15094_v31 = vpop.f32.mrb[77].mxu1  ;;  %v10295_v46 = vadd.f32 %v10294_v10, %v10293_v11  ;;  %v10298_v54 = vsel %vm10262_vm10, %v22704_v58, 0.0  ;;  %v10304_v10 = vsel %vm10262_vm10, %v22725_v49, 0.0 }
 0x4bd   :  { %v10104_v14 = vpop.f32.mrb[54].mxu0  ;;  %v10297_v60 = vadd.f32 %v10296_v20, %v10295_v46 }
 0x4be   :  { %v22776_v48 = vpop.f32.mrb[78].mxu1  ;;  %v22779_v2 = vadd.f32 %v10104_v14, %v22641_v32  ;;  %v15657_v19 = vpop.f32.mrb[55].mxu0  ;;  %v10300_v14 = vsel %vm10262_vm10, %v22709_v12, 0.0 }
 0x4bf   :  { %v15097_v63 = vpop.f32.mrb[79].mxu1  ;;  %v10299_v41 = vadd.f32 %v10298_v54, %v10297_v60 }
 0x4c1   :  { %v10109_v23 = vpop.f32.mrb[56].mxu0 }
 0x4c2   :  { %v22785_v18 = vpop.f32.mrb[80].mxu1  ;;  %v22788_v34 = vadd.f32 %v10109_v23, %v22643_v52  ;;  %v15660_v25 = vpop.f32.mrb[57].mxu0  ;;  %v10301_v23 = vadd.f32 %v10300_v14, %v10299_v41  ;;  %v10310_v14 = vsel %vm10262_vm10, %v22752_v30, 0.0 }
 0x4c3   :  { %v15100_v32 = vpop.f32.mrb[81].mxu1 }
 0x4c4   :  { %v10303_v25 = vadd.f32 %v10302_v22, %v10301_v23  ;;  %v10306_v32 = vsel %vm10262_vm10, %v22734_v37, 0.0  ;;  %v10312_v23 = vsel %vm10262_vm10, %v22761_v1, 0.0 }
 0x4c5   :  { %v10114_v38 = vpop.f32.mrb[58].mxu0 }
 0x4c6   :  { %v22794_v7 = vpop.f32.mrb[82].mxu1  ;;  %v22797_v31 = vadd.f32 %v10114_v38, %v22645_v42  ;;  %v15663_v13 = vpop.f32.mrb[59].mxu0  ;;  %v10305_v54 = vadd.f32 %v10304_v10, %v10303_v25  ;;  %v10314_v25 = vsel %vm10262_vm10, %v22770_v9, 0.0 }
 0x4c7   :  { %v15103_v52 = vpop.f32.mrb[83].mxu1  ;;  %v10308_v13 = vsel %vm10262_vm10, %v22743_v39, 0.0 }
 0x4c8   :  { %v10307_v60 = vadd.f32 %v10306_v32, %v10305_v54 }
 0x4c9   :  { %v10119_v19 = vpop.f32.mrb[60].mxu0 }
 0x4ca   :  { %v22803_v63 = vpop.f32.mrb[84].mxu1  ;;  %v22806_v50 = vadd.f32 %v10119_v19, %v22647_v8  ;;  %v15666_v3 = vpop.f32.mrb[61].mxu0 }
 0x4cb   :  { %v15106_v42 = vpop.f32.mrb[85].mxu1  ;;  %v10309_v3 = vadd.f32 %v10308_v13, %v10307_v60 }
 0x4cd   :  { %v10124_v11 = vpop.f32.mrb[62].mxu0  ;;  %v10311_v42 = vadd.f32 %v10310_v14, %v10309_v3 }
 0x4ce   :  { %v22812_v20 = vpop.f32.mrb[86].mxu1  ;;  %v22815_v46 = vadd.f32 %v10124_v11, %v22706_v33  ;;  %v15669_v38 = vpop.f32.mrb[63].mxu0 }
 0x4cf   :  { %v15109_v8 = vpop.f32.mrb[87].mxu1  ;;  %v10313_v54 = vadd.f32 %v10312_v23, %v10311_v42  ;;  %v10320_v23 = vsel %vm10262_vm10, %v22797_v31, 0.0 }
 0x4d0   :  { %v10316_v8 = vsel %vm10262_vm10, %v22779_v2, 0.0 }
 0x4d1   :  { %v10129_v52 = vpop.f32.mrb[64].mxu0  ;;  %v10315_v13 = vadd.f32 %v10314_v25, %v10313_v54  ;;  %v10322_v25 = vsel %vm10262_vm10, %v22806_v50, 0.0 }
 0x4d2   :  { %v22821_v41 = vpop.f32.mrb[88].mxu1  ;;  %v22824_v19 = vadd.f32 %v10129_v52, %v22711_v36  ;;  %v15672_v22 = vpop.f32.mrb[65].mxu0  ;;  %v10318_v52 = vsel %vm10262_vm10, %v22788_v34, 0.0 }
 0x4d3   :  { %v15112_v33 = vpop.f32.mrb[89].mxu1 }
 0x4d4   :  { %v10317_v33 = vadd.f32 %v10316_v8, %v10315_v13  ;;  %v10324_v8 = vsel %vm10262_vm10, %v22815_v46, 0.0 }
 0x4d5   :  { %v10134_v10 = vpop.f32.mrb[66].mxu0 }
 0x4d6   :  { %v22830_v11 = vpop.f32.mrb[90].mxu1  ;;  %v22833_v32 = vadd.f32 %v10134_v10, %v22722_v4  ;;  %v15675_v38 = vpop.f32.mrb[67].mxu0  ;;  %v10319_v42 = vadd.f32 %v10318_v52, %v10317_v33  ;;  %v10326_v52 = vsel %vm10262_vm10, %v22824_v19, 0.0 }
 0x4d7   :  { %v15115_v36 = vpop.f32.mrb[91].mxu1 }
 0x4d8   :  { %v10321_v24 = vadd.f32 %v10320_v23, %v10319_v42  ;;  %v10328_v23 = vsel %vm10262_vm10, %v22833_v32, 0.0 }
 0x4d9   :  { %v10139_v60 = vpop.f32.mrb[68].mxu0 }
 0x4da   :  { %v22839_v14 = vpop.f32.mrb[92].mxu1  ;;  %v22842_v22 = vadd.f32 %v10139_v60, %v22731_v53  ;;  %v15678_v3 = vpop.f32.mrb[69].mxu0  ;;  %v10323_v13 = vadd.f32 %v10322_v25, %v10321_v24 }
 0x4db   :  { %v15118_v4 = vpop.f32.mrb[93].mxu1 }
 0x4dc   :  { %v10325_v27 = vadd.f32 %v10324_v8, %v10323_v13  ;;  %v10330_v24 = vsel %vm10262_vm10, %v22842_v22, 0.0 }
 0x4dd   :  { %v10144_v10 = vpop.f32.mrb[70].mxu0 }
 0x4de   :  { %v22848_v38 = vpop.f32.mrb[94].mxu1  ;;  %v22851_v54 = vadd.f32 %v10144_v10, %v22740_v15  ;;  %v15681_v36 = vpop.f32.mrb[71].mxu0  ;;  %v10327_v42 = vadd.f32 %v10326_v52, %v10325_v27 }
 0x4df   :  { %v15121_v53 = vpop.f32.mrb[95].mxu1 }
 0x4e0   :  { %26956 = vst [vmem:[#allocation91_spill] sm:$0xff] %v22851_v54  ;;  %v10329_v53 = vadd.f32 %v10328_v23, %v10327_v42 }
 0x4e1   :  { %v10149_v60 = vpop.f32.mrb[72].mxu0 }
 0x4e2   :  { %v22857_v3 = vpop.f32.mrb[96].mxu1  ;;  %v22860_v33 = vadd.f32 %v10149_v60, %v22749_v35  ;;  %v15684_v4 = vpop.f32.mrb[73].mxu0  ;;  %v10332_v35 = vsel %vm10262_vm10, %v22851_v54, 0.0  ;;  %v10331_v60 = vadd.f32 %v10330_v24, %v10329_v53 }
 0x4e3   :  { %v15124_v15 = vpop.f32.mrb[97].mxu1 }
 0x4e4   :  { %26957 = vst [vmem:[#allocation95_spill] sm:$0xff] %v22860_v33  ;;  %v10334_v8 = vsel %vm10262_vm10, %v22860_v33, 0.0  ;;  %v10333_v52 = vadd.f32 %v10332_v35, %v10331_v60 }
 0x4e5   :  { %v10154_v10 = vpop.f32.mrb[74].mxu0 }
 0x4e6   :  { %v22867_v25 = vadd.f32 %v10154_v10, %v22758_v47  ;;  %v15687_v36 = vpop.f32.mrb[75].mxu0  ;;  %v10335_v47 = vadd.f32 %v10334_v8, %v10333_v52 }
 0x4e8   :  { %26958 = vst [vmem:[#allocation96_spill] sm:$0xff] %v22867_v25  ;;  %v10336_v15 = vsel %vm10262_vm10, %v22867_v25, 0.0 }
 0x4e9   :  { %v10159_v4 = vpop.f32.mrb[76].mxu0  ;;  %v10337_v36 = vadd.f32 %v10336_v15, %v10335_v47 }
 0x4ea   :  { %v22874_v13 = vadd.f32 %v10159_v4, %v22767_v17  ;;  %v15690_v27 = vpop.f32.mrb[77].mxu0 }
 0x4ec   :  { %26959 = vst [vmem:[#allocation99_spill] sm:$0xff] %v22874_v13  ;;  %v10338_v23 = vsel %vm10262_vm10, %v22874_v13, 0.0 }
 0x4ed   :  { %v10164_v10 = vpop.f32.mrb[78].mxu0  ;;  %v10339_v33 = vadd.f32 %v10338_v23, %v10337_v36 }
 0x4ee   :  { %v15816_v42 = vadd.f32 %v10164_v10, %v22776_v48  ;;  %v15693_v24 = vpop.f32.mrb[79].mxu0 }
 0x4f0   :  { %v10340_v53 = vsel %vm10262_vm10, %v15816_v42, 0.0 }
 0x4f1   :  { %v10169_v54 = vpop.f32.mrb[80].mxu0  ;;  %v10341_v35 = vadd.f32 %v10340_v53, %v10339_v33 }
 0x4f2   :  { %v15817_v17 = vadd.f32 %v10169_v54, %v22785_v18  ;;  %v15696_v4 = vpop.f32.mrb[81].mxu0 }
 0x4f4   :  { %v10342_v60 = vsel %vm10262_vm10, %v15817_v17, 0.0 }
 0x4f5   :  { %v10343_v27 = vadd.f32 %v10342_v60, %v10341_v35  ;;  %v10174_v8 = vpop.f32.mrb[82].mxu0 }
 0x4f6   :  { %v15818_v52 = vadd.f32 %v10174_v8, %v22794_v7  ;;  %v15699_v25 = vpop.f32.mrb[83].mxu0 }
 0x4f8   :  { %v10344_v13 = vsel %vm10262_vm10, %v15818_v52, 0.0 }
 0x4f9   :  { %v10345_v48 = vadd.f32 %v10344_v13, %v10343_v27  ;;  %v10179_v10 = vpop.f32.mrb[84].mxu0 }
 0x4fa   :  { %v15819_v15 = vadd.f32 %v10179_v10, %v22803_v63  ;;  %v15702_v47 = vpop.f32.mrb[85].mxu0 }
 0x4fc   :  { %v10346_v23 = vsel %vm10262_vm10, %v15819_v15, 0.0 }
 0x4fd   :  { %v10347_v24 = vadd.f32 %v10346_v23, %v10345_v48  ;;  %v10184_v18 = vpop.f32.mrb[86].mxu0 }
 0x4fe   :  { %v15820_v54 = vadd.f32 %v10184_v18, %v22812_v20  ;;  %v15705_v33 = vpop.f32.mrb[87].mxu0 }
 0x500   :  { %v10348_v36 = vsel %vm10262_vm10, %v15820_v54, 0.0 }
 0x501   :  { %v10349_v53 = vadd.f32 %v10348_v36, %v10347_v24  ;;  %v10189_v4 = vpop.f32.mrb[88].mxu0 }
 0x502   :  { %v15821_v7 = vadd.f32 %v10189_v4, %v22821_v41  ;;  %v15708_v25 = vpop.f32.mrb[89].mxu0 }
 0x504   :  { %v10350_v13 = vsel %vm10262_vm10, %v15821_v7, 0.0 }
 0x505   :  { %v10351_v35 = vadd.f32 %v10350_v13, %v10349_v53  ;;  %v10194_v60 = vpop.f32.mrb[90].mxu0 }
 0x506   :  { %v15822_v63 = vadd.f32 %v10194_v60, %v22830_v11  ;;  %v15711_v27 = vpop.f32.mrb[91].mxu0 }
 0x508   :  { %v10352_v8 = vsel %vm10262_vm10, %v15822_v63, 0.0 }
 0x509   :  { %v10353_v48 = vadd.f32 %v10352_v8, %v10351_v35  ;;  %v10199_v10 = vpop.f32.mrb[92].mxu0 }
 0x50a   :  { %v15823_v20 = vadd.f32 %v10199_v10, %v22839_v14  ;;  %v15714_v47 = vpop.f32.mrb[93].mxu0 }
 0x50c   :  { %v10354_v23 = vsel %vm10262_vm10, %v15823_v20, 0.0 }
 0x50d   :  { %v10355_v24 = vadd.f32 %v10354_v23, %v10353_v48  ;;  %v10204_v18 = vpop.f32.mrb[94].mxu0 }
 0x50e   :  { %v15824_v41 = vadd.f32 %v10204_v18, %v22848_v38  ;;  %v15717_v33 = vpop.f32.mrb[95].mxu0 }
 0x510   :  { %v10356_v36 = vsel %vm10262_vm10, %v15824_v41, 0.0 }
 0x511   :  { %v10357_v53 = vadd.f32 %v10356_v36, %v10355_v24  ;;  %v10209_v4 = vpop.f32.mrb[96].mxu0 }
 0x512   :  { %v15825_v11 = vadd.f32 %v10209_v4, %v22857_v3  ;;  %v15720_v25 = vpop.f32.mrb[97].mxu0 }
 0x514   :  { %v10358_v13 = vsel %vm10262_vm10, %v15825_v11, 0.0 }
 0x515   :  { %v10359_v35 = vadd.f32 %v10358_v13, %v10357_v53 }
 0x517   :  { %v10360_v60 = vrot.slane %v10359_v35, 4 }
 0x519   :  { %v10361_v14 = vadd.f32 %v10360_v60, %v10359_v35 }
 0x51b   :  { %v10362_v27 = vrot.slane %v10361_v14, 2 }
 0x51d   :  { %v10363_v8 = vadd.f32 %v10362_v27, %v10361_v14 }
 0x51f   :  { %v10364_v10 = vrot.slane %v10363_v8, 1 }
 0x521   :  { %v10365_v48 = vadd.f32 %v10364_v10, %v10363_v8 }
 0x523   :  { %v22900_v47 = vmul.f32 0.0025510204, %v10365_v48 }
 0x525   :  { %v22903_v38 = vsub.f32 %v15816_v42, %v22900_v47  ;;  %v22906_v23 = vsub.f32 %v15817_v17, %v22900_v47  ;;  %v22909_v3 = vsub.f32 %v15818_v52, %v22900_v47  ;;  %v22912_v24 = vsub.f32 %v15819_v15, %v22900_v47 }
 0x526   :  { %v22915_v18 = vsub.f32 %v15820_v54, %v22900_v47  ;;  %v22918_v33 = vsub.f32 %v15821_v7, %v22900_v47  ;;  %v22921_v36 = vsub.f32 %v15822_v63, %v22900_v47  ;;  %v22924_v42 = vsub.f32 %v15823_v20, %v22900_v47 }
 0x527   :  { %v22927_v17 = vsub.f32 %v15824_v41, %v22900_v47  ;;  %v22930_v52 = vsub.f32 %v15825_v11, %v22900_v47  ;;  %v22934_v15 = vsub.f32 %v22650_v45, %v22900_v47  ;;  %v22938_v54 = vsub.f32 %v22653_v59, %v22900_v47 }
 0x528   :  { %v22942_v7 = vsub.f32 %v22656_v29, %v22900_v47  ;;  %v22946_v63 = vsub.f32 %v22659_v51, %v22900_v47  ;;  %v22954_v45 = vsub.f32 %v22662_v44, %v22900_v47  ;;  %v22960_v29 = vsub.f32 %v22665_v61, %v22900_v47 }
 0x529   :  { %v10417_v20 = vmul.f32 %v22934_v15, %v22934_v15  ;;  %v10418_v41 = vmul.f32 %v22938_v54, %v22938_v54  ;;  %v22968_v25 = vsub.f32 %v22668_v16, %v22900_v47  ;;  %v22975_v61 = vsub.f32 %v22671_v5, %v22900_v47 }
 0x52a   :  { %v10419_v59 = vmul.f32 %v22942_v7, %v22942_v7  ;;  %v10420_v51 = vmul.f32 %v22946_v63, %v22946_v63  ;;  %v10421_v44 = vmul.f32 %v22954_v45, %v22954_v45  ;;  %v10422_v60 = vmul.f32 %v22960_v29, %v22960_v29 }
 0x52b   :  { %v10466_v53 = vsel %vm10262_vm10, %v10417_v20, 0.0  ;;  %v10467_v4 = vsel %vm10262_vm10, %v10418_v41, 0.0  ;;  %v22982_v16 = vsub.f32 %v22674_v43, %v22900_v47  ;;  %v10423_v8 = vmul.f32 %v22968_v25, %v22968_v25 }
 0x52c   :  { %v10468_v11 = vadd.f32 %v10467_v4, %v10466_v53  ;;  %v10469_v13 = vsel %vm10262_vm10, %v10419_v59, 0.0  ;;  %v10471_v14 = vsel %vm10262_vm10, %v10420_v51, 0.0  ;;  %v10473_v10 = vsel %vm10262_vm10, %v10421_v44, 0.0 }
 0x52d   :  { %v22989_v5 = vsub.f32 %v22677_v55, %v22900_v47  ;;  %v10424_v20 = vmul.f32 %v22975_v61, %v22975_v61  ;;  %v10475_v41 = vsel %vm10262_vm10, %v10422_v60, 0.0  ;;  %v22996_v43 = vsub.f32 %v22680_v21, %v22900_v47 }
 0x52e   :  { %v10470_v35 = vadd.f32 %v10469_v13, %v10468_v11  ;;  %v10425_v51 = vmul.f32 %v22982_v16, %v22982_v16  ;;  %v10477_v53 = vsel %vm10262_vm10, %v10423_v8, 0.0  ;;  %v23003_v55 = vsub.f32 %v22683_v40, %v22900_v47 }
 0x52f   :  { %v10426_v11 = vmul.f32 %v22989_v5, %v22989_v5  ;;  %v10479_v44 = vsel %vm10262_vm10, %v10424_v20, 0.0  ;;  %v23010_v21 = vsub.f32 %v22686_v56, %v22900_v47  ;;  %v23017_v40 = vsub.f32 %v22689_v62, %v22900_v47 }
 0x530   :  { %v10472_v27 = vadd.f32 %v10471_v14, %v10470_v35  ;;  %v10427_v35 = vmul.f32 %v22996_v43, %v22996_v43  ;;  %v10481_v60 = vsel %vm10262_vm10, %v10425_v51, 0.0  ;;  %v23024_v56 = vsub.f32 %v22692_v57, %v22900_v47 }
 0x531   :  { %v10483_v8 = vsel %vm10262_vm10, %v10426_v11, 0.0  ;;  %v23031_v62 = vsub.f32 %v22695_v6, %v22900_v47  ;;  %v23038_v57 = vsub.f32 %v22698_v28, %v22900_v47  ;;  %v23045_v6 = vsub.f32 %v22701_v0, %v22900_v47 }
 0x532   :  { %v10474_v48 = vadd.f32 %v10473_v10, %v10472_v27  ;;  %v10428_v27 = vmul.f32 %v23003_v55, %v23003_v55  ;;  %v10485_v20 = vsel %vm10262_vm10, %v10427_v35, 0.0  ;;  %v23052_v28 = vsub.f32 %v22704_v58, %v22900_v47 }
 0x533   :  { %v23059_v0 = vsub.f32 %v22709_v12, %v22900_v47  ;;  %v23066_v58 = vsub.f32 %v22714_v26, %v22900_v47  ;;  %v10389_v12 = vsub.f32 %v22725_v49, %v22900_v47 }
 0x534   :  { %v10476_v59 = vadd.f32 %v10475_v41, %v10474_v48  ;;  %v10429_v48 = vmul.f32 %v23010_v21, %v23010_v21  ;;  %v10487_v51 = vsel %vm10262_vm10, %v10428_v27, 0.0 }
 0x535   :  { %v10437_v26 = vmul.f32 %v23066_v58, %v23066_v58 }
 0x536   :  { %v10478_v4 = vadd.f32 %v10477_v53, %v10476_v59  ;;  %v10430_v59 = vmul.f32 %v23017_v40, %v23017_v40  ;;  %v10489_v11 = vsel %vm10262_vm10, %v10429_v48, 0.0 }
 0x538   :  { %v10480_v13 = vadd.f32 %v10479_v44, %v10478_v4  ;;  %v10431_v4 = vmul.f32 %v23024_v56, %v23024_v56  ;;  %v10491_v35 = vsel %vm10262_vm10, %v10430_v59, 0.0 }
 0x53a   :  { %v10482_v14 = vadd.f32 %v10481_v60, %v10480_v13  ;;  %v10432_v13 = vmul.f32 %v23031_v62, %v23031_v62  ;;  %v10493_v27 = vsel %vm10262_vm10, %v10431_v4, 0.0 }
 0x53c   :  { %v10484_v10 = vadd.f32 %v10483_v8, %v10482_v14  ;;  %v10433_v14 = vmul.f32 %v23038_v57, %v23038_v57  ;;  %v10495_v48 = vsel %vm10262_vm10, %v10432_v13, 0.0 }
 0x53e   :  { %v10486_v41 = vadd.f32 %v10485_v20, %v10484_v10  ;;  %v10434_v10 = vmul.f32 %v23045_v6, %v23045_v6  ;;  %v10497_v59 = vsel %vm10262_vm10, %v10433_v14, 0.0  ;;  %v10438_v14 = vmul.f32 %v10389_v12, %v10389_v12 }
 0x540   :  { %v10488_v53 = vadd.f32 %v10487_v51, %v10486_v41  ;;  %v10435_v41 = vmul.f32 %v23052_v28, %v23052_v28  ;;  %v10499_v4 = vsel %vm10262_vm10, %v10434_v10, 0.0 }
 0x542   :  { %v10490_v44 = vadd.f32 %v10489_v11, %v10488_v53  ;;  %v10436_v53 = vmul.f32 %v23059_v0, %v23059_v0  ;;  %v10501_v13 = vsel %vm10262_vm10, %v10435_v41, 0.0 }
 0x544   :  { %v10492_v60 = vadd.f32 %v10491_v35, %v10490_v44  ;;  %v10390_v44 = vsub.f32 %v22734_v37, %v22900_v47  ;;  %v10503_v49 = vsel %vm10262_vm10, %v10436_v53, 0.0  ;;  %v10505_v37 = vsel %vm10262_vm10, %v10437_v26, 0.0 }
 0x546   :  { %v10494_v8 = vadd.f32 %v10493_v27, %v10492_v60  ;;  %v10391_v60 = vsub.f32 %v22743_v39, %v22900_v47  ;;  %v10439_v10 = vmul.f32 %v10390_v44, %v10390_v44 }
 0x548   :  { %v10496_v20 = vadd.f32 %v10495_v48, %v10494_v8  ;;  %v23086_v8 = vsub.f32 %v22752_v30, %v22900_v47  ;;  %v10440_v41 = vmul.f32 %v10391_v60, %v10391_v60  ;;  %v10509_v12 = vsel %vm10262_vm10, %v10439_v10, 0.0 }
 0x54a   :  { %v10498_v51 = vadd.f32 %v10497_v59, %v10496_v20  ;;  %v23091_v20 = vsub.f32 %v22761_v1, %v22900_v47  ;;  %v10507_v59 = vsel %vm10262_vm10, %v10438_v14, 0.0  ;;  %v10441_v30 = vmul.f32 %v23086_v8, %v23086_v8 }
 0x54c   :  { %v10500_v11 = vadd.f32 %v10499_v4, %v10498_v51  ;;  %v23096_v51 = vsub.f32 %v22770_v9, %v22900_v47  ;;  %v23103_v4 = vsub.f32 %v22779_v2, %v22900_v47  ;;  %v10442_v1 = vmul.f32 %v23091_v20, %v23091_v20 }
 0x54d   :  { %v23110_v9 = vsub.f32 %v22788_v34, %v22900_v47  ;;  %v23117_v2 = vsub.f32 %v22797_v31, %v22900_v47  ;;  %v23124_v34 = vsub.f32 %v22806_v50, %v22900_v47  ;;  %v23131_v31 = vsub.f32 %v22815_v46, %v22900_v47 }
 0x54e   :  { %v10502_v35 = vadd.f32 %v10501_v13, %v10500_v11  ;;  %v10511_v11 = vsel %vm10262_vm10, %v10440_v41, 0.0  ;;  %v10443_v26 = vmul.f32 %v23096_v51, %v23096_v51  ;;  %v10513_v13 = vsel %vm10262_vm10, %v10441_v30, 0.0 }
 0x54f   :  { %v10444_v60 = vmul.f32 %v23103_v4, %v23103_v4  ;;  %v10515_v14 = vsel %vm10262_vm10, %v10442_v1, 0.0  ;;  %v23138_v50 = vsub.f32 %v22824_v19, %v22900_v47  ;;  %v23145_v46 = vsub.f32 %v22833_v32, %v22900_v47 }
 0x550   :  { %v10504_v27 = vadd.f32 %v10503_v49, %v10502_v35  ;;  %v10517_v10 = vsel %vm10262_vm10, %v10443_v26, 0.0  ;;  %v23152_v19 = vsub.f32 %v22842_v22, %v22900_v47 }
 0x551   :  { %v10519_v41 = vsel %vm10262_vm10, %v10444_v60, 0.0  ;;  %v10450_v60 = vmul.f32 %v23145_v46, %v23145_v46 }
 0x552   :  { %v10506_v48 = vadd.f32 %v10505_v37, %v10504_v27  ;;  %v10445_v27 = vmul.f32 %v23110_v9, %v23110_v9 }
 0x554   :  { %v10508_v39 = vadd.f32 %v10507_v59, %v10506_v48  ;;  %v10446_v48 = vmul.f32 %v23117_v2, %v23117_v2  ;;  %v10521_v30 = vsel %vm10262_vm10, %v10445_v27, 0.0  ;;  %v26961_v27 = vld [vmem:[#allocation95_spill] sm:$0xff] }
 0x555   :  { %v23166_v22 = vsub.f32 %v26961_v27, %v22900_v47 }
 0x556   :  { %v10510_v53 = vadd.f32 %v10509_v12, %v10508_v39  ;;  %v10447_v39 = vmul.f32 %v23124_v34, %v23124_v34  ;;  %v10523_v1 = vsel %vm10262_vm10, %v10446_v48, 0.0 }
 0x558   :  { %v10512_v44 = vadd.f32 %v10511_v11, %v10510_v53  ;;  %v10448_v53 = vmul.f32 %v23131_v31, %v23131_v31  ;;  %v10525_v26 = vsel %vm10262_vm10, %v10447_v39, 0.0 }
 0x55a   :  { %v10514_v35 = vadd.f32 %v10513_v13, %v10512_v44  ;;  %v10449_v44 = vmul.f32 %v23138_v50, %v23138_v50 }
 0x55c   :  { %v10516_v49 = vadd.f32 %v10515_v14, %v10514_v35  ;;  %v26960_v35 = vld [vmem:[#allocation91_spill] sm:$0xff]  ;;  %v10527_v14 = vsel %vm10262_vm10, %v10448_v53, 0.0 }
 0x55d   :  { %v23159_v32 = vsub.f32 %v26960_v35, %v22900_v47  ;;  %v26963_v53 = vld [vmem:[#allocation99_spill] sm:$0xff] }
 0x55e   :  { %v10518_v37 = vadd.f32 %v10517_v10, %v10516_v49  ;;  %v10451_v10 = vmul.f32 %v23152_v19, %v23152_v19 }
 0x55f   :  { %v10452_v39 = vmul.f32 %v23159_v32, %v23159_v32 }
 0x560   :  { %v10520_v59 = vadd.f32 %v10519_v41, %v10518_v37  ;;  %v10529_v37 = vsel %vm10262_vm10, %v10449_v44, 0.0  ;;  %v26962_v41 = vld [vmem:[#allocation96_spill] sm:$0xff]  ;;  %v10533_v44 = vsel %vm10262_vm10, %v10451_v10, 0.0  ;;  %v10457_v10 = vmul.f32 %v22906_v23, %v22906_v23 }
 0x561   :  { %v10535_v35 = vsel %vm10262_vm10, %v10452_v39, 0.0  ;;  %v10458_v39 = vmul.f32 %v22909_v3, %v22909_v3 }
 0x562   :  { %v10522_v12 = vadd.f32 %v10521_v30, %v10520_v59  ;;  %v23173_v59 = vsub.f32 %v26962_v41, %v22900_v47  ;;  %v10531_v30 = vsel %vm10262_vm10, %v10450_v60, 0.0 }
 0x564   :  { %v10524_v11 = vadd.f32 %v10523_v1, %v10522_v12  ;;  %v23180_v1 = vsub.f32 %v26963_v53, %v22900_v47  ;;  %v10456_v47 = vmul.f32 %v22903_v38, %v22903_v38 }
 0x566   :  { %v10526_v13 = vadd.f32 %v10525_v26, %v10524_v11  ;;  %v10453_v11 = vmul.f32 %v23166_v22, %v23166_v22  ;;  %v10455_v60 = vmul.f32 %v23180_v1, %v23180_v1 }
 0x568   :  { %v10528_v49 = vadd.f32 %v10527_v14, %v10526_v13  ;;  %v10454_v13 = vmul.f32 %v23173_v59, %v23173_v59  ;;  %v10541_v41 = vsel %vm10262_vm10, %v10455_v60, 0.0  ;;  %v10461_v60 = vmul.f32 %v22918_v33, %v22918_v33 }
 0x56a   :  { %v10530_v48 = vadd.f32 %v10529_v37, %v10528_v49  ;;  %v10537_v49 = vsel %vm10262_vm10, %v10453_v11, 0.0  ;;  %v10539_v37 = vsel %vm10262_vm10, %v10454_v13, 0.0  ;;  %v10459_v11 = vmul.f32 %v22912_v24, %v22912_v24 }
 0x56b   :  { %v10460_v13 = vmul.f32 %v22915_v18, %v22915_v18 }
 0x56c   :  { %v10532_v12 = vadd.f32 %v10531_v30, %v10530_v48 }
 0x56e   :  { %v10534_v26 = vadd.f32 %v10533_v44, %v10532_v12  ;;  %v10543_v12 = vsel %vm10262_vm10, %v10456_v47, 0.0  ;;  %v10545_v44 = vsel %vm10262_vm10, %v10457_v10, 0.0  ;;  %v10462_v47 = vmul.f32 %v22921_v36, %v22921_v36 }
 0x56f   :  { %v10463_v10 = vmul.f32 %v22924_v42, %v22924_v42 }
 0x570   :  { %v10536_v14 = vadd.f32 %v10535_v35, %v10534_v26  ;;  %v10547_v35 = vsel %vm10262_vm10, %v10458_v39, 0.0  ;;  %v10464_v39 = vmul.f32 %v22927_v17, %v22927_v17 }
 0x572   :  { %v10538_v27 = vadd.f32 %v10537_v49, %v10536_v14  ;;  %v10549_v49 = vsel %vm10262_vm10, %v10459_v11, 0.0  ;;  %v10465_v11 = vmul.f32 %v22930_v52, %v22930_v52  ;;  %v10570_v52 = vld [vmem:[%s24824_s2] sm:$0x1] }
 0x574   :  { %v10540_v48 = vadd.f32 %v10539_v37, %v10538_v27  ;;  %v10551_v37 = vsel %vm10262_vm10, %v10460_v13, 0.0  ;;  %v10559_v13 = vsel %vm10262_vm10, %v10464_v39, 0.0  ;;  %v10561_v42 = vsel %vm10262_vm10, %v10465_v11, 0.0 }
 0x576   :  { %v10542_v30 = vadd.f32 %v10541_v41, %v10540_v48  ;;  %v10553_v41 = vsel %vm10262_vm10, %v10461_v60, 0.0 }
 0x578   :  { %v10544_v53 = vadd.f32 %v10543_v12, %v10542_v30  ;;  %v10555_v12 = vsel %vm10262_vm10, %v10462_v47, 0.0 }
 0x57a   :  { %v10546_v26 = vadd.f32 %v10545_v44, %v10544_v53  ;;  %v10557_v44 = vsel %vm10262_vm10, %v10463_v10, 0.0  ;;  %v16632_v10 = vmov 1966171168  }
 0x57b   :  { %v11750_v39 = vunpack.c.l.s4 %v16632_v10  ;;  %v26966_v10 = vmov 0.0  }
 0x57c   :  { %v10548_v14 = vadd.f32 %v10547_v35, %v10546_v26 }
 0x57e   :  { %v10550_v27 = vadd.f32 %v10549_v49, %v10548_v14 }
 0x580   :  { %v10552_v48 = vadd.f32 %v10551_v37, %v10550_v27 }
 0x582   :  { %v10554_v30 = vadd.f32 %v10553_v41, %v10552_v48 }
 0x584   :  { %v10556_v53 = vadd.f32 %v10555_v12, %v10554_v30 }
 0x586   :  { %v10558_v26 = vadd.f32 %v10557_v44, %v10556_v53  ;;  %v26964_v53 = vld [vmem:[#allocation5_spill] sm:$0xff]  ;;  %v11751_v44 = vunpack.c.0.s8 %v11750_v39 }
 0x587   :  { %v25596_v11 = vsub.s32 0, %v26964_v53 }
 0x588   :  { %v10560_v35 = vadd.f32 %v10559_v13, %v10558_v26  ;;  %v23230_v13 = vsub.s32 %v11751_v44, %v26964_v53 }
 0x58a   :  { %v10562_v14 = vadd.f32 %v10561_v42, %v10560_v35  ;;  %26965 = vst [vmem:[#allocation339_spill] sm:$0xff] %v23230_v13 }
 0x58c   :  { %v10563_v60 = vrot.slane %v10562_v14, 4 }
 0x58e   :  { %v10564_v49 = vadd.f32 %v10563_v60, %v10562_v14 }
 0x590   :  { %v10565_v27 = vrot.slane %v10564_v49, 2 }
 0x592   :  { %v10566_v37 = vadd.f32 %v10565_v27, %v10564_v49 }
 0x594   :  { %v10567_v17 = vrot.slane %v10566_v37, 1 }
 0x596   :  { %v10568_v48 = vadd.f32 %v10567_v17, %v10566_v37 }
 0x598   :  { %v10569_v47 = vmul.f32 0.0025510204, %v10568_v48 }
 0x59a   :  { %v10571_v41 = vadd.f32 1e-05, %v10569_v47 }
 0x59c   :  { %16600 = vrsqrt.f32 %v10571_v41 }
 0x5a6   :  { %v16601_v30 = vpop.eup %16600 }
 0x5a7   :  { %v10573_v12 = vmul.f32 %v16601_v30, %v10570_v52 }
 0x5a9   :  { %v10578_v26 = vrot.slane %v10573_v12, %v25596_v11 }
 0x5ab   :  { %v10580_v35 = vmul.f32 %v10578_v26, %v22934_v15  ;;  %v10581_v42 = vmul.f32 %v10578_v26, %v22938_v54  ;;  %v10582_v14 = vmul.f32 %v10578_v26, %v22942_v7  ;;  %v10583_v60 = vmul.f32 %v10578_v26, %v22946_v63 }
 0x5ac   :  { %v10584_v49 = vmul.f32 %v10578_v26, %v22954_v45  ;;  %v23238_v27 = vmul.f32 %v10578_v26, %v23180_v1  ;;  %v10585_v37 = vmul.f32 %v10578_v26, %v22960_v29  ;;  %v10586_v17 = vmul.f32 %v10578_v26, %v22968_v25 }
 0x5ad   :  { %v10587_v48 = vmul.f32 %v10578_v26, %v22975_v61  ;;  %v10588_v47 = vmul.f32 %v10578_v26, %v22982_v16  ;;  %v10589_v15 = vmul.f32 %v10578_v26, %v22989_v5  ;;  %v10590_v54 = vmul.f32 %v10578_v26, %v22996_v43 }
 0x5ae   :  { %v10591_v7 = vmul.f32 %v10578_v26, %v23003_v55  ;;  %v10592_v63 = vmul.f32 %v10578_v26, %v23010_v21  ;;  %v10593_v45 = vmul.f32 %v10578_v26, %v23017_v40  ;;  %v10594_v1 = vmul.f32 %v10578_v26, %v23024_v56 }
 0x5af   :  { %v10595_v29 = vmul.f32 %v10578_v26, %v23031_v62  ;;  %v10596_v25 = vmul.f32 %v10578_v26, %v23038_v57  ;;  %v10597_v61 = vmul.f32 %v10578_v26, %v23045_v6  ;;  %v10598_v16 = vmul.f32 %v10578_v26, %v23052_v28 }
 0x5b0   :  { %v10599_v5 = vmul.f32 %v10578_v26, %v23059_v0  ;;  %v10600_v43 = vmul.f32 %v10578_v26, %v23066_v58  ;;  %v10601_v55 = vmul.f32 %v10578_v26, %v23086_v8  ;;  %v10602_v21 = vmul.f32 %v10578_v26, %v23091_v20  ;;  %v13892_v0 = vld [vmem:[%s24825_s3] ss:$0 sm:$0xff] }
 0x5b1   :  { %v10603_v40 = vmul.f32 %v10578_v26, %v23096_v51  ;;  %v10604_v56 = vmul.f32 %v10578_v26, %v23103_v4  ;;  %v10605_v62 = vmul.f32 %v10578_v26, %v23110_v9  ;;  %v10606_v57 = vmul.f32 %v10578_v26, %v23117_v2 }
 0x5b2   :  { %v10607_v6 = vmul.f32 %v10578_v26, %v23124_v34  ;;  %v10608_v28 = vmul.f32 %v10578_v26, %v23131_v31  ;;  %v10609_v58 = vmul.f32 %v10578_v26, %v23138_v50  ;;  %v10610_v8 = vmul.f32 %v10578_v26, %v23145_v46 }
 0x5b3   :  { %v10611_v20 = vmul.f32 %v10578_v26, %v23152_v19  ;;  %v10612_v51 = vmul.f32 %v10578_v26, %v23159_v32  ;;  %v10613_v4 = vmul.f32 %v10578_v26, %v23166_v22  ;;  %v10614_v9 = vmul.f32 %v10578_v26, %v23173_v59  ;;  %v13893_v19 = vld [vmem:[%s24826_s4 + $0x8] sm:$0xff] }
 0x5b4   :  { %v10616_v2 = vmul.f32 %v10578_v26, %v22903_v38  ;;  %v10617_v34 = vmul.f32 %v10578_v26, %v22906_v23  ;;  %v10618_v31 = vmul.f32 %v10578_v26, %v22909_v3  ;;  %v10619_v41 = vmul.f32 %v10578_v26, %v22912_v24  ;;  %15722 = vmatpush3.msra.mxu1 %v13893_v19 }
 0x5b5   :  { %v10620_v50 = vmul.f32 %v10578_v26, %v22915_v18  ;;  %v10621_v46 = vmul.f32 %v10578_v26, %v22918_v33  ;;  %v10622_v32 = vmul.f32 %v10578_v26, %v22921_v36  ;;  %v10630_v22 = vadd.f32 %v13892_v0, %v10580_v35  ;;  %15732 = vmatprep.subr.mxu1 %v26966_v10 }
 0x5b6   :  { %v10631_v59 = vadd.f32 %v13892_v0, %v10581_v42  ;;  %v10632_v30 = vadd.f32 %v13892_v0, %v10582_v14  ;;  %v10633_v38 = vadd.f32 %v13892_v0, %v10583_v60  ;;  %v10634_v23 = vadd.f32 %v13892_v0, %v10584_v49 }
 0x5b7   :  { %v10635_v52 = vadd.f32 %v13892_v0, %v10585_v37  ;;  %v10636_v3 = vadd.f32 %v13892_v0, %v10586_v17  ;;  %v10637_v24 = vadd.f32 %v13892_v0, %v10587_v48  ;;  %v10638_v18 = vadd.f32 %v13892_v0, %v10588_v47 }
 0x5b8   :  { %v10639_v39 = vadd.f32 %v13892_v0, %v10589_v15  ;;  %v10640_v33 = vadd.f32 %v13892_v0, %v10590_v54  ;;  %v10641_v12 = vadd.f32 %v13892_v0, %v10591_v7  ;;  %v10642_v44 = vadd.f32 %v13892_v0, %v10592_v63 }
 0x5b9   :  { %v10643_v11 = vadd.f32 %v13892_v0, %v10593_v45  ;;  %v10644_v53 = vadd.f32 %v13892_v0, %v10594_v1  ;;  %v10645_v13 = vadd.f32 %v13892_v0, %v10595_v29  ;;  %v10646_v36 = vadd.f32 %v13892_v0, %v10596_v25 }
 0x5ba   :  { %v10647_v26 = vadd.f32 %v13892_v0, %v10597_v61  ;;  %v10648_v35 = vadd.f32 %v13892_v0, %v10598_v16  ;;  %v10649_v42 = vadd.f32 %v13892_v0, %v10599_v5  ;;  %v10650_v14 = vadd.f32 %v13892_v0, %v10600_v43 }
 0x5bb   :  { %v23284_v60 = vadd.f32 %v13892_v0, %v10601_v55  ;;  %v10652_v49 = vadd.f32 %v13892_v0, %v10602_v21  ;;  %v10653_v37 = vadd.f32 %v13892_v0, %v10603_v40  ;;  %v10654_v17 = vadd.f32 %v13892_v0, %v10604_v56 }
 0x5bc   :  { %v10655_v19 = vadd.f32 %v13892_v0, %v10605_v62  ;;  %v10656_v48 = vadd.f32 %v13892_v0, %v10606_v57  ;;  %v10657_v47 = vadd.f32 %v13892_v0, %v10607_v6  ;;  %v10658_v15 = vadd.f32 %v13892_v0, %v10608_v28 }
 0x5bd   :  { %v10659_v54 = vadd.f32 %v13892_v0, %v10609_v58  ;;  %v10660_v7 = vadd.f32 %v13892_v0, %v10610_v8  ;;  %v10661_v63 = vadd.f32 %v13892_v0, %v10611_v20  ;;  %v10662_v45 = vadd.f32 %v13892_v0, %v10612_v51 }
 0x5be   :  { %v10663_v1 = vadd.f32 %v13892_v0, %v10613_v4  ;;  %v10664_v29 = vadd.f32 %v13892_v0, %v10614_v9  ;;  %v10665_v25 = vadd.f32 %v13892_v0, %v23238_v27  ;;  %v10666_v61 = vadd.f32 %v13892_v0, %v10616_v2 }
 0x5bf   :  { %v10667_v16 = vadd.f32 %v13892_v0, %v10617_v34  ;;  %v10668_v5 = vadd.f32 %v13892_v0, %v10618_v31  ;;  %v10669_v43 = vadd.f32 %v13892_v0, %v10619_v41  ;;  %v10670_v55 = vadd.f32 %v13892_v0, %v10620_v50 }
 0x5c0   :  { %v10671_v21 = vadd.f32 %v13892_v0, %v10621_v46  ;;  %v23287_v40 = vadd.f32 %v13892_v0, %v10622_v32  ;;  %v10673_v56 = vmax.f32 %v10630_v22, 0.0  ;;  %v10674_v62 = vmax.f32 %v10631_v59, 0.0 }
 0x5c1   :  { %v10675_v57 = vmax.f32 %v10632_v30, 0.0  ;;  %v23289_v6 = vmax.f32 %v10633_v38, 0.0  ;;  %v10677_v28 = vmax.f32 %v10634_v23, 0.0  ;;  %v23291_v58 = vmax.f32 %v10635_v52, 0.0 }
 0x5c2   :  { %26967 = vst [vmem:[#allocation103_spill] sm:$0xff] %v23287_v40  ;;  %v23293_v8 = vmax.f32 %v10636_v3, 0.0  ;;  %v23295_v20 = vmax.f32 %v10637_v24, 0.0  ;;  %v23297_v27 = vmax.f32 %v10638_v18, 0.0  ;;  %v23299_v51 = vmax.f32 %v10639_v39, 0.0 }
 0x5c3   :  { %v23301_v4 = vmax.f32 %v10640_v33, 0.0  ;;  %v23303_v0 = vmax.f32 %v10641_v12, 0.0  ;;  %v23305_v9 = vmax.f32 %v10642_v44, 0.0  ;;  %v23307_v2 = vmax.f32 %v10643_v11, 0.0 }
 0x5c4   :  { %v23309_v34 = vmax.f32 %v10644_v53, 0.0  ;;  %v23311_v31 = vmax.f32 %v10645_v13, 0.0  ;;  %v23313_v41 = vmax.f32 %v10646_v36, 0.0  ;;  %v23315_v50 = vmax.f32 %v10647_v26, 0.0 }
 0x5c5   :  { %26968 = vst [vmem:[#allocation100_spill] sm:$0xff] %v23301_v4  ;;  %v23317_v46 = vmax.f32 %v10648_v35, 0.0  ;;  %v23319_v32 = vmax.f32 %v10649_v42, 0.0  ;;  %v23321_v22 = vmax.f32 %v10650_v14, 0.0  ;;  %v23324_v30 = vmax.f32 %v10652_v49, 0.0  ;;  %v26970_v35 = vld [vmem:[#allocation6_spill] sm:$0xff] }
 0x5c6   :  { %v23326_v11 = vmax.f32 %v10653_v37, 0.0  ;;  %v23328_v53 = vmax.f32 %v10654_v17, 0.0  ;;  %v23330_v13 = vmax.f32 %v10655_v19, 0.0  ;;  %v23332_v38 = vmax.f32 %v10656_v48, 0.0 }
 0x5c7   :  { %v23334_v23 = vmax.f32 %v10657_v47, 0.0  ;;  %v23336_v52 = vmax.f32 %v10658_v15, 0.0  ;;  %v23338_v3 = vmax.f32 %v10659_v54, 0.0  ;;  %v23340_v24 = vmax.f32 %v10660_v7, 0.0 }
 0x5c8   :  { %v10759_v18 = vcombine.high %v10673_v56, %v10673_v56  ;;  %v23342_v39 = vmax.f32 %v10661_v63, 0.0  ;;  %v23344_v33 = vmax.f32 %v10662_v45, 0.0  ;;  %v23346_v12 = vmax.f32 %v10663_v1, 0.0 }
 0x5c9   :  { %26969 = vst [vmem:[#allocation106_spill] sm:$0xff] %v23336_v52  ;;  %v10776_v44 = vcombine.high %v10674_v62, %v10674_v62  ;;  %v23348_v36 = vmax.f32 %v10664_v29, 0.0  ;;  %v23350_v26 = vmax.f32 %v10665_v25, 0.0  ;;  %v23353_v42 = vrot.slane %v10673_v56, %v26970_v35 }
 0x5ca   :  { %v10793_v14 = vcombine.high %v10675_v57, %v10675_v57  ;;  %v23355_v49 = vmax.f32 %v10666_v61, 0.0  ;;  %v23358_v37 = vrot.slane %v10674_v62, %v26970_v35  ;;  %v23361_v17 = vrot.slane %v10675_v57, %v26970_v35 }
 0x5cb   :  { %v10810_v19 = vcombine.high %v23289_v6, %v23289_v6  ;;  %v23365_v48 = vmax.f32 %v10667_v16, 0.0  ;;  %v23367_v47 = vmax.f32 %v10668_v5, 0.0  ;;  %v23369_v15 = vmax.f32 %v10669_v43, 0.0 }
 0x5cc   :  { %v23372_v54 = vrot.slane %v10759_v18, %v26970_v35  ;;  %v23374_v7 = vmax.f32 %v10670_v55, 0.0  ;;  %v23376_v63 = vmax.f32 %v10671_v21, 0.0  ;;  %v23379_v45 = vrot.slane %v10776_v44, %v26970_v35 }
 0x5cd   :  { %v10826_v1 = vcombine.high %v10677_v28, %v10677_v28  ;;  %v23384_v25 = vrot.slane %v10793_v14, %v26970_v35  ;;  %v10843_v16 = vcombine.high %v23291_v58, %v23291_v58  ;;  %v23395_v55 = vrot.slane %v10810_v19, %v26970_v35 }
 0x5ce   :  { %v10876_v21 = vcombine.high %v23295_v20, %v23295_v20  ;;  %v23402_v62 = vrot.slane %v10677_v28, %v26970_v35  ;;  %v23406_v57 = vrot.slane %v23291_v58, %v26970_v35  ;;  %v10893_v18 = vcombine.high %v23297_v27, %v23297_v27 }
 0x5cf   :  { %26971 = vst [vmem:[#allocation104_spill] sm:$0xff] %v23395_v55  ;;  %v23413_v14 = vrot.slane %v10826_v1, %v26970_v35  ;;  %v10860_v19 = vcombine.high %v23293_v8, %v23293_v8  ;;  %v23419_v28 = vrot.slane %v23293_v8, %v26970_v35  ;;  %v23424_v5 = vrot.slane %v10843_v16, %v26970_v35 }
 0x5d0   :  { %26972 = vst [vmem:[#allocation345_spill] sm:$0xff] %v23402_v62  ;;  %v23428_v61 = vrot.slane %v23295_v20, %v26970_v35  ;;  %v10910_v1 = vcombine.high %v23299_v51, %v23299_v51  ;;  %v23435_v43 = vrot.slane %v10876_v21, %v26970_v35  ;;  %v23439_v8 = vrot.slane %v23297_v27, %v26970_v35 }
 0x5d1   :  { %26973 = vst [vmem:[#allocation110_spill] sm:$0xff] %v23413_v14  ;;  %v10927_v16 = vcombine.high %v23301_v4, %v23301_v4  ;;  %v23448_v29 = vrot.slane %v10893_v18, %v26970_v35  ;;  %v10943_v21 = vcombine.high %v23303_v0, %v23303_v0  ;;  %v23455_v27 = vrot.slane %v10860_v19, %v26970_v35 }
 0x5d2   :  { %v23461_v20 = vrot.slane %v23299_v51, %v26970_v35  ;;  %v23468_v59 = vrot.slane %v10910_v1, %v26970_v35  ;;  %v10960_v19 = vcombine.high %v23305_v9, %v23305_v9  ;;  %v23485_v1 = vrot.slane %v23303_v0, %v26970_v35 }
 0x5d3   :  { %26974 = vst [vmem:[#allocation114_spill] sm:$0xff] %v23448_v29  ;;  %v23479_v18 = vrot.slane %v10927_v16, %v26970_v35  ;;  %v23488_v40 = vrot.slane %v10943_v21, %v26970_v35  ;;  %v23492_v56 = vrot.slane %v23305_v9, %v26970_v35  ;;  %v10977_v16 = vcombine.high %v23307_v2, %v23307_v2 }
 0x5d4   :  { %26975 = vst [vmem:[#allocation109_spill] sm:$0xff] %v23461_v20  ;;  %26976 = vst [vmem:[#allocation419_spill] sm:$0xff] %v23468_v59  ;;  %v23500_v58 = vrot.slane %v23307_v2, %v26970_v35  ;;  %v10993_v0 = vcombine.high %v23309_v34, %v23309_v34  ;;  %v23507_v44 = vrot.slane %v10960_v19, %v26970_v35 }
 0x5d5   :  { %v11010_v9 = vcombine.high %v23311_v31, %v23311_v31  ;;  %v11027_v51 = vcombine.high %v23313_v41, %v23313_v41  ;;  %v23517_v2 = vrot.slane %v23309_v34, %v26970_v35  ;;  %v11044_v4 = vcombine.high %v23315_v50, %v23315_v50 }
 0x5d6   :  { %v11060_v19 = vcombine.high %v23317_v46, %v23317_v46  ;;  %v23531_v10 = vrot.slane %v23311_v31, %v26970_v35  ;;  %v23534_v34 = vrot.slane %v10977_v16, %v26970_v35  ;;  %v23539_v14 = vrot.slane %v10993_v0, %v26970_v35 }
 0x5d7   :  { %26977 = vst [vmem:[#allocation115_spill] sm:$0xff] %v23517_v2  ;;  %v11077_v21 = vcombine.high %v23319_v32, %v23319_v32  ;;  %v23546_v20 = vrot.slane %v11010_v9, %v26970_v35  ;;  %v23550_v31 = vrot.slane %v23313_v41, %v26970_v35  ;;  %v23553_v16 = vrot.slane %v11027_v51, %v26970_v35 }
 0x5d8   :  { %26978 = vst [vmem:[#allocation117_spill] sm:$0xff] %v23531_v10  ;;  %26979 = vst [vmem:[#allocation116_spill] sm:$0xff] %v23539_v14  ;;  %v23558_v29 = vrot.slane %v11044_v4, %v26970_v35  ;;  %v23562_v62 = vrot.slane %v23317_v46, %v26970_v35  ;;  %v23565_v9 = vrot.slane %v11060_v19, %v26970_v35  ;;  %v26981_v4 = vmax.f32 %v23284_v60, 0.0 }
 0x5d9   :  { %v23573_v59 = vrot.slane %v23319_v32, %v26970_v35  ;;  %v23581_v19 = vrot.slane %v11077_v21, %v26970_v35  ;;  %v11094_v41 = vcombine.high %v23321_v22, %v23321_v22  ;;  %v11119_v51 = vcombine.high %v23324_v30, %v23324_v30 }
 0x5da   :  { %v11110_v0 = vcombine.high %v26981_v4, %v26981_v4  ;;  %v23595_v46 = vrot.slane %v23321_v22, %v26970_v35  ;;  %v11136_v32 = vcombine.high %v23326_v11, %v23326_v11  ;;  %v23612_v22 = vrot.slane %v23324_v30, %v26970_v35 }
 0x5db   :  { %26980 = vst [vmem:[#allocation118_spill] sm:$0xff] %v23573_v59  ;;  %26982 = vst [vmem:[#allocation420_spill] sm:$0xff] %v23581_v19  ;;  %v11169_v21 = vcombine.high %v23330_v13, %v23330_v13  ;;  %v23619_v14 = vrot.slane %v11094_v41, %v26970_v35  ;;  %v23622_v2 = vrot.slane %v11119_v51, %v26970_v35 }
 0x5dc   :  { %26983 = vst [vmem:[#allocation120_spill] sm:$0xff] %v23595_v46  ;;  %v23608_v4 = vrot.slane %v11110_v0, %v26970_v35  ;;  %v23626_v0 = vrot.slane %v23326_v11, %v26970_v35  ;;  %v11153_v60 = vcombine.high %v23328_v53, %v23328_v53  ;;  %v23634_v59 = vrot.slane %v23328_v53, %v26970_v35 }
 0x5dd   :  { %26984 = vst [vmem:[#allocation125_spill] sm:$0xff] %v23619_v14  ;;  %26985 = vst [vmem:[#allocation121_spill] sm:$0xff] %v23622_v2  ;;  %v11186_v41 = vcombine.high %v23332_v38, %v23332_v38  ;;  %v23639_v51 = vrot.slane %v11136_v32, %v26970_v35  ;;  %v23643_v11 = vrot.slane %v23330_v13, %v26970_v35 }
 0x5de   :  { %v11203_v30 = vcombine.high %v23334_v23, %v23334_v23  ;;  %v11220_v10 = vcombine.high %v23336_v52, %v23336_v52  ;;  %v23654_v46 = vrot.slane %v11169_v21, %v26970_v35  ;;  %v23658_v32 = vrot.slane %v23332_v38, %v26970_v35 }
 0x5df   :  { %26986 = vst [vmem:[#allocation375_spill] sm:$0xff] %v23643_v11  ;;  %v23666_v55 = vrot.slane %v23334_v23, %v26970_v35  ;;  %v11236_v14 = vcombine.high %v23338_v3, %v23338_v3  ;;  %v23671_v21 = vrot.slane %v11153_v60, %v26970_v35  ;;  %v23676_v53 = vrot.slane %v11186_v41, %v26970_v35 }
 0x5e0   :  { %26987 = vst [vmem:[#allocation130_spill] sm:$0xff] %v23654_v46  ;;  %26988 = vst [vmem:[#allocation128_spill] sm:$0xff] %v23658_v32  ;;  %v11253_v13 = vcombine.high %v23340_v24, %v23340_v24  ;;  %v23685_v2 = vrot.slane %v11203_v30, %v26970_v35  ;;  %v23688_v60 = vrot.slane %v11220_v10, %v26970_v35 }
 0x5e1   :  { %26989 = vst [vmem:[#allocation136_spill] sm:$0xff] %v23671_v21  ;;  %v23696_v21 = vrot.slane %v23338_v3, %v26970_v35  ;;  %v11286_v19 = vcombine.high %v23344_v33, %v23344_v33  ;;  %v23703_v23 = vrot.slane %v11236_v14, %v26970_v35  ;;  %v23707_v10 = vrot.slane %v23340_v24, %v26970_v35 }
 0x5e2   :  { %v11270_v41 = vcombine.high %v23342_v39, %v23342_v39  ;;  %v23716_v32 = vrot.slane %v11253_v13, %v26970_v35  ;;  %v23720_v14 = vrot.slane %v23342_v39, %v26970_v35  ;;  %v23728_v46 = vrot.slane %v23344_v33, %v26970_v35 }
 0x5e3   :  { %26990 = vst [vmem:[#allocation421_spill] sm:$0xff] %v23703_v23  ;;  %26991 = vst [vmem:[#allocation134_spill] sm:$0xff] %v23707_v10  ;;  %v11303_v38 = vcombine.high %v23346_v12, %v23346_v12  ;;  %v23735_v3 = vrot.slane %v11286_v19, %v26970_v35  ;;  %v23739_v39 = vrot.slane %v23346_v12, %v26970_v35 }
 0x5e4   :  { %26992 = vst [vmem:[#allocation135_spill] sm:$0xff] %v23716_v32  ;;  %26993 = vst [vmem:[#allocation138_spill] sm:$0xff] %v23720_v14  ;;  %v11320_v24 = vcombine.high %v23348_v36, %v23348_v36  ;;  %v23748_v11 = vrot.slane %v11270_v41, %v26970_v35  ;;  %v11337_v19 = vcombine.high %v23350_v26, %v23350_v26 }
 0x5e5   :  { %26994 = vst [vmem:[#allocation137_spill] sm:$0xff] %v23728_v46  ;;  %26995 = vst [vmem:[#allocation140_spill] sm:$0xff] %v23735_v3  ;;  %v11353_v52 = vcombine.high %v23355_v49, %v23355_v49  ;;  %v11370_v33 = vcombine.high %v23365_v48, %v23365_v48  ;;  %v23763_v41 = vrot.slane %v11303_v38, %v26970_v35 }
 0x5e6   :  { %26996 = vst [vmem:[#allocation142_spill] sm:$0xff] %v23739_v39  ;;  %26997 = vst [vmem:[#allocation145_spill] sm:$0xff] %v23748_v11  ;;  %v23767_v11 = vrot.slane %v23348_v36, %v26970_v35  ;;  %v11403_v13 = vcombine.high %v23369_v15, %v23369_v15  ;;  %v11318_v14 = vcombine.high %v23739_v39, %v23739_v39 }
 0x5e7   :  { %v23776_v32 = vrot.slane %v11320_v24, %v26970_v35  ;;  %v11420_v38 = vcombine.high %v23374_v7, %v23374_v7  ;;  %v23781_v30 = vrot.slane %v11337_v19, %v26970_v35  ;;  %v23785_v36 = vrot.slane %v23355_v49, %v26970_v35 }
 0x5e8   :  { %26998 = vst [vmem:[#allocation164_spill] sm:$0xff] %v23767_v11  ;;  %v23789_v10 = vrot.slane %v23365_v48, %v26970_v35  ;;  %v11437_v12 = vcombine.high %v23376_v63, %v23376_v63  ;;  %v23794_v24 = vrot.slane %v11353_v52, %v26970_v35  ;;  %v23797_v39 = vrot.slane %v11370_v33, %v26970_v35 }
 0x5e9   :  { %26999 = vst [vmem:[#allocation150_spill] sm:$0xff] %v23776_v32  ;;  %27000 = vst [vmem:[#allocation147_spill] sm:$0xff] %v23785_v36  ;;  %v11387_v19 = vcombine.high %v23367_v47, %v23367_v47  ;;  %v23803_v49 = vrot.slane %v23367_v47, %v26970_v35  ;;  %v11319_v48 = vcombine.high %v23763_v41, %v23763_v41 }
 0x5ea   :  { %27001 = vst [vmem:[#allocation152_spill] sm:$0xff] %v23794_v24  ;;  %v11344_v3 = vrot.slane %v23350_v26, %v26970_v35  ;;  %v23811_v52 = vrot.slane %v23369_v15, %v26970_v35  ;;  %v23814_v33 = vrot.slane %v11403_v13, %v26970_v35  ;;  %v11335_v46 = vcombine.high %v23767_v11, %v23767_v11 }
 0x5eb   :  { %27002 = vst [vmem:[#allocation149_spill] sm:$0xff] %v23803_v49  ;;  %v11336_v47 = vcombine.high %v23776_v32, %v23776_v32  ;;  %v23821_v23 = vrot.slane %v11420_v38, %v26970_v35  ;;  %v23825_v41 = vrot.slane %v23376_v63, %v26970_v35  ;;  %v11385_v13 = vcombine.high %v23789_v10, %v23789_v10 }
 0x5ec   :  { %v23834_v11 = vrot.slane %v11437_v12, %v26970_v35  ;;  %v11386_v32 = vcombine.high %v23797_v39, %v23797_v39  ;;  %v23841_v63 = vrot.slane %v11387_v19, %v26970_v35  ;;  %v11418_v15 = vcombine.high %v23811_v52, %v23811_v52 }
 0x5ed   :  { %27003 = vst [vmem:[#allocation425_spill] sm:$0xff] %v23821_v23  ;;  %27004 = vst [vmem:[#allocation154_spill] sm:$0xff] %v23825_v41  ;;  %v11419_v10 = vcombine.high %v23814_v33, %v23814_v33  ;;  %v23851_v12 = vrot.slane %v23374_v7, %v26970_v35  ;;  %v27008_v38 = vcombine.high %v23379_v45, %v23379_v45  ;;  %v27057_v23 = vld [vmem:[#allocation142_spill] sm:$0xff] }
 0x5ee   :  { %27005 = vst [vmem:[#allocation151_spill] sm:$0xff] %v23834_v11  ;;  %27006 = vst [vmem:[#allocation167_spill] sm:$0xff] %v23841_v63  ;;  %v27009_v63 = vcombine.high %v23353_v42, %v23353_v42  ;;  %v27010_v7 = vcombine.high %v23361_v17, %v23361_v17  ;;  %v27012_v26 = vcombine.high %v23384_v25, %v23384_v25 }
 0x5ef   :  { %27007 = vst [vmem:[#allocation169_spill] sm:$0xff] %v23851_v12  ;;  %v23857_v36 = vmax.f32 %v23353_v42, %v27008_v38  ;;  %v27011_v38 = vcombine.high %v23372_v54, %v23372_v54  ;;  %v27015_v45 = vcombine.high %v23406_v57, %v23406_v57  ;;  %v27019_v57 = vcombine.high %v23419_v28, %v23419_v28 }
 0x5f0   :  { %v11606_v24 = vmax.f32 %v27009_v63, %v23361_v17  ;;  %v23871_v12 = vmax.f32 %v23372_v54, %v27010_v7  ;;  %v23883_v42 = vmax.f32 %v23358_v37, %v27012_v26  ;;  %v27013_v17 = vrot.slane %v23289_v6, %v26970_v35 }
 0x5f1   :  { %v11608_v19 = vmax.f32 %v27011_v38, %v23384_v25  ;;  %v27014_v63 = vcombine.high %v23358_v37, %v23358_v37  ;;  %v11611_v11 = vmax.f32 %v27015_v45, %v23428_v61  ;;  %v27016_v54 = vcombine.high %v23428_v61, %v23428_v61 }
 0x5f2   :  { %v27017_v26 = vcombine.high %v23424_v5, %v23424_v5  ;;  %v27018_v37 = vcombine.high %v23435_v43, %v23435_v43  ;;  %v11615_v45 = vmax.f32 %v27019_v57, %v23439_v8  ;;  %v27020_v61 = vcombine.high %v23439_v8, %v23439_v8 }
 0x5f3   :  { %v11610_v7 = vmax.f32 %v27014_v63, %v27013_v17  ;;  %v23899_v25 = vmax.f32 %v23424_v5, %v27016_v54  ;;  %v27021_v5 = vcombine.high %v23492_v56, %v23492_v56  ;;  %v27024_v8 = vcombine.high %v23485_v1, %v23485_v1 }
 0x5f4   :  { %v11613_v6 = vmax.f32 %v27017_v26, %v23435_v43  ;;  %v23909_v38 = vmax.f32 %v23419_v28, %v27018_v37  ;;  %v11616_v17 = vmax.f32 %v23455_v27, %v27020_v61  ;;  %v27022_v43 = vcombine.high %v23479_v18, %v23479_v18 }
 0x5f5   :  { %v23923_v63 = vmax.f32 %v23479_v18, %v27021_v5  ;;  %v27023_v28 = vcombine.high %v23507_v44, %v23507_v44  ;;  %v11620_v27 = vmax.f32 %v27024_v8, %v23500_v58  ;;  %v27025_v56 = vcombine.high %v23500_v58, %v23500_v58 }
 0x5f6   :  { %v11618_v54 = vmax.f32 %v27022_v43, %v23507_v44  ;;  %v11646_v57 = vmax.f32 %v11318_v14, %v11344_v3  ;;  %v27026_v18 = vcombine.high %v23488_v40, %v23488_v40  ;;  %v27027_v61 = vcombine.high %v23546_v20, %v23546_v20 }
 0x5f7   :  { %v23933_v26 = vmax.f32 %v23485_v1, %v27023_v28  ;;  %v23943_v37 = vmax.f32 %v23488_v40, %v27025_v56  ;;  %v27028_v1 = vcombine.high %v23558_v29, %v23558_v29  ;;  %v27029_v58 = vcombine.high %v23550_v31, %v23550_v31 }
 0x5f8   :  { %v11622_v44 = vmax.f32 %v27026_v18, %v23534_v34  ;;  %v11623_v5 = vmax.f32 %v27027_v61, %v23558_v29  ;;  %v27030_v40 = vcombine.high %v23562_v62, %v23562_v62  ;;  %v27031_v20 = vcombine.high %v23553_v16, %v23553_v16 }
 0x5f9   :  { %v23957_v43 = vmax.f32 %v23550_v31, %v27028_v1  ;;  %v11625_v3 = vmax.f32 %v27029_v58, %v23562_v62  ;;  %v27032_v29 = vcombine.high %v23565_v9, %v23565_v9  ;;  %v27033_v28 = vrot.slane %v23315_v50, %v26970_v35  ;;  %v27039_v1 = vld [vmem:[#allocation121_spill] sm:$0xff] }
 0x5fa   :  { %v23967_v34 = vmax.f32 %v23553_v16, %v27030_v40  ;;  %v11627_v14 = vmax.f32 %v27031_v20, %v23565_v9  ;;  %v27034_v31 = vcombine.high %v23626_v0, %v23626_v0  ;;  %v27035_v56 = vcombine.high %v23608_v4, %v23608_v4  ;;  %v27040_v40 = vld [vmem:[#allocation136_spill] sm:$0xff] }
 0x5fb   :  { %v23979_v8 = vmax.f32 %v27033_v28, %v27032_v29  ;;  %v27036_v18 = vcombine.high %v23639_v51, %v23639_v51  ;;  %v27037_v50 = vcombine.high %v23612_v22, %v23612_v22  ;;  %v27038_v0 = vcombine.high %v23634_v59, %v23634_v59 }
 0x5fc   :  { %v23985_v62 = vmax.f32 %v23608_v4, %v27034_v31  ;;  %v11630_v16 = vmax.f32 %v27035_v56, %v23639_v51  ;;  %v27041_v4 = vcombine.high %v27039_v1, %v27039_v1  ;;  %v27042_v51 = vcombine.high %v23676_v53, %v23676_v53 }
 0x5fd   :  { %v23995_v9 = vmax.f32 %v23612_v22, %v27036_v18  ;;  %v11632_v61 = vmax.f32 %v27037_v50, %v23634_v59  ;;  %v24005_v58 = vmax.f32 %v27039_v1, %v27038_v0  ;;  %v27043_v22 = vcombine.high %v23688_v60, %v23688_v60  ;;  %v27046_v50 = vld [vmem:[#allocation421_spill] sm:$0xff]  ;;  %v27049_v1 = vld [vmem:[#allocation106_spill] sm:$0xff] }
 0x5fe   :  { %v11634_v20 = vmax.f32 %v27041_v4, %v27040_v40  ;;  %v11635_v29 = vmax.f32 %v27042_v51, %v23688_v60  ;;  %v27044_v59 = vcombine.high %v23666_v55, %v23666_v55  ;;  %v27045_v56 = vcombine.high %v23696_v21, %v23696_v21 }
 0x5ff   :  { %v24019_v28 = vmax.f32 %v23666_v55, %v27043_v22  ;;  %v27047_v53 = vcombine.high %v23685_v2, %v23685_v2  ;;  %v27048_v60 = vcombine.high %v27046_v50, %v27046_v50  ;;  %v27050_v40 = vrot.slane %v27049_v1, %v26970_v35  ;;  %v27051_v55 = vld [vmem:[#allocation137_spill] sm:$0xff] }
 0x600   :  { %v11637_v31 = vmax.f32 %v27044_v59, %v23696_v21  ;;  %v24029_v18 = vmax.f32 %v23685_v2, %v27045_v56  ;;  %v24044_v51 = vmax.f32 %v27051_v55, %v11319_v48  ;;  %v27052_v21 = vld [vmem:[#allocation164_spill] sm:$0xff]  ;;  %v27053_v22 = vcombine.high %v27051_v55, %v27051_v55  ;;  %v27055_v2 = vld [vmem:[#allocation150_spill] sm:$0xff] }
 0x601   :  { %v11639_v0 = vmax.f32 %v27047_v53, %v27046_v50  ;;  %v24041_v4 = vmax.f32 %v27050_v40, %v27048_v60  ;;  %v27054_v56 = vld [vmem:[#allocation140_spill] sm:$0xff]  ;;  %v24058_v1 = vmax.f32 %v27057_v23, %v11336_v47  ;;  %v11647_v60 = vmax.f32 %v11385_v13, %v23811_v52  ;;  %v27062_v47 = vld [vmem:[#allocation110_spill] sm:$0xff] }
 0x602   :  { %v11642_v59 = vmax.f32 %v27053_v22, %v27052_v21  ;;  %v24051_v41 = vmax.f32 %v27054_v56, %v11335_v46  ;;  %v27056_v50 = vcombine.high %v27054_v56, %v27054_v56  ;;  %v24062_v48 = vmax.f32 %v23797_v39, %v11418_v15  ;;  %v27058_v46 = vld [vmem:[#allocation104_spill] sm:$0xff]  ;;  %v27064_v13 = vld [vmem:[#allocation114_spill] sm:$0xff] }
 0x603   :  { %v11649_v40 = vmax.f32 %v11386_v32, %v23814_v33  ;;  %v24066_v55 = vmax.f32 %v23803_v49, %v11419_v10  ;;  %v11653_v21 = vmax.f32 %v23857_v36, %v27058_v46  ;;  %v27059_v22 = vcombine.high %v27058_v46, %v27058_v46  ;;  %v27108_v49 = vld [vmem:[#allocation154_spill] sm:$0xff] }
 0x604   :  { %v11644_v53 = vmax.f32 %v27056_v50, %v27055_v2  ;;  %v27060_v2 = vld [vmem:[#allocation345_spill] sm:$0xff]  ;;  %v11657_v32 = vmax.f32 %v23883_v42, %v27062_v47  ;;  %v27063_v33 = vcombine.high %v27062_v47, %v27062_v47  ;;  %v27065_v36 = vcombine.high %v27064_v13, %v27064_v13 }
 0x605   :  { %v11654_v56 = vmax.f32 %v11606_v24, %v27059_v22  ;;  %v11655_v23 = vmax.f32 %v23871_v12, %v27060_v2  ;;  %v27061_v52 = vcombine.high %v27060_v2, %v27060_v2  ;;  %v27066_v50 = vld [vmem:[#allocation109_spill] sm:$0xff]  ;;  %v27068_v22 = vld [vmem:[#allocation419_spill] sm:$0xff] }
 0x606   :  { %v11658_v15 = vmax.f32 %v11610_v7, %v27063_v33  ;;  %v11659_v10 = vmax.f32 %v11611_v11, %v27065_v36  ;;  %v11660_v24 = vmax.f32 %v23899_v25, %v27066_v50  ;;  %v27067_v12 = vcombine.high %v27066_v50, %v27066_v50  ;;  %v27072_v33 = vld [vmem:[#allocation115_spill] sm:$0xff] }
 0x607   :  { %v11656_v39 = vmax.f32 %v11608_v19, %v27061_v52  ;;  %v11662_v19 = vmax.f32 %v23909_v38, %v27068_v22  ;;  %v27069_v42 = vcombine.high %v27068_v22, %v27068_v22  ;;  %v27070_v52 = vld [vmem:[#allocation100_spill] sm:$0xff]  ;;  %v11665_v25 = vmax.f32 %v23923_v63, %v27072_v33 }
 0x608   :  { %v11661_v46 = vmax.f32 %v11613_v6, %v27067_v12  ;;  %v27071_v11 = vrot.slane %v27070_v52, %v26970_v35  ;;  %v27073_v6 = vcombine.high %v27072_v33, %v27072_v33  ;;  %v27074_v38 = vcombine.high %v23781_v30, %v23781_v30  ;;  %v27078_v63 = vld [vmem:[#allocation152_spill] sm:$0xff]  ;;  %v27082_v33 = vld [vmem:[#allocation118_spill] sm:$0xff] }
 0x609   :  { %v11663_v2 = vmax.f32 %v11615_v45, %v27069_v42  ;;  %v27075_v45 = vld [vmem:[#allocation116_spill] sm:$0xff]  ;;  %v27079_v52 = vcombine.high %v27078_v63, %v27078_v63 }
 0x60a   :  { %v11664_v47 = vmax.f32 %v11616_v17, %v27071_v11  ;;  %v11666_v13 = vmax.f32 %v11618_v54, %v27073_v6  ;;  %v24109_v36 = vmax.f32 %v11642_v59, %v27074_v38  ;;  %v11667_v50 = vmax.f32 %v23933_v26, %v27075_v45  ;;  %v27077_v17 = vld [vmem:[#allocation117_spill] sm:$0xff]  ;;  %v27084_v38 = vld [vmem:[#allocation420_spill] sm:$0xff] }
 0x60b   :  { %v27076_v12 = vcombine.high %v27075_v45, %v27075_v45  ;;  %v11669_v42 = vmax.f32 %v23943_v37, %v27077_v17  ;;  %v24121_v11 = vmax.f32 %v11646_v57, %v27079_v52  ;;  %v27081_v54 = vcombine.high %v27077_v17, %v27077_v17  ;;  %v27088_v17 = vld [vmem:[#allocation125_spill] sm:$0xff] }
 0x60c   :  { %v27083_v6 = vcombine.high %v27082_v33, %v27082_v33  ;;  %v11672_v45 = vmax.f32 %v23957_v43, %v27084_v38 }
 0x60d   :  { %v11668_v22 = vmax.f32 %v11620_v27, %v27076_v12  ;;  %27080 = vst [vmem:[#allocation181_spill] sm:$0xff] %v24121_v11  ;;  %v11670_v59 = vmax.f32 %v11622_v44, %v27081_v54  ;;  %v27085_v27 = vcombine.high %v27084_v38, %v27084_v38  ;;  %v27086_v12 = vld [vmem:[#allocation120_spill] sm:$0xff]  ;;  %v27089_v54 = vld [vmem:[#allocation375_spill] sm:$0xff]  ;;  %v27101_v44 = vld [vmem:[#allocation145_spill] sm:$0xff] }
 0x60e   :  { %v11671_v26 = vmax.f32 %v11623_v5, %v27083_v6  ;;  %v11674_v7 = vmax.f32 %v23967_v34, %v27086_v12  ;;  %v27087_v57 = vcombine.high %v27086_v12, %v27086_v12  ;;  %v11677_v5 = vmax.f32 %v23985_v62, %v27089_v54  ;;  %v27091_v6 = vld [vmem:[#allocation130_spill] sm:$0xff] }
 0x60f   :  { %v11673_v37 = vmax.f32 %v11625_v3, %v27085_v27  ;;  %v27090_v43 = vcombine.high %v27089_v54, %v27089_v54  ;;  %v11679_v3 = vmax.f32 %v23995_v9, %v27091_v6  ;;  %v27092_v34 = vcombine.high %v27091_v6, %v27091_v6  ;;  %v27093_v27 = vld [vmem:[#allocation128_spill] sm:$0xff]  ;;  %v27095_v62 = vld [vmem:[#allocation134_spill] sm:$0xff] }
 0x610   :  { %v11675_v52 = vmax.f32 %v11627_v14, %v27087_v57  ;;  %v27094_v12 = vcombine.high %v27093_v27, %v27093_v27  ;;  %v27096_v54 = vcombine.high %v27095_v62, %v27095_v62  ;;  %v27102_v62 = vld [vmem:[#allocation147_spill] sm:$0xff] }
 0x611   :  { %v11678_v33 = vmax.f32 %v11630_v16, %v27090_v43  ;;  %v24151_v38 = vmax.f32 %v11632_v61, %v27092_v34  ;;  %v27097_v43 = vld [vmem:[#allocation135_spill] sm:$0xff]  ;;  %v27099_v34 = vld [vmem:[#allocation138_spill] sm:$0xff]  ;;  %v27103_v9 = vcombine.high %v27102_v62, %v27102_v62 }
 0x612   :  { %v24158_v57 = vmax.f32 %v11634_v20, %v27094_v12  ;;  %v24163_v16 = vmax.f32 %v11635_v29, %v27096_v54  ;;  %v27098_v61 = vcombine.high %v27097_v43, %v27097_v43  ;;  %v27100_v20 = vcombine.high %v27099_v34, %v27099_v34 }
 0x613   :  { %v24186_v35 = vmax.f32 %v11644_v53, %v27103_v9 }
 0x614   :  { %v24170_v6 = vmax.f32 %v11637_v31, %v27098_v61  ;;  %v24177_v12 = vmax.f32 %v11639_v0, %v27100_v20  ;;  %v27105_v31 = vld [vmem:[#allocation339_spill] sm:$0xff] }
 0x615   :  { %27104 = vst [vmem:[#allocation179_spill] sm:$0xff] %v24186_v35  ;;  %v24189_v61 = vrot.slane %v11653_v21, %v27105_v31  ;;  %v24192_v14 = vrot.slane %v11654_v56, %v27105_v31  ;;  %v24195_v0 = vrot.slane %v11655_v23, %v27105_v31  ;;  %v24198_v20 = vrot.slane %v11656_v39, %v27105_v31  ;;  %v27106_v56 = vld [vmem:[#allocation425_spill] sm:$0xff] }
 0x616   :  { %v24201_v29 = vrot.slane %v11657_v32, %v27105_v31  ;;  %v24204_v54 = vrot.slane %v11658_v15, %v27105_v31  ;;  %v24207_v53 = vrot.slane %v11659_v10, %v27105_v31  ;;  %v27107_v9 = vcombine.high %v27106_v56, %v27106_v56  ;;  %v27110_v10 = vld [vmem:[#allocation151_spill] sm:$0xff] }
 0x617   :  { %v24219_v32 = vrot.slane %v11660_v24, %v27105_v31  ;;  %v27109_v15 = vcombine.high %v27108_v49, %v27108_v49  ;;  %v24229_v21 = vrot.slane %v11661_v46, %v27105_v31  ;;  %v24267_v56 = vrot.slane %v11667_v50, %v27105_v31 }
 0x618   :  { %v24214_v23 = vmax.f32 %v11647_v60, %v27107_v9  ;;  %v24232_v60 = vrot.slane %v11662_v19, %v27105_v31  ;;  %v24254_v9 = vrot.slane %v11664_v47, %v27105_v31  ;;  %v24270_v24 = vrot.slane %v11668_v22, %v27105_v31 }
 0x619   :  { %v24224_v11 = vmax.f32 %v11649_v40, %v27109_v15  ;;  %v24241_v40 = vrot.slane %v11663_v2, %v27105_v31  ;;  %v24257_v2 = vrot.slane %v11665_v25, %v27105_v31  ;;  %v24260_v15 = vrot.slane %v11666_v13, %v27105_v31 }
 0x61a   :  { %v24275_v25 = vrot.slane %v11669_v42, %v27105_v31  ;;  %v24278_v13 = vrot.slane %v11670_v59, %v27105_v31  ;;  %v24281_v46 = vrot.slane %v11671_v26, %v27105_v31  ;;  %v24284_v19 = vrot.slane %v11672_v45, %v27105_v31 }
 0x61b   :  { %27111 = vst [vmem:[#allocation184_spill] sm:$0xff] %v24260_v15  ;;  %v24287_v50 = vrot.slane %v11673_v37, %v27105_v31  ;;  %v24290_v22 = vrot.slane %v11674_v7, %v27105_v31  ;;  %v24293_v47 = vrot.slane %v11675_v52, %v27105_v31  ;;  %v11860_v26 = vcombine.high %v24260_v15, %v24260_v15 }
 0x61c   :  { %27112 = vst [vmem:[#allocation428_spill] sm:$0xff] %v24275_v25  ;;  %27113 = vst [vmem:[#allocation182_spill] sm:$0xff] %v24284_v19  ;;  %v24302_v45 = vrot.slane %v11677_v5, %v27105_v31  ;;  %v11876_v7 = vcombine.high %v24270_v24, %v24270_v24  ;;  %v24309_v52 = vrot.slane %v11678_v33, %v27105_v31 }
 0x61d   :  { %27114 = vst [vmem:[#allocation175_spill] sm:$0xff] %v24293_v47  ;;  %v24312_v42 = vrot.slane %v11679_v3, %v27105_v31  ;;  %v11884_v59 = vcombine.high %v24275_v25, %v24275_v25  ;;  %v11900_v5 = vcombine.high %v24281_v46, %v24281_v46  ;;  %v27116_v37 = vmax.f32 %v23979_v8, %v27088_v17 }
 0x61e   :  { %27115 = vst [vmem:[#allocation187_spill] sm:$0xff] %v24309_v52  ;;  %v11908_v33 = vcombine.high %v24284_v19, %v24284_v19  ;;  %v11924_v15 = vcombine.high %v24290_v22, %v24290_v22  ;;  %v11948_v25 = vcombine.high %v24302_v45, %v24302_v45  ;;  %v11971_v8 = vrot.slane %v24151_v38, %v27105_v31 }
 0x61f   :  { %v24324_v39 = vrot.slane %v27116_v37, %v27105_v31  ;;  %v27118_v17 = vmax.f32 %v24005_v58, %v27093_v27  ;;  %v24346_v3 = vrot.slane %v24158_v57, %v27105_v31  ;;  %v11995_v47 = vrot.slane %v24163_v16, %v27105_v31 }
 0x620   :  { %v27120_v38 = vmax.f32 %v24019_v28, %v27097_v43  ;;  %v24362_v27 = vrot.slane %v24170_v6, %v27105_v31  ;;  %v27122_v57 = vmax.f32 %v24029_v18, %v27099_v34  ;;  %v24370_v35 = vrot.slane %v24177_v12, %v27105_v31  ;;  %v27128_v12 = vld [vmem:[#allocation179_spill] sm:$0xff] }
 0x621   :  { %27117 = vst [vmem:[#allocation185_spill] sm:$0xff] %v24324_v39  ;;  %v24342_v37 = vrot.slane %v27118_v17, %v27105_v31  ;;  %v11956_v39 = vcombine.high %v24309_v52, %v24309_v52  ;;  %v27124_v16 = vmax.f32 %v24041_v4, %v27101_v44  ;;  %v27125_v43 = vmax.f32 %v24044_v51, %v23781_v30 }
 0x622   :  { %v24358_v58 = vrot.slane %v27120_v38, %v27105_v31  ;;  %v12019_v17 = vrot.slane %v27122_v57, %v27105_v31  ;;  %27123 = vst [vmem:[#allocation189_spill] sm:$0xff] %v24370_v35  ;;  %v24384_v38 = vrot.slane %v24109_v36, %v27105_v31  ;;  %v27127_v18 = vmax.f32 %v24051_v41, %v27102_v62 }
 0x623   :  { %27119 = vst [vmem:[#allocation190_spill] sm:$0xff] %v24342_v37  ;;  %v24376_v28 = vrot.slane %v27124_v16, %v27105_v31  ;;  %v12043_v6 = vrot.slane %v27125_v43, %v27105_v31  ;;  %v12067_v57 = vrot.slane %v27128_v12, %v27105_v31  ;;  %v11972_v4 = vcombine.high %v11971_v8, %v11971_v8 }
 0x624   :  { %27121 = vst [vmem:[#allocation186_spill] sm:$0xff] %v24358_v58  ;;  %27126 = vst [vmem:[#allocation193_spill] sm:$0xff] %v24384_v38  ;;  %v12059_v34 = vrot.slane %v27127_v18, %v27105_v31  ;;  %v11980_v44 = vcombine.high %v24342_v37, %v24342_v37  ;;  %v27129_v51 = vmax.f32 %v24058_v1, %v27078_v63 }
 0x625   :  { %v11996_v16 = vcombine.high %v11995_v47, %v11995_v47  ;;  %v12004_v41 = vcombine.high %v24358_v58, %v24358_v58  ;;  %v12091_v62 = vrot.slane %v24214_v23, %v27105_v31  ;;  %v27131_v43 = vmax.f32 %v24062_v48, %v27108_v49  ;;  %v27133_v48 = vld [vmem:[#allocation181_spill] sm:$0xff] }
 0x626   :  { %v24400_v36 = vrot.slane %v27129_v51, %v27105_v31  ;;  %v12020_v30 = vcombine.high %v12019_v17, %v12019_v17  ;;  %v12028_v1 = vcombine.high %v24370_v35, %v24370_v35  ;;  %v12044_v51 = vcombine.high %v12043_v6, %v12043_v6 }
 0x627   :  { %v24410_v18 = vrot.slane %v27131_v43, %v27105_v31  ;;  %v12052_v23 = vcombine.high %v24384_v38, %v24384_v38  ;;  %v12060_v58 = vcombine.high %v12059_v34, %v12059_v34  ;;  %v12068_v37 = vcombine.high %v12067_v57, %v12067_v57 }
 0x628   :  { %27130 = vst [vmem:[#allocation192_spill] sm:$0xff] %v24400_v36  ;;  %v24424_v43 = vrot.slane %v27133_v48, %v27105_v31  ;;  %v24428_v12 = vrot.slane %v24224_v11, %v27105_v31  ;;  %v27136_v63 = vmax.f32 %v24066_v55, %v27110_v10  ;;  %v12092_v38 = vcombine.high %v12091_v62, %v12091_v62 }
 0x629   :  { %27132 = vst [vmem:[#allocation195_spill] sm:$0xff] %v24410_v18  ;;  %v27138_v49 = vcombine.high %v24189_v61, %v24189_v61  ;;  %v27139_v36 = vcombine.high %v24198_v20, %v24198_v20  ;;  %v27140_v55 = vcombine.high %v24192_v14, %v24192_v14  ;;  %v27141_v10 = vcombine.high %v24201_v29, %v24201_v29 }
 0x62a   :  { %27134 = vst [vmem:[#allocation203_spill] sm:$0xff] %v24424_v43  ;;  %27135 = vst [vmem:[#allocation200_spill] sm:$0xff] %v24428_v12  ;;  %v24434_v35 = vrot.slane %v27136_v63, %v27105_v31  ;;  %v12254_v43 = vmax.f32 %v12052_v23, %v12059_v34  ;;  %v24484_v19 = vmax.f32 %v24290_v22, %v11924_v15 }
 0x62b   :  { %v12229_v48 = vmax.f32 %v24189_v61, %v27138_v49  ;;  %v12231_v11 = vmax.f32 %v24198_v20, %v27139_v36  ;;  %v12230_v63 = vmax.f32 %v27140_v55, %v24195_v0  ;;  %v12232_v52 = vmax.f32 %v27141_v10, %v24204_v54 }
 0x62c   :  { %27137 = vst [vmem:[#allocation205_spill] sm:$0xff] %v24434_v35  ;;  %v27142_v35 = vcombine.high %v24232_v60, %v24232_v60  ;;  %v12238_v49 = vmax.f32 %v11860_v26, %v24267_v56  ;;  %v27143_v20 = vcombine.high %v24207_v53, %v24207_v53  ;;  %v27144_v55 = vcombine.high %v24219_v32, %v24219_v32 }
 0x62d   :  { %v27145_v10 = vcombine.high %v24241_v40, %v24241_v40  ;;  %v12239_v26 = vmax.f32 %v24270_v24, %v11876_v7  ;;  %v24487_v34 = vmax.f32 %v24302_v45, %v11948_v25  ;;  %v12263_v23 = vmax.f32 %v12231_v11, %v24201_v29  ;;  %v27157_v11 = vld [vmem:[#allocation186_spill] sm:$0xff] }
 0x62e   :  { %v12235_v61 = vmax.f32 %v24232_v60, %v27142_v35  ;;  %v12233_v36 = vmax.f32 %v24207_v53, %v27143_v20  ;;  %v12234_v12 = vmax.f32 %v27144_v55, %v24229_v21  ;;  %v27146_v35 = vcombine.high %v24257_v2, %v24257_v2 }
 0x62f   :  { %v12236_v18 = vmax.f32 %v27145_v10, %v24254_v9  ;;  %v12240_v53 = vmax.f32 %v11884_v59, %v24278_v13  ;;  %v24478_v20 = vmax.f32 %v24281_v46, %v11900_v5  ;;  %v24481_v55 = vmax.f32 %v11908_v33, %v24287_v50  ;;  %v27151_v33 = vld [vmem:[#allocation428_spill] sm:$0xff] }
 0x630   :  { %v12237_v60 = vmax.f32 %v24257_v2, %v27146_v35  ;;  %v12246_v2 = vmax.f32 %v11956_v39, %v24312_v42  ;;  %v12247_v10 = vmax.f32 %v11971_v8, %v11972_v4  ;;  %v24492_v24 = vmax.f32 %v12235_v61, %v24241_v40  ;;  %v27158_v61 = vld [vmem:[#allocation189_spill] sm:$0xff] }
 0x631   :  { %v27147_v46 = vcombine.high %v24267_v56, %v24267_v56  ;;  %v12248_v7 = vmax.f32 %v11980_v44, %v24346_v3  ;;  %v12261_v15 = vmax.f32 %v12229_v48, %v24192_v14  ;;  %v27148_v25 = vcombine.high %v24195_v0, %v24195_v0 }
 0x632   :  { %v27149_v29 = vcombine.high %v24204_v54, %v24204_v54  ;;  %v12249_v45 = vmax.f32 %v11995_v47, %v11996_v16  ;;  %v12250_v40 = vmax.f32 %v12004_v41, %v24362_v27  ;;  %v27150_v56 = vcombine.high %v24254_v9, %v24254_v9 }
 0x633   :  { %v24497_v59 = vmax.f32 %v12238_v49, %v27147_v46  ;;  %v12262_v22 = vmax.f32 %v12230_v63, %v27148_v25  ;;  %v24514_v8 = vmax.f32 %v12239_v26, %v27151_v33  ;;  %v12251_v14 = vmax.f32 %v12019_v17, %v12020_v30 }
 0x634   :  { %v12264_v39 = vmax.f32 %v12232_v52, %v27149_v29  ;;  %v24511_v5 = vmax.f32 %v12236_v18, %v27150_v56  ;;  %v27152_v0 = vcombine.high %v24229_v21, %v24229_v21  ;;  %v24521_v44 = vmax.f32 %v12254_v43, %v12060_v58  ;;  %v27153_v58 = vld [vmem:[#allocation184_spill] sm:$0xff] }
 0x635   :  { %v12314_v54 = vcombine.low %v12262_v22, %v12263_v23  ;;  %v12252_v47 = vmax.f32 %v12028_v1, %v24376_v28  ;;  %v12253_v52 = vmax.f32 %v12043_v6, %v12044_v51  ;;  %v12317_v16 = vcombine.low %v24497_v59, %v24514_v8  ;;  %v27154_v51 = vld [vmem:[#allocation182_spill] sm:$0xff] }
 0x636   :  { %v24519_v4 = vmax.f32 %v12234_v12, %v27152_v0  ;;  %v12316_v9 = vcombine.low %v24492_v24, %v24511_v5  ;;  %v12255_v41 = vmax.f32 %v12067_v57, %v12068_v37  ;;  %v24529_v17 = vmax.f32 %v12233_v36, %v24219_v32  ;;  %v27155_v37 = vld [vmem:[#allocation187_spill] sm:$0xff]  ;;  %v27165_v0 = vld [vmem:[#allocation192_spill] sm:$0xff] }
 0x637   :  { %v12519_v30 = vcombine.low %v12261_v15, %v12262_v22  ;;  %v24532_v18 = vmax.f32 %v12091_v62, %v12092_v38  ;;  %v24535_v12 = vmax.f32 %v12237_v60, %v27153_v58  ;;  %v24539_v1 = vrot.slane %v12317_v16, %v27105_v31  ;;  %v27156_v38 = vld [vmem:[#allocation190_spill] sm:$0xff] }
 0x638   :  { %v12315_v21 = vcombine.low %v12264_v39, %v24519_v4  ;;  %v12338_v6 = vrot.slane %v12316_v9, %v27105_v31  ;;  %v12273_v43 = vmax.f32 %v24478_v20, %v27154_v51  ;;  %v12277_v32 = vmax.f32 %v24487_v34, %v27155_v37 }
 0x639   :  { %v12324_v57 = vrot.slane %v12314_v54, %v27105_v31  ;;  %v12520_v48 = vcombine.low %v12263_v23, %v24529_v17  ;;  %v12279_v62 = vmax.f32 %v12247_v10, %v27156_v38  ;;  %v24549_v63 = vmax.f32 %v12249_v45, %v27157_v11 }
 0x63a   :  { %v24552_v49 = vmax.f32 %v12251_v14, %v27158_v61  ;;  %v12521_v36 = vcombine.low %v24519_v4, %v24492_v24  ;;  %v12522_v35 = vcombine.low %v24535_v12, %v24497_v59  ;;  %v12529_v60 = vrot.slane %v12519_v30, %v27105_v31  ;;  %v27168_v61 = vld [vmem:[#allocation193_spill] sm:$0xff] }
 0x63b   :  { %v12331_v26 = vrot.slane %v12315_v21, %v27105_v31  ;;  %v12347_v34 = vcombine.low %v12338_v6, %v24539_v1  ;;  %v27159_v23 = vcombine.high %v24278_v13, %v24278_v13  ;;  %v27160_v46 = vcombine.high %v24312_v42, %v24312_v42  ;;  %v12293_v6 = vld [vmem:[%s24826_s4] sm:$0xff] }
 0x63c   :  { %v27161_v25 = vcombine.high %v24346_v3, %v24346_v3  ;;  %v27162_v29 = vcombine.high %v24362_v27, %v24362_v27  ;;  %v12536_v45 = vrot.slane %v12520_v48, %v27105_v31  ;;  %v12550_v9 = vrot.slane %v12522_v35, %v27105_v31 }
 0x63d   :  { %v24564_v10 = vmax.f32 %v12240_v53, %v27159_v23  ;;  %v12278_v15 = vmax.f32 %v12246_v2, %v27160_v46  ;;  %v12346_v56 = vcombine.low %v12324_v57, %v12331_v26  ;;  %v12361_v13 = vrot.slane %v12347_v34, %v27105_v31 }
 0x63e   :  { %v12280_v22 = vmax.f32 %v12248_v7, %v27161_v25  ;;  %v24575_v39 = vmax.f32 %v12250_v40, %v27162_v29  ;;  %v27163_v53 = vcombine.high %v24376_v28, %v24376_v28  ;;  %v27164_v7 = vld [vmem:[#allocation203_spill] sm:$0xff]  ;;  %v27166_v28 = vcombine.high %v27165_v0, %v27165_v0 }
 0x63f   :  { %v12363_v42 = vcombine.low %v24564_v10, %v12278_v15  ;;  %v12084_v27 = vcombine.high %v27164_v7, %v27164_v7  ;;  %v12354_v40 = vrot.slane %v12346_v56, %v27105_v31  ;;  %v27167_v48 = vcombine.high %v24287_v50, %v24287_v50 }
 0x640   :  { %v24582_v33 = vmax.f32 %v12252_v47, %v27163_v53  ;;  %v12364_v2 = vcombine.low %v12279_v62, %v12280_v22  ;;  %v12365_v3 = vcombine.low %v24575_v39, %v24552_v49  ;;  %v12256_v54 = vmax.f32 %v27166_v28, %v27164_v7  ;;  %v27171_v53 = vld [vmem:[#allocation175_spill] sm:$0xff] }
 0x641   :  { %v24597_v47 = vmax.f32 %v12255_v41, %v27165_v0  ;;  %v12373_v16 = vrot.slane %v12363_v42, %v27105_v31  ;;  %v12362_v58 = vcombine.low %v12354_v40, %v12361_v13  ;;  %v24612_v41 = vrot.slane %v12521_v36, %v27105_v31  ;;  %v27170_v13 = vld [vmem:[#allocation185_spill] sm:$0xff]  ;;  %v27173_v7 = vld [vmem:[#allocation195_spill] sm:$0xff] }
 0x642   :  { %v12366_v14 = vcombine.low %v24582_v33, %v24521_v44  ;;  %v12380_v21 = vrot.slane %v12364_v2, %v27105_v31  ;;  %v24603_v30 = vrot.slane %v12365_v3, %v27105_v31  ;;  %v24609_v57 = vmax.f32 %v12256_v54, %v12084_v27 }
 0x643   :  { %v24618_v38 = vmax.f32 %v24481_v55, %v27167_v48  ;;  %v12285_v35 = vmax.f32 %v12253_v52, %v27168_v61  ;;  %v12568_v26 = vcombine.low %v24514_v8, %v12277_v32  ;;  %v12551_v34 = vcombine.low %v12529_v60, %v12536_v45  ;;  %15724 = vmatmul.mubr.msk.f32.vlgmr.msra.gmra.mrb[98].mxu1 %vm10262_vm10, %v12362_v58  ;;  %v27175_v58 = vld [vmem:[#allocation169_spill] sm:$0xff] }
 0x644   :  { %v12394_v37 = vrot.slane %v12366_v14, %v27105_v31  ;;  %v12395_v11 = vcombine.low %v12373_v16, %v12380_v21  ;;  %v12412_v36 = vcombine.low %v24597_v47, %v24609_v57  ;;  %v12569_v46 = vcombine.low %v12278_v15, %v12279_v62  ;;  %15733 = vmatpush3.msra.mxu1 %v12293_v6  ;;  %v27176_v6 = vld [vmem:[#allocation149_spill] sm:$0xff] }
 0x645   :  { %v27169_v25 = vmov 0.0   ;;  %v12570_v55 = vcombine.low %v24549_v63, %v24575_v39  ;;  %v12571_v52 = vcombine.low %v24552_v49, %v12285_v35  ;;  %v12552_v22 = vcombine.low %v24612_v41, %v12550_v9 }
 0x646   :  { %v12396_v23 = vcombine.low %v24603_v30, %v12394_v37  ;;  %15726 = vmatprep.mubr.msk.f32.mxu1 %vm16631_vm2, %v27169_v25  ;;  %v12403_v50 = vrot.slane %v12395_v11, %v27105_v31  ;;  %v12419_v60 = vrot.slane %v12412_v36, %v27105_v31  ;;  %15743 = vmatprep.subr.mxu1 %v27169_v25 }
 0x647   :  { %v12578_v62 = vrot.slane %v12568_v26, %v27105_v31  ;;  %v12585_v15 = vrot.slane %v12569_v46, %v27105_v31  ;;  %v12592_v29 = vrot.slane %v12570_v55, %v27105_v31  ;;  %v12599_v45 = vrot.slane %v12571_v52, %v27105_v31 }
 0x648   :  { %v12410_v32 = vrot.slane %v12396_v23, %v27105_v31  ;;  %v12617_v56 = vcombine.low %v24521_v44, %v24597_v47  ;;  %v27172_v42 = vcombine.high %v27171_v53, %v27171_v53  ;;  %v24648_v3 = vmax.f32 %v24484_v19, %v27171_v53 }
 0x649   :  { %v12289_v27 = vmax.f32 %v24532_v18, %v27173_v7  ;;  %v12727_v14 = vcombine.low %v24492_v24, %v24535_v12  ;;  %v12728_v0 = vcombine.low %v12273_v43, %v24618_v38  ;;  %v12600_v28 = vcombine.low %v12578_v62, %v12585_v15 }
 0x64a   :  { %v12244_v2 = vmax.f32 %v27172_v42, %v27170_v13  ;;  %v12411_v40 = vcombine.low %v12403_v50, %v12410_v32  ;;  %v12601_v54 = vcombine.low %v12592_v29, %v12599_v45  ;;  %v12559_v9 = vrot.slane %v12551_v34, %v27105_v31  ;;  %v27179_v34 = vld [vmem:[#allocation205_spill] sm:$0xff] }
 0x64b   :  { %v12767_v19 = vcombine.low %v24648_v3, %v24549_v63  ;;  %v12768_v18 = vcombine.low %v12285_v35, %v24521_v44  ;;  %v12769_v16 = vcombine.low %v24597_v47, %v12289_v27  ;;  %v12426_v24 = vrot.slane %v12419_v60, %v27105_v31  ;;  %v27174_v44 = vld [vmem:[#allocation200_spill] sm:$0xff] }
 0x64c   :  { %15727 = vmatmul.mubr.msk.f32.gmra.mrb[100].mxu1 %vm10262_vm10, %v12411_v40  ;;  %v12566_v20 = vrot.slane %v12552_v22, %v27105_v31  ;;  %v12608_v12 = vrot.slane %v12600_v28, %v27105_v31  ;;  %v12615_v51 = vrot.slane %v12601_v54, %v27105_v31  ;;  %v12108_v47 = vcombine.high %v27174_v44, %v27174_v44 }
 0x64d   :  { %15729 = vmatprep.mubr.msk.f32.mxu1 %vm16631_vm2, %v27169_v25  ;;  %v12776_v43 = vrot.slane %v12767_v19, %v27105_v31  ;;  %v12783_v21 = vrot.slane %v12768_v18, %v27105_v31  ;;  %v12790_v63 = vrot.slane %v12769_v16, %v27105_v31  ;;  %v27177_v37 = vcombine.high %v27176_v6, %v27176_v6 }
 0x64e   :  { %v11940_v11 = vcombine.high %v27170_v13, %v27170_v13  ;;  %v12616_v61 = vcombine.low %v12608_v12, %v12615_v51  ;;  %v27178_v35 = vcombine.high %v27173_v7, %v27173_v7  ;;  %v12116_v23 = vcombine.high %v27179_v34, %v27179_v34 }
 0x64f   :  { %v11651_v48 = vmax.f32 %v27177_v37, %v27175_v58  ;;  %v12726_v36 = vcombine.low %v24529_v17, %v24519_v4  ;;  %v12791_v46 = vcombine.low %v12776_v43, %v24603_v30  ;;  %v12792_v50 = vcombine.low %v12783_v21, %v12790_v63  ;;  %v13900_v4 = vld [vmem:[%s24826_s4 + $0x10] sm:$0xff] }
 0x650   :  { %v12258_v26 = vmax.f32 %v27178_v35, %v27174_v44  ;;  %15730 = vmatmul.mubr.msk.f32.gmra.mrb[102].mxu1 %vm10262_vm10, %v12426_v24  ;;  %v12742_v55 = vrot.slane %v12727_v14, %v27105_v31  ;;  %v12276_v32 = vmax.f32 %v12244_v2, %v11940_v11  ;;  %v12958_v60 = vcombine.low %v24552_v49, %v24582_v33  ;;  %v27180_v33 = vld [vmem:[#allocation151_spill] sm:$0xff]  ;;  %v27184_v63 = vld [vmem:[#allocation6_spill] sm:$0xff] }
 0x651   :  { %15734 = vmatprep.mubr.msk.f32.mxu1 %vm16631_vm2, %v27169_v25  ;;  %v12749_v22 = vrot.slane %v12728_v0, %v27105_v31  ;;  %v12567_v62 = vcombine.low %v12559_v9, %v12566_v20  ;;  %v12799_v17 = vrot.slane %v12791_v46, %v27105_v31  ;;  %v12806_v30 = vrot.slane %v12792_v50, %v27105_v31  ;;  %v27182_v14 = vld [vmem:[#allocation103_spill] sm:$0xff] }
 0x652   :  { %v12290_v52 = vmax.f32 %v12258_v26, %v12108_v47  ;;  %v12624_v15 = vrot.slane %v12617_v56, %v27105_v31  ;;  %v12957_v29 = vcombine.low %v12276_v32, %v24575_v39  ;;  %v12973_v13 = vrot.slane %v12958_v60, %v27105_v31  ;;  %v27183_v9 = vld [vmem:[#allocation167_spill] sm:$0xff]  ;;  %v13258_v60 = vld [vmem:[%s24829_s7] sm:$0xff] }
 0x653   :  { %v11435_v49 = vcombine.high %v27175_v58, %v27175_v58  ;;  %v27181_v53 = vcombine.high %v27180_v33, %v27180_v33  ;;  %v12735_v2 = vrot.slane %v12726_v36, %v27105_v31  ;;  %v12807_v7 = vcombine.low %v12799_v17, %v12806_v30  ;;  %v13904_v58 = vld [vmem:[%s24826_s4 + $0x18] sm:$0xff] }
 0x654   :  { %v12959_v45 = vcombine.low %v24609_v57, %v12290_v52  ;;  %15735 = vmatmul.mubr.msk.f32.vlgmr.msra.gmra.mrb[98].mxu1 %vm10262_vm10, %v12567_v62  ;;  %v12966_v39 = vrot.slane %v12957_v29, %v27105_v31  ;;  %v12751_v27 = vcombine.low %v24539_v1, %v12749_v22  ;;  %v12259_v40 = vmax.f32 %v27179_v34, %v12116_v23  ;;  %v13259_v22 = vld [vmem:[%s24829_s7 + $0x8] sm:$0xff] }
 0x655   :  { %v11699_v42 = vmax.f32 %v11651_v48, %v27181_v53  ;;  %15744 = vmatpush3.msra.mxu1 %v13900_v4  ;;  %15737 = vmatprep.mubr.msk.f32.mxu1 %vm16631_vm2, %v27169_v25  ;;  %v12750_v56 = vcombine.low %v12735_v2, %v12742_v55  ;;  %v10715_v0 = vmax.f32 %v27182_v14, 0.0  ;;  %v11652_v19 = vmax.f32 %v27183_v9, %v11435_v49 }
 0x656   :  { %v12980_v57 = vrot.slane %v12959_v45, %v27105_v31  ;;  %15754 = vmatprep.subr.mxu1 %v27169_v25  ;;  %v12981_v28 = vcombine.low %v12966_v39, %v12973_v13  ;;  %v12916_v16 = vcombine.low %v24511_v5, %v24497_v59  ;;  %v12918_v24 = vcombine.low %v24618_v38, %v24648_v3 }
 0x657   :  { %v12123_v18 = vrot.slane %v11699_v42, %v27105_v31  ;;  %v12631_v12 = vrot.slane %v12624_v15, %v27105_v31  ;;  %v12758_v51 = vrot.slane %v12750_v56, %v27105_v31  ;;  %v12765_v43 = vrot.slane %v12751_v27, %v27105_v31 }
 0x658   :  { %v12982_v54 = vcombine.low %v12624_v15, %v12980_v57  ;;  %15738 = vmatmul.mubr.msk.f32.gmra.mrb[100].mxu1 %vm10262_vm10, %v12616_v61  ;;  %v12989_v1 = vrot.slane %v12981_v28, %v27105_v31  ;;  %v11460_v44 = vrot.slane %v10715_v0, %v27184_v63  ;;  %v12917_v5 = vcombine.low %v24514_v8, %v24564_v10 }
 0x659   :  { %15740 = vmatprep.mubr.msk.f32.mxu1 %vm16631_vm2, %v27169_v25  ;;  %v12291_v21 = vmax.f32 %v12259_v40, %v12123_v18  ;;  %v12939_v3 = vrot.slane %v12918_v24, %v27105_v31  ;;  %v12766_v47 = vcombine.low %v12758_v51, %v12765_v43  ;;  %v12925_v37 = vrot.slane %v12916_v16, %v27105_v31 }
 0x65a   :  { %v12996_v20 = vrot.slane %v12982_v54, %v27105_v31  ;;  %v11700_v38 = vmax.f32 %v11652_v19, %v11460_v44  ;;  %v12124_v48 = vcombine.high %v12123_v18, %v12123_v18  ;;  %v12932_v11 = vrot.slane %v12917_v5, %v27105_v31 }
 0x65b   :  { %v12808_v6 = vcombine.low %v12290_v52, %v12291_v21  ;;  %v12940_v61 = vcombine.low %v24612_v41, %v12925_v37  ;;  %v16633_v62 = vmov 0.0|0.0   ;;  %v15773_v4 = vpack.c.bf16 %v13259_v22, %v13258_v60 }
 0x65c   :  { %v12997_v59 = vcombine.low %v12989_v1, %v12996_v20  ;;  %15741 = vmatmul.mubr.msk.f32.gmra.mrb[102].mxu1 %vm10262_vm10, %v12631_v12  ;;  %v12131_v8 = vrot.slane %v11700_v38, %v27105_v31  ;;  %v12941_v35 = vcombine.low %v12932_v11, %v12939_v3  ;;  %v13135_v38 = vld [vmem:[%s24827_s5] sm:$0x1] }
 0x65d   :  { %15745 = vmatprep.mubr.msk.f32.mxu1 %vm16631_vm2, %v27169_v25  ;;  %v12815_v10 = vrot.slane %v12808_v6, %v27105_v31  ;;  %v12948_v36 = vrot.slane %v12940_v61, %v27105_v31 }
 0x65e   :  { %v12260_v26 = vmax.f32 %v12124_v48, %v12131_v8  ;;  %v12132_v34 = vcombine.high %v12131_v8, %v12131_v8  ;;  %v12955_v46 = vrot.slane %v12941_v35, %v27105_v31  ;;  %v13908_v48 = vld [vmem:[%s24828_s6] ss:$0 sm:$0xff] }
 0x65f   :  { %v12822_v23 = vrot.slane %v12815_v10, %v27105_v31 }
 0x660   :  { %15746 = vmatmul.mubr.msk.f32.vlgmr.msra.gmra.mrb[98].mxu1 %vm10262_vm10, %v12766_v47  ;;  %v12292_v50 = vmax.f32 %v12260_v26, %v12132_v34  ;;  %v12956_v41 = vcombine.low %v12948_v36, %v12955_v46 }
 0x661   :  { %15755 = vmatpush3.msra.mxu1 %v13904_v58  ;;  %15748 = vmatprep.mubr.msk.f32.mxu1 %vm16631_vm2, %v27169_v25  ;;  %v27185_v58 = vld [vmem:[#allocation5_spill] sm:$0xff] }
 0x662   :  { %v12998_v55 = vcombine.low %v12291_v21, %v12292_v50  ;;  %15772 = vmatprep.subr.bf16.mxu1 %v16633_v62  ;;  %v27186_v6 = vsub.s32 0, %v27185_v58 }
 0x664   :  { %15749 = vmatmul.mubr.msk.f32.gmra.mrb[100].mxu1 %vm10262_vm10, %v12807_v7  ;;  %v13005_v52 = vrot.slane %v12998_v55, %v27105_v31 }
 0x665   :  { %15751 = vmatprep.mubr.msk.f32.mxu1 %vm16631_vm2, %v27169_v25 }
 0x666   :  { %v13012_v32 = vrot.slane %v13005_v52, %v27105_v31 }
 0x668   :  { %15752 = vmatmul.mubr.msk.f32.gmra.mrb[102].mxu1 %vm10262_vm10, %v12822_v23 }
 0x669   :  { %15756 = vmatprep.mubr.msk.f32.mxu1 %vm16631_vm2, %v27169_v25 }
 0x66c   :  { %15757 = vmatmul.mubr.msk.f32.vlgmr.msra.gmra.mrb[98].mxu1 %vm10262_vm10, %v12956_v41 }
 0x66d   :  { %15759 = vmatprep.mubr.msk.f32.mxu1 %vm16631_vm2, %v27169_v25  ;;  %15774 = vmatpush3.bf16.msra.mxu1 %v15773_v4 }
 0x670   :  { %15760 = vmatmul.mubr.msk.f32.gmra.mrb[100].mxu1 %vm10262_vm10, %v12997_v59 }
 0x671   :  { %15762 = vmatprep.mubr.msk.f32.mxu1 %vm16631_vm2, %v27169_v25 }
 0x674   :  { %15763 = vmatmul.mubr.msk.f32.gmra.mrb[102].mxu1 %vm10262_vm10, %v13012_v32 }
 0x675   :  { %15769 = vmatprep.mubr.msk.f32.mxu1 %vm16631_vm2, %v27169_v25 }
 0x73f   :  { %v13085_v17 = vpop.f32.mrb[98].mxu1 }
 0x740   :  { %v15758_v30 = vpop.f32.mrb[99].mxu1  ;;  %v13103_v29 = vsel %vm13102_vm11, %v13085_v17, 0.0 }
 0x743   :  { %v13090_v15 = vpop.f32.mrb[100].mxu1 }
 0x744   :  { %v13104_v25 = vsel %vm13102_vm11, %v13090_v15, 0.0  ;;  %v15761_v45 = vpop.f32.mrb[101].mxu1 }
 0x745   :  { %v13105_v13 = vadd.f32 %v13104_v25, %v13103_v29 }
 0x747   :  { %v13095_v49 = vpop.f32.mrb[102].mxu1 }
 0x748   :  { %v13107_v33 = vsel %vm13106_vm12, %v13095_v49, 0.0  ;;  %v15764_v53 = vpop.f32.mrb[103].mxu1 }
 0x749   :  { %v13108_v42 = vadd.f32 %v13107_v33, %v13105_v13 }
 0x74b   :  { %v13109_v2 = vrot.slane %v13108_v42, 4 }
 0x74d   :  { %v13110_v7 = vadd.f32 %v13109_v2, %v13108_v42 }
 0x74f   :  { %v13111_v39 = vrot.slane %v13110_v7, 2 }
 0x751   :  { %v13112_v57 = vadd.f32 %v13111_v39, %v13110_v7 }
 0x753   :  { %v13113_v56 = vrot.slane %v13112_v57, 1 }
 0x755   :  { %v13114_v27 = vadd.f32 %v13113_v56, %v13112_v57  ;;  %v13909_v57 = vld [vmem:[%s24830_s8] ss:$0 sm:$0xff] }
 0x757   :  { %v13116_v40 = vmul.f32 0.055555556, %v13114_v27 }
 0x759   :  { %v13117_v14 = vsub.f32 %v13085_v17, %v13116_v40  ;;  %v13118_v0 = vsub.f32 %v13090_v15, %v13116_v40  ;;  %v13119_v28 = vsub.f32 %v13095_v49, %v13116_v40 }
 0x75b   :  { %v13120_v54 = vmul.f32 %v13117_v14, %v13117_v14  ;;  %v13121_v9 = vmul.f32 %v13118_v0, %v13118_v0  ;;  %v13122_v19 = vmul.f32 %v13119_v28, %v13119_v28 }
 0x75d   :  { %v13123_v18 = vsel %vm13102_vm11, %v13120_v54, 0.0  ;;  %v13124_v16 = vsel %vm13102_vm11, %v13121_v9, 0.0  ;;  %v13126_v1 = vsel %vm13106_vm12, %v13122_v19, 0.0 }
 0x75e   :  { %v13125_v24 = vadd.f32 %v13124_v16, %v13123_v18 }
 0x760   :  { %v13127_v20 = vadd.f32 %v13126_v1, %v13125_v24 }
 0x762   :  { %v13128_v12 = vrot.slane %v13127_v20, 4 }
 0x764   :  { %v13129_v51 = vadd.f32 %v13128_v12, %v13127_v20 }
 0x766   :  { %v13130_v43 = vrot.slane %v13129_v51, 2 }
 0x768   :  { %v13131_v21 = vadd.f32 %v13130_v43, %v13129_v51 }
 0x76a   :  { %v13132_v63 = vrot.slane %v13131_v21, 1 }
 0x76c   :  { %v13133_v44 = vadd.f32 %v13132_v63, %v13131_v21 }
 0x76e   :  { %v13134_v59 = vmul.f32 0.055555556, %v13133_v44 }
 0x770   :  { %v13136_v5 = vadd.f32 1e-05, %v13134_v59 }
 0x772   :  { %16602 = vrsqrt.f32 %v13136_v5 }
 0x77c   :  { %v16603_v3 = vpop.eup %16602 }
 0x77d   :  { %v13138_v47 = vmul.f32 %v16603_v3, %v13135_v38 }
 0x77f   :  { %v13143_v37 = vrot.slane %v13138_v47, %v27186_v6 }
 0x781   :  { %v13145_v11 = vmul.f32 %v13143_v37, %v13117_v14  ;;  %v13146_v8 = vmul.f32 %v13143_v37, %v13118_v0 }
 0x783   :  { %v13154_v10 = vadd.f32 %v13908_v48, %v13145_v11  ;;  %v13155_v61 = vadd.f32 %v13908_v48, %v13146_v8 }
 0x785   :  { %v13156_v35 = vmax.f32 %v13154_v10, 0.0  ;;  %v13157_v26 = vmax.f32 %v13155_v61, 0.0 }
 0x787   :  { %v13160_v34 = vcombine.high %v13156_v35, %v13156_v35  ;;  %v13167_v23 = vrot.slane %v13156_v35, %v27105_v31  ;;  %v13198_v36 = vcombine.high %v13157_v26, %v13157_v26  ;;  %v13205_v46 = vrot.slane %v13157_v26, %v27105_v31 }
 0x789   :  { %v13174_v50 = vrot.slane %v13160_v34, %v27105_v31  ;;  %v13175_v41 = vcombine.high %v13167_v23, %v13167_v23  ;;  %v13212_v55 = vrot.slane %v13198_v36, %v27105_v31  ;;  %v13213_v52 = vcombine.high %v13205_v46, %v13205_v46 }
 0x78a   :  { %v13221_v32 = vrot.slane %v13205_v46, %v27105_v31  ;;  %v13182_v30 = vrot.slane %v13167_v23, %v27105_v31 }
 0x78b   :  { %v13189_v60 = vrot.slane %v13174_v50, %v27105_v31  ;;  %v13196_v22 = vrot.slane %v13175_v41, %v27105_v31  ;;  %v13214_v62 = vcombine.high %v13212_v55, %v13212_v55  ;;  %v13228_v4 = vrot.slane %v13212_v55, %v27105_v31 }
 0x78c   :  { %v13235_v17 = vrot.slane %v13213_v52, %v27105_v31  ;;  %v13243_v25 = vcombine.high %v13221_v32, %v13221_v32 }
 0x78d   :  { %v13197_v15 = vcombine.high %v13196_v22, %v13196_v22  ;;  %v13242_v29 = vrot.slane %v13214_v62, %v27105_v31  ;;  %v13253_v13 = vmax.f32 %v13196_v22, %v13189_v60 }
 0x78e   :  { %v13254_v49 = vmax.f32 %v13235_v17, %v13228_v4 }
 0x78f   :  { %v13252_v45 = vmax.f32 %v13182_v30, %v13197_v15  ;;  %v13255_v33 = vmax.f32 %v13243_v25, %v13242_v29 }
 0x791   :  { %v13256_v53 = vmax.f32 %v13252_v45, %v13253_v13  ;;  %v13257_v42 = vmax.f32 %v13254_v49, %v13255_v33 }
 0x793   :  { %v13269_v2 = vcombine.low %v13256_v53, %v13257_v42 }
 0x795   :  { %v13276_v7 = vrot.slane %v13269_v2, %v27105_v31 }
 0x797   :  { %v13283_v39 = vrot.slane %v13276_v7, %v27105_v31 }
 0x799   :  { %15770 = vmatmul.mubr.msk.f32.vlgmr.msra.gmra.mrb[104].mxu1 %vm13102_vm11, %v13283_v39 }
 0x86c   :  { %v13352_v56 = vpop.f32.mrb[104].mxu1 }
 0x86d   :  { %v13353_v27 = vadd.f32 %v13909_v57, %v13352_v56  ;;  %v15771_v40 = vpop.f32.mrb[105].mxu1 }
 0x86f   :  { %13357 = vst.msk [vmem:[#allocation2] sm:$0x3] %vm13356_vm13, %v13353_v27 }
 0x870   :  { %16616 = shalt.err (!%p16613_p4)
}
 0x871   :  { %s16617_s28 = scalar_lea.hbm %s24831_s9, 32 }
 0x872   :  { %p16618_p5 = scmp.ne.s32.totalorder %s24831_s9, %s16617_s28  ;;  %p16621_p6 = scmp.lt.u32.totalorder %s16617_s28, %s24831_s9 }
 0x874   :  { %p16623_p7 = pnand %p16621_p6, %p16618_p5 }
 0x876   :  { %16626 = shalt.err (!%p16623_p7)
}
 0x877   :  { %13367 = dma.vmem_to_hbm [thread:$0]  %s13365_s25, 32, %s24831_s9, [#allocation3]  }
 0x878   :  { %16627 = dma.done.wait [#allocation3], 32  }
 0x879   :  { %16628 = vsyncadd [#allocation3], 4294967264 }
 0x87a   :  { %13371 = vsyncpa [#allocation3], 1 }

</bundles_post_ra>
